<compile_context>
chip_gen: v5e
topology: v5e:2x2
jax: 0.10.0
libtpu: 0.0.40
codegen_flags: <defaults>
</compile_context>

<pallas_src>
import jax
import jax.numpy as jnp
import numpy as np
from jax.experimental import pallas as pl
from jax.experimental.pallas import tpu as pltpu

MIN_ACT = 6

# flat-row layout constants (stored row width = 11 everywhere)
WS = 11            # stored width of every flat activation matrix
L1 = 9 * WS + 10   # 109: conv1 output in s2d2 layout, valid 10x10, 128 ch
L2 = 8 * WS + 9    # 97 : conv2 output, valid 9x9, 64 ch
L3 = 6 * WS + 7    # 73 : conv3 output, valid 7x7, 64 ch


# ----------------------------------------------------------------------------- kernels
def _trunk_kernel(x8_ref, w1_ref, b1_ref, w2_ref, b2_ref, w3_ref, b3_ref,
                  o_ref, a1_ref, a2_ref, a3_ref):
    # x8_ref: (1, 121, 512) f32  space-to-depth(8) input, 4 channel blocks of 128
    #         (block cb = (r*2+s), first 64 lanes real, rest zero padding)
    # w1_ref: (9, 128, 128) bf16 combined conv1 weights (one per (a,b) shift)
    # w2_ref: (4, 128, 64)  bf16 conv2 weights in s2d2 space (2x2 stride-1 taps)
    # w3_ref: (9, 64, 64)   bf16 conv3 weights (3x3 taps)
    # o_ref : (1, 49, 64)   f32  valid 7x7x64 conv3 output, (h, w, c) order

    # ---- conv1: 8x8 stride-4 conv, expressed as 9 shifted matmuls over the
    #      s2d input; output produced directly in s2d2 (10x10x128) flat layout.
    acc = jnp.zeros((L1, 128), jnp.float32)
    for a in range(3):
        for b in range(3):
            t = a * 3 + b
            off = (a // 2) * WS + (b // 2)
            cb = (a % 2) * 2 + (b % 2)
            lhs = x8_ref[0, off:off + L1, cb * 128:(cb + 1) * 128].astype(jnp.bfloat16)
            acc = acc + jnp.dot(lhs, w1_ref[t], preferred_element_type=jnp.float32)
    a1_ref[...] = jnp.maximum(acc + b1_ref[...], 0.0)          # bias tiled to 128

    # ---- conv2: 4x4 stride-2 conv == 2x2 stride-1 conv in s2d2 space.
    acc = jnp.zeros((L2, 64), jnp.float32)
    for p in range(2):
        for q in range(2):
            off = p * WS + q
            lhs = a1_ref[off:off + L2, :].astype(jnp.bfloat16)
            acc = acc + jnp.dot(lhs, w2_ref[p * 2 + q], preferred_element_type=jnp.float32)
    a2_ref[...] = jnp.maximum(acc + b2_ref[...], 0.0)

    # ---- conv3: 3x3 stride-1 conv.
    acc = jnp.zeros((L3, 64), jnp.float32)
    for kh in range(3):
        for kw in range(3):
            off = kh * WS + kw
            lhs = a2_ref[off:off + L3, :].astype(jnp.bfloat16)
            acc = acc + jnp.dot(lhs, w3_ref[kh * 3 + kw], preferred_element_type=jnp.float32)
    a3_ref[...] = jnp.maximum(acc + b3_ref[...], 0.0)

    # ---- emit the valid 7x7x64 region in (h, w, c) order -> (49, 64)
    for kh in range(7):
        o_ref[0, kh * 7:(kh + 1) * 7, :] = a3_ref[kh * WS:kh * WS + 7, :].astype(o_ref.dtype)


def _head_kernel(y_ref, w4_ref, b4_ref, wvp_ref, bvp_ref, val_ref, pi_ref):
    # y_ref  : (TB, 3136) f32   flattened conv3 outputs for TB batch rows
    # w4_ref : (3136, 512) bf16, b4_ref: (1, 512) f32
    # wvp_ref: (512, 128)  f32   cols 0..A-1 = policy, col A = value, rest 0
    # bvp_ref: (1, 128)    f32
    y = y_ref[...].astype(jnp.bfloat16)                                 # (TB, 3136)
    h = jnp.dot(y, w4_ref[...], preferred_element_type=jnp.float32) + b4_ref[...]
    h = jnp.maximum(h, 0.0)                                             # conv4 + ReLU (f32)
    hp = jnp.dot(h, wvp_ref[...], preferred_element_type=jnp.float32) + bvp_ref[...]
    logits = hp[:, 0:MIN_ACT]                                           # (TB, A)
    m = jnp.max(logits, axis=-1, keepdims=True)
    e = jnp.exp(logits - m)
    pi_ref[...] = (e / jnp.sum(e, axis=-1, keepdims=True)).astype(pi_ref.dtype)
    val_ref[...] = hp[:, MIN_ACT:MIN_ACT + 1].astype(val_ref.dtype)


# ----------------------------------------------------------------------------- wrappers
def _space_to_depth8(x_nhwc):
    """(B,84,84,4) -> (B,121,512): pad to 88, s2d by 8, channels ordered
    (r, s | hi, wi, cin), each 64-wide block lane-padded to 128."""
    B = x_nhwc.shape[0]
    xp = jnp.pad(x_nhwc, ((0, 0), (0, 4), (0, 4), (0, 0)))        # 84 -> 88 (zeros)
    t = xp.reshape(B, 11, 2, 4, 11, 2, 4, 4)                      # (B,I,r,hi,J,s,wi,c)
    t = t.transpose(0, 1, 4, 2, 5, 3, 6, 7)                       # (B,I,J,r,s,hi,wi,c)
    t = t.reshape(B, 121, 4, 64)                                  # channel blocks of 64
    t = jnp.pad(t, ((0, 0), (0, 0), (0, 0), (0, 64)))             # pad each block to 128
    return t.reshape(B, 121, 512)


def nature_forward(x_nchw, fp):
    x = jnp.transpose(x_nchw, (0, 2, 3, 1))                       # NCHW -> NHWC
    B = x.shape[0]
    x8 = _space_to_depth8(x)                                      # (B, 121, 512) f32

    y = pl.pallas_call(
        _trunk_kernel,
        out_shape=jax.ShapeDtypeStruct((B, 49, 64), jnp.float32),
        grid=(B,),
        in_specs=[
            pl.BlockSpec((1, 121, 512), lambda i: (i, 0, 0)),
            pl.BlockSpec((9, 128, 128), lambda i: (0, 0, 0)),
            pl.BlockSpec((1, 128), lambda i: (0, 0)),
            pl.BlockSpec((4, 128, 64), lambda i: (0, 0, 0)),
            pl.BlockSpec((1, 64), lambda i: (0, 0)),
            pl.BlockSpec((9, 64, 64), lambda i: (0, 0, 0)),
            pl.BlockSpec((1, 64), lambda i: (0, 0)),
        ],
        out_specs=pl.BlockSpec((1, 49, 64), lambda i: (i, 0, 0)),
        scratch_shapes=[
            pltpu.VMEM((L1, 128), jnp.float32),
            pltpu.VMEM((L2, 64), jnp.float32),
            pltpu.VMEM((L3, 64), jnp.float32),
        ],
        compiler_params=pltpu.CompilerParams(
            dimension_semantics=("parallel",),
            vmem_limit_bytes=16 * 1024 * 1024),
    )(x8, fp["w1c"], fp["b1t"], fp["w2r"], fp["b2"], fp["w3r"], fp["b3"])

    # head over batch-row blocks (TB rows per grid step -> real MXU utilization)
    TB = min(128, ((B + 7) // 8) * 8)
    Bp = ((B + TB - 1) // TB) * TB
    y2d = y.reshape(B, 49 * 64)                                   # (h, w, c)-order flatten
    if Bp != B:
        y2d = jnp.pad(y2d, ((0, Bp - B), (0, 0)))

    val, pi = pl.pallas_call(
        _head_kernel,
        out_shape=(jax.ShapeDtypeStruct((Bp, 1), jnp.float32),
                   jax.ShapeDtypeStruct((Bp, MIN_ACT), jnp.float32)),
        grid=(Bp // TB,),
        in_specs=[
            pl.BlockSpec((TB, 49 * 64), lambda i: (i, 0)),
            pl.BlockSpec((49 * 64, 512), lambda i: (0, 0)),
            pl.BlockSpec((1, 512), lambda i: (0, 0)),
            pl.BlockSpec((512, 128), lambda i: (0, 0)),
            pl.BlockSpec((1, 128), lambda i: (0, 0)),
        ],
        out_specs=(pl.BlockSpec((TB, 1), lambda i: (i, 0)),
                   pl.BlockSpec((TB, MIN_ACT), lambda i: (i, 0))),
        compiler_params=pltpu.CompilerParams(
            dimension_semantics=("parallel",),
            vmem_limit_bytes=16 * 1024 * 1024),
    )(y2d, fp["w4f"], fp["b4"], fp["wvp"], fp["bvp"])

    # torch: self.v(y).squeeze() -> (B,), softmax(policy(y).view(-1, A)) -> (B, A)
    return val[:B, 0], pi[:B]


# ----------------------------------------------------------------------------- params
def _kaiming_uniform(key, shape, fan_in, a=0.0):
    gain = float(np.sqrt(2.0 / (1.0 + a * a)))
    bound = gain * float(np.sqrt(3.0 / fan_in))
    return jax.random.uniform(key, shape, jnp.float32, -bound, bound)


def make_params(key):
    ks = jax.random.split(key, 6)
    p = {}
    p["w1"] = _kaiming_uniform(ks[0], (8, 8, 4, 32), 4 * 8 * 8)        # HWIO
    p["b1"] = jnp.zeros((1, 32), jnp.float32)
    p["w2"] = _kaiming_uniform(ks[1], (4, 4, 32, 64), 32 * 4 * 4)
    p["b2"] = jnp.zeros((1, 64), jnp.float32)
    p["w3"] = _kaiming_uniform(ks[2], (3, 3, 64, 64), 64 * 3 * 3)
    p["b3"] = jnp.zeros((1, 64), jnp.float32)
    p["w4f"] = _kaiming_uniform(ks[3], (7 * 7 * 64, 512), 64 * 7 * 7)  # conv4 as matmul
    p["b4"] = jnp.zeros((1, 512), jnp.float32)
    p["wvf"] = _kaiming_uniform(ks[4], (512, 1), 512, a=1.0)           # 1x1 value head
    p["bv"] = jnp.zeros((1, 1), jnp.float32)
    p["wpf"] = _kaiming_uniform(ks[5], (512, MIN_ACT), 512, a=1.0)     # 1x1 policy head
    p["bp"] = jnp.zeros((1, MIN_ACT), jnp.float32)
    return p


def prepare_params(p):
    """Build the kernel-layout weights from the canonical fp32 params."""
    f = {}
    # conv1: 8x8/4 -> 2x2/1 over s2d4 input; fold the s2d2 output packing into
    # 9 combined weights (one per (a, b) input shift), lane/row padded to 128.
    w1_np = np.asarray(p["w1"], np.float32)
    w1r = (w1_np.reshape(2, 4, 2, 4, 4, 32)
           .transpose(0, 2, 1, 3, 4, 5).reshape(2, 2, 64, 32))         # (p,q,64,32)
    w1c = np.zeros((3, 3, 128, 128), np.float32)
    for a in range(3):
        for b in range(3):
            for dh in range(2):
                for dw in range(2):
                    pp, qq = a - dh, b - dw
                    if 0 <= pp <= 1 and 0 <= qq <= 1:
                        col = (dh * 2 + dw) * 32
                        w1c[a, b, 0:64, col:col + 32] = w1r[pp, qq]
    f["w1c"] = jnp.asarray(w1c.reshape(9, 128, 128), jnp.bfloat16)
    f["b1t"] = jnp.tile(p["b1"], (1, 4))                               # (1,128) f32
    # conv2: 4x4/2 -> 2x2/1 in s2d2 space.
    f["w2r"] = (p["w2"].reshape(2, 2, 2, 2, 32, 64)
                .transpose(0, 2, 1, 3, 4, 5).reshape(4, 128, 64)).astype(jnp.bfloat16)
    f["b2"] = p["b2"]
    f["w3r"] = p["w3"].reshape(9, 64, 64).astype(jnp.bfloat16)
    f["b3"] = p["b3"]
    f["w4f"] = p["w4f"].astype(jnp.bfloat16)
    f["b4"] = p["b4"]
    # fused value+policy head, lane-padded to 128: cols 0..A-1 policy, col A value.
    wvp = jnp.zeros((512, 128), jnp.float32)
    wvp = wvp.at[:, 0:MIN_ACT].set(p["wpf"]).at[:, MIN_ACT:MIN_ACT + 1].set(p["wvf"])
    f["wvp"] = wvp                                                      # keep f32 (tiny matmul)
    bvp = jnp.zeros((1, 128), jnp.float32)
    bvp = bvp.at[:, 0:MIN_ACT].set(p["bp"]).at[:, MIN_ACT:MIN_ACT + 1].set(p["bv"])
    f["bvp"] = bvp
    return f


# ----------------------------------------------------------------------------- reference
def reference_forward(x_nchw, p):
    x = jnp.transpose(x_nchw, (0, 2, 3, 1))

    def conv(x, w, b, s):
        y = jax.lax.conv_general_dilated(
            x, w, (s, s), "VALID", dimension_numbers=("NHWC", "HWIO", "NHWC"))
        return jnp.maximum(y + b, 0.0)

    y = conv(x, p["w1"], p["b1"], 4)
    y = conv(y, p["w2"], p["b2"], 2)
    y = conv(y, p["w3"], p["b3"], 1)
    h = jnp.maximum(y.reshape(y.shape[0], -1) @ p["w4f"] + p["b4"], 0.0)
    v = (h @ p["wvf"] + p["bv"]).reshape(-1)
    pi = jax.nn.softmax(h @ p["wpf"] + p["bp"], axis=-1)
    return v, pi


# ----------------------------------------------------------------------------- main
if __name__ == "__main__":
    # NatureNetwork conv arithmetic (8/4 -> 4/2 -> 3/1 -> 7/1) requires 84x84 input.
    B = 2
    x = jax.random.uniform(jax.random.PRNGKey(0), (B, 4, 84, 84), jnp.float32)
    params = make_params(jax.random.PRNGKey(42))
    fparams = prepare_params(params)

    fwd = jax.jit(nature_forward)
    value, pi = jax.block_until_ready(fwd(x, fparams))
    v_ref, pi_ref = jax.block_until_ready(reference_forward(x, params))

    assert value.shape == (B,) and pi.shape == (B, MIN_ACT)
    np.testing.assert_allclose(np.asarray(value), np.asarray(v_ref), rtol=2e-2, atol=2e-2)
    np.testing.assert_allclose(np.asarray(pi), np.asarray(pi_ref), rtol=2e-2, atol=2e-2)
    assert np.allclose(np.asarray(pi).sum(-1), 1.0, atol=1e-4)

    print("KERNEL_OK")
</pallas_src>

<mosaic_0001>
module attributes {stable_mosaic.version = 11 : i64} {
  func.func @_trunk_kernel(%arg0: i32, %arg1: memref<1x121x512xf32, #tpu.memory_space<vmem>>, %arg2: memref<9x128x128xbf16, #tpu.memory_space<vmem>>, %arg3: memref<1x128xf32, #tpu.memory_space<vmem>>, %arg4: memref<4x128x64xbf16, #tpu.memory_space<vmem>>, %arg5: memref<1x64xf32, #tpu.memory_space<vmem>>, %arg6: memref<9x64x64xbf16, #tpu.memory_space<vmem>>, %arg7: memref<1x64xf32, #tpu.memory_space<vmem>>, %arg8: memref<1x49x64xf32, #tpu.memory_space<vmem>>, %arg9: memref<109x128xf32, #tpu.memory_space<vmem>>, %arg10: memref<97x64xf32, #tpu.memory_space<vmem>>, %arg11: memref<73x64xf32, #tpu.memory_space<vmem>>) attributes {dimension_semantics = [#tpu.dimension_semantics<parallel>], iteration_bounds = array<i64: 2>, scalar_prefetch = 0 : i64, scratch_operands = 3 : i64, tpu.core_type = #tpu.core_type<tc>, window_params = [{transform_indices = @transform_0, window_bounds = array<i64: 1, 121, 512>}, {pipeline_mode = #tpu.pipeline_mode<synchronous>, transform_indices = @transform_1, window_bounds = array<i64: 9, 128, 128>}, {pipeline_mode = #tpu.pipeline_mode<synchronous>, transform_indices = @transform_2, window_bounds = array<i64: 1, 128>}, {pipeline_mode = #tpu.pipeline_mode<synchronous>, transform_indices = @transform_3, window_bounds = array<i64: 4, 128, 64>}, {pipeline_mode = #tpu.pipeline_mode<synchronous>, transform_indices = @transform_4, window_bounds = array<i64: 1, 64>}, {pipeline_mode = #tpu.pipeline_mode<synchronous>, transform_indices = @transform_5, window_bounds = array<i64: 9, 64, 64>}, {pipeline_mode = #tpu.pipeline_mode<synchronous>, transform_indices = @transform_6, window_bounds = array<i64: 1, 64>}, {transform_indices = @transform_7, window_bounds = array<i64: 1, 49, 64>}]} {
    %cst = arith.constant 0.000000e+00 : f32
    %0 = vector.broadcast %cst : f32 to vector<109x128xf32>
    %c0 = arith.constant 0 : index
    %c0_0 = arith.constant 0 : index
    %c0_1 = arith.constant 0 : index
    %1 = vector.load %arg1[%c0, %c0_0, %c0_1] : memref<1x121x512xf32, #tpu.memory_space<vmem>>, vector<1x109x128xf32>
    %2 = vector.shape_cast %1 : vector<1x109x128xf32> to vector<109x128xf32>
    %3 = arith.truncf %2 : vector<109x128xf32> to vector<109x128xbf16>
    %c0_2 = arith.constant 0 : index
    %c0_3 = arith.constant 0 : index
    %c0_4 = arith.constant 0 : index
    %4 = vector.load %arg2[%c0_2, %c0_3, %c0_4] : memref<9x128x128xbf16, #tpu.memory_space<vmem>>, vector<1x128x128xbf16>
    %5 = vector.shape_cast %4 : vector<1x128x128xbf16> to vector<128x128xbf16>
    %cst_5 = arith.constant dense<0.000000e+00> : vector<109x128xf32>
    %6 = tpu.matmul %3, %5, %cst_5 {dimension_numbers = #tpu.dot_dimension_numbers<[1], [0], [0], [1], [0, 0, 1, 1], [], []>} : vector<109x128xbf16>, vector<128x128xbf16>, vector<109x128xf32> -> vector<109x128xf32>
    %7 = arith.addf %0, %6 : vector<109x128xf32>
    %c0_6 = arith.constant 0 : index
    %c0_7 = arith.constant 0 : index
    %c128 = arith.constant 128 : index
    %8 = vector.load %arg1[%c0_6, %c0_7, %c128] : memref<1x121x512xf32, #tpu.memory_space<vmem>>, vector<1x109x128xf32>
    %9 = vector.shape_cast %8 : vector<1x109x128xf32> to vector<109x128xf32>
    %10 = arith.truncf %9 : vector<109x128xf32> to vector<109x128xbf16>
    %c1 = arith.constant 1 : index
    %c0_8 = arith.constant 0 : index
    %c0_9 = arith.constant 0 : index
    %11 = vector.load %arg2[%c1, %c0_8, %c0_9] : memref<9x128x128xbf16, #tpu.memory_space<vmem>>, vector<1x128x128xbf16>
    %12 = vector.shape_cast %11 : vector<1x128x128xbf16> to vector<128x128xbf16>
    %cst_10 = arith.constant dense<0.000000e+00> : vector<109x128xf32>
    %13 = tpu.matmul %10, %12, %cst_10 {dimension_numbers = #tpu.dot_dimension_numbers<[1], [0], [0], [1], [0, 0, 1, 1], [], []>} : vector<109x128xbf16>, vector<128x128xbf16>, vector<109x128xf32> -> vector<109x128xf32>
    %14 = arith.addf %7, %13 : vector<109x128xf32>
    %c0_11 = arith.constant 0 : index
    %c1_12 = arith.constant 1 : index
    %c0_13 = arith.constant 0 : index
    %15 = vector.load %arg1[%c0_11, %c1_12, %c0_13] : memref<1x121x512xf32, #tpu.memory_space<vmem>>, vector<1x109x128xf32>
    %16 = vector.shape_cast %15 : vector<1x109x128xf32> to vector<109x128xf32>
    %17 = arith.truncf %16 : vector<109x128xf32> to vector<109x128xbf16>
    %c2 = arith.constant 2 : index
    %c0_14 = arith.constant 0 : index
    %c0_15 = arith.constant 0 : index
    %18 = vector.load %arg2[%c2, %c0_14, %c0_15] : memref<9x128x128xbf16, #tpu.memory_space<vmem>>, vector<1x128x128xbf16>
    %19 = vector.shape_cast %18 : vector<1x128x128xbf16> to vector<128x128xbf16>
    %cst_16 = arith.constant dense<0.000000e+00> : vector<109x128xf32>
    %20 = tpu.matmul %17, %19, %cst_16 {dimension_numbers = #tpu.dot_dimension_numbers<[1], [0], [0], [1], [0, 0, 1, 1], [], []>} : vector<109x128xbf16>, vector<128x128xbf16>, vector<109x128xf32> -> vector<109x128xf32>
    %21 = arith.addf %14, %20 : vector<109x128xf32>
    %c0_17 = arith.constant 0 : index
    %c0_18 = arith.constant 0 : index
    %c256 = arith.constant 256 : index
    %22 = vector.load %arg1[%c0_17, %c0_18, %c256] : memref<1x121x512xf32, #tpu.memory_space<vmem>>, vector<1x109x128xf32>
    %23 = vector.shape_cast %22 : vector<1x109x128xf32> to vector<109x128xf32>
    %24 = arith.truncf %23 : vector<109x128xf32> to vector<109x128xbf16>
    %c3 = arith.constant 3 : index
    %c0_19 = arith.constant 0 : index
    %c0_20 = arith.constant 0 : index
    %25 = vector.load %arg2[%c3, %c0_19, %c0_20] : memref<9x128x128xbf16, #tpu.memory_space<vmem>>, vector<1x128x128xbf16>
    %26 = vector.shape_cast %25 : vector<1x128x128xbf16> to vector<128x128xbf16>
    %cst_21 = arith.constant dense<0.000000e+00> : vector<109x128xf32>
    %27 = tpu.matmul %24, %26, %cst_21 {dimension_numbers = #tpu.dot_dimension_numbers<[1], [0], [0], [1], [0, 0, 1, 1], [], []>} : vector<109x128xbf16>, vector<128x128xbf16>, vector<109x128xf32> -> vector<109x128xf32>
    %28 = arith.addf %21, %27 : vector<109x128xf32>
    %c0_22 = arith.constant 0 : index
    %c0_23 = arith.constant 0 : index
    %c384 = arith.constant 384 : index
    %29 = vector.load %arg1[%c0_22, %c0_23, %c384] : memref<1x121x512xf32, #tpu.memory_space<vmem>>, vector<1x109x128xf32>
    %30 = vector.shape_cast %29 : vector<1x109x128xf32> to vector<109x128xf32>
    %31 = arith.truncf %30 : vector<109x128xf32> to vector<109x128xbf16>
    %c4 = arith.constant 4 : index
    %c0_24 = arith.constant 0 : index
    %c0_25 = arith.constant 0 : index
    %32 = vector.load %arg2[%c4, %c0_24, %c0_25] : memref<9x128x128xbf16, #tpu.memory_space<vmem>>, vector<1x128x128xbf16>
    %33 = vector.shape_cast %32 : vector<1x128x128xbf16> to vector<128x128xbf16>
    %cst_26 = arith.constant dense<0.000000e+00> : vector<109x128xf32>
    %34 = tpu.matmul %31, %33, %cst_26 {dimension_numbers = #tpu.dot_dimension_numbers<[1], [0], [0], [1], [0, 0, 1, 1], [], []>} : vector<109x128xbf16>, vector<128x128xbf16>, vector<109x128xf32> -> vector<109x128xf32>
    %35 = arith.addf %28, %34 : vector<109x128xf32>
    %c0_27 = arith.constant 0 : index
    %c1_28 = arith.constant 1 : index
    %c256_29 = arith.constant 256 : index
    %36 = vector.load %arg1[%c0_27, %c1_28, %c256_29] : memref<1x121x512xf32, #tpu.memory_space<vmem>>, vector<1x109x128xf32>
    %37 = vector.shape_cast %36 : vector<1x109x128xf32> to vector<109x128xf32>
    %38 = arith.truncf %37 : vector<109x128xf32> to vector<109x128xbf16>
    %c5 = arith.constant 5 : index
    %c0_30 = arith.constant 0 : index
    %c0_31 = arith.constant 0 : index
    %39 = vector.load %arg2[%c5, %c0_30, %c0_31] : memref<9x128x128xbf16, #tpu.memory_space<vmem>>, vector<1x128x128xbf16>
    %40 = vector.shape_cast %39 : vector<1x128x128xbf16> to vector<128x128xbf16>
    %cst_32 = arith.constant dense<0.000000e+00> : vector<109x128xf32>
    %41 = tpu.matmul %38, %40, %cst_32 {dimension_numbers = #tpu.dot_dimension_numbers<[1], [0], [0], [1], [0, 0, 1, 1], [], []>} : vector<109x128xbf16>, vector<128x128xbf16>, vector<109x128xf32> -> vector<109x128xf32>
    %42 = arith.addf %35, %41 : vector<109x128xf32>
    %c0_33 = arith.constant 0 : index
    %c11 = arith.constant 11 : index
    %c0_34 = arith.constant 0 : index
    %43 = vector.load %arg1[%c0_33, %c11, %c0_34] : memref<1x121x512xf32, #tpu.memory_space<vmem>>, vector<1x109x128xf32>
    %44 = vector.shape_cast %43 : vector<1x109x128xf32> to vector<109x128xf32>
    %45 = arith.truncf %44 : vector<109x128xf32> to vector<109x128xbf16>
    %c6 = arith.constant 6 : index
    %c0_35 = arith.constant 0 : index
    %c0_36 = arith.constant 0 : index
    %46 = vector.load %arg2[%c6, %c0_35, %c0_36] : memref<9x128x128xbf16, #tpu.memory_space<vmem>>, vector<1x128x128xbf16>
    %47 = vector.shape_cast %46 : vector<1x128x128xbf16> to vector<128x128xbf16>
    %cst_37 = arith.constant dense<0.000000e+00> : vector<109x128xf32>
    %48 = tpu.matmul %45, %47, %cst_37 {dimension_numbers = #tpu.dot_dimension_numbers<[1], [0], [0], [1], [0, 0, 1, 1], [], []>} : vector<109x128xbf16>, vector<128x128xbf16>, vector<109x128xf32> -> vector<109x128xf32>
    %49 = arith.addf %42, %48 : vector<109x128xf32>
    %c0_38 = arith.constant 0 : index
    %c11_39 = arith.constant 11 : index
    %c128_40 = arith.constant 128 : index
    %50 = vector.load %arg1[%c0_38, %c11_39, %c128_40] : memref<1x121x512xf32, #tpu.memory_space<vmem>>, vector<1x109x128xf32>
    %51 = vector.shape_cast %50 : vector<1x109x128xf32> to vector<109x128xf32>
    %52 = arith.truncf %51 : vector<109x128xf32> to vector<109x128xbf16>
    %c7 = arith.constant 7 : index
    %c0_41 = arith.constant 0 : index
    %c0_42 = arith.constant 0 : index
    %53 = vector.load %arg2[%c7, %c0_41, %c0_42] : memref<9x128x128xbf16, #tpu.memory_space<vmem>>, vector<1x128x128xbf16>
    %54 = vector.shape_cast %53 : vector<1x128x128xbf16> to vector<128x128xbf16>
    %cst_43 = arith.constant dense<0.000000e+00> : vector<109x128xf32>
    %55 = tpu.matmul %52, %54, %cst_43 {dimension_numbers = #tpu.dot_dimension_numbers<[1], [0], [0], [1], [0, 0, 1, 1], [], []>} : vector<109x128xbf16>, vector<128x128xbf16>, vector<109x128xf32> -> vector<109x128xf32>
    %56 = arith.addf %49, %55 : vector<109x128xf32>
    %c0_44 = arith.constant 0 : index
    %c12 = arith.constant 12 : index
    %c0_45 = arith.constant 0 : index
    %57 = vector.load %arg1[%c0_44, %c12, %c0_45] : memref<1x121x512xf32, #tpu.memory_space<vmem>>, vector<1x109x128xf32>
    %58 = vector.shape_cast %57 : vector<1x109x128xf32> to vector<109x128xf32>
    %59 = arith.truncf %58 : vector<109x128xf32> to vector<109x128xbf16>
    %c8 = arith.constant 8 : index
    %c0_46 = arith.constant 0 : index
    %c0_47 = arith.constant 0 : index
    %60 = vector.load %arg2[%c8, %c0_46, %c0_47] : memref<9x128x128xbf16, #tpu.memory_space<vmem>>, vector<1x128x128xbf16>
    %61 = vector.shape_cast %60 : vector<1x128x128xbf16> to vector<128x128xbf16>
    %cst_48 = arith.constant dense<0.000000e+00> : vector<109x128xf32>
    %62 = tpu.matmul %59, %61, %cst_48 {dimension_numbers = #tpu.dot_dimension_numbers<[1], [0], [0], [1], [0, 0, 1, 1], [], []>} : vector<109x128xbf16>, vector<128x128xbf16>, vector<109x128xf32> -> vector<109x128xf32>
    %63 = arith.addf %56, %62 : vector<109x128xf32>
    %c0_49 = arith.constant 0 : index
    %c0_50 = arith.constant 0 : index
    %64 = vector.load %arg3[%c0_49, %c0_50] : memref<1x128xf32, #tpu.memory_space<vmem>>, vector<1x128xf32>
    %65 = vector.broadcast %64 : vector<1x128xf32> to vector<109x128xf32>
    %66 = arith.addf %63, %65 : vector<109x128xf32>
    %cst_51 = arith.constant 0.000000e+00 : f32
    %67 = vector.broadcast %cst_51 : f32 to vector<109x128xf32>
    %68 = arith.maximumf %66, %67 : vector<109x128xf32>
    %c0_52 = arith.constant 0 : index
    %c0_53 = arith.constant 0 : index
    %69 = vector.load %arg9[%c0_52, %c0_53] : memref<109x128xf32, #tpu.memory_space<vmem>>, vector<109x128xf32>
    tpu.vector_store %arg9[%c0_52, %c0_53], %68 {strides = array<i32>} : memref<109x128xf32, #tpu.memory_space<vmem>>, vector<109x128xf32>,
    %cst_54 = arith.constant 0.000000e+00 : f32
    %70 = vector.broadcast %cst_54 : f32 to vector<97x64xf32>
    %c0_55 = arith.constant 0 : index
    %c0_56 = arith.constant 0 : index
    %71 = vector.load %arg9[%c0_55, %c0_56] : memref<109x128xf32, #tpu.memory_space<vmem>>, vector<97x128xf32>
    %72 = arith.truncf %71 : vector<97x128xf32> to vector<97x128xbf16>
    %c0_57 = arith.constant 0 : index
    %c0_58 = arith.constant 0 : index
    %c0_59 = arith.constant 0 : index
    %73 = vector.load %arg4[%c0_57, %c0_58, %c0_59] : memref<4x128x64xbf16, #tpu.memory_space<vmem>>, vector<1x128x64xbf16>
    %74 = vector.shape_cast %73 : vector<1x128x64xbf16> to vector<128x64xbf16>
    %cst_60 = arith.constant dense<0.000000e+00> : vector<97x64xf32>
    %75 = tpu.matmul %72, %74, %cst_60 {dimension_numbers = #tpu.dot_dimension_numbers<[1], [0], [0], [1], [0, 0, 1, 1], [], []>} : vector<97x128xbf16>, vector<128x64xbf16>, vector<97x64xf32> -> vector<97x64xf32>
    %76 = arith.addf %70, %75 : vector<97x64xf32>
    %c1_61 = arith.constant 1 : index
    %c0_62 = arith.constant 0 : index
    %77 = vector.load %arg9[%c1_61, %c0_62] : memref<109x128xf32, #tpu.memory_space<vmem>>, vector<97x128xf32>
    %78 = arith.truncf %77 : vector<97x128xf32> to vector<97x128xbf16>
    %c1_63 = arith.constant 1 : index
    %c0_64 = arith.constant 0 : index
    %c0_65 = arith.constant 0 : index
    %79 = vector.load %arg4[%c1_63, %c0_64, %c0_65] : memref<4x128x64xbf16, #tpu.memory_space<vmem>>, vector<1x128x64xbf16>
    %80 = vector.shape_cast %79 : vector<1x128x64xbf16> to vector<128x64xbf16>
    %cst_66 = arith.constant dense<0.000000e+00> : vector<97x64xf32>
    %81 = tpu.matmul %78, %80, %cst_66 {dimension_numbers = #tpu.dot_dimension_numbers<[1], [0], [0], [1], [0, 0, 1, 1], [], []>} : vector<97x128xbf16>, vector<128x64xbf16>, vector<97x64xf32> -> vector<97x64xf32>
    %82 = arith.addf %76, %81 : vector<97x64xf32>
    %c11_67 = arith.constant 11 : index
    %c0_68 = arith.constant 0 : index
    %83 = vector.load %arg9[%c11_67, %c0_68] : memref<109x128xf32, #tpu.memory_space<vmem>>, vector<97x128xf32>
    %84 = arith.truncf %83 : vector<97x128xf32> to vector<97x128xbf16>
    %c2_69 = arith.constant 2 : index
    %c0_70 = arith.constant 0 : index
    %c0_71 = arith.constant 0 : index
    %85 = vector.load %arg4[%c2_69, %c0_70, %c0_71] : memref<4x128x64xbf16, #tpu.memory_space<vmem>>, vector<1x128x64xbf16>
    %86 = vector.shape_cast %85 : vector<1x128x64xbf16> to vector<128x64xbf16>
    %cst_72 = arith.constant dense<0.000000e+00> : vector<97x64xf32>
    %87 = tpu.matmul %84, %86, %cst_72 {dimension_numbers = #tpu.dot_dimension_numbers<[1], [0], [0], [1], [0, 0, 1, 1], [], []>} : vector<97x128xbf16>, vector<128x64xbf16>, vector<97x64xf32> -> vector<97x64xf32>
    %88 = arith.addf %82, %87 : vector<97x64xf32>
    %c12_73 = arith.constant 12 : index
    %c0_74 = arith.constant 0 : index
    %89 = vector.load %arg9[%c12_73, %c0_74] : memref<109x128xf32, #tpu.memory_space<vmem>>, vector<97x128xf32>
    %90 = arith.truncf %89 : vector<97x128xf32> to vector<97x128xbf16>
    %c3_75 = arith.constant 3 : index
    %c0_76 = arith.constant 0 : index
    %c0_77 = arith.constant 0 : index
    %91 = vector.load %arg4[%c3_75, %c0_76, %c0_77] : memref<4x128x64xbf16, #tpu.memory_space<vmem>>, vector<1x128x64xbf16>
    %92 = vector.shape_cast %91 : vector<1x128x64xbf16> to vector<128x64xbf16>
    %cst_78 = arith.constant dense<0.000000e+00> : vector<97x64xf32>
    %93 = tpu.matmul %90, %92, %cst_78 {dimension_numbers = #tpu.dot_dimension_numbers<[1], [0], [0], [1], [0, 0, 1, 1], [], []>} : vector<97x128xbf16>, vector<128x64xbf16>, vector<97x64xf32> -> vector<97x64xf32>
    %94 = arith.addf %88, %93 : vector<97x64xf32>
    %c0_79 = arith.constant 0 : index
    %c0_80 = arith.constant 0 : index
    %95 = vector.load %arg5[%c0_79, %c0_80] : memref<1x64xf32, #tpu.memory_space<vmem>>, vector<1x64xf32>
    %96 = vector.broadcast %95 : vector<1x64xf32> to vector<97x64xf32>
    %97 = arith.addf %94, %96 : vector<97x64xf32>
    %cst_81 = arith.constant 0.000000e+00 : f32
    %98 = vector.broadcast %cst_81 : f32 to vector<97x64xf32>
    %99 = arith.maximumf %97, %98 : vector<97x64xf32>
    %c0_82 = arith.constant 0 : index
    %c0_83 = arith.constant 0 : index
    %100 = vector.load %arg10[%c0_82, %c0_83] : memref<97x64xf32, #tpu.memory_space<vmem>>, vector<97x64xf32>
    tpu.vector_store %arg10[%c0_82, %c0_83], %99 {strides = array<i32>} : memref<97x64xf32, #tpu.memory_space<vmem>>, vector<97x64xf32>,
    %cst_84 = arith.constant 0.000000e+00 : f32
    %101 = vector.broadcast %cst_84 : f32 to vector<73x64xf32>
    %c0_85 = arith.constant 0 : index
    %c0_86 = arith.constant 0 : index
    %102 = vector.load %arg10[%c0_85, %c0_86] : memref<97x64xf32, #tpu.memory_space<vmem>>, vector<73x64xf32>
    %103 = arith.truncf %102 : vector<73x64xf32> to vector<73x64xbf16>
    %c0_87 = arith.constant 0 : index
    %c0_88 = arith.constant 0 : index
    %c0_89 = arith.constant 0 : index
    %104 = vector.load %arg6[%c0_87, %c0_88, %c0_89] : memref<9x64x64xbf16, #tpu.memory_space<vmem>>, vector<1x64x64xbf16>
    %105 = vector.shape_cast %104 : vector<1x64x64xbf16> to vector<64x64xbf16>
    %cst_90 = arith.constant dense<0.000000e+00> : vector<73x64xf32>
    %106 = tpu.matmul %103, %105, %cst_90 {dimension_numbers = #tpu.dot_dimension_numbers<[1], [0], [0], [1], [0, 0, 1, 1], [], []>} : vector<73x64xbf16>, vector<64x64xbf16>, vector<73x64xf32> -> vector<73x64xf32>
    %107 = arith.addf %101, %106 : vector<73x64xf32>
    %c1_91 = arith.constant 1 : index
    %c0_92 = arith.constant 0 : index
    %108 = vector.load %arg10[%c1_91, %c0_92] : memref<97x64xf32, #tpu.memory_space<vmem>>, vector<73x64xf32>
    %109 = arith.truncf %108 : vector<73x64xf32> to vector<73x64xbf16>
    %c1_93 = arith.constant 1 : index
    %c0_94 = arith.constant 0 : index
    %c0_95 = arith.constant 0 : index
    %110 = vector.load %arg6[%c1_93, %c0_94, %c0_95] : memref<9x64x64xbf16, #tpu.memory_space<vmem>>, vector<1x64x64xbf16>
    %111 = vector.shape_cast %110 : vector<1x64x64xbf16> to vector<64x64xbf16>
    %cst_96 = arith.constant dense<0.000000e+00> : vector<73x64xf32>
    %112 = tpu.matmul %109, %111, %cst_96 {dimension_numbers = #tpu.dot_dimension_numbers<[1], [0], [0], [1], [0, 0, 1, 1], [], []>} : vector<73x64xbf16>, vector<64x64xbf16>, vector<73x64xf32> -> vector<73x64xf32>
    %113 = arith.addf %107, %112 : vector<73x64xf32>
    %c2_97 = arith.constant 2 : index
    %c0_98 = arith.constant 0 : index
    %114 = vector.load %arg10[%c2_97, %c0_98] : memref<97x64xf32, #tpu.memory_space<vmem>>, vector<73x64xf32>
    %115 = arith.truncf %114 : vector<73x64xf32> to vector<73x64xbf16>
    %c2_99 = arith.constant 2 : index
    %c0_100 = arith.constant 0 : index
    %c0_101 = arith.constant 0 : index
    %116 = vector.load %arg6[%c2_99, %c0_100, %c0_101] : memref<9x64x64xbf16, #tpu.memory_space<vmem>>, vector<1x64x64xbf16>
    %117 = vector.shape_cast %116 : vector<1x64x64xbf16> to vector<64x64xbf16>
    %cst_102 = arith.constant dense<0.000000e+00> : vector<73x64xf32>
    %118 = tpu.matmul %115, %117, %cst_102 {dimension_numbers = #tpu.dot_dimension_numbers<[1], [0], [0], [1], [0, 0, 1, 1], [], []>} : vector<73x64xbf16>, vector<64x64xbf16>, vector<73x64xf32> -> vector<73x64xf32>
    %119 = arith.addf %113, %118 : vector<73x64xf32>
    %c11_103 = arith.constant 11 : index
    %c0_104 = arith.constant 0 : index
    %120 = vector.load %arg10[%c11_103, %c0_104] : memref<97x64xf32, #tpu.memory_space<vmem>>, vector<73x64xf32>
    %121 = arith.truncf %120 : vector<73x64xf32> to vector<73x64xbf16>
    %c3_105 = arith.constant 3 : index
    %c0_106 = arith.constant 0 : index
    %c0_107 = arith.constant 0 : index
    %122 = vector.load %arg6[%c3_105, %c0_106, %c0_107] : memref<9x64x64xbf16, #tpu.memory_space<vmem>>, vector<1x64x64xbf16>
    %123 = vector.shape_cast %122 : vector<1x64x64xbf16> to vector<64x64xbf16>
    %cst_108 = arith.constant dense<0.000000e+00> : vector<73x64xf32>
    %124 = tpu.matmul %121, %123, %cst_108 {dimension_numbers = #tpu.dot_dimension_numbers<[1], [0], [0], [1], [0, 0, 1, 1], [], []>} : vector<73x64xbf16>, vector<64x64xbf16>, vector<73x64xf32> -> vector<73x64xf32>
    %125 = arith.addf %119, %124 : vector<73x64xf32>
    %c12_109 = arith.constant 12 : index
    %c0_110 = arith.constant 0 : index
    %126 = vector.load %arg10[%c12_109, %c0_110] : memref<97x64xf32, #tpu.memory_space<vmem>>, vector<73x64xf32>
    %127 = arith.truncf %126 : vector<73x64xf32> to vector<73x64xbf16>
    %c4_111 = arith.constant 4 : index
    %c0_112 = arith.constant 0 : index
    %c0_113 = arith.constant 0 : index
    %128 = vector.load %arg6[%c4_111, %c0_112, %c0_113] : memref<9x64x64xbf16, #tpu.memory_space<vmem>>, vector<1x64x64xbf16>
    %129 = vector.shape_cast %128 : vector<1x64x64xbf16> to vector<64x64xbf16>
    %cst_114 = arith.constant dense<0.000000e+00> : vector<73x64xf32>
    %130 = tpu.matmul %127, %129, %cst_114 {dimension_numbers = #tpu.dot_dimension_numbers<[1], [0], [0], [1], [0, 0, 1, 1], [], []>} : vector<73x64xbf16>, vector<64x64xbf16>, vector<73x64xf32> -> vector<73x64xf32>
    %131 = arith.addf %125, %130 : vector<73x64xf32>
    %c13 = arith.constant 13 : index
    %c0_115 = arith.constant 0 : index
    %132 = vector.load %arg10[%c13, %c0_115] : memref<97x64xf32, #tpu.memory_space<vmem>>, vector<73x64xf32>
    %133 = arith.truncf %132 : vector<73x64xf32> to vector<73x64xbf16>
    %c5_116 = arith.constant 5 : index
    %c0_117 = arith.constant 0 : index
    %c0_118 = arith.constant 0 : index
    %134 = vector.load %arg6[%c5_116, %c0_117, %c0_118] : memref<9x64x64xbf16, #tpu.memory_space<vmem>>, vector<1x64x64xbf16>
    %135 = vector.shape_cast %134 : vector<1x64x64xbf16> to vector<64x64xbf16>
    %cst_119 = arith.constant dense<0.000000e+00> : vector<73x64xf32>
    %136 = tpu.matmul %133, %135, %cst_119 {dimension_numbers = #tpu.dot_dimension_numbers<[1], [0], [0], [1], [0, 0, 1, 1], [], []>} : vector<73x64xbf16>, vector<64x64xbf16>, vector<73x64xf32> -> vector<73x64xf32>
    %137 = arith.addf %131, %136 : vector<73x64xf32>
    %c22 = arith.constant 22 : index
    %c0_120 = arith.constant 0 : index
    %138 = vector.load %arg10[%c22, %c0_120] : memref<97x64xf32, #tpu.memory_space<vmem>>, vector<73x64xf32>
    %139 = arith.truncf %138 : vector<73x64xf32> to vector<73x64xbf16>
    %c6_121 = arith.constant 6 : index
    %c0_122 = arith.constant 0 : index
    %c0_123 = arith.constant 0 : index
    %140 = vector.load %arg6[%c6_121, %c0_122, %c0_123] : memref<9x64x64xbf16, #tpu.memory_space<vmem>>, vector<1x64x64xbf16>
    %141 = vector.shape_cast %140 : vector<1x64x64xbf16> to vector<64x64xbf16>
    %cst_124 = arith.constant dense<0.000000e+00> : vector<73x64xf32>
    %142 = tpu.matmul %139, %141, %cst_124 {dimension_numbers = #tpu.dot_dimension_numbers<[1], [0], [0], [1], [0, 0, 1, 1], [], []>} : vector<73x64xbf16>, vector<64x64xbf16>, vector<73x64xf32> -> vector<73x64xf32>
    %143 = arith.addf %137, %142 : vector<73x64xf32>
    %c23 = arith.constant 23 : index
    %c0_125 = arith.constant 0 : index
    %144 = vector.load %arg10[%c23, %c0_125] : memref<97x64xf32, #tpu.memory_space<vmem>>, vector<73x64xf32>
    %145 = arith.truncf %144 : vector<73x64xf32> to vector<73x64xbf16>
    %c7_126 = arith.constant 7 : index
    %c0_127 = arith.constant 0 : index
    %c0_128 = arith.constant 0 : index
    %146 = vector.load %arg6[%c7_126, %c0_127, %c0_128] : memref<9x64x64xbf16, #tpu.memory_space<vmem>>, vector<1x64x64xbf16>
    %147 = vector.shape_cast %146 : vector<1x64x64xbf16> to vector<64x64xbf16>
    %cst_129 = arith.constant dense<0.000000e+00> : vector<73x64xf32>
    %148 = tpu.matmul %145, %147, %cst_129 {dimension_numbers = #tpu.dot_dimension_numbers<[1], [0], [0], [1], [0, 0, 1, 1], [], []>} : vector<73x64xbf16>, vector<64x64xbf16>, vector<73x64xf32> -> vector<73x64xf32>
    %149 = arith.addf %143, %148 : vector<73x64xf32>
    %c24 = arith.constant 24 : index
    %c0_130 = arith.constant 0 : index
    %150 = vector.load %arg10[%c24, %c0_130] : memref<97x64xf32, #tpu.memory_space<vmem>>, vector<73x64xf32>
    %151 = arith.truncf %150 : vector<73x64xf32> to vector<73x64xbf16>
    %c8_131 = arith.constant 8 : index
    %c0_132 = arith.constant 0 : index
    %c0_133 = arith.constant 0 : index
    %152 = vector.load %arg6[%c8_131, %c0_132, %c0_133] : memref<9x64x64xbf16, #tpu.memory_space<vmem>>, vector<1x64x64xbf16>
    %153 = vector.shape_cast %152 : vector<1x64x64xbf16> to vector<64x64xbf16>
    %cst_134 = arith.constant dense<0.000000e+00> : vector<73x64xf32>
    %154 = tpu.matmul %151, %153, %cst_134 {dimension_numbers = #tpu.dot_dimension_numbers<[1], [0], [0], [1], [0, 0, 1, 1], [], []>} : vector<73x64xbf16>, vector<64x64xbf16>, vector<73x64xf32> -> vector<73x64xf32>
    %155 = arith.addf %149, %154 : vector<73x64xf32>
    %c0_135 = arith.constant 0 : index
    %c0_136 = arith.constant 0 : index
    %156 = vector.load %arg7[%c0_135, %c0_136] : memref<1x64xf32, #tpu.memory_space<vmem>>, vector<1x64xf32>
    %157 = vector.broadcast %156 : vector<1x64xf32> to vector<73x64xf32>
    %158 = arith.addf %155, %157 : vector<73x64xf32>
    %cst_137 = arith.constant 0.000000e+00 : f32
    %159 = vector.broadcast %cst_137 : f32 to vector<73x64xf32>
    %160 = arith.maximumf %158, %159 : vector<73x64xf32>
    %c0_138 = arith.constant 0 : index
    %c0_139 = arith.constant 0 : index
    %161 = vector.load %arg11[%c0_138, %c0_139] : memref<73x64xf32, #tpu.memory_space<vmem>>, vector<73x64xf32>
    tpu.vector_store %arg11[%c0_138, %c0_139], %160 {strides = array<i32>} : memref<73x64xf32, #tpu.memory_space<vmem>>, vector<73x64xf32>,
    %c0_140 = arith.constant 0 : index
    %c0_141 = arith.constant 0 : index
    %162 = vector.load %arg11[%c0_140, %c0_141] : memref<73x64xf32, #tpu.memory_space<vmem>>, vector<7x64xf32>
    %c0_142 = arith.constant 0 : index
    %c0_143 = arith.constant 0 : index
    %c0_144 = arith.constant 0 : index
    %163 = vector.load %arg8[%c0_142, %c0_143, %c0_144] : memref<1x49x64xf32, #tpu.memory_space<vmem>>, vector<1x7x64xf32>
    %164 = vector.shape_cast %163 : vector<1x7x64xf32> to vector<7x64xf32>
    %165 = vector.shape_cast %162 : vector<7x64xf32> to vector<1x7x64xf32>
    tpu.vector_store %arg8[%c0_142, %c0_143, %c0_144], %165 {strides = array<i32>} : memref<1x49x64xf32, #tpu.memory_space<vmem>>, vector<1x7x64xf32>,
    %c11_145 = arith.constant 11 : index
    %c0_146 = arith.constant 0 : index
    %166 = vector.load %arg11[%c11_145, %c0_146] : memref<73x64xf32, #tpu.memory_space<vmem>>, vector<7x64xf32>
    %c0_147 = arith.constant 0 : index
    %c7_148 = arith.constant 7 : index
    %c0_149 = arith.constant 0 : index
    %167 = vector.load %arg8[%c0_147, %c7_148, %c0_149] : memref<1x49x64xf32, #tpu.memory_space<vmem>>, vector<1x7x64xf32>
    %168 = vector.shape_cast %167 : vector<1x7x64xf32> to vector<7x64xf32>
    %169 = vector.shape_cast %166 : vector<7x64xf32> to vector<1x7x64xf32>
    tpu.vector_store %arg8[%c0_147, %c7_148, %c0_149], %169 {strides = array<i32>} : memref<1x49x64xf32, #tpu.memory_space<vmem>>, vector<1x7x64xf32>,
    %c22_150 = arith.constant 22 : index
    %c0_151 = arith.constant 0 : index
    %170 = vector.load %arg11[%c22_150, %c0_151] : memref<73x64xf32, #tpu.memory_space<vmem>>, vector<7x64xf32>
    %c0_152 = arith.constant 0 : index
    %c14 = arith.constant 14 : index
    %c0_153 = arith.constant 0 : index
    %171 = vector.load %arg8[%c0_152, %c14, %c0_153] : memref<1x49x64xf32, #tpu.memory_space<vmem>>, vector<1x7x64xf32>
    %172 = vector.shape_cast %171 : vector<1x7x64xf32> to vector<7x64xf32>
    %173 = vector.shape_cast %170 : vector<7x64xf32> to vector<1x7x64xf32>
    tpu.vector_store %arg8[%c0_152, %c14, %c0_153], %173 {strides = array<i32>} : memref<1x49x64xf32, #tpu.memory_space<vmem>>, vector<1x7x64xf32>,
    %c33 = arith.constant 33 : index
    %c0_154 = arith.constant 0 : index
    %174 = vector.load %arg11[%c33, %c0_154] : memref<73x64xf32, #tpu.memory_space<vmem>>, vector<7x64xf32>
    %c0_155 = arith.constant 0 : index
    %c21 = arith.constant 21 : index
    %c0_156 = arith.constant 0 : index
    %175 = vector.load %arg8[%c0_155, %c21, %c0_156] : memref<1x49x64xf32, #tpu.memory_space<vmem>>, vector<1x7x64xf32>
    %176 = vector.shape_cast %175 : vector<1x7x64xf32> to vector<7x64xf32>
    %177 = vector.shape_cast %174 : vector<7x64xf32> to vector<1x7x64xf32>
    tpu.vector_store %arg8[%c0_155, %c21, %c0_156], %177 {strides = array<i32>} : memref<1x49x64xf32, #tpu.memory_space<vmem>>, vector<1x7x64xf32>,
    %c44 = arith.constant 44 : index
    %c0_157 = arith.constant 0 : index
    %178 = vector.load %arg11[%c44, %c0_157] : memref<73x64xf32, #tpu.memory_space<vmem>>, vector<7x64xf32>
    %c0_158 = arith.constant 0 : index
    %c28 = arith.constant 28 : index
    %c0_159 = arith.constant 0 : index
    %179 = vector.load %arg8[%c0_158, %c28, %c0_159] : memref<1x49x64xf32, #tpu.memory_space<vmem>>, vector<1x7x64xf32>
    %180 = vector.shape_cast %179 : vector<1x7x64xf32> to vector<7x64xf32>
    %181 = vector.shape_cast %178 : vector<7x64xf32> to vector<1x7x64xf32>
    tpu.vector_store %arg8[%c0_158, %c28, %c0_159], %181 {strides = array<i32>} : memref<1x49x64xf32, #tpu.memory_space<vmem>>, vector<1x7x64xf32>,
    %c55 = arith.constant 55 : index
    %c0_160 = arith.constant 0 : index
    %182 = vector.load %arg11[%c55, %c0_160] : memref<73x64xf32, #tpu.memory_space<vmem>>, vector<7x64xf32>
    %c0_161 = arith.constant 0 : index
    %c35 = arith.constant 35 : index
    %c0_162 = arith.constant 0 : index
    %183 = vector.load %arg8[%c0_161, %c35, %c0_162] : memref<1x49x64xf32, #tpu.memory_space<vmem>>, vector<1x7x64xf32>
    %184 = vector.shape_cast %183 : vector<1x7x64xf32> to vector<7x64xf32>
    %185 = vector.shape_cast %182 : vector<7x64xf32> to vector<1x7x64xf32>
    tpu.vector_store %arg8[%c0_161, %c35, %c0_162], %185 {strides = array<i32>} : memref<1x49x64xf32, #tpu.memory_space<vmem>>, vector<1x7x64xf32>,
    %c66 = arith.constant 66 : index
    %c0_163 = arith.constant 0 : index
    %186 = vector.load %arg11[%c66, %c0_163] : memref<73x64xf32, #tpu.memory_space<vmem>>, vector<7x64xf32>
    %c0_164 = arith.constant 0 : index
    %c42 = arith.constant 42 : index
    %c0_165 = arith.constant 0 : index
    %187 = vector.load %arg8[%c0_164, %c42, %c0_165] : memref<1x49x64xf32, #tpu.memory_space<vmem>>, vector<1x7x64xf32>
    %188 = vector.shape_cast %187 : vector<1x7x64xf32> to vector<7x64xf32>
    %189 = vector.shape_cast %186 : vector<7x64xf32> to vector<1x7x64xf32>
    tpu.vector_store %arg8[%c0_164, %c42, %c0_165], %189 {strides = array<i32>} : memref<1x49x64xf32, #tpu.memory_space<vmem>>, vector<1x7x64xf32>,
    return
  }
  func.func @transform_0(%arg0: i32) -> (i32, i32, i32) {
    %c0_i32 = arith.constant 0 : i32
    %c0_i32_0 = arith.constant 0 : i32
    %c0_i32_1 = arith.constant 0 : i32
    return %arg0, %c0_i32, %c0_i32_0 : i32, i32, i32
  }
  func.func @transform_1(%arg0: i32) -> (i32, i32, i32) {
    %c0_i32 = arith.constant 0 : i32
    %c0_i32_0 = arith.constant 0 : i32
    %c0_i32_1 = arith.constant 0 : i32
    %c0_i32_2 = arith.constant 0 : i32
    return %c0_i32, %c0_i32_0, %c0_i32_1 : i32, i32, i32
  }
  func.func @transform_2(%arg0: i32) -> (i32, i32) {
    %c0_i32 = arith.constant 0 : i32
    %c0_i32_0 = arith.constant 0 : i32
    %c0_i32_1 = arith.constant 0 : i32
    return %c0_i32, %c0_i32_0 : i32, i32
  }
  func.func @transform_3(%arg0: i32) -> (i32, i32, i32) {
    %c0_i32 = arith.constant 0 : i32
    %c0_i32_0 = arith.constant 0 : i32
    %c0_i32_1 = arith.constant 0 : i32
    %c0_i32_2 = arith.constant 0 : i32
    return %c0_i32, %c0_i32_0, %c0_i32_1 : i32, i32, i32
  }
  func.func @transform_4(%arg0: i32) -> (i32, i32) {
    %c0_i32 = arith.constant 0 : i32
    %c0_i32_0 = arith.constant 0 : i32
    %c0_i32_1 = arith.constant 0 : i32
    return %c0_i32, %c0_i32_0 : i32, i32
  }
  func.func @transform_5(%arg0: i32) -> (i32, i32, i32) {
    %c0_i32 = arith.constant 0 : i32
    %c0_i32_0 = arith.constant 0 : i32
    %c0_i32_1 = arith.constant 0 : i32
    %c0_i32_2 = arith.constant 0 : i32
    return %c0_i32, %c0_i32_0, %c0_i32_1 : i32, i32, i32
  }
  func.func @transform_6(%arg0: i32) -> (i32, i32) {
    %c0_i32 = arith.constant 0 : i32
    %c0_i32_0 = arith.constant 0 : i32
    %c0_i32_1 = arith.constant 0 : i32
    return %c0_i32, %c0_i32_0 : i32, i32
  }
  func.func @transform_7(%arg0: i32) -> (i32, i32, i32) {
    %c0_i32 = arith.constant 0 : i32
    %c0_i32_0 = arith.constant 0 : i32
    %c0_i32_1 = arith.constant 0 : i32
    return %arg0, %c0_i32, %c0_i32_0 : i32, i32, i32
  }
}

module attributes {stable_mosaic.version = 11 : i64} {
  func.func @_head_kernel(%arg0: i32, %arg1: memref<8x3136xf32, #tpu.memory_space<vmem>>, %arg2: memref<3136x512xbf16, #tpu.memory_space<vmem>>, %arg3: memref<1x512xf32, #tpu.memory_space<vmem>>, %arg4: memref<512x128xf32, #tpu.memory_space<vmem>>, %arg5: memref<1x128xf32, #tpu.memory_space<vmem>>, %arg6: memref<8x1xf32, #tpu.memory_space<vmem>>, %arg7: memref<8x6xf32, #tpu.memory_space<vmem>>) attributes {dimension_semantics = [#tpu.dimension_semantics<parallel>], iteration_bounds = array<i64: 1>, scalar_prefetch = 0 : i64, scratch_operands = 0 : i64, tpu.core_type = #tpu.core_type<tc>, window_params = [{transform_indices = @transform_0, window_bounds = array<i64: 8, 3136>}, {pipeline_mode = #tpu.pipeline_mode<synchronous>, transform_indices = @transform_1, window_bounds = array<i64: 3136, 512>}, {pipeline_mode = #tpu.pipeline_mode<synchronous>, transform_indices = @transform_2, window_bounds = array<i64: 1, 512>}, {pipeline_mode = #tpu.pipeline_mode<synchronous>, transform_indices = @transform_3, window_bounds = array<i64: 512, 128>}, {pipeline_mode = #tpu.pipeline_mode<synchronous>, transform_indices = @transform_4, window_bounds = array<i64: 1, 128>}, {transform_indices = @transform_5, window_bounds = array<i64: 8, 1>}, {transform_indices = @transform_6, window_bounds = array<i64: 8, 6>}]} {
    %c0 = arith.constant 0 : index
    %c0_0 = arith.constant 0 : index
    %0 = vector.load %arg1[%c0, %c0_0] : memref<8x3136xf32, #tpu.memory_space<vmem>>, vector<8x3136xf32>
    %1 = arith.truncf %0 : vector<8x3136xf32> to vector<8x3136xbf16>
    %c0_1 = arith.constant 0 : index
    %c0_2 = arith.constant 0 : index
    %2 = vector.load %arg2[%c0_1, %c0_2] : memref<3136x512xbf16, #tpu.memory_space<vmem>>, vector<3136x512xbf16>
    %cst = arith.constant dense<0.000000e+00> : vector<8x512xf32>
    %3 = tpu.matmul %1, %2, %cst {dimension_numbers = #tpu.dot_dimension_numbers<[1], [0], [0], [1], [0, 0, 1, 1], [], []>} : vector<8x3136xbf16>, vector<3136x512xbf16>, vector<8x512xf32> -> vector<8x512xf32>
    %c0_3 = arith.constant 0 : index
    %c0_4 = arith.constant 0 : index
    %4 = vector.load %arg3[%c0_3, %c0_4] : memref<1x512xf32, #tpu.memory_space<vmem>>, vector<1x512xf32>
    %5 = vector.broadcast %4 : vector<1x512xf32> to vector<8x512xf32>
    %6 = arith.addf %3, %5 : vector<8x512xf32>
    %cst_5 = arith.constant 0.000000e+00 : f32
    %7 = vector.broadcast %cst_5 : f32 to vector<8x512xf32>
    %8 = arith.maximumf %6, %7 : vector<8x512xf32>
    %c0_6 = arith.constant 0 : index
    %c0_7 = arith.constant 0 : index
    %9 = vector.load %arg4[%c0_6, %c0_7] : memref<512x128xf32, #tpu.memory_space<vmem>>, vector<512x128xf32>
    %cst_8 = arith.constant dense<0.000000e+00> : vector<8x128xf32>
    %10 = tpu.matmul %8, %9, %cst_8 {dimension_numbers = #tpu.dot_dimension_numbers<[1], [0], [0], [1], [0, 0, 1, 1], [], []>} : vector<8x512xf32>, vector<512x128xf32>, vector<8x128xf32> -> vector<8x128xf32>
    %c0_9 = arith.constant 0 : index
    %c0_10 = arith.constant 0 : index
    %11 = vector.load %arg5[%c0_9, %c0_10] : memref<1x128xf32, #tpu.memory_space<vmem>>, vector<1x128xf32>
    %12 = vector.broadcast %11 : vector<1x128xf32> to vector<8x128xf32>
    %13 = arith.addf %10, %12 : vector<8x128xf32>
    %14 = vector.extract_strided_slice %13 {offsets = [0, 0], sizes = [8, 6], strides = [1, 1]} : vector<8x128xf32> to vector<8x6xf32>
    %cst_11 = arith.constant dense<0xFF800000> : vector<8xf32>
    %15 = vector.multi_reduction <maximumf>, %14, %cst_11 [1] : vector<8x6xf32> to vector<8xf32>
    %16 = vector.shape_cast %15 : vector<8xf32> to vector<8x1xf32>
    %17 = vector.broadcast %16 : vector<8x1xf32> to vector<8x6xf32>
    %18 = arith.subf %14, %17 : vector<8x6xf32>
    %19 = math.exp %18 : vector<8x6xf32>
    %cst_12 = arith.constant dense<0.000000e+00> : vector<8xf32>
    %20 = vector.multi_reduction <add>, %19, %cst_12 [1] : vector<8x6xf32> to vector<8xf32>
    %21 = vector.shape_cast %20 : vector<8xf32> to vector<8x1xf32>
    %22 = vector.broadcast %21 : vector<8x1xf32> to vector<8x6xf32>
    %23 = arith.divf %19, %22 : vector<8x6xf32>
    %c0_13 = arith.constant 0 : index
    %c0_14 = arith.constant 0 : index
    %24 = vector.load %arg7[%c0_13, %c0_14] : memref<8x6xf32, #tpu.memory_space<vmem>>, vector<8x6xf32>
    tpu.vector_store %arg7[%c0_13, %c0_14], %23 {strides = array<i32>} : memref<8x6xf32, #tpu.memory_space<vmem>>, vector<8x6xf32>,
    %25 = vector.extract_strided_slice %13 {offsets = [0, 6], sizes = [8, 1], strides = [1, 1]} : vector<8x128xf32> to vector<8x1xf32>
    %c0_15 = arith.constant 0 : index
    %c0_16 = arith.constant 0 : index
    %26 = vector.load %arg6[%c0_15, %c0_16] : memref<8x1xf32, #tpu.memory_space<vmem>>, vector<8x1xf32>
    tpu.vector_store %arg6[%c0_15, %c0_16], %25 {strides = array<i32>} : memref<8x1xf32, #tpu.memory_space<vmem>>, vector<8x1xf32>,
    return
  }
  func.func @transform_0(%arg0: i32) -> (i32, i32) {
    %c0_i32 = arith.constant 0 : i32
    %c0_i32_0 = arith.constant 0 : i32
    return %arg0, %c0_i32 : i32, i32
  }
  func.func @transform_1(%arg0: i32) -> (i32, i32) {
    %c0_i32 = arith.constant 0 : i32
    %c0_i32_0 = arith.constant 0 : i32
    %c0_i32_1 = arith.constant 0 : i32
    return %c0_i32, %c0_i32_0 : i32, i32
  }
  func.func @transform_2(%arg0: i32) -> (i32, i32) {
    %c0_i32 = arith.constant 0 : i32
    %c0_i32_0 = arith.constant 0 : i32
    %c0_i32_1 = arith.constant 0 : i32
    return %c0_i32, %c0_i32_0 : i32, i32
  }
  func.func @transform_3(%arg0: i32) -> (i32, i32) {
    %c0_i32 = arith.constant 0 : i32
    %c0_i32_0 = arith.constant 0 : i32
    %c0_i32_1 = arith.constant 0 : i32
    return %c0_i32, %c0_i32_0 : i32, i32
  }
  func.func @transform_4(%arg0: i32) -> (i32, i32) {
    %c0_i32 = arith.constant 0 : i32
    %c0_i32_0 = arith.constant 0 : i32
    %c0_i32_1 = arith.constant 0 : i32
    return %c0_i32, %c0_i32_0 : i32, i32
  }
  func.func @transform_5(%arg0: i32) -> (i32, i32) {
    %c0_i32 = arith.constant 0 : i32
    %c0_i32_0 = arith.constant 0 : i32
    return %arg0, %c0_i32 : i32, i32
  }
  func.func @transform_6(%arg0: i32) -> (i32, i32) {
    %c0_i32 = arith.constant 0 : i32
    %c0_i32_0 = arith.constant 0 : i32
    return %arg0, %c0_i32 : i32, i32
  }
}

</mosaic_0001>

<bundles_post_ra>
// kernel: nature_forward.2
= control target key start
LH: loop header
LB: loop body
LE: loop exit
PB: predicated region body
PF: predicated region fallthrough
CT: control target
= control target key end

     0   :  { %s4564_s24 = smov 0   ;;  %s5698_s0 = inlined_call_operand.vmem [shape: f32[2,121,512], index: 0, kind: input, shape index: {}]   ;;  %s5699_s1 = inlined_call_operand.vmem [shape: bf16[9,128,128], index: 1, kind: input, shape index: {}]   ;;  %s5700_s2 = inlined_call_operand.vmem [shape: f32[1,128], index: 2, kind: input, shape index: {}]   ;;  %s5701_s3 = inlined_call_operand.vmem [shape: bf16[4,128,64], index: 3, kind: input, shape index: {}]   ;;  %s5702_s4 = inlined_call_operand.vmem [shape: f32[1,64], index: 4, kind: input, shape index: {}]   ;;  %s5703_s5 = inlined_call_operand.vmem [shape: bf16[9,64,64], index: 5, kind: input, shape index: {}]   ;;  %s5704_s6 = inlined_call_operand.vmem [shape: f32[1,64], index: 6, kind: input, shape index: {}]   ;;  %s5705_s7 = inlined_call_operand.vmem [shape: f32[2,49,64], index: 7, kind: output, shape index: {}]  }
   0x1 LB: > { %s3484_s25 = sadd.s32 4294967295, %s4522_s24   ;;  %p3488_p0 = scmp.ge.s32.totalorder %s4522_s24, 1  ;;  %s4522_s24 = sphi %s4564_s24, %s17_s24  }
   0x2   : > { %p237_p1 = scmp.lt.s32.totalorder %s4522_s24, 3 }
   0x4   : > { %p238_p2 = pnand %p3488_p0, %p237_p1 }
   0x5   : > { %p269_p3 = scmp.lt.s32.totalorder (!%p238_p2), %s3484_s25, 1 }
   0x6   : > { %241 = sbr.rel (%p238_p2) target bundleno = 1006 (0x3ee), region = 48 }
   0xb   : > { %v4355_v0 = vld [vmem:[%s5699_s1 + $0x78] sm:$0xff]  ;;  %v4354_v2 = vld [vmem:[%s5699_s1 + $0x70] sm:$0xff]  ;;  %v4353_v5 = vld [vmem:[%s5699_s1 + $0x68] sm:$0xff]  ;;  %s5707_s25 = smov (!%p269_p3, %s3484_s25), 1  ;;  %vm560_vm0 = vsmask.f32 7424 }
   0xc   : > { %v4347_v1 = vld [vmem:[%s5699_s1 + $0x38] sm:$0xff]  ;;  %403 = vmatpush.bf16.msra.mxu0 %v4355_v0  ;;  %v4346_v3 = vld [vmem:[%s5699_s1 + $0x30] sm:$0xff]  ;;  %v4345_v6 = vld [vmem:[%s5699_s1 + $0x28] sm:$0xff]  ;;  %s4339_s10 = sshll.u32 %s5707_s25, 9  ;;  %vm1244_vm1 = vsmask.f32 6400 }
   0xd   : > { %495 = vmatpush.bf16.msra.mxu1 %v4347_v1  ;;  %4480 = vmatpush.bf16.msra.mxu3 %v4347_v1  ;;  %v4587_v4 = vld [vmem:[%s5699_s1 + $0xb8] sm:$0xff]  ;;  %v4599_v7 = vld [vmem:[%s5699_s1 + $0xb0] sm:$0xff]  ;;  %v4352_v8 = vld [vmem:[%s5699_s1 + $0x60] sm:$0xff]  ;;  %s4637_s17 = scalar_lea.vmem %s5698_s0, %s4339_s10  ;;  %vm1681_vm2 = vcmask 1045504   ;;  %vm2423_vm3 = vcmask 523264   ;;  %vm2436_vm4 = vcmask 516096  }
   0xe   : > { %4488 = vmatpush.bf16.msra.mxu2 %v4587_v4  ;;  %v4344_v9 = vld [vmem:[%s5699_s1 + $0x20] sm:$0xff]  ;;  %v4611_v10 = vld [vmem:[%s5699_s1 + $0xa8] sm:$0xff]  ;;  %v4351_v11 = vld [vmem:[%s5699_s1 + $0x58] sm:$0xff]  ;;  %s4504_s29 = smul.u32 56, %s5707_s25  ;;  %vm3415_vm5 = vcmask 522240  }
   0xf   : > { %v4343_v12 = vld [vmem:[%s5699_s1 + $0x18] sm:$0xff]  ;;  %v4625_v13 = vld [vmem:[%s5699_s1 + $0xa0] sm:$0xff]  ;;  %v4350_v14 = vld [vmem:[%s5699_s1 + $0x50] sm:$0xff] }
  0x10   : > { %404 = vmatpush.bf16.msra.mxu0 %v4354_v2  ;;  %v4342_v15 = vld [vmem:[%s5699_s1 + $0x10] sm:$0xff]  ;;  %v4643_v16 = vld [vmem:[%s5699_s1 + $0x98] sm:$0xff]  ;;  %v4646_v17 = vld [vmem:[%s4637_s17 + $0x80] sm:$0xff] }
  0x11   : > { %496 = vmatpush.bf16.msra.mxu1 %v4346_v3  ;;  %4481 = vmatpush.bf16.msra.mxu3 %v4346_v3  ;;  %v4349_v18 = vld [vmem:[%s5699_s1 + $0x48] sm:$0xff]  ;;  %v4652_v19 = vld [vmem:[%s4637_s17 + $0xa0] sm:$0xff]  ;;  %v4671_v24 = vld [vmem:[%s5699_s1 + $0x90] sm:$0xff] }
  0x12   : > { %4489 = vmatpush.bf16.msra.mxu2 %v4599_v7  ;;  %v4341_v20 = vld [vmem:[%s5699_s1 + $0x8] sm:$0xff]  ;;  %v4658_v21 = vld [vmem:[%s4637_s17 + $0xc0] sm:$0xff]  ;;  %v4665_v23 = vpack.c.bf16 %v4652_v19, %v4646_v17  ;;  %v4371_v35 = vld [vmem:[%s5699_s1 + $0xf8] sm:$0xff] }
  0x13   : > { %v4661_v22 = vld [vmem:[%s4637_s17 + $0xe0] sm:$0xff]  ;;  %v317_v29 = vld [vmem:[%s4637_s17 + $0x8] sm:$0xff]  ;;  %v4370_v43 = vld [vmem:[%s5699_s1 + $0xf0] sm:$0xff] }
  0x14   : > { %405 = vmatpush.bf16.msra.mxu0 %v4353_v5  ;;  %v4675_v25 = vpack.c.bf16 %v4661_v22, %v4658_v21  ;;  %v577_v26 = vshll.u32 %v4665_v23, 16  ;;  %v4348_v27 = vld [vmem:[%s5699_s1 + $0x40] sm:$0xff]  ;;  %v318_v30 = vld [vmem:[%s4637_s17 + $0x28] sm:$0xff]  ;;  %v581_v38 = vshrl.u32 %v4665_v23, 16  ;;  %v4367_v59 = vld [vmem:[%s5699_s1 + $0xd8] sm:$0xff] }
  0x15   : > { %497 = vmatpush.bf16.msra.mxu1 %v4345_v6  ;;  %4482 = vmatpush.bf16.msra.mxu3 %v4345_v6  ;;  %v4340_v28 = vld [vmem:[%s5699_s1] sm:$0xff]  ;;  %v4357_v36 = vld [vmem:[%s5699_s1 + $0x88] sm:$0xff]  ;;  %v331_v40 = vpack.c.bf16 %v318_v30, %v317_v29  ;;  %v4366_v1 = vld [vmem:[%s5699_s1 + $0xd0] sm:$0xff] }
  0x16   : > { %4490 = vmatpush.bf16.msra.mxu2 %v4611_v10  ;;  %v280_v31 = vld [vmem:[%s4637_s17] sm:$0xff]  ;;  %v4701_v37 = vrot.slane %v577_v26, 1  ;;  %v585_v39 = vshll.u32 %v4675_v25, 16  ;;  %v4369_v47 = vld [vmem:[%s5699_s1 + $0xe8] sm:$0xff]  ;;  %v589_v60 = vshrl.u32 %v4675_v25, 16  ;;  %v732_v29 = vld [vmem:[%s4637_s17 + $0x70] sm:$0xff] }
  0x17   : > { %v4688_v32 = vld [vmem:[%s4637_s17 + $0x20] sm:$0xff]  ;;  %v4738_v53 = vld [vmem:[%s4637_s17 + $0x48] sm:$0xff] }
  0x18   : > { %406 = vmatpush.bf16.msra.mxu0 %v4352_v8  ;;  %v4691_v33 = vld [vmem:[%s4637_s17 + $0x140] sm:$0xff]  ;;  %v294_v41 = vpack.c.bf16 %v4688_v32, %v280_v31  ;;  %v583_v45 = vor.u32 %v581_v38, %v4701_v37  ;;  %v587_v46 = vrot.slane %v585_v39, 1  ;;  %v4741_v54 = vld [vmem:[%s4637_s17 + $0x68] sm:$0xff] }
  0x19   : > { %498 = vmatpush.bf16.msra.mxu1 %v4344_v9  ;;  %4483 = vmatpush.bf16.msra.mxu3 %v4344_v9  ;;  %v291_v34 = vld [vmem:[%s4637_s17 + $0x160] sm:$0xff]  ;;  %v332_v62 = vpack.c.bf16 %v4741_v54, %v4738_v53  ;;  %v4783_v8 = vld [vmem:[%s4637_s17 + $0xa8] sm:$0xff]  ;;  %v729_v9 = vld [vmem:[%s4637_s17 + $0x10] sm:$0xff] }
  0x1a   : > { %4491 = vmatpush.bf16.msra.mxu2 %v4625_v13  ;;  %v4707_v42 = vpack.c.bf16 %v291_v34, %v4691_v33  ;;  %v4356_v44 = vld [vmem:[%s5699_s1 + $0x80] sm:$0xff]  ;;  %v588_v48 = vsel %vm560_vm0, %v583_v45, %v587_v46  ;;  %v591_v2 = vor.u32 %v589_v60, %v587_v46  ;;  %v4799_v26 = vld [vmem:[%s4637_s17 + $0xc8] sm:$0xff]  ;;  %v4395_v45 = vld [vmem:[%s5699_s1 + $0x1b8] sm:$0xff] }
  0x1b   : > { %v4724_v49 = vld [vmem:[%s4637_s17 + $0x100] sm:$0xff]  ;;  %v4815_v39 = vld [vmem:[%s4637_s17 + $0x108] sm:$0xff] }
  0x1c   : > { %407 = vmatpush.bf16.msra.mxu0 %v4351_v11  ;;  %v4727_v50 = vld [vmem:[%s4637_s17 + $0x120] sm:$0xff]  ;;  %v605_v30 = vshrl.u32 %v4707_v42, 16 }
  0x1d   : > { %499 = vmatpush.bf16.msra.mxu1 %v4343_v12  ;;  %4484 = vmatpush.bf16.msra.mxu3 %v4343_v12  ;;  %v4368_v51 = vld [vmem:[%s5699_s1 + $0xe0] sm:$0xff]  ;;  %v4735_v52 = vpack.c.bf16 %v4727_v50, %v4724_v49  ;;  %v601_v12 = vshll.u32 %v4707_v42, 16 }
  0x1e   : > { %4492 = vmatpush.bf16.msra.mxu2 %v4643_v16  ;;  %v4744_v55 = vld [vmem:[%s4637_s17 + $0x40] sm:$0xff] }
  0x1f   : > { %v4747_v56 = vld [vmem:[%s4637_s17 + $0x60] sm:$0xff]  ;;  %v593_v61 = vshll.u32 %v4735_v52, 16  ;;  %v597_v11 = vshrl.u32 %v4735_v52, 16 }
  0x20   : > { %408 = vmatpush.bf16.msra.mxu0 %v4350_v14  ;;  %v4750_v57 = vld [vmem:[%s4637_s17 + $0x180] sm:$0xff]  ;;  %v4763_v63 = vpack.c.bf16 %v4747_v56, %v4744_v55 }
  0x21   : > { %500 = vmatpush.bf16.msra.mxu1 %v4342_v15  ;;  %4485 = vmatpush.bf16.msra.mxu3 %v4342_v15  ;;  %v293_v58 = vld [vmem:[%s4637_s17 + $0x1a0] sm:$0x1f]  ;;  %v595_v3 = vrot.slane %v593_v61, 1  ;;  %v4403_v61 = vld [vmem:[%s5699_s1 + $0x1f8] sm:$0xff] }
  0x22   : > { %4493 = vmatpush.bf16.msra.mxu2 %v4671_v24  ;;  %v300_v0 = vpack.c.bf16 %v293_v58, %v4750_v57  ;;  %v4364_v6 = vld [vmem:[%s5699_s1 + $0xc0] sm:$0xff]  ;;  %v736_v58 = vld [vmem:[%s4637_s17 + $0xf0] sm:$0xff] }
  0x23   : > { %v596_v5 = vsel %vm560_vm0, %v591_v2, %v595_v3  ;;  %v599_v15 = vor.u32 %v597_v11, %v595_v3  ;;  %v4402_v2 = vld [vmem:[%s5699_s1 + $0x1f0] sm:$0xff]  ;;  %v4392_v11 = vld [vmem:[%s5699_s1 + $0x1a0] sm:$0xff] }
  0x24   : > { %409 = vmatpush.bf16.msra.mxu0 %v4349_v18  ;;  %v4386_v3 = vld [vmem:[%s5699_s1 + $0x170] sm:$0xff] }
  0x25   : > { %501 = vmatpush.bf16.msra.mxu1 %v4341_v20  ;;  %4486 = vmatpush.bf16.msra.mxu3 %v4341_v20  ;;  %v540_v20 = vld [vmem:[%s4637_s17 + $0x1a0] sm:$0x3f] }
  0x26   : > { %4494 = vmatpush.bf16.msra.mxu2 %v4357_v36 }
  0x28   : > { %410 = vmatpush.bf16.msra.mxu0 %v4348_v27  ;;  %v4802_v27 = vld [vmem:[%s4637_s17 + $0xe8] sm:$0xff] }
  0x29   : > { %502 = vmatpush.bf16.msra.mxu1 %v4340_v28  ;;  %4487 = vmatpush.bf16.msra.mxu3 %v4340_v28  ;;  %v731_v28 = vld [vmem:[%s4637_s17 + $0x50] sm:$0xff]  ;;  %v334_v31 = vpack.c.bf16 %v4802_v27, %v4799_v26 }
  0x2a   : > { %4495 = vmatpush.bf16.msra.mxu2 %v4356_v44  ;;  %v4809_v34 = vpack.c.bf16 %v732_v29, %v731_v28 }
  0x2b   : > { %411 = vmatmul.bf16.vlgmr.msra.gmra.mxu0 %v331_v40  ;;  %v4818_v40 = vld [vmem:[%s4637_s17 + $0x128] sm:$0xff] }
  0x2c   : > { %671 = vmatpush.bf16.msrb.mxu0 %v4587_v4  ;;  %503 = vmatmul.bf16.vlgmr.msra.gmra.mxu1 %v294_v41  ;;  %v4365_v4 = vld [vmem:[%s5699_s1 + $0xc8] sm:$0xff]  ;;  %v733_v41 = vld [vmem:[%s4637_s17 + $0x90] sm:$0xff] }
  0x2d   : > { %815 = vmatpush.bf16.msrb.mxu3 %v4371_v35  ;;  %689 = vmatmul.bf16.vlgmr.msra.gmra.mxu2 %v588_v48  ;;  %v4835_v48 = vld [vmem:[%s4637_s17 + $0x168] sm:$0xff] }
  0x2e   : > { %528 = vmatmul.bf16.vlgmr.msra.gmra.mxu3 %v4707_v42  ;;  %v734_v42 = vld [vmem:[%s4637_s17 + $0xb0] sm:$0xff]  ;;  %1362 = vmatpush.bf16.msrb.mxu2 %v4395_v45 }
  0x30   : > { %672 = vmatpush.bf16.msrb.mxu0 %v4599_v7  ;;  %v4780_v7 = vld [vmem:[%s4637_s17 + $0x88] sm:$0xff] }
  0x31   : > { %816 = vmatpush.bf16.msrb.mxu3 %v4370_v43  ;;  %v335_v43 = vpack.c.bf16 %v4818_v40, %v4815_v39 }
  0x34   : > { %673 = vmatpush.bf16.msrb.mxu0 %v4611_v10  ;;  %v4787_v10 = vld [vmem:[%s4637_s17 + $0x30] sm:$0xff] }
  0x35   : > { %817 = vmatpush.bf16.msrb.mxu3 %v4369_v47  ;;  %v743_v14 = vpack.c.bf16 %v4787_v10, %v729_v9  ;;  %v4832_v47 = vld [vmem:[%s4637_s17 + $0x148] sm:$0xff] }
  0x36   : > { %v4385_v9 = vld [vmem:[%s5699_s1 + $0x168] sm:$0xff] }
  0x38   : > { %674 = vmatpush.bf16.msrb.mxu0 %v4625_v13  ;;  %v333_v13 = vpack.c.bf16 %v4783_v8, %v4780_v7 }
  0x39   : > { %818 = vmatpush.bf16.msrb.mxu3 %v4368_v51  ;;  %v735_v51 = vld [vmem:[%s4637_s17 + $0xd0] sm:$0xff] }
  0x3a   : > { %v4841_v60 = vpack.c.bf16 %v736_v58, %v735_v51  ;;  %v569_v51 = vshll.u32 %v4763_v63, 16  ;;  %v1206_v58 = vld [vmem:[%s4637_s17 + $0x20] sm:$0xf8] }
  0x3b   : > { %416 = vmatmul.bf16.gmra.mxu0 %v332_v62  ;;  %v4387_v62 = vld [vmem:[%s5699_s1 + $0x178] sm:$0xff] }
  0x3c   : > { %675 = vmatpush.bf16.msrb.mxu0 %v4643_v16  ;;  %508 = vmatmul.bf16.gmra.mxu1 %v4763_v63  ;;  %v603_v16 = vrot.slane %v601_v12, 1  ;;  %v539_v12 = vld [vmem:[%s4637_s17] sm:$0xfe] }
  0x3d   : > { %819 = vmatpush.bf16.msrb.mxu3 %v4367_v59  ;;  %694 = vmatmul.bf16.gmra.mxu2 %v596_v5  ;;  %v336_v59 = vpack.c.bf16 %v4835_v48, %v4832_v47  ;;  %v4377_v5 = vld [vmem:[%s5699_s1 + $0x128] sm:$0xff]  ;;  %v541_v28 = vpack.c.bf16 %v4688_v32, %v539_v12  ;;  %v4399_v32 = vld [vmem:[%s5699_s1 + $0x1d8] sm:$0xff]  ;;  %v740_v12 = vld [vmem:[%s4637_s17 + $0x170] sm:$0xff] }
  0x3e   : > { %533 = vmatmul.bf16.gmra.mxu3 %v300_v0  ;;  %v604_v18 = vsel %vm560_vm0, %v599_v15, %v603_v16  ;;  %v607_v35 = vor.u32 %v605_v30, %v603_v16  ;;  %v4394_v0 = vld [vmem:[%s5699_s1 + $0x1b0] sm:$0xff]  ;;  %1148 = vmatpush.bf16.msrb.mxu1 %v4387_v62  ;;  %v4384_v30 = vld [vmem:[%s5699_s1 + $0x160] sm:$0xff]  ;;  %v1221_v62 = vpack.c.bf16 %v4646_v17, %v4747_v56  ;;  %v4381_v17 = vld [vmem:[%s5699_s1 + $0x148] sm:$0xff] }
  0x3f   : > { %1363 = vmatpush.bf16.msrb.mxu2 %v4394_v0  ;;  %v737_v15 = vld [vmem:[%s4637_s17 + $0x110] sm:$0xff]  ;;  %v4397_v0 = vld [vmem:[%s5699_s1 + $0x1c8] sm:$0xff] }
  0x40   : > { %676 = vmatpush.bf16.msrb.mxu0 %v4671_v24  ;;  %v542_v24 = vpack.c.bf16 %v540_v20, %v4750_v57  ;;  %v738_v16 = vld [vmem:[%s4637_s17 + $0x130] sm:$0xff] }
  0x41   : > { %820 = vmatpush.bf16.msrb.mxu3 %v4366_v1  ;;  %v4378_v1 = vld [vmem:[%s5699_s1 + $0x130] sm:$0xff]  ;;  %v4895_v29 = vpack.c.bf16 %v738_v16, %v737_v15 }
  0x42   : > { %1149 = vmatpush.bf16.msrb.mxu1 %v4386_v3  ;;  %v1254_v3 = vshrl.u32 %v1221_v62, 16 }
  0x44   : > { %677 = vmatpush.bf16.msrb.mxu0 %v4357_v36  ;;  %v1256_v15 = vrot.slane %v1254_v3, 1 }
  0x45   : > { %821 = vmatpush.bf16.msrb.mxu3 %v4365_v4  ;;  %v4393_v4 = vld [vmem:[%s5699_s1 + $0x1a8] sm:$0xff] }
  0x46   : > { %1364 = vmatpush.bf16.msrb.mxu2 %v4393_v4  ;;  %1150 = vmatpush.bf16.msrb.mxu1 %v4385_v9  ;;  %v1257_v4 = vshll.u32 %v1221_v62, 16  ;;  %v571_v9 = vrot.slane %v569_v51, 1 }
  0x48   : > { %678 = vmatpush.bf16.msrb.mxu0 %v4356_v44  ;;  %v4824_v44 = vpack.c.bf16 %v734_v42, %v733_v41  ;;  %v4390_v41 = vld [vmem:[%s5699_s1 + $0x190] sm:$0xff]  ;;  %v1259_v16 = vrot.slane %v1257_v4, 2 }
  0x49   : > { %822 = vmatpush.bf16.msrb.mxu3 %v4364_v6  ;;  %v4401_v6 = vld [vmem:[%s5699_s1 + $0x1e8] sm:$0xff]  ;;  %v4374_v42 = vld [vmem:[%s5699_s1 + $0x110] sm:$0xff] }
  0x4a   : > { %1365 = vmatpush.bf16.msrb.mxu2 %v4392_v11  ;;  %1151 = vmatpush.bf16.msrb.mxu1 %v4384_v30  ;;  %v739_v11 = vld [vmem:[%s4637_s17 + $0x150] sm:$0xff]  ;;  %v1260_v30 = vor.u32 %v1259_v16, %v1256_v15 }
  0x4b   : > { %421 = vmatmul.bf16.gmra.mxu0 %v333_v13  ;;  %v4882_v13 = vld [vmem:[%s4637_s17 + $0x188] sm:$0xff] }
  0x4c   : > { %513 = vmatmul.bf16.gmra.mxu1 %v4665_v23  ;;  %v609_v23 = vshll.u32 %v542_v24, 16 }
  0x4d   : > { %699 = vmatmul.bf16.gmra.mxu2 %v604_v18  ;;  %1575 = vmatpush.bf16.msra.mxu3 %v4403_v61  ;;  %v4376_v18 = vld [vmem:[%s5699_s1 + $0x120] sm:$0xff]  ;;  %v1220_v61 = vpack.c.bf16 %v4744_v55, %v1206_v58 }
  0x4e   : > { %823 = vmatmul.bf16.vlgmr.msrb.gmra.mxu3 %v743_v14  ;;  %v611_v36 = vrot.slane %v609_v23, 1  ;;  %v330_v14 = vld [vmem:[%s4637_s17 + $0x1a8] sm:$0x1f]  ;;  %v4391_v23 = vld [vmem:[%s5699_s1 + $0x198] sm:$0xff]  ;;  %v4388_v55 = vld [vmem:[%s5699_s1 + $0x180] sm:$0xff] }
  0x4f   : > { %v337_v20 = vpack.c.bf16 %v330_v14, %v4882_v13  ;;  %1366 = vmatpush.bf16.msrb.mxu2 %v4391_v23 }
  0x50   : > { %v612_v38 = vsel %vm560_vm0, %v607_v35, %v611_v36  ;;  %v564_v35 = vshll.u32 %v541_v28, 16 }
  0x51   : > { %1576 = vmatpush.bf16.msra.mxu3 %v4402_v2  ;;  %v1249_v2 = vshll.u32 %v1220_v61, 16 }
  0x52   : > { %v566_v45 = vrot.slane %v564_v35, 1  ;;  %v4380_v35 = vld [vmem:[%s5699_s1 + $0x140] sm:$0xff] }
  0x53   : > { %1367 = vmatpush.bf16.msrb.mxu2 %v4390_v41  ;;  %v1251_v14 = vrot.slane %v1249_v2, 2 }
  0x55   : > { %1577 = vmatpush.bf16.msra.mxu3 %v4401_v6 }
  0x5b   : > { %426 = vmatmul.bf16.gmra.mxu0 %v334_v31  ;;  %v4375_v31 = vld [vmem:[%s5699_s1 + $0x118] sm:$0xff] }
  0x5c   : > { %518 = vmatmul.bf16.gmra.mxu1 %v4675_v25  ;;  %v613_v25 = vshrl.u32 %v542_v24, 16  ;;  %v4400_v24 = vld [vmem:[%s5699_s1 + $0x1e0] sm:$0xff] }
  0x5d   : > { %704 = vmatmul.bf16.gmra.mxu2 %v612_v38  ;;  %1578 = vmatpush.bf16.msra.mxu3 %v4400_v24  ;;  %v4383_v38 = vld [vmem:[%s5699_s1 + $0x158] sm:$0xff]  ;;  %v4396_v24 = vld [vmem:[%s5699_s1 + $0x1c0] sm:$0xff] }
  0x5e   : > { %828 = vmatmul.bf16.gmra.mxu3 %v4809_v34  ;;  %v615_v46 = vor.u32 %v613_v25, %v611_v36  ;;  %v1017_v36 = vld [vmem:[%s4637_s17 + $0x10] sm:$0xfe]  ;;  %1152 = vmatpush.bf16.msrb.mxu1 %v4383_v38  ;;  %v562_v25 = vshrl.u32 %v541_v28, 16  ;;  %v1046_v38 = vshll.u32 %v4809_v34, 16 }
  0x60   : > { %v567_v6 = vor.u32 %v566_v45, %v562_v25  ;;  %v573_v45 = vshrl.u32 %v4763_v63, 16 }
  0x61   : > { %1579 = vmatpush.bf16.msra.mxu3 %v4399_v32 }
  0x62   : > { %v572_v23 = vsel %vm560_vm0, %v567_v6, %v571_v9 }
  0x6b   : > { %431 = vmatmul.bf16.gmra.mxu0 %v335_v43  ;;  %v4398_v43 = vld [vmem:[%s5699_s1 + $0x1d0] sm:$0xff] }
  0x6c   : > { %523 = vmatmul.bf16.gmra.mxu1 %v4735_v52  ;;  %v4379_v52 = vld [vmem:[%s5699_s1 + $0x138] sm:$0xff]  ;;  %1580 = vmatpush.bf16.msra.mxu3 %v4398_v43 }
  0x6d   : > { %709 = vmatmul.bf16.gmra.mxu2 %v615_v46  ;;  %959 = vmatpush.bf16.msra.mxu0 %v4379_v52  ;;  %v1019_v46 = vpack.c.bf16 %v4787_v10, %v1017_v36  ;;  %v4389_v52 = vld [vmem:[%s5699_s1 + $0x188] sm:$0xff]  ;;  %v4411_v43 = vld [vmem:[%s5699_s1 + $0x238] sm:$0xff] }
  0x6e   : > { %833 = vmatmul.bf16.gmra.mxu3 %v4824_v44  ;;  %v4373_v10 = vld [vmem:[%s5699_s1 + $0x108] sm:$0xff]  ;;  %1368 = vmatpush.bf16.msrb.mxu2 %v4389_v52  ;;  %v4972_v52 = vld [vmem:[%s4637_s17 + $0x190] sm:$0xff] }
  0x70   : > { %1581 = vmatpush.bf16.msra.mxu3 %v4397_v0 }
  0x71   : > { %960 = vmatpush.bf16.msra.mxu0 %v4378_v1  ;;  %v1246_v1 = vshrl.u32 %v1220_v61, 16  ;;  %v1420_v61 = vld [vmem:[%s4637_s17 + $0x28] sm:$0xf8] }
  0x72   : > { %1369 = vmatpush.bf16.msrb.mxu2 %v4388_v55 }
  0x73   : > { %v1248_v56 = vrot.slane %v1246_v1, 1 }
  0x74   : > { %1582 = vmatpush.bf16.msra.mxu3 %v4396_v24 }
  0x75   : > { %961 = vmatpush.bf16.msra.mxu0 %v4377_v5  ;;  %v1041_v5 = vshll.u32 %v1019_v46, 16  ;;  %v1252_v28 = vor.u32 %v1251_v14, %v1248_v56 }
  0x77   : > { %v1261_v32 = vsel %vm1244_vm1, %v1252_v28, %v1260_v30  ;;  %v1043_v36 = vrot.slane %v1041_v5, 1  ;;  %v1434_v5 = vpack.c.bf16 %v4738_v53, %v1420_v61  ;;  %v1223_v28 = vpack.c.bf16 %v4724_v49, %v4661_v22 }
  0x78   : > { %v1436_v22 = vpack.c.bf16 %v4799_v26, %v4783_v8 }
  0x79   : > { %962 = vmatpush.bf16.msra.mxu0 %v4376_v18  ;;  %v1039_v18 = vshrl.u32 %v1019_v46, 16  ;;  %v1222_v46 = vpack.c.bf16 %v4658_v21, %v4652_v19  ;;  %v1435_v21 = vpack.c.bf16 %v4780_v7, %v4741_v54  ;;  %v1459_v53 = vshrl.u32 %v1434_v5, 16 }
  0x7a   : > { %v1462_v55 = vshll.u32 %v1434_v5, 16 }
  0x7b   : > { %436 = vmatmul.bf16.gmra.mxu0 %v336_v59  ;;  %v4382_v59 = vld [vmem:[%s5699_s1 + $0x150] sm:$0xff]  ;;  %v1044_v41 = vor.u32 %v1043_v36, %v1039_v18  ;;  %v1263_v51 = vshrl.u32 %v1222_v46, 16  ;;  %v1266_v58 = vshll.u32 %v1222_v46, 16  ;;  %v1467_v54 = vshrl.u32 %v1435_v21, 16  ;;  %v4409_v46 = vld [vmem:[%s5699_s1 + $0x228] sm:$0xff] }
  0x7c   : > { %1153 = vmatpush.bf16.msrb.mxu1 %v4382_v59  ;;  %v575_v59 = vor.u32 %v573_v45, %v571_v9  ;;  %v4410_v9 = vld [vmem:[%s5699_s1 + $0x230] sm:$0xff]  ;;  %v1470_v7 = vshll.u32 %v1435_v21, 16  ;;  %v1461_v16 = vrot.slane %v1459_v53, 1  ;;  %v1464_v18 = vrot.slane %v1462_v55, 2  ;;  %v875_v53 = vld [vmem:[%s4637_s17 + $0x58] sm:$0xff] }
  0x7d   : > { %963 = vmatpush.bf16.msra.mxu0 %v4375_v31  ;;  %v4956_v31 = vpack.c.bf16 %v740_v12, %v739_v11  ;;  %1370 = vmatmul.bf16.vlgmr.msrb.gmra.mxu2 %v1261_v32  ;;  %v1265_v62 = vrot.slane %v1263_v51, 1  ;;  %v1268_v0 = vrot.slane %v1266_v58, 2  ;;  %v1050_v11 = vshrl.u32 %v4809_v34, 16  ;;  %v873_v32 = vld [vmem:[%s4637_s17 + $0x18] sm:$0xff] }
  0x7e   : > { %838 = vmatmul.bf16.gmra.mxu3 %v4841_v60  ;;  %v580_v4 = vsel %vm560_vm0, %v575_v59, %v4701_v37  ;;  %v1054_v12 = vshll.u32 %v4824_v44, 16  ;;  %v1472_v24 = vrot.slane %v1470_v7, 2  ;;  %v1465_v36 = vor.u32 %v1464_v18, %v1461_v16 }
  0x7f   : > { %v1269_v1 = vor.u32 %v1268_v0, %v1265_v62  ;;  %v1058_v62 = vshrl.u32 %v4824_v44, 16  ;;  %v1062_v0 = vshll.u32 %v4841_v60, 16 }
  0x80   : > { %1154 = vmatpush.bf16.msrb.mxu1 %v4381_v17  ;;  %v1056_v17 = vrot.slane %v1054_v12, 1 }
  0x81   : > { %964 = vmatpush.bf16.msra.mxu0 %v4374_v42  ;;  %v1048_v42 = vrot.slane %v1046_v38, 1  ;;  %v1270_v6 = vsel %vm1244_vm1, %v1260_v30, %v1269_v1  ;;  %v1272_v30 = vshrl.u32 %v1223_v28, 16  ;;  %v1064_v8 = vrot.slane %v1062_v0, 1  ;;  %v878_v0 = vld [vmem:[%s4637_s17 + $0xb8] sm:$0xff] }
  0x83   : > { %v1049_v25 = vsel %vm560_vm0, %v1044_v41, %v1048_v42  ;;  %v1052_v37 = vor.u32 %v1050_v11, %v1048_v42  ;;  %v1274_v41 = vrot.slane %v1272_v30, 1  ;;  %v4408_v11 = vld [vmem:[%s5699_s1 + $0x220] sm:$0xff] }
  0x84   : > { %1155 = vmatpush.bf16.msrb.mxu1 %v4380_v35  ;;  %v874_v35 = vld [vmem:[%s4637_s17 + $0x38] sm:$0xff] }
  0x85   : > { %965 = vmatpush.bf16.msra.mxu0 %v4373_v10  ;;  %v742_v10 = vld [vmem:[%s4637_s17 + $0x1b0] sm:$0x1f]  ;;  %v1057_v56 = vsel %vm560_vm0, %v1052_v37, %v1056_v17 }
  0x86   : > { %v749_v63 = vpack.c.bf16 %v742_v10, %v4972_v52 }
  0x87   : > { %1156 = vmatmul.bf16.vlgmr.msrb.gmra.mxu1 %v1049_v25  ;;  %v887_v25 = vpack.c.bf16 %v874_v35, %v873_v32  ;;  %v1070_v32 = vshll.u32 %v4895_v29, 16 }
  0x8b   : > { %441 = vmatmul.bf16.gmra.mxu0 %v337_v20  ;;  %v4372_v20 = vld [vmem:[%s5699_s1 + $0x100] sm:$0xff] }
  0x8c   : > { %966 = vmatpush.bf16.msra.mxu0 %v4372_v20  ;;  %v1469_v20 = vrot.slane %v1467_v54, 1 }
  0x8d   : > { %1375 = vmatmul.bf16.gmra.mxu2 %v1270_v6 }
  0x8e   : > { %843 = vmatmul.bf16.gmra.mxu3 %v4895_v29  ;;  %v1473_v38 = vor.u32 %v1472_v24, %v1469_v20 }
  0x90   : > { %v1474_v10 = vsel %vm1244_vm1, %v1465_v36, %v1473_v38 }
  0x97   : > { %1161 = vmatmul.bf16.gmra.mxu1 %v1057_v56 }
  0x9b   : > { %679 = vmatmul.bf16.vlgmr.msrb.gmra.mxu0 %v572_v23  ;;  %v1275_v23 = vshll.u32 %v1223_v28, 16  ;;  %v1437_v28 = vpack.c.bf16 %v4815_v39, %v4802_v27 }
  0x9c   : > { %1752 = vmatpush.bf16.msrb.mxu0 %v4411_v43 }
  0x9d   : > { %v1277_v42 = vrot.slane %v1275_v23, 2  ;;  %v1066_v23 = vshrl.u32 %v4841_v60, 16 }
  0x9e   : > { %848 = vmatmul.bf16.gmra.mxu3 %v4956_v31 }
  0x9f   : > { %v1278_v51 = vor.u32 %v1277_v42, %v1274_v41  ;;  %v1068_v41 = vor.u32 %v1066_v23, %v1064_v8  ;;  %v1485_v42 = vshrl.u32 %v1437_v28, 16  ;;  %v1219_v23 = vld [vmem:[%s4637_s17 + $0x1c0] sm:$0xff] }
  0xa0   : > { %1753 = vmatpush.bf16.msrb.mxu0 %v4410_v9  ;;  %v1224_v9 = vpack.c.bf16 %v4691_v33, %v4727_v50 }
  0xa1   : > { %v1279_v61 = vsel %vm1244_vm1, %v1269_v1, %v1278_v51 }
  0xa2   : > { %1380 = vmatmul.bf16.gmra.mxu2 %v1279_v61  ;;  %v1281_v12 = vshrl.u32 %v1224_v9, 16  ;;  %v1284_v37 = vshll.u32 %v1224_v9, 16 }
  0xa4   : > { %1754 = vmatpush.bf16.msrb.mxu0 %v4409_v46  ;;  %v1283_v54 = vrot.slane %v1281_v12, 1  ;;  %v1286_v7 = vrot.slane %v1284_v37, 2 }
  0xa6   : > { %v1287_v18 = vor.u32 %v1286_v7, %v1283_v54  ;;  %v1078_v54 = vshll.u32 %v4956_v31, 16 }
  0xa8   : > { %v412_v2 = vpop.f32.mrf.mxu0  ;;  %1755 = vmatpush.bf16.msrb.mxu0 %v4408_v11  ;;  %v1288_v30 = vsel %vm1244_vm1, %v1278_v51, %v1287_v18  ;;  %v1487_v51 = vrot.slane %v1485_v42, 1  ;;  %v1438_v11 = vpack.c.bf16 %v4832_v47, %v4818_v40  ;;  %v1080_v47 = vrot.slane %v1078_v54, 1 }
  0xa9   : > { %v504_v3 = vpop.f32.mrf.mxu1 }
  0xaa   : > { %v4980_v19 = vadd.f32 %v504_v3, %v412_v2  ;;  %v1060_v2 = vor.u32 %v1058_v62, %v1056_v17  ;;  %v1476_v3 = vshrl.u32 %v1436_v22, 16  ;;  %v876_v17 = vld [vmem:[%s4637_s17 + $0x78] sm:$0xff]  ;;  %v1497_v40 = vshll.u32 %v1438_v11, 16 }
  0xab   : > { %684 = vmatmul.bf16.gmra.mxu0 %v580_v4  ;;  %v1479_v4 = vshll.u32 %v1436_v22, 16  ;;  %v888_v16 = vpack.c.bf16 %v876_v17, %v875_v53  ;;  %v4407_v22 = vld [vmem:[%s5699_s1 + $0x218] sm:$0xff]  ;;  %v1074_v17 = vshrl.u32 %v4895_v29, 16 }
  0xac   : > { %v1065_v26 = vsel %vm560_vm0, %v1060_v2, %v1064_v8  ;;  %v1478_v44 = vrot.slane %v1476_v3, 1  ;;  %v877_v62 = vld [vmem:[%s4637_s17 + $0x98] sm:$0xff]  ;;  %1756 = vmatpush.bf16.msrb.mxu0 %v4407_v22 }
  0xad   : > { %1166 = vmatmul.bf16.gmra.mxu1 %v1065_v26  ;;  %v1481_v21 = vrot.slane %v1479_v4, 2 }
  0xae   : > { %853 = vmatmul.bf16.gmra.mxu3 %v749_v63 }
  0xaf   : > { %v1482_v55 = vor.u32 %v1481_v21, %v1478_v44  ;;  %v889_v44 = vpack.c.bf16 %v878_v0, %v877_v62 }
  0xb0   : > { %v4993_v34 = vpop.f32.mrf.mxu0  ;;  %v690_v45 = vpop.f32.mrf.mxu2 }
  0xb1   : > { %v4991_v14 = vpop.f32.mrf.mxu3  ;;  %v4995_v15 = vpop.f32.mrf.mxu1  ;;  %v1483_v33 = vsel %vm1244_vm1, %v1473_v38, %v1482_v55  ;;  %v1072_v38 = vrot.slane %v1070_v32, 1  ;;  %v4406_v32 = vld [vmem:[%s5699_s1 + $0x210] sm:$0xff] }
  0xb2   : > { %1385 = vmatmul.bf16.gmra.mxu2 %v1288_v30  ;;  %v1218_v30 = vld [vmem:[%s4637_s17 + $0x1a0] sm:$0xff]  ;;  %1757 = vmatpush.bf16.msrb.mxu0 %v4406_v32 }
  0xb3   : > { %v1073_v27 = vsel %vm560_vm0, %v1068_v41, %v1072_v38  ;;  %v1018_v41 = vld [vmem:[%s4637_s17 + $0x1b0] sm:$0x3f] }
  0xb4   : > { %v1020_v22 = vpack.c.bf16 %v1018_v41, %v4972_v52 }
  0xb8   : > { %v417_v58 = vpop.f32.mrf.mxu0  ;;  %v5021_v6 = vpop.f32.mrf.mxu2 }
  0xb9   : > { %v5001_v43 = vpop.f32.mrf.mxu3  ;;  %v509_v59 = vpop.f32.mrf.mxu1 }
  0xba   : > { %v5008_v49 = vadd.f32 %v509_v59, %v417_v58 }
  0xbb   : > { %967 = vmatmul.bf16.vlgmr.msra.gmra.mxu0 %v887_v25  ;;  %v1488_v25 = vshll.u32 %v1437_v28, 16  ;;  %v1499_v28 = vrot.slane %v1497_v40, 2 }
  0xbd   : > { %1171 = vmatmul.bf16.gmra.mxu1 %v1073_v27  ;;  %v1490_v58 = vrot.slane %v1488_v25, 2  ;;  %v879_v25 = vld [vmem:[%s4637_s17 + $0xd8] sm:$0xff] }
  0xbe   : > { %1583 = vmatmul.bf16.vlgmr.msra.gmra.mxu3 %v1474_v10  ;;  %v880_v27 = vld [vmem:[%s4637_s17 + $0xf8] sm:$0xff] }
  0xbf   : > { %v1491_v2 = vor.u32 %v1490_v58, %v1487_v51 }
  0xc0   : > { %v5017_v5 = vpop.f32.mrf.mxu0  ;;  %v695_v36 = vpop.f32.mrf.mxu2 }
  0xc1   : > { %v5015_v63 = vpop.f32.mrf.mxu3  ;;  %v5019_v1 = vpop.f32.mrf.mxu1  ;;  %v1492_v37 = vsel %vm1244_vm1, %v1482_v55, %v1491_v2 }
  0xc8   : > { %v422_v20 = vpop.f32.mrf.mxu0  ;;  %v5057_v3 = vpop.f32.mrf.mxu2 }
  0xc9   : > { %v5030_v56 = vpop.f32.mrf.mxu3  ;;  %v514_v24 = vpop.f32.mrf.mxu1 }
  0xca   : > { %v515_v50 = vadd.f32 %v514_v24, %v422_v20  ;;  %v1494_v20 = vshrl.u32 %v1438_v11, 16  ;;  %v1082_v11 = vshrl.u32 %v4956_v31, 16 }
  0xcb   : > { %972 = vmatmul.bf16.gmra.mxu0 %v888_v16  ;;  %v1076_v16 = vor.u32 %v1074_v17, %v1072_v38 }
  0xcc   : > { %v5038_v35 = vadd.f32 %v690_v45, %v515_v50  ;;  %v5048_v45 = vld [vmem:[%s4637_s17 + $0x160] sm:$0xff]  ;;  %v1496_v50 = vrot.slane %v1494_v20, 1 }
  0xcd   : > { %v1225_v59 = vpack.c.bf16 %v4750_v57, %v5048_v45  ;;  %v1081_v55 = vsel %vm560_vm0, %v1076_v16, %v1080_v47  ;;  %v4405_v16 = vld [vmem:[%s5699_s1 + $0x208] sm:$0xff] }
  0xce   : > { %1588 = vmatmul.bf16.gmra.mxu3 %v1483_v33  ;;  %1176 = vmatmul.bf16.gmra.mxu1 %v1081_v55  ;;  %v1500_v51 = vor.u32 %v1499_v28, %v1496_v50  ;;  %v881_v55 = vld [vmem:[%s4637_s17 + $0x118] sm:$0xff]  ;;  %v1432_v28 = vld [vmem:[%s4637_s17 + $0x1a8] sm:$0xff] }
  0xcf   : > { %v1290_v10 = vshrl.u32 %v1225_v59, 16  ;;  %v1293_v61 = vshll.u32 %v1225_v59, 16  ;;  %1758 = vmatpush.bf16.msrb.mxu0 %v4405_v16 }
  0xd0   : > { %v5043_v60 = vpop.f32.mrf.mxu0  ;;  %v700_v29 = vpop.f32.mrf.mxu2 }
  0xd1   : > { %v5041_v39 = vpop.f32.mrf.mxu3  ;;  %v5045_v46 = vpop.f32.mrf.mxu1  ;;  %v1292_v4 = vrot.slane %v1290_v10, 1  ;;  %v1295_v8 = vrot.slane %v1293_v61, 2  ;;  %v890_v61 = vpack.c.bf16 %v880_v27, %v879_v25  ;;  %v1090_v25 = vshrl.u32 %v1020_v22, 16 }
  0xd3   : > { %v1296_v21 = vor.u32 %v1295_v8, %v1292_v4  ;;  %v1501_v8 = vsel %vm1244_vm1, %v1491_v2, %v1500_v51 }
  0xd5   : > { %v1297_v53 = vsel %vm1244_vm1, %v1287_v18, %v1296_v21 }
  0xd6   : > { %1390 = vmatmul.bf16.gmra.mxu2 %v1297_v53  ;;  %v1084_v53 = vor.u32 %v1082_v11, %v1080_v47 }
  0xd8   : > { %v427_v9 = vpop.f32.mrf.mxu0 }
  0xd9   : > { %v5059_v26 = vpop.f32.mrf.mxu3  ;;  %v519_v57 = vpop.f32.mrf.mxu1 }
  0xda   : > { %v520_v12 = vadd.f32 %v519_v57, %v427_v9  ;;  %v1439_v9 = vpack.c.bf16 %v4882_v13, %v4835_v48 }
  0xdb   : > { %977 = vmatmul.bf16.gmra.mxu0 %v889_v44 }
  0xdc   : > { %v5067_v7 = vadd.f32 %v695_v36, %v520_v12  ;;  %v5081_v36 = vpack.c.bf16 %v1219_v23, %v1218_v30  ;;  %v5096_v12 = vpop.f32.mrf.mxu2  ;;  %v1503_v2 = vshrl.u32 %v1439_v9, 16  ;;  %v1506_v54 = vshll.u32 %v1439_v9, 16  ;;  %v1433_v30 = vld [vmem:[%s4637_s17 + $0x1c8] sm:$0xff]  ;;  %v884_v9 = vld [vmem:[%s4637_s17 + $0x178] sm:$0xff] }
  0xde   : > { %1593 = vmatmul.bf16.gmra.mxu3 %v1492_v37  ;;  %v1299_v38 = vshrl.u32 %v5081_v36, 16  ;;  %v1302_v42 = vshll.u32 %v5081_v36, 16  ;;  %v1086_v37 = vshll.u32 %v1020_v22, 16  ;;  %v1505_v20 = vrot.slane %v1503_v2, 1 }
  0xdf   : > { %v1508_v40 = vrot.slane %v1506_v54, 2 }
  0xe0   : > { %v5072_v24 = vpop.f32.mrf.mxu0  ;;  %v1301_v58 = vrot.slane %v1299_v38, 1  ;;  %v1304_v59 = vrot.slane %v1302_v42, 2  ;;  %v1088_v17 = vrot.slane %v1086_v37, 1  ;;  %v1440_v42 = vpack.c.bf16 %v1433_v30, %v1432_v28  ;;  %v1634_v28 = vld [vmem:[%s4637_s17 + $0x40] sm:$0xff] }
  0xe1   : > { %v5070_v18 = vpop.f32.mrf.mxu3  ;;  %v5074_v33 = vpop.f32.mrf.mxu1  ;;  %v1509_v50 = vor.u32 %v1508_v40, %v1505_v20  ;;  %v885_v20 = vld [vmem:[%s4637_s17 + $0x198] sm:$0xff]  ;;  %v1635_v30 = vld [vmem:[%s4637_s17 + $0x60] sm:$0xff] }
  0xe2   : > { %v1305_v62 = vor.u32 %v1304_v59, %v1301_v58  ;;  %v1089_v48 = vsel %vm560_vm0, %v1084_v53, %v1088_v17  ;;  %v1092_v58 = vor.u32 %v1090_v25, %v1088_v17  ;;  %v4404_v59 = vld [vmem:[%s5699_s1 + $0x200] sm:$0xff]  ;;  %v886_v40 = vld [vmem:[%s4637_s17 + $0x1b8] sm:$0x1f] }
  0xe3   : > { %1181 = vmatmul.bf16.gmra.mxu1 %v1089_v48  ;;  %v1510_v38 = vsel %vm1244_vm1, %v1500_v51, %v1509_v50  ;;  %1759 = vmatpush.bf16.msrb.mxu0 %v4404_v59 }
  0xe4   : > { %v1306_v57 = vsel %vm1244_vm1, %v1296_v21, %v1305_v62  ;;  %v705_v47 = vpop.f32.mrf.mxu2 }
  0xe6   : > { %1395 = vmatmul.bf16.gmra.mxu2 %v1306_v57 }
  0xe8   : > { %v432_v0 = vpop.f32.mrf.mxu0 }
  0xe9   : > { %v5089_v10 = vpop.f32.mrf.mxu3  ;;  %v524_v4 = vpop.f32.mrf.mxu1 }
  0xea   : > { %v525_v44 = vadd.f32 %v524_v4, %v432_v0  ;;  %v1515_v0 = vshll.u32 %v1440_v42, 16 }
  0xeb   : > { %982 = vmatmul.bf16.gmra.mxu0 %v890_v61  ;;  %v1512_v61 = vshrl.u32 %v1440_v42, 16 }
  0xec   : > { %v723_v52 = vadd.f32 %v700_v29, %v525_v44  ;;  %v882_v29 = vld [vmem:[%s4637_s17 + $0x138] sm:$0xff]  ;;  %v5118_v4 = vpop.f32.mrf.mxu2 }
  0xed   : > { %v891_v32 = vpack.c.bf16 %v882_v29, %v881_v55  ;;  %v883_v44 = vld [vmem:[%s4637_s17 + $0x158] sm:$0xff]  ;;  %v893_v55 = vpack.c.bf16 %v886_v40, %v885_v20  ;;  %v1640_v20 = vld [vmem:[%s4637_s17 + $0x100] sm:$0xff] }
  0xee   : > { %1598 = vmatmul.bf16.gmra.mxu3 %v1501_v8  ;;  %v1514_v8 = vrot.slane %v1512_v61, 1  ;;  %v892_v37 = vpack.c.bf16 %v884_v9, %v883_v44 }
  0xf0   : > { %v5102_v21 = vpop.f32.mrf.mxu0 }
  0xf1   : > { %v834_v13 = vpop.f32.mrf.mxu3 }
  0xf2   : > { %v5100_v31 = vadd.f32 %v834_v13, %v5038_v35 }
  0xf3   : > { %1186 = vmatmul.bf16.gmra.mxu1 %v1092_v58 }
  0xf4   : > { %v710_v17 = vpop.f32.mrf.mxu2 }
  0xf6   : > { %1400 = vmatmul.bf16.gmra.mxu2 %v1305_v62  ;;  %v1517_v62 = vrot.slane %v1515_v0, 2 }
  0xf8   : > { %v437_v35 = vpop.f32.mrf.mxu0  ;;  %v1518_v57 = vor.u32 %v1517_v62, %v1514_v8 }
  0xf9   : > { %v5111_v23 = vpop.f32.mrf.mxu3  ;;  %v530_v41 = vadd.f32 %v4991_v14, %v437_v35 }
  0xfb   : > { %v725_v27 = vadd.f32 %v705_v47, %v530_v41  ;;  %987 = vmatmul.bf16.gmra.mxu0 %v891_v32  ;;  %v1636_v32 = vld [vmem:[%s4637_s17 + $0x80] sm:$0xff] }
  0xfc   : > { %v1649_v25 = vpack.c.bf16 %v1636_v32, %v1635_v30  ;;  %v5183_v32 = vld [vmem:[%s5701_s3 + $0xf8] sm:$0xff] }
  0xfd   : > { %2337 = vmatpush.bf16.msra.mxu0 %v5183_v32 }
  0xfe   : > { %1603 = vmatmul.bf16.gmra.mxu3 %v1510_v38 }
 0x100   : > { %v5123_v22 = vpop.f32.mrf.mxu0 }
 0x101   : > { %v839_v14 = vpop.f32.mrf.mxu3 }
 0x102   : > { %v5121_v51 = vadd.f32 %v839_v14, %v5067_v7  ;;  %v1519_v7 = vsel %vm1244_vm1, %v1509_v50, %v1518_v57  ;;  %v1633_v50 = vld [vmem:[%s4637_s17 + $0x20] sm:$0xf0] }
 0x103   : > { %v1648_v42 = vpack.c.bf16 %v1634_v28, %v1633_v50 }
 0x105   : > { %v1682_v59 = vrot.slane %v1648_v42, 2 }
 0x108   : > { %v442_v53 = vpop.f32.mrf.mxu0 }
 0x109   : > { %v5127_v11 = vpop.f32.mrf.mxu3  ;;  %v535_v2 = vadd.f32 %v5015_v63, %v442_v53 }
 0x10b   : > { %v727_v54 = vadd.f32 %v710_v17, %v535_v2  ;;  %992 = vmatmul.bf16.gmra.mxu0 %v892_v37 }
 0x10e   : > { %1608 = vmatmul.bf16.gmra.mxu3 %v1519_v7 }
 0x110   : > { %v5133_v16 = vpop.f32.mrf.mxu0 }
 0x111   : > { %v844_v48 = vpop.f32.mrf.mxu3 }
 0x112   : > { %v5131_v13 = vadd.f32 %v844_v48, %v723_v52  ;;  %v507_v52 = vadd.f32 %v4995_v15, %v4993_v34  ;;  %v1637_v34 = vld [vmem:[%s4637_s17 + $0xa0] sm:$0xff] }
 0x113   : > { %v1638_v15 = vld [vmem:[%s4637_s17 + $0xc0] sm:$0xff] }
 0x114   : > { %v1639_v48 = vld [vmem:[%s4637_s17 + $0xe0] sm:$0xff] }
 0x118   : > { %v680_v63 = vpop.f32.mrf.mxu0 }
 0x119   : > { %v5137_v47 = vpop.f32.mrf.mxu3  ;;  %v715_v29 = vadd.f32 %v680_v63, %v4980_v19  ;;  %v1683_v19 = vrot.slane %v1649_v25, 2 }
 0x11b   : > { %997 = vmatmul.bf16.gmra.mxu0 %v893_v55  ;;  %v1684_v14 = vsel %vm1681_vm2, %v1682_v59, %v1683_v19  ;;  %v859_v17 = vadd.f32 %v5041_v39, %v715_v29  ;;  %v4435_v39 = vld [vmem:[%s5701_s3 + $0xb8] sm:$0xff] }
 0x11c   : > { %2196 = vmatpush.bf16.msrb.mxu3 %v4435_v39  ;;  %v4415_v39 = vld [vmem:[%s5701_s3 + $0x18] sm:$0xff] }
 0x11e   : > { %1613 = vmatmul.bf16.gmra.mxu3 %v1518_v57  ;;  %v1650_v57 = vpack.c.bf16 %v1638_v15, %v1637_v34  ;;  %v4417_v15 = vld [vmem:[%s5701_s3 + $0x28] sm:$0xff] }
 0x120   : > { %v682_v38 = vpop.f32.mrf.mxu0  ;;  %v1685_v53 = vrot.slane %v1650_v57, 2 }
 0x121   : > { %v849_v35 = vpop.f32.mrf.mxu3  ;;  %v716_v58 = vadd.f32 %v682_v38, %v507_v52  ;;  %v1641_v52 = vld [vmem:[%s4637_s17 + $0x120] sm:$0xff] }
 0x122   : > { %v5146_v41 = vadd.f32 %v849_v35, %v725_v27  ;;  %v512_v27 = vadd.f32 %v5019_v1, %v5017_v5  ;;  %v1651_v1 = vpack.c.bf16 %v1640_v20, %v1639_v48  ;;  %v1642_v35 = vld [vmem:[%s4637_s17 + $0x140] sm:$0xff] }
 0x123   : > { %v860_v40 = vadd.f32 %v5059_v26, %v716_v58  ;;  %v4427_v26 = vld [vmem:[%s5701_s3 + $0x78] sm:$0xff]  ;;  %v1652_v25 = vpack.c.bf16 %v1642_v35, %v1641_v52  ;;  %v4434_v58 = vld [vmem:[%s5701_s3 + $0xb0] sm:$0xff]  ;;  %v4432_v48 = vld [vmem:[%s5701_s3 + $0xa0] sm:$0xff] }
 0x124   : > { %v1687_v63 = vrot.slane %v1651_v1, 2  ;;  %1977 = vmatpush.bf16.msra.mxu1 %v4427_v26  ;;  %2197 = vmatpush.bf16.msrb.mxu3 %v4434_v58  ;;  %v4431_v26 = vld [vmem:[%s5701_s3 + $0x98] sm:$0xff] }
 0x126   : > { %v1688_v28 = vsel %vm1681_vm2, %v1685_v53, %v1687_v63 }
 0x128   : > { %v685_v0 = vpop.f32.mrf.mxu0 }
 0x129   : > { %v5148_v61 = vpop.f32.mrf.mxu3  ;;  %v717_v8 = vadd.f32 %v685_v0, %v5008_v49  ;;  %v1686_v49 = vsel %vm1681_vm2, %v1683_v19, %v1685_v53  ;;  %v4426_v19 = vld [vmem:[%s5701_s3 + $0x70] sm:$0xff]  ;;  %v1689_v0 = vrot.slane %v1652_v25, 2  ;;  %v5226_v53 = vld [vmem:[%s5701_s3 + $0xe8] sm:$0xff] }
 0x12a   : > { %1978 = vmatpush.bf16.msra.mxu1 %v4426_v19  ;;  %v4414_v25 = vld [vmem:[%s5701_s3 + $0x10] sm:$0xff] }
 0x12b   : > { %1760 = vmatmul.bf16.vlgmr.msrb.gmra.mxu0 %v1684_v14  ;;  %v861_v29 = vadd.f32 %v5070_v18, %v717_v8  ;;  %v4418_v18 = vld [vmem:[%s5701_s3 + $0x30] sm:$0xff] }
 0x12c   : > { %v5204_v8 = vld [vmem:[%s5701_s3 + $0xf0] sm:$0xff] }
 0x12d   : > { %2338 = vmatpush.bf16.msra.mxu0 %v5204_v8 }
 0x130   : > { %v687_v9 = vpop.f32.mrf.mxu0 }
 0x131   : > { %v854_v62 = vpop.f32.mrf.mxu3  ;;  %v718_v37 = vadd.f32 %v687_v9, %v512_v27  ;;  %v1644_v27 = vld [vmem:[%s4637_s17 + $0x180] sm:$0xff]  ;;  %2339 = vmatpush.bf16.msra.mxu0 %v5226_v53 }
 0x132   : > { %v5156_v44 = vadd.f32 %v854_v62, %v727_v54  ;;  %v4419_v54 = vld [vmem:[%s5701_s3 + $0x38] sm:$0xff]  ;;  %v4433_v62 = vld [vmem:[%s5701_s3 + $0xa8] sm:$0xff]  ;;  %v1653_v57 = vpack.c.bf16 %v1644_v27, %v5048_v45  ;;  %v4416_v45 = vld [vmem:[%s5701_s3 + $0x20] sm:$0xff] }
 0x133   : > { %2068 = vmatpush.bf16.msra.mxu2 %v4419_v54  ;;  %v862_v38 = vadd.f32 %v5089_v10, %v718_v37  ;;  %v1690_v10 = vsel %vm1681_vm2, %v1687_v63, %v1689_v0  ;;  %2198 = vmatpush.bf16.msrb.mxu3 %v4433_v62  ;;  %v4422_v62 = vld [vmem:[%s5701_s3 + $0x50] sm:$0xff] }
 0x134   : > { %v1691_v37 = vrot.slane %v1653_v57, 2  ;;  %v5295_v57 = vld [vmem:[%s5701_s3 + $0xd0] sm:$0xff] }
 0x137   : > { %2069 = vmatpush.bf16.msra.mxu2 %v4418_v18  ;;  %2199 = vmatpush.bf16.msrb.mxu3 %v4432_v48  ;;  %v5276_v18 = vld [vmem:[%s5701_s3 + $0xd8] sm:$0xff]  ;;  %v4429_v48 = vld [vmem:[%s5701_s3 + $0x88] sm:$0xff] }
 0x138   : > { %v968_v2 = vpop.f32.mrf.mxu0 }
 0x139   : > { %v5160_v7 = vadd.f32 %v968_v2, %v859_v17  ;;  %v1692_v2 = vsel %vm1681_vm2, %v1689_v0, %v1691_v37  ;;  %v5269_v52 = vpop.f32.mrf.mxu3 }
 0x13b   : > { %1765 = vmatmul.bf16.gmra.mxu0 %v1686_v49  ;;  %2070 = vmatpush.bf16.msra.mxu2 %v4417_v15 }
 0x13c   : > { %2200 = vmatpush.bf16.msrb.mxu3 %v4431_v26  ;;  %v4421_v26 = vld [vmem:[%s5701_s3 + $0x48] sm:$0xff] }
 0x13f   : > { %2071 = vmatpush.bf16.msra.mxu2 %v4416_v45 }
 0x140   : > { %v970_v5 = vpop.f32.mrf.mxu0 }
 0x141   : > { %v5168_v55 = vadd.f32 %v970_v5, %v860_v40  ;;  %v4424_v40 = vld [vmem:[%s5701_s3 + $0x60] sm:$0xff]  ;;  %v1693_v5 = vrot.slane %v5081_v36, 2  ;;  %v1584_v15 = vpop.f32.mrf.mxu3 }
 0x142   : > { %v1647_v36 = vld [vmem:[%s4637_s17 + $0x1e0] sm:$0x1]  ;;  %s5655_s17 = scalar_lea.vmem %s5705_s7, %s4504_s29 }
 0x143   : > { %v1694_v54 = vsel %vm1681_vm2, %v1691_v37, %v1693_v5  ;;  %2072 = vmatpush.bf16.msra.mxu2 %v4415_v39  ;;  %v1655_v35 = vpack.c.bf16 %v1647_v36, %v1647_v36  ;;  %v4437_v36 = vld [vmem:[%s5701_s3 + $0xc8] sm:$0xff] }
 0x147   : > { %2073 = vmatpush.bf16.msra.mxu2 %v4414_v25  ;;  %v4420_v25 = vld [vmem:[%s5701_s3 + $0x40] sm:$0xff] }
 0x148   : > { %v973_v50 = vpop.f32.mrf.mxu0 }
 0x149   : > { %v5178_v30 = vadd.f32 %v973_v50, %v861_v29  ;;  %v5261_v29 = vpop.f32.mrf.mxu1  ;;  %v4423_v50 = vld [vmem:[%s5701_s3 + $0x58] sm:$0xff] }
 0x14b   : > { %1770 = vmatmul.bf16.gmra.mxu0 %v1688_v28  ;;  %v5267_v28 = vpop.f32.mrf.mxu2 }
 0x150   : > { %v975_v42 = vpop.f32.mrf.mxu0 }
 0x151   : > { %v5195_v59 = vadd.f32 %v975_v42, %v862_v38  ;;  %v1157_v38 = vpop.f32.mrf.mxu1  ;;  %v1695_v42 = vrot.slane %v1655_v35, 2 }
 0x152   : > { %v1192_v39 = vadd.f32 %v1157_v38, %v5160_v7 }
 0x153   : > { %v1371_v58 = vpop.f32.mrf.mxu2  ;;  %v1696_v0 = vsel %vm1681_vm2, %v1693_v5, %v1695_v42 }
 0x158   : > { %v978_v14 = vpop.f32.mrf.mxu0 }
 0x159   : > { %v5207_v34 = vadd.f32 %v978_v14, %v5100_v31  ;;  %v4425_v31 = vld [vmem:[%s5701_s3 + $0x68] sm:$0xff]  ;;  %v4430_v14 = vld [vmem:[%s5701_s3 + $0x90] sm:$0xff]  ;;  %v1159_v27 = vpop.f32.mrf.mxu1 }
 0x15a   : > { %1979 = vmatpush.bf16.msra.mxu1 %v4425_v31  ;;  %2201 = vmatpush.bf16.msrb.mxu3 %v4430_v14  ;;  %v1193_v38 = vadd.f32 %v1159_v27, %v5168_v55 }
 0x15b   : > { %1775 = vmatmul.bf16.gmra.mxu0 %v1690_v10  ;;  %v1373_v31 = vpop.f32.mrf.mxu2 }
 0x15e   : > { %1980 = vmatpush.bf16.msra.mxu1 %v4424_v40  ;;  %2202 = vmatpush.bf16.msrb.mxu3 %v4429_v48 }
 0x160   : > { %v5217_v9 = vpop.f32.mrf.mxu0 }
 0x161   : > { %v1162_v45 = vpop.f32.mrf.mxu1 }
 0x162   : > { %1981 = vmatpush.bf16.msra.mxu1 %v4423_v50 }
 0x166   : > { %1982 = vmatpush.bf16.msra.mxu1 %v4422_v62 }
 0x168   : > { %v983_v17 = vpop.f32.mrf.mxu0 }
 0x169   : > { %v5231_v49 = vadd.f32 %v983_v17, %v5121_v51  ;;  %v5247_v51 = vld [vmem:[%s5701_s3 + $0xe0] sm:$0xff]  ;;  %v1586_v17 = vpop.f32.mrf.mxu3  ;;  %v1164_v50 = vpop.f32.mrf.mxu1 }
 0x16a   : > { %2340 = vmatpush.bf16.msra.mxu0 %v5247_v51  ;;  %1983 = vmatpush.bf16.msra.mxu1 %v4421_v26 }
 0x16b   : > { %1780 = vmatmul.bf16.gmra.mxu0 %v1692_v2  ;;  %v4412_v2 = vld [vmem:[%s5701_s3] sm:$0xff] }
 0x16e   : > { %2341 = vmatpush.bf16.msra.mxu0 %v5276_v18  ;;  %1984 = vmatpush.bf16.msra.mxu1 %v4420_v25 }
 0x170   : > { %v5239_v20 = vpop.f32.mrf.mxu0 }
 0x172   : > { %2342 = vmatpush.bf16.msra.mxu0 %v5295_v57 }
 0x176   : > { %2343 = vmatpush.bf16.msra.mxu0 %v4437_v36 }
 0x178   : > { %v988_v1 = vpop.f32.mrf.mxu0 }
 0x179   : > { %v5256_v63 = vadd.f32 %v988_v1, %v5131_v13  ;;  %v1376_v1 = vpop.f32.mrf.mxu2 }
 0x17b   : > { %1785 = vmatmul.bf16.gmra.mxu0 %v1694_v54  ;;  %v1589_v54 = vpop.f32.mrf.mxu3 }
 0x180   : > { %v5271_v13 = vpop.f32.mrf.mxu0 }
 0x181   : > { %v1378_v42 = vpop.f32.mrf.mxu2 }
 0x183   : > { %v1591_v14 = vpop.f32.mrf.mxu3 }
 0x188   : > { %v993_v19 = vpop.f32.mrf.mxu0 }
 0x189   : > { %v5287_v10 = vadd.f32 %v993_v19, %v5146_v41  ;;  %v4413_v41 = vld [vmem:[%s5701_s3 + $0x8] sm:$0xff]  ;;  %v5328_v19 = vld [vmem:[%s5700_s2] ss:$0 sm:$0xff]  ;;  %v1381_v48 = vpop.f32.mrf.mxu2 }
 0x18a   : > { %2074 = vmatpush.bf16.msra.mxu2 %v4413_v41  ;;  %v1167_v41 = vpop.f32.mrf.mxu1 }
 0x18b   : > { %1790 = vmatmul.bf16.gmra.mxu0 %v1696_v0  ;;  %v4428_v0 = vld [vmem:[%s5701_s3 + $0x80] sm:$0xff]  ;;  %v1594_v25 = vpop.f32.mrf.mxu3 }
 0x18c   : > { %2203 = vmatpush.bf16.msrb.mxu3 %v4428_v0 }
 0x18e   : > { %2075 = vmatpush.bf16.msra.mxu2 %v4412_v2  ;;  %v4436_v2 = vld [vmem:[%s5701_s3 + $0xc0] sm:$0xff] }
 0x18f   : > { %2344 = vmatpush.bf16.msra.mxu0 %v4436_v2 }
 0x190   : > { %v5297_v37 = vpop.f32.mrf.mxu0  ;;  %4496 = vmatpush.bf16.msra.mxu3 %v5183_v32 }
 0x194   : > { %4497 = vmatpush.bf16.msra.mxu3 %v5204_v8  ;;  %v1195_v8 = vadd.f32 %v1164_v50, %v5195_v59  ;;  %v1196_v50 = vadd.f32 %v1167_v41, %v5207_v34 }
 0x198   : > { %v998_v40 = vpop.f32.mrf.mxu0  ;;  %4498 = vmatpush.bf16.msra.mxu3 %v5226_v53  ;;  %v517_v53 = vadd.f32 %v5045_v46, %v5043_v60  ;;  %v1410_v60 = vadd.f32 %v1381_v48, %v1196_v50 }
 0x199   : > { %v5310_v5 = vadd.f32 %v998_v40, %v5156_v44  ;;  %v1406_v44 = vadd.f32 %v1371_v58, %v1192_v39  ;;  %v1194_v39 = vadd.f32 %v1162_v45, %v5178_v30  ;;  %v1383_v30 = vpop.f32.mrf.mxu2 }
 0x19a   : > { %v720_v59 = vadd.f32 %v5021_v6, %v517_v53  ;;  %v1623_v6 = vadd.f32 %v1594_v25, %v1410_v60 }
 0x19b   : > { %v1619_v7 = vadd.f32 %v1584_v15, %v1406_v44  ;;  %v1407_v15 = vadd.f32 %v1373_v31, %v1193_v38  ;;  %v1408_v32 = vadd.f32 %v1376_v1, %v1194_v39  ;;  %v1409_v1 = vadd.f32 %v1378_v42, %v1195_v8 }
 0x19c   : > { %4499 = vmatpush.bf16.msra.mxu3 %v5247_v51 }
 0x19d   : > { %v1620_v40 = vadd.f32 %v1586_v17, %v1407_v15  ;;  %v1621_v0 = vadd.f32 %v1589_v54, %v1408_v32  ;;  %v1596_v15 = vpop.f32.mrf.mxu3  ;;  %v1622_v54 = vadd.f32 %v1591_v14, %v1409_v1 }
 0x1a0   : > { %v5319_v35 = vpop.f32.mrf.mxu0  ;;  %4500 = vmatpush.bf16.msra.mxu3 %v5276_v18  ;;  %v864_v18 = vadd.f32 %v5111_v23, %v720_v59 }
 0x1a1   : > { %v1386_v39 = vpop.f32.mrf.mxu2 }
 0x1a2   : > { %v1008_v46 = vadd.f32 %v5217_v9, %v864_v18  ;;  %v522_v9 = vadd.f32 %v5074_v33, %v5072_v24 }
 0x1a4   : > { %4501 = vmatpush.bf16.msra.mxu3 %v5295_v57 }
 0x1a8   : > { %v1761_v58 = vpop.f32.mrf.mxu0  ;;  %4502 = vmatpush.bf16.msra.mxu3 %v4437_v36 }
 0x1a9   : > { %v1796_v62 = vadd.f32 %v1761_v58, %v1619_v7  ;;  %v1169_v7 = vpop.f32.mrf.mxu1 }
 0x1aa   : > { %v1197_v14 = vadd.f32 %v1169_v7, %v1008_v46 }
 0x1ab   : > { %v1814_v55 = vadd.f32 %v5328_v19, %v1796_v62 }
 0x1ac   : > { %4503 = vmatpush.bf16.msra.mxu3 %v4436_v2  ;;  %v1411_v36 = vadd.f32 %v1383_v30, %v1197_v14  ;;  %v722_v2 = vadd.f32 %v5057_v3, %v522_v9 }
 0x1ad   : > { %v1828_v27 = vmax.f32 %v1814_v55, 0.0 }
 0x1ae   : > { %v866_v24 = vadd.f32 %v5127_v11, %v722_v2 }
 0x1af   : > { %1842 = vst [vmem:[#allocation2] sm:$0xff] %v1828_v27 }
 0x1b0   : > { %v1763_v26 = vpop.f32.mrf.mxu0  ;;  %v1010_v3 = vadd.f32 %v5239_v20, %v866_v24  ;;  %v532_v24 = vadd.f32 %v5001_v43, %v5123_v22 }
 0x1b1   : > { %v1797_v44 = vadd.f32 %v1763_v26, %v1620_v40  ;;  %v1172_v51 = vpop.f32.mrf.mxu1 }
 0x1b2   : > { %v1198_v53 = vadd.f32 %v1172_v51, %v5231_v49 }
 0x1b3   : > { %v1815_v31 = vadd.f32 %v5328_v19, %v1797_v44  ;;  %v1599_v44 = vpop.f32.mrf.mxu3 }
 0x1b5   : > { %v1829_v38 = vmax.f32 %v1815_v31, 0.0 }
 0x1b7   : > { %1843 = vst [vmem:[#allocation2 + $0x8] sm:$0xff] %v1829_v38  ;;  %v1869_v17 = vpack.c.bf16 %v1829_v38, %v1828_v27 }
 0x1b8   : > { %v1766_v45 = vpop.f32.mrf.mxu0 }
 0x1b9   : > { %v1798_v58 = vadd.f32 %v1766_v45, %v1621_v0  ;;  %2076 = vmatmul.bf16.vlgmr.msra.gmra.mxu2 %v1869_v17  ;;  %v1174_v31 = vpop.f32.mrf.mxu1  ;;  %v1388_v0 = vpop.f32.mrf.mxu2 }
 0x1bb   : > { %v1816_v62 = vadd.f32 %v5328_v19, %v1798_v58  ;;  %v1624_v58 = vadd.f32 %v1596_v15, %v1411_v36 }
 0x1bd   : > { %v1830_v55 = vmax.f32 %v1816_v62, 0.0 }
 0x1be   : > { %v1892_v57 = vld [vmem:[#allocation2 + $0x1] sm:$0xff] }
 0x1bf   : > { %1844 = vst [vmem:[#allocation2 + $0x10] sm:$0xff] %v1830_v55 }
 0x1c0   : > { %v1768_v27 = vpop.f32.mrf.mxu0 }
 0x1c1   : > { %v1799_v40 = vadd.f32 %v1768_v27, %v1622_v54  ;;  %v1177_v30 = vpop.f32.mrf.mxu1  ;;  %v1412_v54 = vadd.f32 %v1386_v39, %v1198_v53  ;;  %v1391_v15 = vpop.f32.mrf.mxu2  ;;  %v527_v39 = vadd.f32 %v5261_v29, %v5102_v21 }
 0x1c3   : > { %v1817_v42 = vadd.f32 %v5328_v19, %v1799_v40  ;;  %v1625_v51 = vadd.f32 %v1599_v44, %v1412_v54  ;;  %v1199_v40 = vadd.f32 %v1174_v31, %v1010_v3  ;;  %v724_v44 = vadd.f32 %v5096_v12, %v527_v39 }
 0x1c5   : > { %v1831_v26 = vmax.f32 %v1817_v42, 0.0  ;;  %v1413_v20 = vadd.f32 %v1388_v0, %v1199_v40  ;;  %v868_v29 = vadd.f32 %v5137_v47, %v724_v44  ;;  %v4447_v47 = vld [vmem:[%s5703_s5 + $0x18] sm:$0xff] }
 0x1c6   : > { %v1893_v32 = vld [vmem:[#allocation2 + $0x9] sm:$0xff]  ;;  %2601 = vmatpush.bf16.msrb.mxu2 %v4447_v47 }
 0x1c7   : > { %1845 = vst [vmem:[#allocation2 + $0x18] sm:$0xff] %v1831_v26  ;;  %v1905_v34 = vpack.c.bf16 %v1893_v32, %v1892_v57  ;;  %v1870_v41 = vpack.c.bf16 %v1831_v26, %v1830_v55  ;;  %v2111_v17 = vld [vmem:[#allocation2 + $0xb] sm:$0xff]  ;;  %v1601_v55 = vpop.f32.mrf.mxu3 }
 0x1c8   : > { %v1771_v23 = vpop.f32.mrf.mxu0  ;;  %v2252_v7 = vld [vmem:[#allocation2 + $0xc] sm:$0xff] }
 0x1c9   : > { %v1800_v38 = vadd.f32 %v1771_v23, %v1623_v6  ;;  %1985 = vmatmul.bf16.vlgmr.msra.gmra.mxu1 %v1905_v34  ;;  %2081 = vmatmul.bf16.gmra.mxu2 %v1870_v41  ;;  %v1179_v32 = vpop.f32.mrf.mxu1  ;;  %v1626_v23 = vadd.f32 %v1601_v55, %v1413_v20 }
 0x1cb   : > { %v1818_v48 = vadd.f32 %v5328_v19, %v1800_v38  ;;  %v1200_v38 = vadd.f32 %v1177_v30, %v5256_v63 }
 0x1cd   : > { %v1832_v8 = vmax.f32 %v1818_v48, 0.0  ;;  %v1393_v48 = vpop.f32.mrf.mxu2 }
 0x1ce   : > { %v2112_v25 = vld [vmem:[#allocation2 + $0x13] sm:$0xff] }
 0x1cf   : > { %v2253_v45 = vld [vmem:[#allocation2 + $0x14] sm:$0xff]  ;;  %1846 = vst [vmem:[#allocation2 + $0x20] sm:$0xff] %v1832_v8  ;;  %v2124_v1 = vpack.c.bf16 %v2112_v25, %v2111_v17  ;;  %v1604_v26 = vpop.f32.mrf.mxu3  ;;  %v1012_v17 = vadd.f32 %v5271_v13, %v868_v29 }
 0x1d0   : > { %v2265_v62 = vpack.c.bf16 %v2253_v45, %v2252_v7  ;;  %v1773_v59 = vpop.f32.mrf.mxu0  ;;  %v1894_v18 = vld [vmem:[#allocation2 + $0x11] sm:$0xff] }
 0x1d1   : > { %v1801_v33 = vadd.f32 %v1773_v59, %v1624_v58  ;;  %2204 = vmatmul.bf16.vlgmr.msrb.gmra.mxu3 %v2124_v1  ;;  %v1182_v7 = vpop.f32.mrf.mxu1  ;;  %v1201_v53 = vadd.f32 %v1179_v32, %v1012_v17  ;;  %v4451_v13 = vld [vmem:[%s5703_s5 + $0x38] sm:$0xff] }
 0x1d2   : > { %2345 = vmatmul.bf16.vlgmr.msra.gmra.mxu0 %v2265_v62  ;;  %2528 = vmatpush.bf16.msrb.mxu1 %v4451_v13 }
 0x1d3   : > { %v1819_v50 = vadd.f32 %v5328_v19, %v1801_v33  ;;  %v1415_v30 = vadd.f32 %v1393_v48, %v1201_v53 }
 0x1d5   : > { %v1833_v27 = vmax.f32 %v1819_v50, 0.0  ;;  %v1396_v33 = vpop.f32.mrf.mxu2 }
 0x1d6   : > { %v1895_v49 = vld [vmem:[#allocation2 + $0x19] sm:$0xff] }
 0x1d7   : > { %1847 = vst [vmem:[#allocation2 + $0x28] sm:$0xff] %v1833_v27  ;;  %v1906_v60 = vpack.c.bf16 %v1895_v49, %v1894_v18  ;;  %v1871_v46 = vpack.c.bf16 %v1833_v27, %v1832_v8  ;;  %v2113_v14 = vld [vmem:[#allocation2 + $0x1b] sm:$0xff]  ;;  %v1414_v8 = vadd.f32 %v1391_v15, %v1200_v38  ;;  %v1606_v2 = vpop.f32.mrf.mxu3  ;;  %v726_v27 = vadd.f32 %v5118_v4, %v532_v24 }
 0x1d8   : > { %v1776_v42 = vpop.f32.mrf.mxu0  ;;  %v2254_v41 = vld [vmem:[#allocation2 + $0x1c] sm:$0xff]  ;;  %v1628_v40 = vadd.f32 %v1606_v2, %v1415_v30  ;;  %v537_v38 = vadd.f32 %v5030_v56, %v5133_v16 }
 0x1d9   : > { %v1802_v11 = vadd.f32 %v1776_v42, %v1625_v51  ;;  %1990 = vmatmul.bf16.gmra.mxu1 %v1906_v60  ;;  %2086 = vmatmul.bf16.gmra.mxu2 %v1871_v46  ;;  %v1627_v58 = vadd.f32 %v1604_v26, %v1414_v8  ;;  %v1202_v60 = vadd.f32 %v1182_v7, %v5287_v10  ;;  %v1184_v22 = vpop.f32.mrf.mxu1 }
 0x1db   : > { %v1820_v57 = vadd.f32 %v5328_v19, %v1802_v11  ;;  %v870_v11 = vadd.f32 %v5148_v61, %v726_v27  ;;  %v1416_v26 = vadd.f32 %v1396_v33, %v1202_v60 }
 0x1dd   : > { %v1834_v6 = vmax.f32 %v1820_v57, 0.0  ;;  %v1014_v4 = vadd.f32 %v5297_v37, %v870_v11  ;;  %v1398_v57 = vpop.f32.mrf.mxu2  ;;  %v4446_v37 = vld [vmem:[%s5703_s5 + $0x10] sm:$0xff] }
 0x1de   : > { %v2114_v34 = vld [vmem:[#allocation2 + $0x23] sm:$0xff]  ;;  %2602 = vmatpush.bf16.msrb.mxu2 %v4446_v37 }
 0x1df   : > { %v2255_v31 = vld [vmem:[#allocation2 + $0x24] sm:$0xff]  ;;  %1848 = vst [vmem:[#allocation2 + $0x30] sm:$0xff] %v1834_v6  ;;  %v2125_v9 = vpack.c.bf16 %v2114_v34, %v2113_v14  ;;  %v1609_v15 = vpop.f32.mrf.mxu3  ;;  %v1203_v44 = vadd.f32 %v1184_v22, %v1014_v4 }
 0x1e0   : > { %v2266_v36 = vpack.c.bf16 %v2255_v31, %v2254_v41  ;;  %v1778_v21 = vpop.f32.mrf.mxu0  ;;  %v1896_v45 = vld [vmem:[#allocation2 + $0x21] sm:$0xff]  ;;  %v1629_v10 = vadd.f32 %v1609_v15, %v1416_v26 }
 0x1e1   : > { %v1803_v0 = vadd.f32 %v1778_v21, %v1626_v23  ;;  %2209 = vmatmul.bf16.gmra.mxu3 %v2125_v9  ;;  %v1187_v9 = vpop.f32.mrf.mxu1  ;;  %v4449_v26 = vld [vmem:[%s5703_s5 + $0x28] sm:$0xff] }
 0x1e2   : > { %2350 = vmatmul.bf16.gmra.mxu0 %v2266_v36  ;;  %v1417_v36 = vadd.f32 %v1398_v57, %v1203_v44  ;;  %v1204_v7 = vadd.f32 %v1187_v9, %v5310_v5 }
 0x1e3   : > { %v1821_v12 = vadd.f32 %v5328_v19, %v1803_v0  ;;  %v728_v0 = vadd.f32 %v5267_v28, %v537_v38  ;;  %v4450_v28 = vld [vmem:[%s5703_s5 + $0x30] sm:$0xff] }
 0x1e4   : > { %2529 = vmatpush.bf16.msrb.mxu1 %v4450_v28 }
 0x1e5   : > { %v1835_v25 = vmax.f32 %v1821_v12, 0.0  ;;  %v1401_v8 = vpop.f32.mrf.mxu2  ;;  %v872_v16 = vadd.f32 %v5269_v52, %v728_v0 }
 0x1e6   : > { %v1897_v63 = vld [vmem:[#allocation2 + $0x29] sm:$0xff] }
 0x1e7   : > { %1849 = vst [vmem:[#allocation2 + $0x38] sm:$0xff] %v1835_v25  ;;  %v1907_v1 = vpack.c.bf16 %v1897_v63, %v1896_v45  ;;  %v1872_v62 = vpack.c.bf16 %v1835_v25, %v1834_v6  ;;  %v2115_v50 = vld [vmem:[#allocation2 + $0x2b] sm:$0xff]  ;;  %v1611_v31 = vpop.f32.mrf.mxu3 }
 0x1e8   : > { %v1781_v55 = vpop.f32.mrf.mxu0  ;;  %v2256_v49 = vld [vmem:[#allocation2 + $0x2c] sm:$0xff]  ;;  %v1630_v25 = vadd.f32 %v1611_v31, %v1417_v36  ;;  %2530 = vmatpush.bf16.msrb.mxu1 %v4449_v26 }
 0x1e9   : > { %v1804_v59 = vadd.f32 %v1781_v55, %v1627_v58  ;;  %1995 = vmatmul.bf16.gmra.mxu1 %v1907_v1  ;;  %2091 = vmatmul.bf16.gmra.mxu2 %v1872_v62  ;;  %v1418_v1 = vadd.f32 %v1401_v8, %v1204_v7  ;;  %v1016_v62 = vadd.f32 %v5319_v35, %v872_v16  ;;  %v1189_v5 = vpop.f32.mrf.mxu1  ;;  %v4452_v16 = vld [vmem:[%s5703_s5 + $0x40] sm:$0xff] }
 0x1eb   : > { %v1822_v54 = vadd.f32 %v5328_v19, %v1804_v59  ;;  %v1205_v52 = vadd.f32 %v1189_v5, %v1016_v62  ;;  %v4463_v62 = vld [vmem:[%s5703_s5 + $0x98] sm:$0xff] }
 0x1ed   : > { %v1836_v3 = vmax.f32 %v1822_v54, 0.0  ;;  %v1403_v54 = vpop.f32.mrf.mxu2 }
 0x1ee   : > { %v2116_v18 = vld [vmem:[#allocation2 + $0x33] sm:$0xff]  ;;  %v1419_v27 = vadd.f32 %v1403_v54, %v1205_v52 }
 0x1ef   : > { %v2257_v51 = vld [vmem:[#allocation2 + $0x34] sm:$0xff]  ;;  %1850 = vst [vmem:[#allocation2 + $0x40] sm:$0xff] %v1836_v3  ;;  %v2126_v46 = vpack.c.bf16 %v2116_v18, %v2115_v50  ;;  %v1614_v53 = vpop.f32.mrf.mxu3 }
 0x1f0   : > { %v2267_v43 = vpack.c.bf16 %v2257_v51, %v2256_v49  ;;  %v1783_v42 = vpop.f32.mrf.mxu0  ;;  %v1898_v6 = vld [vmem:[#allocation2 + $0x31] sm:$0xff]  ;;  %v1631_v24 = vadd.f32 %v1614_v53, %v1418_v1  ;;  %v5427_v1 = vld [vmem:[%s5702_s4] ss:$0 sm:$0xff] }
 0x1f1   : > { %v1805_v39 = vadd.f32 %v1783_v42, %v1628_v40  ;;  %2214 = vmatmul.bf16.gmra.mxu3 %v2126_v46 }
 0x1f2   : > { %2355 = vmatmul.bf16.gmra.mxu0 %v2267_v43 }
 0x1f3   : > { %v1823_v20 = vadd.f32 %v5328_v19, %v1805_v39  ;;  %v4445_v39 = vld [vmem:[%s5703_s5 + $0x8] sm:$0xff] }
 0x1f4   : > { %2603 = vmatpush.bf16.msrb.mxu2 %v4445_v39 }
 0x1f5   : > { %v1837_v32 = vmax.f32 %v1823_v20, 0.0 }
 0x1f6   : > { %v1899_v14 = vld [vmem:[#allocation2 + $0x39] sm:$0xff] }
 0x1f7   : > { %1851 = vst [vmem:[#allocation2 + $0x48] sm:$0xff] %v1837_v32  ;;  %v1908_v34 = vpack.c.bf16 %v1899_v14, %v1898_v6  ;;  %v1873_v41 = vpack.c.bf16 %v1837_v32, %v1836_v3  ;;  %v2117_v29 = vld [vmem:[#allocation2 + $0x3b] sm:$0xff]  ;;  %v1616_v15 = vpop.f32.mrf.mxu3 }
 0x1f8   : > { %v1786_v23 = vpop.f32.mrf.mxu0  ;;  %v2258_v12 = vld [vmem:[#allocation2 + $0x3c] sm:$0xff]  ;;  %v1632_v46 = vadd.f32 %v1616_v15, %v1419_v27 }
 0x1f9   : > { %v1806_v61 = vadd.f32 %v1786_v23, %v1629_v10  ;;  %2000 = vmatmul.bf16.gmra.mxu1 %v1908_v34  ;;  %2096 = vmatmul.bf16.gmra.mxu2 %v1873_v41 }
 0x1fb   : > { %v1824_v48 = vadd.f32 %v5328_v19, %v1806_v61 }
 0x1fd   : > { %v1838_v21 = vmax.f32 %v1824_v48, 0.0 }
 0x1fe   : > { %v2118_v17 = vld [vmem:[#allocation2 + $0x43] sm:$0xff] }
 0x1ff   : > { %v2259_v2 = vld [vmem:[#allocation2 + $0x44] sm:$0xff]  ;;  %1852 = vst [vmem:[#allocation2 + $0x50] sm:$0xff] %v1838_v21  ;;  %v2127_v45 = vpack.c.bf16 %v2118_v17, %v2117_v29 }
 0x200   : > { %v2268_v63 = vpack.c.bf16 %v2259_v2, %v2258_v12  ;;  %v1788_v56 = vpop.f32.mrf.mxu0  ;;  %v1900_v55 = vld [vmem:[#allocation2 + $0x41] sm:$0xff]  ;;  %v4455_v12 = vld [vmem:[%s5703_s5 + $0x58] sm:$0xff]  ;;  %v4454_v2 = vld [vmem:[%s5703_s5 + $0x50] sm:$0xff] }
 0x201   : > { %v1807_v58 = vadd.f32 %v1788_v56, %v1630_v25  ;;  %2219 = vmatmul.bf16.gmra.mxu3 %v2127_v45  ;;  %v4448_v29 = vld [vmem:[%s5703_s5 + $0x20] sm:$0xff] }
 0x202   : > { %2360 = vmatmul.bf16.gmra.mxu0 %v2268_v63  ;;  %2531 = vmatpush.bf16.msrb.mxu1 %v4448_v29  ;;  %v4453_v63 = vld [vmem:[%s5703_s5 + $0x48] sm:$0xff] }
 0x203   : > { %v1825_v47 = vadd.f32 %v5328_v19, %v1807_v58  ;;  %2698 = vmatpush.bf16.msrb.mxu3 %v4455_v12 }
 0x205   : > { %v1839_v13 = vmax.f32 %v1825_v47, 0.0 }
 0x206   : > { %v1901_v59 = vld [vmem:[#allocation2 + $0x49] sm:$0xff] }
 0x207   : > { %1853 = vst [vmem:[#allocation2 + $0x58] sm:$0xff] %v1839_v13  ;;  %v1909_v33 = vpack.c.bf16 %v1901_v59, %v1900_v55  ;;  %v1874_v30 = vpack.c.bf16 %v1839_v13, %v1838_v21  ;;  %v2119_v49 = vld [vmem:[#allocation2 + $0x4b] sm:$0xff]  ;;  %v4444_v21 = vld [vmem:[%s5703_s5] sm:$0xff]  ;;  %2699 = vmatpush.bf16.msrb.mxu3 %v4454_v2  ;;  %v4471_v55 = vld [vmem:[%s5703_s5 + $0xd8] sm:$0xff] }
 0x208   : > { %v1791_v3 = vpop.f32.mrf.mxu0  ;;  %v2260_v40 = vld [vmem:[#allocation2 + $0x4c] sm:$0xff]  ;;  %2604 = vmatpush.bf16.msrb.mxu2 %v4444_v21  ;;  %3126 = vmatpush.bf16.msrb.mxu0 %v4471_v55 }
 0x209   : > { %v1808_v50 = vadd.f32 %v1791_v3, %v1631_v24  ;;  %2005 = vmatmul.bf16.gmra.mxu1 %v1909_v33  ;;  %2101 = vmatmul.bf16.gmra.mxu2 %v1874_v30  ;;  %v4470_v33 = vld [vmem:[%s5703_s5 + $0xd0] sm:$0xff] }
 0x20b   : > { %v1826_v35 = vadd.f32 %v5328_v19, %v1808_v50  ;;  %2700 = vmatpush.bf16.msrb.mxu3 %v4453_v63  ;;  %v4459_v50 = vld [vmem:[%s5703_s5 + $0x78] sm:$0xff] }
 0x20c   : > { %2912 = vmatpush.bf16.msra.mxu2 %v4463_v62  ;;  %3127 = vmatpush.bf16.msrb.mxu0 %v4470_v33 }
 0x20d   : > { %v1840_v18 = vmax.f32 %v1826_v35, 0.0  ;;  %2805 = vmatpush.bf16.msra.mxu1 %v4459_v50 }
 0x20e   : > { %v2120_v51 = vld [vmem:[#allocation2 + $0x53] sm:$0xff] }
 0x20f   : > { %v2261_v60 = vld [vmem:[#allocation2 + $0x54] sm:$0xff]  ;;  %1854 = vst [vmem:[#allocation2 + $0x60] sm:$0xff] %v1840_v18  ;;  %v2128_v43 = vpack.c.bf16 %v2120_v51, %v2119_v49  ;;  %2701 = vmatpush.bf16.msrb.mxu3 %v4452_v16  ;;  %v4469_v18 = vld [vmem:[%s5703_s5 + $0xc8] sm:$0xff] }
 0x210   : > { %v2269_v22 = vpack.c.bf16 %v2261_v60, %v2260_v40  ;;  %v1793_v42 = vpop.f32.mrf.mxu0  ;;  %v1902_v57 = vld [vmem:[#allocation2 + $0x51] sm:$0xff]  ;;  %3128 = vmatpush.bf16.msrb.mxu0 %v4469_v18  ;;  %v4468_v60 = vld [vmem:[%s5703_s5 + $0xc0] sm:$0xff] }
 0x211   : > { %v1809_v11 = vadd.f32 %v1793_v42, %v1632_v46  ;;  %2224 = vmatmul.bf16.gmra.mxu3 %v2128_v43 }
 0x212   : > { %2365 = vmatmul.bf16.gmra.mxu0 %v2269_v22 }
 0x213   : > { %v1827_v4 = vadd.f32 %v5328_v19, %v1809_v11 }
 0x214   : > { %3129 = vmatpush.bf16.msrb.mxu0 %v4468_v60 }
 0x215   : > { %v1841_v20 = vmax.f32 %v1827_v4, 0.0 }
 0x216   : > { %v1903_v32 = vld [vmem:[#allocation2 + $0x59] sm:$0xff]  ;;  %v1904_v19 = vld [vmem:[#allocation2 + $0x61] sm:$0x1] }
 0x217   : > { %v1868_v6 = vld [vmem:[#allocation2 + $0x60] sm:$0x1]  ;;  %1855 = vst [vmem:[#allocation2 + $0x68] sm:$0x1f] %v1841_v20  ;;  %v1910_v14 = vpack.c.bf16 %v1903_v32, %v1902_v57  ;;  %v1911_v37 = vpack.c.bf16 %v1904_v19, %v1904_v19 }
 0x218   : > { %v1875_v10 = vpack.c.bf16 %v1868_v6, %v1868_v6  ;;  %v2121_v44 = vld [vmem:[#allocation2 + $0x5b] sm:$0xff] }
 0x219   : > { %2010 = vmatmul.bf16.gmra.mxu1 %v1910_v14  ;;  %v2262_v41 = vld [vmem:[#allocation2 + $0x5c] sm:$0xff] }
 0x21a   : > { %2106 = vmatmul.bf16.gmra.mxu2 %v1875_v10 }
 0x21e   : > { %v2122_v34 = vld [vmem:[#allocation2 + $0x63] sm:$0xff]  ;;  %v2123_v38 = vld [vmem:[#allocation2 + $0x6b] sm:$0x1]  ;;  %v2264_v36 = vld [vmem:[#allocation2 + $0x6c] sm:$0x1] }
 0x21f   : > { %v2263_v31 = vld [vmem:[#allocation2 + $0x64] sm:$0xff]  ;;  %v2129_v23 = vpack.c.bf16 %v2122_v34, %v2121_v44  ;;  %v2130_v9 = vpack.c.bf16 %v2123_v38, %v2123_v38  ;;  %v2271_v0 = vpack.c.bf16 %v2264_v36, %v2264_v36  ;;  %v4462_v34 = vld [vmem:[%s5703_s5 + $0x90] sm:$0xff] }
 0x220   : > { %v2270_v61 = vpack.c.bf16 %v2263_v31, %v2262_v41  ;;  %v4458_v41 = vld [vmem:[%s5703_s5 + $0x70] sm:$0xff]  ;;  %2913 = vmatpush.bf16.msra.mxu2 %v4462_v34 }
 0x221   : > { %2229 = vmatmul.bf16.gmra.mxu3 %v2129_v23  ;;  %2806 = vmatpush.bf16.msra.mxu1 %v4458_v41 }
 0x222   : > { %2370 = vmatmul.bf16.gmra.mxu0 %v2270_v61 }
 0x229   : > { %2015 = vmatmul.bf16.gmra.mxu1 %v1911_v37 }
 0x231   : > { %2234 = vmatmul.bf16.gmra.mxu3 %v2130_v9 }
 0x23c   : > { %v2077_v48 = vpop.f32.mrf.mxu2 }
 0x241   : > { %2375 = vmatmul.bf16.vlgmr.msra.gmra.mxu3 %v2271_v0 }
 0x244   : > { %v2079_v8 = vpop.f32.mrf.mxu2 }
 0x246   : > { %v1986_v17 = vpop.f32.mrf.mxu1 }
 0x247   : > { %v2078_v56 = vadd.f32 %v2077_v48, %v1986_v17 }
 0x24c   : > { %v2082_v25 = vpop.f32.mrf.mxu2 }
 0x24e   : > { %v1988_v7 = vpop.f32.mrf.mxu1 }
 0x24f   : > { %v2346_v45 = vpop.f32.mrf.mxu0  ;;  %v2080_v24 = vadd.f32 %v2079_v8, %v1988_v7 }
 0x254   : > { %v2205_v58 = vpop.f32.mrf.mxu3  ;;  %v2084_v28 = vpop.f32.mrf.mxu2 }
 0x255   : > { %v2239_v53 = vadd.f32 %v2205_v58, %v2078_v56 }
 0x256   : > { %v1991_v47 = vpop.f32.mrf.mxu1 }
 0x257   : > { %v2348_v5 = vpop.f32.mrf.mxu0  ;;  %v2380_v13 = vadd.f32 %v2346_v45, %v2239_v53  ;;  %v2083_v51 = vadd.f32 %v2082_v25, %v1991_v47 }
 0x259   : > { %v2397_v59 = vadd.f32 %v5427_v1, %v2380_v13 }
 0x25b   : > { %v2410_v52 = vmax.f32 %v2397_v59, 0.0 }
 0x25c   : > { %v2207_v30 = vpop.f32.mrf.mxu3  ;;  %v2087_v54 = vpop.f32.mrf.mxu2 }
 0x25d   : > { %2424 = vst.msk [vmem:[#allocation3] sm:$0xff] %vm2423_vm3, %v2410_v52  ;;  %v2240_v3 = vadd.f32 %v2207_v30, %v2080_v24 }
 0x25e   : > { %v1993_v27 = vpop.f32.mrf.mxu1 }
 0x25f   : > { %v2351_v35 = vpop.f32.mrf.mxu0  ;;  %v2381_v15 = vadd.f32 %v2348_v5, %v2240_v3  ;;  %v2085_v4 = vadd.f32 %v2084_v28, %v1993_v27  ;;  %v4461_v5 = vld [vmem:[%s5703_s5 + $0x88] sm:$0xff] }
 0x260   : > { %2914 = vmatpush.bf16.msra.mxu2 %v4461_v5  ;;  %v4466_v5 = vld [vmem:[%s5703_s5 + $0xb0] sm:$0xff] }
 0x261   : > { %v2398_v49 = vadd.f32 %v5427_v1, %v2381_v15 }
 0x263   : > { %v2411_v40 = vmax.f32 %v2398_v49, 0.0 }
 0x264   : > { %v2210_v46 = vpop.f32.mrf.mxu3  ;;  %v2089_v43 = vpop.f32.mrf.mxu2  ;;  %v2438_v32 = vld [vmem:[#allocation3] sm:$0xff] }
 0x265   : > { %2425 = vst.msk [vmem:[#allocation3 + $0x8] sm:$0xff] %vm2423_vm3, %v2411_v40  ;;  %v2241_v22 = vadd.f32 %v2210_v46, %v2083_v51 }
 0x266   : > { %v1996_v42 = vpop.f32.mrf.mxu1 }
 0x267   : > { %v2353_v11 = vpop.f32.mrf.mxu0  ;;  %v2382_v39 = vadd.f32 %v2351_v35, %v2241_v22  ;;  %v2088_v37 = vadd.f32 %v2087_v54, %v1996_v42 }
 0x269   : > { %v2399_v26 = vadd.f32 %v5427_v1, %v2382_v39 }
 0x26b   : > { %v2412_v20 = vmax.f32 %v2399_v26, 0.0 }
 0x26c   : > { %v2212_v57 = vpop.f32.mrf.mxu3  ;;  %v2439_v6 = vld [vmem:[#allocation3 + $0x8] sm:$0xff]  ;;  %v2092_v14 = vpop.f32.mrf.mxu2 }
 0x26d   : > { %2426 = vst.msk [vmem:[#allocation3 + $0x10] sm:$0xff] %vm2423_vm3, %v2412_v20  ;;  %v2242_v10 = vadd.f32 %v2212_v57, %v2085_v4  ;;  %v2448_v44 = vpack.c.bf16 %v2439_v6, %v2438_v32  ;;  %v2461_v9 = vld [vmem:[#allocation3 + $0x1] sm:$0xff] }
 0x26e   : > { %v1998_v31 = vpop.f32.mrf.mxu1  ;;  %v2631_v21 = vld [vmem:[#allocation3 + $0x2] sm:$0xff] }
 0x26f   : > { %v2356_v23 = vpop.f32.mrf.mxu0  ;;  %v2383_v61 = vadd.f32 %v2353_v11, %v2242_v10  ;;  %4129 = vmatmul.msk.bf16.vlgmr.msrb.gmra.mxu2 %vm2423_vm3, %v2448_v44  ;;  %v2090_v63 = vadd.f32 %v2089_v43, %v1998_v31  ;;  %v4457_v43 = vld [vmem:[%s5703_s5 + $0x68] sm:$0xff] }
 0x270   : > { %2807 = vmatpush.bf16.msra.mxu1 %v4457_v43 }
 0x271   : > { %v2400_v19 = vadd.f32 %v5427_v1, %v2383_v61 }
 0x273   : > { %v2413_v38 = vmax.f32 %v2400_v19, 0.0 }
 0x274   : > { %v2215_v36 = vpop.f32.mrf.mxu3  ;;  %v2462_v48 = vld [vmem:[#allocation3 + $0x9] sm:$0xff]  ;;  %v2094_v0 = vpop.f32.mrf.mxu2 }
 0x275   : > { %v2632_v29 = vld [vmem:[#allocation3 + $0xa] sm:$0xff]  ;;  %2427 = vst.msk [vmem:[#allocation3 + $0x18] sm:$0xff] %vm2423_vm3, %v2413_v38  ;;  %v2243_v8 = vadd.f32 %v2215_v36, %v2088_v37  ;;  %v2471_v17 = vpack.c.bf16 %v2462_v48, %v2461_v9 }
 0x276   : > { %v2641_v12 = vpack.c.bf16 %v2632_v29, %v2631_v21  ;;  %v2001_v2 = vpop.f32.mrf.mxu1  ;;  %v2440_v58 = vld [vmem:[#allocation3 + $0x10] sm:$0xff] }
 0x277   : > { %v2358_v25 = vpop.f32.mrf.mxu0  ;;  %v2384_v7 = vadd.f32 %v2356_v23, %v2243_v8  ;;  %4108 = vmatmul.msk.bf16.vlgmr.msrb.gmra.mxu1 %vm2423_vm3, %v2471_v17  ;;  %v2093_v52 = vadd.f32 %v2092_v14, %v2001_v2 }
 0x278   : > { %4158 = vmatmul.msk.bf16.vlgmr.msrb.gmra.mxu3 %vm2423_vm3, %v2641_v12 }
 0x279   : > { %v2401_v45 = vadd.f32 %v5427_v1, %v2384_v7  ;;  %v4456_v7 = vld [vmem:[%s5703_s5 + $0x60] sm:$0xff] }
 0x27a   : > { %2808 = vmatpush.bf16.msra.mxu1 %v4456_v7 }
 0x27b   : > { %v2414_v56 = vmax.f32 %v2401_v45, 0.0 }
 0x27c   : > { %v2217_v16 = vpop.f32.mrf.mxu3  ;;  %v5465_v28 = vld [vmem:[#allocation3 + $0x18] sm:$0xff]  ;;  %v2097_v53 = vpop.f32.mrf.mxu2 }
 0x27d   : > { %2428 = vst.msk [vmem:[#allocation3 + $0x20] sm:$0xff] %vm2423_vm3, %v2414_v56  ;;  %v2244_v62 = vadd.f32 %v2217_v16, %v2090_v63  ;;  %v2449_v47 = vpack.c.bf16 %v5465_v28, %v2440_v58  ;;  %v2463_v30 = vld [vmem:[#allocation3 + $0x11] sm:$0xff]  ;;  %v4467_v16 = vld [vmem:[%s5703_s5 + $0xb8] sm:$0xff] }
 0x27e   : > { %v2003_v13 = vpop.f32.mrf.mxu1  ;;  %v2633_v54 = vld [vmem:[#allocation3 + $0x12] sm:$0xff]  ;;  %3019 = vmatpush.bf16.msra.mxu3 %v4467_v16 }
 0x27f   : > { %v2361_v55 = vpop.f32.mrf.mxu0  ;;  %v2385_v59 = vadd.f32 %v2358_v25, %v2244_v62  ;;  %4130 = vmatmul.msk.bf16.gmra.mxu2 %vm2423_vm3, %v2449_v47  ;;  %v3059_v3 = vld [vmem:[#allocation3 + $0x16] sm:$0xff]  ;;  %v2095_v4 = vadd.f32 %v2094_v0, %v2003_v13 }
 0x280   : > { %v4460_v25 = vld [vmem:[%s5703_s5 + $0x80] sm:$0xff] }
 0x281   : > { %v2402_v24 = vadd.f32 %v5427_v1, %v2385_v59  ;;  %2915 = vmatpush.bf16.msra.mxu2 %v4460_v25 }
 0x282   : > { %3020 = vmatpush.bf16.msra.mxu3 %v4466_v5 }
 0x283   : > { %v2415_v33 = vmax.f32 %v2402_v24, 0.0 }
 0x284   : > { %v2220_v50 = vpop.f32.mrf.mxu3  ;;  %v2464_v27 = vld [vmem:[#allocation3 + $0x19] sm:$0xff]  ;;  %v2099_v18 = vpop.f32.mrf.mxu2 }
 0x285   : > { %v2634_v35 = vld [vmem:[#allocation3 + $0x1a] sm:$0xff]  ;;  %2429 = vst.msk [vmem:[#allocation3 + $0x28] sm:$0xff] %vm2423_vm3, %v2415_v33  ;;  %v2245_v49 = vadd.f32 %v2220_v50, %v2093_v52  ;;  %v2472_v51 = vpack.c.bf16 %v2464_v27, %v2463_v30 }
 0x286   : > { %v3060_v15 = vld [vmem:[#allocation3 + $0x1e] sm:$0xff]  ;;  %v2642_v40 = vpack.c.bf16 %v2634_v35, %v2633_v54  ;;  %v2006_v22 = vpop.f32.mrf.mxu1 }
 0x287   : > { %v3069_v60 = vpack.c.bf16 %v3060_v15, %v3059_v3  ;;  %v5475_v46 = vld [vmem:[#allocation3 + $0x20] sm:$0xff]  ;;  %v2363_v42 = vpop.f32.mrf.mxu0  ;;  %v2386_v39 = vadd.f32 %v2361_v55, %v2245_v49  ;;  %4109 = vmatmul.msk.bf16.gmra.mxu1 %vm2423_vm3, %v2472_v51  ;;  %v2098_v23 = vadd.f32 %v2097_v53, %v2006_v22  ;;  %v4465_v54 = vld [vmem:[%s5703_s5 + $0xa8] sm:$0xff]  ;;  %v4479_v3 = vld [vmem:[%s5703_s5 + $0x118] sm:$0xff] }
 0x288   : > { %v3283_v11 = vpack.c.bf16 %v5475_v46, %v5465_v28  ;;  %4159 = vmatmul.msk.bf16.gmra.mxu3 %vm2423_vm3, %v2642_v40  ;;  %3340 = vmatpush.bf16.msrb.mxu2 %v4479_v3  ;;  %v4464_v40 = vld [vmem:[%s5703_s5 + $0xa0] sm:$0xff] }
 0x289   : > { %4274 = vmatmul.msk.bf16.vlgmr.msrb.gmra.mxu0 %vm2423_vm3, %v3069_v60  ;;  %v2403_v26 = vadd.f32 %v5427_v1, %v2386_v39  ;;  %3021 = vmatpush.bf16.msra.mxu3 %v4465_v54 }
 0x28b   : > { %v2416_v20 = vmax.f32 %v2403_v26, 0.0 }
 0x28c   : > { %v2222_v57 = vpop.f32.mrf.mxu3  ;;  %v5486_v32 = vld [vmem:[#allocation3 + $0x28] sm:$0xff]  ;;  %v2102_v6 = vpop.f32.mrf.mxu2 }
 0x28d   : > { %2430 = vst.msk [vmem:[#allocation3 + $0x30] sm:$0xff] %vm2423_vm3, %v2416_v20  ;;  %v2246_v14 = vadd.f32 %v2222_v57, %v2095_v4  ;;  %v2450_v10 = vpack.c.bf16 %v5486_v32, %v5475_v46  ;;  %v2465_v19 = vld [vmem:[#allocation3 + $0x21] sm:$0xff]  ;;  %3022 = vmatpush.bf16.msra.mxu3 %v4464_v40 }
 0x28e   : > { %v2008_v44 = vpop.f32.mrf.mxu1  ;;  %v2635_v37 = vld [vmem:[#allocation3 + $0x22] sm:$0xff] }
 0x28f   : > { %v2387_v34 = vadd.f32 %v2363_v42, %v2246_v14  ;;  %v2366_v41 = vpop.f32.mrf.mxu0  ;;  %4131 = vmatmul.msk.bf16.gmra.mxu2 %vm2423_vm3, %v2450_v10  ;;  %v3061_v38 = vld [vmem:[#allocation3 + $0x26] sm:$0xff]  ;;  %v2100_v62 = vadd.f32 %v2099_v18, %v2008_v44 }
 0x291   : > { %v2404_v31 = vadd.f32 %v5427_v1, %v2387_v34 }
 0x293   : > { %v2417_v61 = vmax.f32 %v2404_v31, 0.0 }
 0x294   : > { %v2225_v9 = vpop.f32.mrf.mxu3  ;;  %v2466_v36 = vld [vmem:[#allocation3 + $0x29] sm:$0xff]  ;;  %v5493_v29 = vpop.f32.mrf.mxu2 }
 0x295   : > { %v2636_v48 = vld [vmem:[#allocation3 + $0x2a] sm:$0xff]  ;;  %2431 = vst.msk [vmem:[#allocation3 + $0x38] sm:$0xff] %vm2423_vm3, %v2417_v61  ;;  %v2247_v0 = vadd.f32 %v2225_v9, %v2098_v23  ;;  %v2473_v8 = vpack.c.bf16 %v2466_v36, %v2465_v19 }
 0x296   : > { %v3062_v21 = vld [vmem:[#allocation3 + $0x2e] sm:$0xff]  ;;  %v2643_v17 = vpack.c.bf16 %v2636_v48, %v2635_v37  ;;  %v2011_v45 = vpop.f32.mrf.mxu1 }
 0x297   : > { %v3070_v12 = vpack.c.bf16 %v3062_v21, %v3061_v38  ;;  %v5496_v2 = vld [vmem:[#allocation3 + $0x30] sm:$0xff]  ;;  %v2388_v56 = vadd.f32 %v2366_v41, %v2247_v0  ;;  %4110 = vmatmul.msk.bf16.gmra.mxu1 %vm2423_vm3, %v2473_v8  ;;  %v2368_v53 = vpop.f32.mrf.mxu0  ;;  %v2103_v35 = vadd.f32 %v2102_v6, %v2011_v45  ;;  %v4475_v23 = vld [vmem:[%s5703_s5 + $0xf8] sm:$0xff] }
 0x298   : > { %v3284_v63 = vpack.c.bf16 %v5496_v2, %v5486_v32  ;;  %4160 = vmatmul.msk.bf16.gmra.mxu3 %vm2423_vm3, %v2643_v17  ;;  %3233 = vmatpush.bf16.msrb.mxu1 %v4475_v23 }
 0x299   : > { %4275 = vmatmul.msk.bf16.gmra.mxu0 %vm2423_vm3, %v3070_v12  ;;  %v2405_v58 = vadd.f32 %v5427_v1, %v2388_v56 }
 0x29b   : > { %v2418_v47 = vmax.f32 %v2405_v58, 0.0 }
 0x29c   : > { %v2227_v13 = vpop.f32.mrf.mxu3  ;;  %v5516_v55 = vld [vmem:[#allocation3 + $0x38] sm:$0xff] }
 0x29d   : > { %v5518_v59 = vpop.f32.mrf.mxu2  ;;  %2432 = vst.msk [vmem:[#allocation3 + $0x40] sm:$0xff] %vm2423_vm3, %v2418_v47  ;;  %v2248_v24 = vadd.f32 %v2227_v13, %v2100_v62  ;;  %v2451_v52 = vpack.c.bf16 %v5516_v55, %v5496_v2  ;;  %v2467_v27 = vld [vmem:[#allocation3 + $0x31] sm:$0xff]  ;;  %v4474_v62 = vld [vmem:[%s5703_s5 + $0xf0] sm:$0xff] }
 0x29e   : > { %v2013_v33 = vpop.f32.mrf.mxu1  ;;  %v2637_v49 = vld [vmem:[#allocation3 + $0x32] sm:$0xff]  ;;  %3234 = vmatpush.bf16.msrb.mxu1 %v4474_v62 }
 0x29f   : > { %v2389_v30 = vadd.f32 %v2368_v53, %v2248_v24  ;;  %4132 = vmatmul.msk.bf16.gmra.mxu2 %vm2423_vm3, %v2451_v52  ;;  %v2371_v18 = vpop.f32.mrf.mxu0  ;;  %v3063_v51 = vld [vmem:[#allocation3 + $0x36] sm:$0xff]  ;;  %v2105_v41 = vadd.f32 %v5493_v29, %v2013_v33  ;;  %v4478_v53 = vld [vmem:[%s5703_s5 + $0x110] sm:$0xff]  ;;  %v2845_v13 = vld [vmem:[#allocation3 + $0xc] sm:$0xff] }
 0x2a0   : > { %3341 = vmatpush.bf16.msrb.mxu2 %v4478_v53  ;;  %v2846_v47 = vld [vmem:[#allocation3 + $0x14] sm:$0xff] }
 0x2a1   : > { %v2406_v50 = vadd.f32 %v5427_v1, %v2389_v30  ;;  %v2855_v24 = vpack.c.bf16 %v2846_v47, %v2845_v13  ;;  %v2739_v33 = vld [vmem:[#allocation3 + $0x13] sm:$0xff] }
 0x2a2   : > { %v2953_v30 = vld [vmem:[#allocation3 + $0x15] sm:$0xff] }
 0x2a3   : > { %v2419_v15 = vmax.f32 %v2406_v50, 0.0 }
 0x2a4   : > { %v2230_v60 = vpop.f32.mrf.mxu3  ;;  %v2468_v43 = vld [vmem:[#allocation3 + $0x39] sm:$0xff] }
 0x2a5   : > { %v2638_v22 = vld [vmem:[#allocation3 + $0x3a] sm:$0xff]  ;;  %v2109_v39 = vpop.f32.mrf.mxu2  ;;  %2433 = vst.msk [vmem:[#allocation3 + $0x48] sm:$0xff] %vm2423_vm3, %v2419_v15  ;;  %v2249_v26 = vadd.f32 %v2230_v60, %v2103_v35  ;;  %v2474_v4 = vpack.c.bf16 %v2468_v43, %v2467_v27  ;;  %v2738_v35 = vld [vmem:[#allocation3 + $0xb] sm:$0xff] }
 0x2a6   : > { %v3064_v42 = vld [vmem:[#allocation3 + $0x3e] sm:$0xff]  ;;  %v2644_v20 = vpack.c.bf16 %v2638_v22, %v2637_v49  ;;  %v2016_v14 = vpop.f32.mrf.mxu1  ;;  %v2952_v15 = vld [vmem:[#allocation3 + $0xd] sm:$0xff]  ;;  %v2748_v49 = vpack.c.bf16 %v2739_v33, %v2738_v35 }
 0x2a7   : > { %v3071_v57 = vpack.c.bf16 %v3064_v42, %v3063_v51  ;;  %v5535_v6 = vld [vmem:[#allocation3 + $0x40] sm:$0xff]  ;;  %v2390_v44 = vadd.f32 %v2371_v18, %v2249_v26  ;;  %4111 = vmatmul.msk.bf16.gmra.mxu1 %vm2423_vm3, %v2474_v4  ;;  %v2373_v9 = vpop.f32.mrf.mxu0  ;;  %v2108_v52 = vadd.f32 %v5518_v59, %v2016_v14  ;;  %v2962_v51 = vpack.c.bf16 %v2953_v30, %v2952_v15  ;;  %v4477_v59 = vld [vmem:[%s5703_s5 + $0x108] sm:$0xff] }
 0x2a8   : > { %v3285_v10 = vpack.c.bf16 %v5535_v6, %v5516_v55  ;;  %4161 = vmatmul.msk.bf16.gmra.mxu3 %vm2423_vm3, %v2644_v20  ;;  %3342 = vmatpush.bf16.msrb.mxu2 %v4477_v59  ;;  %v2848_v22 = vld [vmem:[#allocation3 + $0x24] sm:$0xff]  ;;  %v2847_v39 = vld [vmem:[#allocation3 + $0x1c] sm:$0xff] }
 0x2a9   : > { %4276 = vmatmul.msk.bf16.gmra.mxu0 %vm2423_vm3, %v3071_v57  ;;  %v2407_v34 = vadd.f32 %v5427_v1, %v2390_v44  ;;  %v2856_v26 = vpack.c.bf16 %v2848_v22, %v2847_v39  ;;  %v2741_v4 = vld [vmem:[#allocation3 + $0x23] sm:$0xff]  ;;  %v2740_v57 = vld [vmem:[#allocation3 + $0x1b] sm:$0xff] }
 0x2aa   : > { %v2955_v20 = vld [vmem:[#allocation3 + $0x25] sm:$0xff]  ;;  %v2954_v14 = vld [vmem:[#allocation3 + $0x1d] sm:$0xff]  ;;  %v2749_v44 = vpack.c.bf16 %v2741_v4, %v2740_v57 }
 0x2ab   : > { %v2420_v31 = vmax.f32 %v2407_v34, 0.0  ;;  %v2963_v34 = vpack.c.bf16 %v2955_v20, %v2954_v14  ;;  %v3167_v4 = vld [vmem:[#allocation3 + $0x1f] sm:$0xff]  ;;  %v3166_v14 = vld [vmem:[#allocation3 + $0x17] sm:$0xff] }
 0x2ac   : > { %v2232_v61 = vpop.f32.mrf.mxu3  ;;  %v2447_v19 = vld [vmem:[#allocation3 + $0x48] sm:$0x1]  ;;  %v2470_v0 = vld [vmem:[#allocation3 + $0x49] sm:$0x1]  ;;  %v2640_v17 = vld [vmem:[#allocation3 + $0x4a] sm:$0x1] }
 0x2ad   : > { %2434 = vst.msk [vmem:[#allocation3 + $0x50] sm:$0xff] %vm2423_vm3, %v2420_v31  ;;  %v2250_v37 = vadd.f32 %v2232_v61, %v2105_v41  ;;  %v2452_v38 = vpack.c.bf16 %v2447_v19, %v5535_v6  ;;  %v2469_v29 = vld [vmem:[#allocation3 + $0x41] sm:$0xff]  ;;  %v2850_v41 = vld [vmem:[#allocation3 + $0x34] sm:$0xff]  ;;  %v2849_v31 = vld [vmem:[#allocation3 + $0x2c] sm:$0xff] }
 0x2ae   : > { %v2018_v36 = vpop.f32.mrf.mxu1  ;;  %v2639_v8 = vld [vmem:[#allocation3 + $0x42] sm:$0xff]  ;;  %v2475_v56 = vpack.c.bf16 %v2470_v0, %v2469_v29  ;;  %v2857_v23 = vpack.c.bf16 %v2850_v41, %v2849_v31  ;;  %v4476_v61 = vld [vmem:[%s5703_s5 + $0x100] sm:$0xff] }
 0x2af   : > { %v2391_v48 = vadd.f32 %v2373_v9, %v2250_v37  ;;  %4133 = vmatmul.msk.bf16.gmra.mxu2 %vm2423_vm3, %v2452_v38  ;;  %v3065_v7 = vld [vmem:[#allocation3 + $0x46] sm:$0xff]  ;;  %v2645_v16 = vpack.c.bf16 %v2640_v17, %v2639_v8  ;;  %v2743_v19 = vld [vmem:[#allocation3 + $0x33] sm:$0xff]  ;;  %v2851_v0 = vld [vmem:[#allocation3 + $0x3c] sm:$0xff] }
 0x2b0   : > { %3343 = vmatpush.bf16.msrb.mxu2 %v4476_v61  ;;  %v2957_v37 = vld [vmem:[#allocation3 + $0x35] sm:$0xff]  ;;  %v2742_v9 = vld [vmem:[#allocation3 + $0x2b] sm:$0xff] }
 0x2b1   : > { %v2408_v21 = vadd.f32 %v5427_v1, %v2391_v48  ;;  %v4472_v38 = vld [vmem:[%s5703_s5 + $0xe0] sm:$0xff]  ;;  %v2750_v48 = vpack.c.bf16 %v2743_v19, %v2742_v9  ;;  %v2852_v29 = vld [vmem:[#allocation3 + $0x44] sm:$0xff] }
 0x2b2   : > { %v2956_v36 = vld [vmem:[#allocation3 + $0x2d] sm:$0xff]  ;;  %v2858_v8 = vpack.c.bf16 %v2852_v29, %v2851_v0 }
 0x2b3   : > { %v2421_v12 = vmax.f32 %v2408_v21, 0.0  ;;  %v2964_v21 = vpack.c.bf16 %v2957_v37, %v2956_v36  ;;  %v3168_v9 = vld [vmem:[#allocation3 + $0x27] sm:$0xff] }
 0x2b4   : > { %v2235_v25 = vpop.f32.mrf.mxu3  ;;  %v3066_v45 = vld [vmem:[#allocation3 + $0x4e] sm:$0xff] }
 0x2b5   : > { %2435 = vst.msk [vmem:[#allocation3 + $0x58] sm:$0xff] %vm2423_vm3, %v2421_v12  ;;  %v3072_v58 = vpack.c.bf16 %v3066_v45, %v3065_v7  ;;  %v2251_v54 = vadd.f32 %v2235_v25, %v2108_v52  ;;  %v2745_v12 = vld [vmem:[#allocation3 + $0x43] sm:$0xff]  ;;  %v2744_v45 = vld [vmem:[#allocation3 + $0x3b] sm:$0xff]  ;;  %v2854_v13 = vld [vmem:[#allocation3 + $0x54] sm:$0x1] }
 0x2b6   : > { %v2959_v25 = vld [vmem:[#allocation3 + $0x45] sm:$0xff]  ;;  %v2960_v35 = vld [vmem:[#allocation3 + $0x4d] sm:$0xff]  ;;  %v2961_v15 = vld [vmem:[#allocation3 + $0x55] sm:$0x1] }
 0x2b7   : > { %4112 = vmatmul.msk.bf16.gmra.mxu1 %vm2423_vm3, %v2475_v56  ;;  %v2958_v56 = vld [vmem:[#allocation3 + $0x3d] sm:$0xff] }
 0x2b8   : > { %4162 = vmatmul.msk.bf16.gmra.mxu3 %vm2423_vm3, %v2645_v16  ;;  %v2965_v53 = vpack.c.bf16 %v2959_v25, %v2958_v56 }
 0x2b9   : > { %4277 = vmatmul.msk.bf16.gmra.mxu0 %vm2423_vm3, %v3072_v58  ;;  %v2751_v58 = vpack.c.bf16 %v2745_v12, %v2744_v45 }
 0x2bc   : > { %v2237_v5 = vpop.f32.mrf.mxu3  ;;  %v3067_v3 = vld [vmem:[#allocation3 + $0x56] sm:$0xff]  ;;  %v3068_v50 = vld [vmem:[#allocation3 + $0x5e] sm:$0x1] }
 0x2bd   : > { %v3073_v40 = vpack.c.bf16 %v3068_v50, %v3067_v3  ;;  %v2853_v5 = vld [vmem:[#allocation3 + $0x4c] sm:$0xff] }
 0x2be   : > { %v2859_v30 = vpack.c.bf16 %v2854_v13, %v2853_v5  ;;  %v3279_v5 = vld [vmem:[#allocation3 + $0x48] sm:$0xff] }
 0x2bf   : > { %4216 = vmatmul.msk.bf16.vlgmr.msra.gmra.mxu2 %vm2423_vm3, %v2855_v24 }
 0x2c4   : > { %v2376_v27 = vpop.f32.mrf.mxu3 }
 0x2c5   : > { %v2392_v18 = vadd.f32 %v2376_v27, %v2251_v54  ;;  %v2746_v54 = vld [vmem:[#allocation3 + $0x4b] sm:$0xff]  ;;  %v2747_v27 = vld [vmem:[#allocation3 + $0x53] sm:$0x1] }
 0x2c7   : > { %v2409_v60 = vadd.f32 %v5427_v1, %v2392_v18  ;;  %4187 = vmatmul.msk.bf16.vlgmr.msra.gmra.mxu1 %vm2423_vm3, %v2748_v49  ;;  %v4473_v1 = vld [vmem:[%s5703_s5 + $0xe8] sm:$0xff] }
 0x2c8   : > { %4245 = vmatmul.msk.bf16.vlgmr.msra.gmra.mxu3 %vm2423_vm3, %v2962_v51  ;;  %3235 = vmatpush.bf16.msrb.mxu1 %v4473_v1 }
 0x2c9   : > { %4278 = vmatmul.msk.bf16.gmra.mxu0 %vm2423_vm3, %v3073_v40  ;;  %v2422_v43 = vmax.f32 %v2409_v60, 0.0  ;;  %v2752_v40 = vpack.c.bf16 %v2747_v27, %v2746_v54  ;;  %v2966_v60 = vpack.c.bf16 %v2961_v15, %v2960_v35  ;;  %v3172_v54 = vld [vmem:[#allocation3 + $0x47] sm:$0xff] }
 0x2cb   : > { %2437 = vst.msk [vmem:[#allocation3 + $0x60] sm:$0x1] %vm2436_vm4, %v2422_v43 }
 0x2cc   : > { %v2378_v42 = vpop.f32.mrf.mxu3  ;;  %3236 = vmatpush.bf16.msrb.mxu1 %v4472_v38 }
 0x2cf   : > { %4217 = vmatmul.msk.bf16.gmra.mxu2 %vm2423_vm3, %v2856_v26 }
 0x2d2   : > { %v3282_v15 = vld [vmem:[#allocation3 + $0x60] sm:$0x1] }
 0x2d7   : > { %4188 = vmatmul.msk.bf16.gmra.mxu1 %vm2423_vm3, %v2749_v44 }
 0x2d8   : > { %4246 = vmatmul.msk.bf16.gmra.mxu3 %vm2423_vm3, %v2963_v34  ;;  %v3176_v34 = vpack.c.bf16 %v3167_v4, %v3166_v14 }
 0x2df   : > { %4218 = vmatmul.msk.bf16.gmra.mxu2 %vm2423_vm3, %v2857_v23 }
 0x2e7   : > { %4189 = vmatmul.msk.bf16.gmra.mxu1 %vm2423_vm3, %v2750_v48 }
 0x2e8   : > { %4247 = vmatmul.msk.bf16.gmra.mxu3 %vm2423_vm3, %v2964_v21 }
 0x2ef   : > { %4219 = vmatmul.msk.bf16.gmra.mxu2 %vm2423_vm3, %v2858_v8 }
 0x2f2   : > { %v2606_v17 = vpop.f32.mrf.mxu2 }
 0x2f4   : > { %v2533_v7 = vpop.f32.mrf.mxu1 }
 0x2f5   : > { %v2607_v16 = vadd.f32 %v2606_v17, %v2533_v7  ;;  %v3170_v7 = vld [vmem:[#allocation3 + $0x37] sm:$0xff] }
 0x2f7   : > { %4190 = vmatmul.msk.bf16.gmra.mxu1 %vm2423_vm3, %v2751_v58 }
 0x2f8   : > { %4248 = vmatmul.msk.bf16.gmra.mxu3 %vm2423_vm3, %v2965_v53  ;;  %v3280_v53 = vld [vmem:[#allocation3 + $0x50] sm:$0xff] }
 0x2f9   : > { %v3286_v55 = vpack.c.bf16 %v3280_v53, %v3279_v5 }
 0x2fa   : > { %v2608_v62 = vpop.f32.mrf.mxu2 }
 0x2fb   : > { %v2703_v47 = vpop.f32.mrf.mxu3 }
 0x2fc   : > { %v5589_v24 = vadd.f32 %v2703_v47, %v2607_v16  ;;  %v2535_v52 = vpop.f32.mrf.mxu1 }
 0x2fd   : > { %v2609_v33 = vadd.f32 %v2608_v62, %v2535_v52  ;;  %v3173_v52 = vld [vmem:[#allocation3 + $0x4f] sm:$0xff] }
 0x2ff   : > { %4220 = vmatmul.msk.bf16.gmra.mxu2 %vm2423_vm3, %v2859_v30 }
 0x302   : > { %v2611_v3 = vpop.f32.mrf.mxu2 }
 0x303   : > { %v2705_v50 = vpop.f32.mrf.mxu3 }
 0x304   : > { %v5592_v18 = vadd.f32 %v2705_v50, %v2609_v33  ;;  %v2538_v49 = vpop.f32.mrf.mxu1  ;;  %v3179_v50 = vpack.c.bf16 %v3173_v52, %v3172_v54 }
 0x305   : > { %v2612_v51 = vadd.f32 %v2611_v3, %v2538_v49 }
 0x307   : > { %4191 = vmatmul.msk.bf16.gmra.mxu1 %vm2423_vm3, %v2752_v40 }
 0x308   : > { %4249 = vmatmul.msk.bf16.gmra.mxu3 %vm2423_vm3, %v2966_v60 }
 0x30a   : > { %v2613_v59 = vpop.f32.mrf.mxu2 }
 0x30b   : > { %v2708_v43 = vpop.f32.mrf.mxu3 }
 0x30c   : > { %v5596_v22 = vadd.f32 %v2708_v43, %v2612_v51  ;;  %v2540_v42 = vpop.f32.mrf.mxu1  ;;  %v3281_v51 = vld [vmem:[#allocation3 + $0x58] sm:$0xff] }
 0x30d   : > { %v2614_v39 = vadd.f32 %v2613_v59, %v2540_v42  ;;  %v3287_v60 = vpack.c.bf16 %v3282_v15, %v3281_v51  ;;  %v3174_v42 = vld [vmem:[#allocation3 + $0x57] sm:$0xff] }
 0x30f   : > { %4332 = vmatmul.msk.bf16.vlgmr.msrb.gmra.mxu2 %vm2423_vm3, %v3283_v11  ;;  %v3169_v11 = vld [vmem:[#allocation3 + $0x2f] sm:$0xff] }
 0x310   : > { %v3177_v48 = vpack.c.bf16 %v3169_v11, %v3168_v9 }
 0x312   : > { %v2616_v26 = vpop.f32.mrf.mxu2 }
 0x313   : > { %v2710_v1 = vpop.f32.mrf.mxu3 }
 0x314   : > { %v5602_v20 = vadd.f32 %v2710_v1, %v2614_v39  ;;  %v2543_v57 = vpop.f32.mrf.mxu1  ;;  %v3175_v39 = vld [vmem:[#allocation3 + $0x5f] sm:$0x1] }
 0x315   : > { %v2617_v44 = vadd.f32 %v2616_v26, %v2543_v57  ;;  %v3180_v1 = vpack.c.bf16 %v3175_v39, %v3174_v42 }
 0x317   : > { %4303 = vmatmul.msk.bf16.vlgmr.msrb.gmra.mxu1 %vm2423_vm3, %v3176_v34 }
 0x31a   : > { %v2618_v41 = vpop.f32.mrf.mxu2 }
 0x31b   : > { %v2713_v31 = vpop.f32.mrf.mxu3 }
 0x31c   : > { %v5605_v23 = vadd.f32 %v2713_v31, %v2617_v44  ;;  %v2545_v61 = vpop.f32.mrf.mxu1 }
 0x31d   : > { %v2619_v19 = vadd.f32 %v2618_v41, %v2545_v61 }
 0x31f   : > { %4333 = vmatmul.msk.bf16.gmra.mxu2 %vm2423_vm3, %v3284_v63  ;;  %v3171_v63 = vld [vmem:[#allocation3 + $0x3f] sm:$0xff] }
 0x320   : > { %v3178_v56 = vpack.c.bf16 %v3171_v63, %v3170_v7 }
 0x322   : > { %v2621_v28 = vpop.f32.mrf.mxu2 }
 0x323   : > { %v2715_v46 = vpop.f32.mrf.mxu3 }
 0x324   : > { %v5611_v37 = vadd.f32 %v2715_v46, %v2619_v19  ;;  %v2548_v38 = vpop.f32.mrf.mxu1 }
 0x325   : > { %v2622_v36 = vadd.f32 %v2621_v28, %v2548_v38 }
 0x327   : > { %4304 = vmatmul.msk.bf16.gmra.mxu1 %vm2423_vm3, %v3177_v48 }
 0x32a   : > { %v2623_v21 = vpop.f32.mrf.mxu2 }
 0x32b   : > { %v2718_v29 = vpop.f32.mrf.mxu3 }
 0x32c   : > { %v2734_v0 = vadd.f32 %v2718_v29, %v2622_v36  ;;  %v2550_v8 = vpop.f32.mrf.mxu1 }
 0x32d   : > { %v2624_v17 = vadd.f32 %v2623_v21, %v2550_v8 }
 0x32f   : > { %4334 = vmatmul.msk.bf16.gmra.mxu2 %vm2423_vm3, %v3285_v10 }
 0x332   : > { %v2626_v32 = vpop.f32.mrf.mxu2 }
 0x333   : > { %v2720_v2 = vpop.f32.mrf.mxu3 }
 0x334   : > { %v2735_v12 = vadd.f32 %v2720_v2, %v2624_v17  ;;  %v2553_v25 = vpop.f32.mrf.mxu1 }
 0x335   : > { %v2627_v45 = vadd.f32 %v2626_v32, %v2553_v25 }
 0x337   : > { %4305 = vmatmul.msk.bf16.gmra.mxu1 %vm2423_vm3, %v3178_v56 }
 0x33a   : > { %v2628_v16 = vpop.f32.mrf.mxu2 }
 0x33b   : > { %v2723_v58 = vpop.f32.mrf.mxu3 }
 0x33c   : > { %v2736_v62 = vadd.f32 %v2723_v58, %v2627_v45  ;;  %v2555_v47 = vpop.f32.mrf.mxu1 }
 0x33d   : > { %v2629_v13 = vadd.f32 %v2628_v16, %v2555_v47 }
 0x33f   : > { %4335 = vmatmul.msk.bf16.gmra.mxu2 %vm2423_vm3, %v3286_v55 }
 0x342   : > { %v2917_v10 = vpop.f32.mrf.mxu2 }
 0x343   : > { %v2725_v6 = vpop.f32.mrf.mxu3 }
 0x344   : > { %v2737_v33 = vadd.f32 %v2725_v6, %v2629_v13  ;;  %v2810_v30 = vpop.f32.mrf.mxu1 }
 0x345   : > { %v2835_v3 = vadd.f32 %v2810_v30, %v5589_v24 }
 0x347   : > { %4306 = vmatmul.msk.bf16.gmra.mxu1 %vm2423_vm3, %v3179_v50  ;;  %v2942_v27 = vadd.f32 %v2917_v10, %v2835_v3 }
 0x34a   : > { %v2919_v35 = vpop.f32.mrf.mxu2 }
 0x34c   : > { %v2812_v49 = vpop.f32.mrf.mxu1 }
 0x34d   : > { %v2836_v40 = vadd.f32 %v2812_v49, %v5592_v18 }
 0x34f   : > { %4336 = vmatmul.msk.bf16.gmra.mxu2 %vm2423_vm3, %v3287_v60  ;;  %v2943_v59 = vadd.f32 %v2919_v35, %v2836_v40 }
 0x352   : > { %v2922_v43 = vpop.f32.mrf.mxu2 }
 0x354   : > { %v2815_v26 = vpop.f32.mrf.mxu1 }
 0x355   : > { %v2837_v24 = vadd.f32 %v2815_v26, %v5596_v22 }
 0x357   : > { %4307 = vmatmul.msk.bf16.gmra.mxu1 %vm2423_vm3, %v3180_v1  ;;  %v2944_v4 = vadd.f32 %v2922_v43, %v2837_v24 }
 0x35a   : > { %v2924_v57 = vpop.f32.mrf.mxu2 }
 0x35c   : > { %v2817_v14 = vpop.f32.mrf.mxu1 }
 0x35d   : > { %v2838_v44 = vadd.f32 %v2817_v14, %v5602_v20  ;;  %v3024_v20 = vpop.f32.mrf.mxu3 }
 0x35e   : > { %v3049_v16 = vadd.f32 %v3024_v20, %v2942_v27 }
 0x35f   : > { %v5627_v34 = vadd.f32 %v2924_v57, %v2838_v44 }
 0x362   : > { %v2927_v18 = vpop.f32.mrf.mxu2 }
 0x364   : > { %v2820_v41 = vpop.f32.mrf.mxu1 }
 0x365   : > { %v2839_v31 = vadd.f32 %v2820_v41, %v5605_v23  ;;  %v3131_v23 = vpop.f32.mrf.mxu0  ;;  %v3026_v32 = vpop.f32.mrf.mxu3 }
 0x366   : > { %v3156_v47 = vadd.f32 %v3131_v23, %v3049_v16  ;;  %v3050_v55 = vadd.f32 %v3026_v32, %v2943_v59 }
 0x367   : > { %v5630_v61 = vadd.f32 %v2927_v18, %v2839_v31 }
 0x36a   : > { %v2929_v19 = vpop.f32.mrf.mxu2 }
 0x36c   : > { %v2822_v28 = vpop.f32.mrf.mxu1 }
 0x36d   : > { %v2840_v22 = vadd.f32 %v2822_v28, %v5611_v37  ;;  %v3133_v37 = vpop.f32.mrf.mxu0  ;;  %v3029_v56 = vpop.f32.mrf.mxu3 }
 0x36e   : > { %v3157_v54 = vadd.f32 %v3133_v37, %v3050_v55  ;;  %v3051_v35 = vadd.f32 %v3029_v56, %v2944_v4 }
 0x36f   : > { %v5633_v46 = vadd.f32 %v2929_v19, %v2840_v22 }
 0x372   : > { %v2932_v11 = vpop.f32.mrf.mxu2 }
 0x374   : > { %v2825_v38 = vpop.f32.mrf.mxu1 }
 0x375   : > { %v2841_v9 = vadd.f32 %v2825_v38, %v2734_v0  ;;  %v3031_v6 = vpop.f32.mrf.mxu3 }
 0x376   : > { %v3052_v26 = vadd.f32 %v3031_v6, %v5627_v34 }
 0x377   : > { %v5635_v36 = vadd.f32 %v2932_v11, %v2841_v9 }
 0x37a   : > { %v2934_v48 = vpop.f32.mrf.mxu2 }
 0x37c   : > { %v2827_v21 = vpop.f32.mrf.mxu1 }
 0x37d   : > { %v2842_v29 = vadd.f32 %v2827_v21, %v2735_v12  ;;  %v3136_v12 = vpop.f32.mrf.mxu0  ;;  %v3034_v49 = vpop.f32.mrf.mxu3 }
 0x37e   : > { %v3158_v59 = vadd.f32 %v3136_v12, %v3051_v35  ;;  %v3053_v19 = vadd.f32 %v3034_v49, %v5630_v61 }
 0x37f   : > { %v5637_v8 = vadd.f32 %v2934_v48, %v2842_v29 }
 0x382   : > { %v2937_v17 = vpop.f32.mrf.mxu2 }
 0x384   : > { %v2830_v2 = vpop.f32.mrf.mxu1 }
 0x385   : > { %v2843_v63 = vadd.f32 %v2830_v2, %v2736_v62  ;;  %v5646_v62 = vld [vmem:[%s5704_s6] ss:$0 sm:$0xff]  ;;  %v3138_v27 = vpop.f32.mrf.mxu0  ;;  %v3036_v14 = vpop.f32.mrf.mxu3 }
 0x386   : > { %v3159_v18 = vadd.f32 %v3138_v27, %v3052_v26  ;;  %v3054_v23 = vadd.f32 %v3036_v14, %v5633_v46 }
 0x387   : > { %v5639_v25 = vadd.f32 %v2937_v17, %v2843_v63 }
 0x38a   : > { %v2939_v7 = vpop.f32.mrf.mxu2 }
 0x38c   : > { %v2832_v45 = vpop.f32.mrf.mxu1 }
 0x38d   : > { %v2844_v0 = vadd.f32 %v2832_v45, %v2737_v33  ;;  %v3141_v1 = vpop.f32.mrf.mxu0  ;;  %v3039_v21 = vpop.f32.mrf.mxu3 }
 0x38e   : > { %v3160_v9 = vadd.f32 %v3141_v1, %v3053_v19 }
 0x38f   : > { %v5641_v58 = vadd.f32 %v2939_v7, %v2844_v0  ;;  %v3055_v0 = vadd.f32 %v3039_v21, %v5635_v36 }
 0x392   : > { %v3345_v53 = vpop.f32.mrf.mxu2 }
 0x394   : > { %v3238_v5 = vpop.f32.mrf.mxu1 }
 0x395   : > { %v3263_v13 = vadd.f32 %v3238_v5, %v3156_v47  ;;  %v3143_v11 = vpop.f32.mrf.mxu0  ;;  %v3041_v16 = vpop.f32.mrf.mxu3 }
 0x396   : > { %v3161_v63 = vadd.f32 %v3143_v11, %v3054_v23 }
 0x397   : > { %v3370_v10 = vadd.f32 %v3345_v53, %v3263_v13 }
 0x399   : > { %v3384_v52 = vadd.f32 %v5646_v62, %v3370_v10 }
 0x39a   : > { %v3347_v33 = vpop.f32.mrf.mxu2 }
 0x39b   : > { %v3394_v30 = vmax.f32 %v3384_v52, 0.0  ;;  %v3056_v52 = vadd.f32 %v3041_v16, %v5637_v8 }
 0x39c   : > { %v3240_v3 = vpop.f32.mrf.mxu1 }
 0x39d   : > { %3404 = vst.msk [vmem:[#allocation4] sm:$0xff] %vm2423_vm3, %v3394_v30  ;;  %v3264_v50 = vadd.f32 %v3240_v3, %v3157_v54  ;;  %v3146_v37 = vpop.f32.mrf.mxu0  ;;  %v3044_v30 = vpop.f32.mrf.mxu3 }
 0x39e   : > { %v3162_v5 = vadd.f32 %v3146_v37, %v3055_v0 }
 0x39f   : > { %v3371_v15 = vadd.f32 %v3347_v33, %v3264_v50 }
 0x3a1   : > { %v3385_v51 = vadd.f32 %v5646_v62, %v3371_v15  ;;  %v3057_v15 = vadd.f32 %v3044_v30, %v5639_v25 }
 0x3a2   : > { %v3350_v40 = vpop.f32.mrf.mxu2 }
 0x3a3   : > { %v3395_v60 = vmax.f32 %v3385_v51, 0.0 }
 0x3a4   : > { %v3414_v43 = vld [vmem:[#allocation4] sm:$0x7f]  ;;  %v3243_v42 = vpop.f32.mrf.mxu1 }
 0x3a5   : > { %3416 = vst.msk [vmem:[%s5655_s17] sm:$0x7f] %vm3415_vm5, %v3414_v43  ;;  %v3265_v39 = vadd.f32 %v3243_v42, %v3158_v59  ;;  %v3148_v10 = vpop.f32.mrf.mxu0 }
 0x3a6   : > { %3405 = vst.msk [vmem:[#allocation4 + $0x8] sm:$0xff] %vm2423_vm3, %v3395_v60  ;;  %v3163_v50 = vadd.f32 %v3148_v10, %v3056_v52  ;;  %v3046_v60 = vpop.f32.mrf.mxu3 }
 0x3a7   : > { %v3372_v24 = vadd.f32 %v3350_v40, %v3265_v39 }
 0x3a9   : > { %v3386_v4 = vadd.f32 %v5646_v62, %v3372_v24  ;;  %v3058_v24 = vadd.f32 %v3046_v60, %v5641_v58 }
 0x3aa   : > { %v3352_v57 = vpop.f32.mrf.mxu2 }
 0x3ab   : > { %v3396_v44 = vmax.f32 %v3386_v4, 0.0 }
 0x3ac   : > { %v3245_v41 = vpop.f32.mrf.mxu1 }
 0x3ad   : > { %3406 = vst.msk [vmem:[#allocation4 + $0x10] sm:$0xff] %vm2423_vm3, %v3396_v44  ;;  %v3266_v31 = vadd.f32 %v3245_v41, %v3159_v18  ;;  %v3151_v51 = vpop.f32.mrf.mxu0 }
 0x3ae   : > { %v3164_v59 = vadd.f32 %v3151_v51, %v3057_v15 }
 0x3af   : > { %v3373_v28 = vadd.f32 %v3352_v57, %v3266_v31 }
 0x3b1   : > { %v3387_v22 = vadd.f32 %v5646_v62, %v3373_v28 }
 0x3b2   : > { %v3355_v34 = vpop.f32.mrf.mxu2 }
 0x3b3   : > { %v3397_v38 = vmax.f32 %v3387_v22, 0.0 }
 0x3b4   : > { %v3417_v20 = vld [vmem:[#allocation4 + $0xb] sm:$0x7f]  ;;  %v3248_v48 = vpop.f32.mrf.mxu1 }
 0x3b5   : > { %3418 = vst.msk [vmem:[%s5655_s17 + $0x7] sm:$0x7f] %vm3415_vm5, %v3417_v20  ;;  %v3267_v29 = vadd.f32 %v3248_v48, %v3160_v9  ;;  %v3153_v4 = vpop.f32.mrf.mxu0 }
 0x3b6   : > { %3407 = vst.msk [vmem:[#allocation4 + $0x18] sm:$0xff] %vm2423_vm3, %v3397_v38  ;;  %v3165_v14 = vadd.f32 %v3153_v4, %v3058_v24 }
 0x3b7   : > { %v3374_v17 = vadd.f32 %v3355_v34, %v3267_v29 }
 0x3b9   : > { %v3388_v61 = vadd.f32 %v5646_v62, %v3374_v17 }
 0x3ba   : > { %v3357_v32 = vpop.f32.mrf.mxu2 }
 0x3bb   : > { %v3398_v2 = vmax.f32 %v3388_v61, 0.0 }
 0x3bc   : > { %v3250_v7 = vpop.f32.mrf.mxu1 }
 0x3bd   : > { %v3419_v45 = vld [vmem:[#allocation4 + $0x16] sm:$0x7f]  ;;  %3408 = vst.msk [vmem:[#allocation4 + $0x20] sm:$0xff] %vm2423_vm3, %v3398_v2  ;;  %v3268_v56 = vadd.f32 %v3250_v7, %v3161_v63 }
 0x3be   : > { %3420 = vst.msk [vmem:[%s5655_s17 + $0xe] sm:$0x7f] %vm3415_vm5, %v3419_v45 }
 0x3bf   : > { %v3375_v53 = vadd.f32 %v3357_v32, %v3268_v56 }
 0x3c1   : > { %v3389_v46 = vadd.f32 %v5646_v62, %v3375_v53 }
 0x3c2   : > { %v3360_v47 = vpop.f32.mrf.mxu2 }
 0x3c3   : > { %v3399_v12 = vmax.f32 %v3389_v46, 0.0 }
 0x3c4   : > { %v3421_v13 = vld [vmem:[#allocation4 + $0x21] sm:$0x7f]  ;;  %v3253_v55 = vpop.f32.mrf.mxu1 }
 0x3c5   : > { %3422 = vst.msk [vmem:[%s5655_s17 + $0x15] sm:$0x7f] %vm3415_vm5, %v3421_v13  ;;  %v3269_v6 = vadd.f32 %v3253_v55, %v3162_v5 }
 0x3c6   : > { %3409 = vst.msk [vmem:[#allocation4 + $0x28] sm:$0xff] %vm2423_vm3, %v3399_v12 }
 0x3c7   : > { %v3376_v33 = vadd.f32 %v3360_v47, %v3269_v6 }
 0x3c9   : > { %v3390_v36 = vadd.f32 %v5646_v62, %v3376_v33 }
 0x3ca   : > { %v3362_v54 = vpop.f32.mrf.mxu2 }
 0x3cb   : > { %v3400_v3 = vmax.f32 %v3390_v36, 0.0 }
 0x3cc   : > { %v3255_v27 = vpop.f32.mrf.mxu1 }
 0x3cd   : > { %3410 = vst.msk [vmem:[#allocation4 + $0x30] sm:$0xff] %vm2423_vm3, %v3400_v3  ;;  %v3270_v35 = vadd.f32 %v3255_v27, %v3163_v50 }
 0x3cf   : > { %v3377_v49 = vadd.f32 %v3362_v54, %v3270_v35 }
 0x3d1   : > { %v3391_v40 = vadd.f32 %v5646_v62, %v3377_v49 }
 0x3d2   : > { %v3365_v42 = vpop.f32.mrf.mxu2 }
 0x3d3   : > { %v3401_v8 = vmax.f32 %v3391_v40, 0.0 }
 0x3d4   : > { %v3423_v43 = vld [vmem:[#allocation4 + $0x2c] sm:$0x7f]  ;;  %v3258_v39 = vpop.f32.mrf.mxu1 }
 0x3d5   : > { %3424 = vst.msk [vmem:[%s5655_s17 + $0x1c] sm:$0x7f] %vm3415_vm5, %v3423_v43  ;;  %v3271_v26 = vadd.f32 %v3258_v39, %v3164_v59 }
 0x3d6   : > { %3411 = vst.msk [vmem:[#allocation4 + $0x38] sm:$0xff] %vm2423_vm3, %v3401_v8 }
 0x3d7   : > { %v3378_v1 = vadd.f32 %v3365_v42, %v3271_v26 }
 0x3d9   : > { %v3392_v25 = vadd.f32 %v5646_v62, %v3378_v1 }
 0x3da   : > { %v3367_v31 = vpop.f32.mrf.mxu2 }
 0x3db   : > { %v3402_v57 = vmax.f32 %v3392_v25, 0.0 }
 0x3dc   : > { %v3260_v44 = vpop.f32.mrf.mxu1 }
 0x3dd   : > { %v3425_v18 = vld [vmem:[#allocation4 + $0x37] sm:$0x7f]  ;;  %3412 = vst.msk [vmem:[#allocation4 + $0x40] sm:$0xff] %vm2423_vm3, %v3402_v57  ;;  %v3272_v41 = vadd.f32 %v3260_v44, %v3165_v14 }
 0x3de   : > { %3426 = vst.msk [vmem:[%s5655_s17 + $0x23] sm:$0x7f] %vm3415_vm5, %v3425_v18 }
 0x3df   : > { %v3379_v19 = vadd.f32 %v3367_v31, %v3272_v41 }
 0x3e1   : > { %v3393_v28 = vadd.f32 %v5646_v62, %v3379_v19 }
 0x3e3   : > { %v3403_v22 = vmax.f32 %v3393_v28, 0.0 }
 0x3e5   : > { %3413 = vst.msk [vmem:[#allocation4 + $0x48] sm:$0x1] %vm2436_vm4, %v3403_v22 }
 0x3ec   : > { %v3427_v58 = vld [vmem:[#allocation4 + $0x42] sm:$0x7f] }
 0x3ed   : > { %3428 = vst.msk [vmem:[%s5655_s17 + $0x2a] sm:$0x7f] %vm3415_vm5, %v3427_v58 }
 0x3ee PF: > { %s17_s24 = sadd.s32 1, %s4522_s24  }
 0x3ef   : > { %p14_p4 = scmp.ge.s32.totalorder %s17_s24, 4  }
 0x3f1   :  { %16 = sbr.rel (!%p14_p4) target bundleno = 1 (0x1), region = 97 }

// kernel: nature_forward.3
= control target key start
LH: loop header
LB: loop body
LE: loop exit
PB: predicated region body
PF: predicated region fallthrough
CT: control target
= control target key end

     0   :  { %vm4787_vm0 = vcmask 523264   ;;  %vm6243_vm1 = vcmask 48128   ;;  %s10216_s18 = smov 122   ;;  %vm6273_vm2 = vcmask 7168   ;;  %s15464_s1 = inlined_call_operand.vmem [shape: bf16[3136,512], index: 1, kind: input, shape index: {}]   ;;  %s15465_s0 = inlined_call_operand.vmem [shape: f32[8,3136], index: 0, kind: input, shape index: {}]   ;;  %s15466_s2 = inlined_call_operand.vmem [shape: f32[1,512], index: 2, kind: input, shape index: {}]   ;;  %s15467_s3 = inlined_call_operand.vmem [shape: f32[512,128], index: 3, kind: input, shape index: {}]   ;;  %s15468_s4 = inlined_call_operand.vmem [shape: f32[1,128], index: 4, kind: input, shape index: {}]   ;;  %s15469_s5 = inlined_call_operand.vmem [shape: f32[8,1], index: 5, kind: output, shape index: {0}]   ;;  %s15470_s6 = inlined_call_operand.vmem [shape: f32[8,6], index: 6, kind: output, shape index: {1}]  }
   0x1   :  { %v6397_v0 = vld [vmem:[%s15464_s1 + $0xe0] sm:$0xf]  ;;  %v9453_v1 = vld [vmem:[%s15464_s1 + $0xec] sm:$0xf0] }
   0x2   :  { %v6525_v2 = vld [vmem:[%s15464_s1 + $0x1e0] sm:$0xf]  ;;  %v6398_v3 = vor.u32 %v9453_v1, %v6397_v0  ;;  %v9485_v4 = vld [vmem:[%s15464_s1 + $0x1ec] sm:$0xf0] }
   0x3   :  { %v6653_v5 = vld [vmem:[%s15464_s1 + $0x2e0] sm:$0xf]  ;;  %v9517_v6 = vld [vmem:[%s15464_s1 + $0x2ec] sm:$0xf0]  ;;  %v6526_v7 = vor.u32 %v9485_v4, %v6525_v2 }
   0x4   :  { %v6654_v8 = vor.u32 %v9517_v6, %v6653_v5  ;;  %v6781_v9 = vld [vmem:[%s15464_s1 + $0x3e0] sm:$0xf]  ;;  %v9549_v10 = vld [vmem:[%s15464_s1 + $0x3ec] sm:$0xf0]  ;;  %4791 = vmatpush.bf16.msra.mxu0 %v6398_v3 }
   0x5   :  { %v6381_v11 = vld [vmem:[%s15464_s1 + $0xc0] sm:$0xf]  ;;  %v6782_v12 = vor.u32 %v9549_v10, %v6781_v9  ;;  %v9449_v13 = vld [vmem:[%s15464_s1 + $0xcc] sm:$0xf0]  ;;  %4804 = vmatpush.bf16.msra.mxu1 %v6526_v7 }
   0x6   :  { %v6509_v14 = vld [vmem:[%s15464_s1 + $0x1c0] sm:$0xf]  ;;  %v9481_v15 = vld [vmem:[%s15464_s1 + $0x1cc] sm:$0xf0]  ;;  %4817 = vmatpush.bf16.msra.mxu2 %v6654_v8  ;;  %v6382_v16 = vor.u32 %v9449_v13, %v6381_v11 }
   0x7   :  { %v6510_v17 = vor.u32 %v9481_v15, %v6509_v14  ;;  %v6637_v18 = vld [vmem:[%s15464_s1 + $0x2c0] sm:$0xf]  ;;  %v9513_v19 = vld [vmem:[%s15464_s1 + $0x2cc] sm:$0xf0]  ;;  %4830 = vmatpush.bf16.msra.mxu3 %v6782_v12 }
   0x8   :  { %v6765_v20 = vld [vmem:[%s15464_s1 + $0x3c0] sm:$0xf]  ;;  %v6638_v21 = vor.u32 %v9513_v19, %v6637_v18  ;;  %v9545_v22 = vld [vmem:[%s15464_s1 + $0x3cc] sm:$0xf0]  ;;  %4792 = vmatpush.bf16.msra.mxu0 %v6382_v16 }
   0x9   :  { %v6365_v23 = vld [vmem:[%s15464_s1 + $0xa0] sm:$0xf]  ;;  %v9445_v24 = vld [vmem:[%s15464_s1 + $0xac] sm:$0xf0]  ;;  %v6766_v25 = vor.u32 %v9545_v22, %v6765_v20  ;;  %4805 = vmatpush.bf16.msra.mxu1 %v6510_v17 }
   0xa   :  { %v6493_v26 = vld [vmem:[%s15464_s1 + $0x1a0] sm:$0xf]  ;;  %v9477_v27 = vld [vmem:[%s15464_s1 + $0x1ac] sm:$0xf0]  ;;  %v6366_v29 = vor.u32 %v9445_v24, %v6365_v23  ;;  %4818 = vmatpush.bf16.msra.mxu2 %v6638_v21 }
   0xb   :  { %v6621_v28 = vld [vmem:[%s15464_s1 + $0x2a0] sm:$0xf]  ;;  %v9509_v30 = vld [vmem:[%s15464_s1 + $0x2ac] sm:$0xf0]  ;;  %v6494_v33 = vor.u32 %v9477_v27, %v6493_v26  ;;  %4831 = vmatpush.bf16.msra.mxu3 %v6766_v25 }
   0xc   :  { %v6749_v31 = vld [vmem:[%s15464_s1 + $0x3a0] sm:$0xf]  ;;  %v9541_v32 = vld [vmem:[%s15464_s1 + $0x3ac] sm:$0xf0]  ;;  %v6622_v34 = vor.u32 %v9509_v30, %v6621_v28  ;;  %4793 = vmatpush.bf16.msra.mxu0 %v6366_v29 }
   0xd   :  { %v6349_v35 = vld [vmem:[%s15464_s1 + $0x80] sm:$0xf]  ;;  %v9441_v36 = vld [vmem:[%s15464_s1 + $0x8c] sm:$0xf0]  ;;  %v6750_v38 = vor.u32 %v9541_v32, %v6749_v31  ;;  %4806 = vmatpush.bf16.msra.mxu1 %v6494_v33 }
   0xe   :  { %v6477_v37 = vld [vmem:[%s15464_s1 + $0x180] sm:$0xf]  ;;  %v9473_v39 = vld [vmem:[%s15464_s1 + $0x18c] sm:$0xf0]  ;;  %v6350_v44 = vor.u32 %v9441_v36, %v6349_v35  ;;  %4819 = vmatpush.bf16.msra.mxu2 %v6622_v34 }
   0xf   :  { %v6605_v40 = vld [vmem:[%s15464_s1 + $0x280] sm:$0xf]  ;;  %v9505_v41 = vld [vmem:[%s15464_s1 + $0x28c] sm:$0xf0]  ;;  %v6478_v45 = vor.u32 %v9473_v39, %v6477_v37  ;;  %4832 = vmatpush.bf16.msra.mxu3 %v6750_v38 }
  0x10   :  { %v6733_v42 = vld [vmem:[%s15464_s1 + $0x380] sm:$0xf]  ;;  %v9537_v43 = vld [vmem:[%s15464_s1 + $0x38c] sm:$0xf0]  ;;  %v6606_v46 = vor.u32 %v9505_v41, %v6605_v40  ;;  %4794 = vmatpush.bf16.msra.mxu0 %v6350_v44 }
  0x11   :  { %v6333_v47 = vld [vmem:[%s15464_s1 + $0x60] sm:$0xf]  ;;  %v9437_v48 = vld [vmem:[%s15464_s1 + $0x6c] sm:$0xf0]  ;;  %v6734_v50 = vor.u32 %v9537_v43, %v6733_v42  ;;  %4807 = vmatpush.bf16.msra.mxu1 %v6478_v45 }
  0x12   :  { %v6461_v49 = vld [vmem:[%s15464_s1 + $0x160] sm:$0xf]  ;;  %v9469_v51 = vld [vmem:[%s15464_s1 + $0x16c] sm:$0xf0]  ;;  %v6334_v56 = vor.u32 %v9437_v48, %v6333_v47  ;;  %4820 = vmatpush.bf16.msra.mxu2 %v6606_v46 }
  0x13   :  { %v6589_v52 = vld [vmem:[%s15464_s1 + $0x260] sm:$0xf]  ;;  %v9501_v53 = vld [vmem:[%s15464_s1 + $0x26c] sm:$0xf0]  ;;  %v6462_v57 = vor.u32 %v9469_v51, %v6461_v49  ;;  %4833 = vmatpush.bf16.msra.mxu3 %v6734_v50 }
  0x14   :  { %v6717_v54 = vld [vmem:[%s15464_s1 + $0x360] sm:$0xf]  ;;  %v9533_v55 = vld [vmem:[%s15464_s1 + $0x36c] sm:$0xf0]  ;;  %v6590_v58 = vor.u32 %v9501_v53, %v6589_v52  ;;  %4795 = vmatpush.bf16.msra.mxu0 %v6334_v56 }
  0x15   :  { %v6317_v59 = vld [vmem:[%s15464_s1 + $0x40] sm:$0xf]  ;;  %v9433_v60 = vld [vmem:[%s15464_s1 + $0x4c] sm:$0xf0]  ;;  %v6718_v62 = vor.u32 %v9533_v55, %v6717_v54  ;;  %4808 = vmatpush.bf16.msra.mxu1 %v6462_v57 }
  0x16   :  { %v6445_v61 = vld [vmem:[%s15464_s1 + $0x140] sm:$0xf]  ;;  %v9465_v63 = vld [vmem:[%s15464_s1 + $0x14c] sm:$0xf0]  ;;  %v6318_v4 = vor.u32 %v9433_v60, %v6317_v59  ;;  %4821 = vmatpush.bf16.msra.mxu2 %v6590_v58 }
  0x17   :  { %v6573_v0 = vld [vmem:[%s15464_s1 + $0x240] sm:$0xf]  ;;  %v9497_v1 = vld [vmem:[%s15464_s1 + $0x24c] sm:$0xf0]  ;;  %v6446_v5 = vor.u32 %v9465_v63, %v6445_v61  ;;  %4834 = vmatpush.bf16.msra.mxu3 %v6718_v62 }
  0x18   :  { %v6701_v2 = vld [vmem:[%s15464_s1 + $0x340] sm:$0xf]  ;;  %v9529_v3 = vld [vmem:[%s15464_s1 + $0x34c] sm:$0xf0]  ;;  %v6574_v6 = vor.u32 %v9497_v1, %v6573_v0  ;;  %4796 = vmatpush.bf16.msra.mxu0 %v6318_v4 }
  0x19   :  { %v6301_v7 = vld [vmem:[%s15464_s1 + $0x20] sm:$0xf]  ;;  %v9429_v8 = vld [vmem:[%s15464_s1 + $0x2c] sm:$0xf0]  ;;  %v6702_v10 = vor.u32 %v9529_v3, %v6701_v2  ;;  %4809 = vmatpush.bf16.msra.mxu1 %v6446_v5 }
  0x1a   :  { %v6429_v9 = vld [vmem:[%s15464_s1 + $0x120] sm:$0xf]  ;;  %v9461_v11 = vld [vmem:[%s15464_s1 + $0x12c] sm:$0xf0]  ;;  %v6302_v16 = vor.u32 %v9429_v8, %v6301_v7  ;;  %4822 = vmatpush.bf16.msra.mxu2 %v6574_v6 }
  0x1b   :  { %v6557_v12 = vld [vmem:[%s15464_s1 + $0x220] sm:$0xf]  ;;  %v9493_v13 = vld [vmem:[%s15464_s1 + $0x22c] sm:$0xf0]  ;;  %v6430_v19 = vor.u32 %v9461_v11, %v6429_v9  ;;  %4835 = vmatpush.bf16.msra.mxu3 %v6702_v10  ;;  %v26_v10 = vld [vmem:[%s15465_s0 + $0x18] sm:$0xff] }
  0x1c   :  { %v6685_v14 = vld [vmem:[%s15464_s1 + $0x320] sm:$0xf]  ;;  %v9525_v15 = vld [vmem:[%s15464_s1 + $0x32c] sm:$0xf0]  ;;  %v6558_v20 = vor.u32 %v9493_v13, %v6557_v12  ;;  %4797 = vmatpush.bf16.msra.mxu0 %v6302_v16  ;;  %v24_v11 = vld [vmem:[%s15465_s0 + $0x8] sm:$0xff]  ;;  %v10551_v16 = vpack.c.bf16 %v26_v10, %v26_v10 }
  0x1d   :  { %v6285_v17 = vld [vmem:[%s15464_s1] sm:$0xf]  ;;  %v9425_v18 = vld [vmem:[%s15464_s1 + $0xc] sm:$0xf0]  ;;  %v6686_v24 = vor.u32 %v9525_v15, %v6685_v14  ;;  %4810 = vmatpush.bf16.msra.mxu1 %v6430_v19 }
  0x1e   :  { %v6413_v21 = vld [vmem:[%s15464_s1 + $0x100] sm:$0xf]  ;;  %v9457_v22 = vld [vmem:[%s15464_s1 + $0x10c] sm:$0xf0]  ;;  %v6286_v31 = vor.u32 %v9425_v18, %v6285_v17  ;;  %4823 = vmatpush.bf16.msra.mxu2 %v6558_v20  ;;  %v10553_v17 = vpack.c.bf16 %v24_v11, %v24_v11 }
  0x1f   :  { %v6541_v23 = vld [vmem:[%s15464_s1 + $0x200] sm:$0xf]  ;;  %v9489_v25 = vld [vmem:[%s15464_s1 + $0x20c] sm:$0xf0]  ;;  %v6414_v35 = vor.u32 %v9457_v22, %v6413_v21  ;;  %4836 = vmatpush.bf16.msra.mxu3 %v6686_v24 }
  0x20   :  { %v6669_v26 = vld [vmem:[%s15464_s1 + $0x300] sm:$0xf]  ;;  %v9521_v27 = vld [vmem:[%s15464_s1 + $0x30c] sm:$0xf0]  ;;  %v6542_v36 = vor.u32 %v9489_v25, %v6541_v23  ;;  %4798 = vmatpush.bf16.msra.mxu0 %v6286_v31 }
  0x21   :  { %v6909_v28 = vld [vmem:[%s15464_s1 + $0x4e0] sm:$0xf]  ;;  %v9581_v29 = vld [vmem:[%s15464_s1 + $0x4ec] sm:$0xf0]  ;;  %v6670_v39 = vor.u32 %v9521_v27, %v6669_v26  ;;  %4811 = vmatpush.bf16.msra.mxu1 %v6414_v35 }
  0x22   :  { %v7037_v30 = vld [vmem:[%s15464_s1 + $0x5e0] sm:$0xf]  ;;  %v9613_v32 = vld [vmem:[%s15464_s1 + $0x5ec] sm:$0xf0]  ;;  %v6910_v40 = vor.u32 %v9581_v29, %v6909_v28  ;;  %4824 = vmatpush.bf16.msra.mxu2 %v6542_v36 }
  0x23   :  { %v7165_v33 = vld [vmem:[%s15464_s1 + $0x6e0] sm:$0xf]  ;;  %v9645_v34 = vld [vmem:[%s15464_s1 + $0x6ec] sm:$0xf0]  ;;  %v7038_v41 = vor.u32 %v9613_v32, %v7037_v30  ;;  %4837 = vmatpush.bf16.msra.mxu3 %v6670_v39 }
  0x24   :  { %v7293_v37 = vld [vmem:[%s15464_s1 + $0x7e0] sm:$0xf]  ;;  %v9677_v38 = vld [vmem:[%s15464_s1 + $0x7ec] sm:$0xf0]  ;;  %v7166_v42 = vor.u32 %v9645_v34, %v7165_v33  ;;  %4843 = vmatpush.bf16.msrb.mxu0 %v6910_v40  ;;  %4812 = vmatmul.bf16.vlgmr.msra.gmra.mxu1 %v10553_v17 }
  0x25   :  { %v6893_v43 = vld [vmem:[%s15464_s1 + $0x4c0] sm:$0xf]  ;;  %v9577_v44 = vld [vmem:[%s15464_s1 + $0x4cc] sm:$0xf0]  ;;  %v7294_v46 = vor.u32 %v9677_v38, %v7293_v37  ;;  %4856 = vmatpush.bf16.msrb.mxu1 %v7038_v41 }
  0x26   :  { %v7021_v45 = vld [vmem:[%s15464_s1 + $0x5c0] sm:$0xf]  ;;  %v9609_v47 = vld [vmem:[%s15464_s1 + $0x5cc] sm:$0xf0]  ;;  %v6894_v52 = vor.u32 %v9577_v44, %v6893_v43  ;;  %4869 = vmatpush.bf16.msrb.mxu2 %v7166_v42  ;;  %4838 = vmatmul.bf16.vlgmr.msra.gmra.mxu3 %v10551_v16 }
  0x27   :  { %v7149_v48 = vld [vmem:[%s15464_s1 + $0x6c0] sm:$0xf]  ;;  %v9641_v49 = vld [vmem:[%s15464_s1 + $0x6cc] sm:$0xf0]  ;;  %v7022_v54 = vor.u32 %v9609_v47, %v7021_v45  ;;  %4882 = vmatpush.bf16.msrb.mxu3 %v7294_v46 }
  0x28   :  { %v7277_v50 = vld [vmem:[%s15464_s1 + $0x7c0] sm:$0xf]  ;;  %v9673_v51 = vld [vmem:[%s15464_s1 + $0x7cc] sm:$0xf0]  ;;  %v7150_v55 = vor.u32 %v9641_v49, %v7149_v48  ;;  %4844 = vmatpush.bf16.msrb.mxu0 %v6894_v52 }
  0x29   :  { %v6877_v53 = vld [vmem:[%s15464_s1 + $0x4a0] sm:$0xf]  ;;  %v9573_v56 = vld [vmem:[%s15464_s1 + $0x4ac] sm:$0xf0]  ;;  %v7278_v59 = vor.u32 %v9673_v51, %v7277_v50  ;;  %4857 = vmatpush.bf16.msrb.mxu1 %v7022_v54 }
  0x2a   :  { %v7005_v57 = vld [vmem:[%s15464_s1 + $0x5a0] sm:$0xf]  ;;  %v25_v58 = vld [vmem:[%s15465_s0 + $0x10] sm:$0xff]  ;;  %v6878_v2 = vor.u32 %v9573_v56, %v6877_v53  ;;  %4870 = vmatpush.bf16.msrb.mxu2 %v7150_v55 }
  0x2b   :  { %v9605_v60 = vld [vmem:[%s15464_s1 + $0x5ac] sm:$0xf0]  ;;  %v7133_v61 = vld [vmem:[%s15464_s1 + $0x6a0] sm:$0xf]  ;;  %v10513_v63 = vpack.c.bf16 %v25_v58, %v25_v58  ;;  %4883 = vmatpush.bf16.msrb.mxu3 %v7278_v59 }
  0x2c   :  { %v9637_v62 = vld [vmem:[%s15464_s1 + $0x6ac] sm:$0xf0]  ;;  %v7261_v0 = vld [vmem:[%s15464_s1 + $0x7a0] sm:$0xf]  ;;  %v7006_v6 = vor.u32 %v9605_v60, %v7005_v57  ;;  %4845 = vmatpush.bf16.msrb.mxu0 %v6878_v2 }
  0x2d   :  { %v9669_v1 = vld [vmem:[%s15464_s1 + $0x7ac] sm:$0xf0]  ;;  %v6861_v3 = vld [vmem:[%s15464_s1 + $0x480] sm:$0xf]  ;;  %4825 = vmatmul.bf16.vlgmr.msra.gmra.mxu2 %v10513_v63  ;;  %v7134_v7 = vor.u32 %v9637_v62, %v7133_v61 }
  0x2e   :  { %v9569_v4 = vld [vmem:[%s15464_s1 + $0x48c] sm:$0xf0]  ;;  %v23_v5 = vld [vmem:[%s15465_s0] sm:$0xff]  ;;  %v7262_v12 = vor.u32 %v9669_v1, %v7261_v0  ;;  %4858 = vmatpush.bf16.msrb.mxu1 %v7006_v6 }
  0x2f   :  { %v6989_v8 = vld [vmem:[%s15464_s1 + $0x580] sm:$0xf]  ;;  %v10534_v9 = vpack.c.bf16 %v23_v5, %v23_v5  ;;  %v9601_v13 = vld [vmem:[%s15464_s1 + $0x58c] sm:$0xf0]  ;;  %v6862_v20 = vor.u32 %v9569_v4, %v6861_v3  ;;  %4871 = vmatpush.bf16.msrb.mxu2 %v7134_v7 }
  0x30   :  { %v7117_v14 = vld [vmem:[%s15464_s1 + $0x680] sm:$0xf]  ;;  %v9633_v15 = vld [vmem:[%s15464_s1 + $0x68c] sm:$0xf0]  ;;  %v6990_v21 = vor.u32 %v9601_v13, %v6989_v8  ;;  %4884 = vmatpush.bf16.msrb.mxu3 %v7262_v12 }
  0x31   :  { %v7245_v18 = vld [vmem:[%s15464_s1 + $0x780] sm:$0xf]  ;;  %v9665_v19 = vld [vmem:[%s15464_s1 + $0x78c] sm:$0xf0]  ;;  %4799 = vmatmul.bf16.vlgmr.msra.gmra.mxu0 %v10534_v9  ;;  %v7118_v22 = vor.u32 %v9633_v15, %v7117_v14 }
  0x32   :  { %v6845_v23 = vld [vmem:[%s15464_s1 + $0x460] sm:$0xf]  ;;  %v9565_v24 = vld [vmem:[%s15464_s1 + $0x46c] sm:$0xf0]  ;;  %v7246_v26 = vor.u32 %v9665_v19, %v7245_v18  ;;  %4846 = vmatpush.bf16.msrb.mxu0 %v6862_v20  ;;  %4859 = vmatpush.bf16.msrb.mxu1 %v6990_v21 }
  0x33   :  { %v6973_v25 = vld [vmem:[%s15464_s1 + $0x560] sm:$0xf]  ;;  %v9597_v27 = vld [vmem:[%s15464_s1 + $0x56c] sm:$0xf0]  ;;  %v6846_v32 = vor.u32 %v9565_v24, %v6845_v23  ;;  %4872 = vmatpush.bf16.msrb.mxu2 %v7118_v22  ;;  %v30_v24 = vld [vmem:[%s15465_s0 + $0x38] sm:$0xff] }
  0x34   :  { %v7101_v28 = vld [vmem:[%s15464_s1 + $0x660] sm:$0xf]  ;;  %v9629_v29 = vld [vmem:[%s15464_s1 + $0x66c] sm:$0xf0]  ;;  %v6974_v33 = vor.u32 %v9597_v27, %v6973_v25  ;;  %4885 = vmatpush.bf16.msrb.mxu3 %v7246_v26 }
  0x35   :  { %v7229_v30 = vld [vmem:[%s15464_s1 + $0x760] sm:$0xf]  ;;  %v9661_v31 = vld [vmem:[%s15464_s1 + $0x76c] sm:$0xf0]  ;;  %v7102_v34 = vor.u32 %v9629_v29, %v7101_v28  ;;  %v28_v29 = vld [vmem:[%s15465_s0 + $0x28] sm:$0xff] }
  0x36   :  { %v6829_v35 = vld [vmem:[%s15464_s1 + $0x440] sm:$0xf]  ;;  %v9561_v36 = vld [vmem:[%s15464_s1 + $0x44c] sm:$0xf0]  ;;  %v7230_v38 = vor.u32 %v9661_v31, %v7229_v30  ;;  %4847 = vmatpush.bf16.msrb.mxu0 %v6846_v32  ;;  %4860 = vmatpush.bf16.msrb.mxu1 %v6974_v33 }
  0x37   :  { %v6957_v37 = vld [vmem:[%s15464_s1 + $0x540] sm:$0xf]  ;;  %v9593_v39 = vld [vmem:[%s15464_s1 + $0x54c] sm:$0xf0]  ;;  %v6830_v44 = vor.u32 %v9561_v36, %v6829_v35  ;;  %4873 = vmatpush.bf16.msrb.mxu2 %v7102_v34 }
  0x38   :  { %v7085_v40 = vld [vmem:[%s15464_s1 + $0x640] sm:$0xf]  ;;  %v9625_v41 = vld [vmem:[%s15464_s1 + $0x64c] sm:$0xf0]  ;;  %v6958_v45 = vor.u32 %v9593_v39, %v6957_v37  ;;  %4886 = vmatpush.bf16.msrb.mxu3 %v7230_v38  ;;  %v10724_v38 = vpack.c.bf16 %v30_v24, %v30_v24 }
  0x39   :  { %v7213_v42 = vld [vmem:[%s15464_s1 + $0x740] sm:$0xf]  ;;  %v9657_v43 = vld [vmem:[%s15464_s1 + $0x74c] sm:$0xf0]  ;;  %v7086_v46 = vor.u32 %v9625_v41, %v7085_v40  ;;  %v10726_v40 = vpack.c.bf16 %v28_v29, %v28_v29 }
  0x3a   :  { %v6813_v47 = vld [vmem:[%s15464_s1 + $0x420] sm:$0xf]  ;;  %v9557_v48 = vld [vmem:[%s15464_s1 + $0x42c] sm:$0xf0]  ;;  %v7214_v50 = vor.u32 %v9657_v43, %v7213_v42  ;;  %4848 = vmatpush.bf16.msrb.mxu0 %v6830_v44  ;;  %4861 = vmatpush.bf16.msrb.mxu1 %v6958_v45 }
  0x3b   :  { %v6941_v49 = vld [vmem:[%s15464_s1 + $0x520] sm:$0xf]  ;;  %v9589_v51 = vld [vmem:[%s15464_s1 + $0x52c] sm:$0xf0]  ;;  %v6814_v56 = vor.u32 %v9557_v48, %v6813_v47  ;;  %4874 = vmatpush.bf16.msrb.mxu2 %v7086_v46 }
  0x3c   :  { %v7069_v52 = vld [vmem:[%s15464_s1 + $0x620] sm:$0xf]  ;;  %v9621_v53 = vld [vmem:[%s15464_s1 + $0x62c] sm:$0xf0]  ;;  %v6942_v59 = vor.u32 %v9589_v51, %v6941_v49  ;;  %4887 = vmatpush.bf16.msrb.mxu3 %v7214_v50 }
  0x3d   :  { %v7197_v54 = vld [vmem:[%s15464_s1 + $0x720] sm:$0xf]  ;;  %v9653_v55 = vld [vmem:[%s15464_s1 + $0x72c] sm:$0xf0]  ;;  %v7070_v60 = vor.u32 %v9621_v53, %v7069_v52 }
  0x3e   :  { %v6797_v57 = vld [vmem:[%s15464_s1 + $0x400] sm:$0xf]  ;;  %v9553_v58 = vld [vmem:[%s15464_s1 + $0x40c] sm:$0xf0]  ;;  %v7198_v1 = vor.u32 %v9653_v55, %v7197_v54  ;;  %4849 = vmatpush.bf16.msrb.mxu0 %v6814_v56  ;;  %4862 = vmatpush.bf16.msrb.mxu1 %v6942_v59 }
  0x3f   :  { %v6925_v61 = vld [vmem:[%s15464_s1 + $0x500] sm:$0xf]  ;;  %v9585_v62 = vld [vmem:[%s15464_s1 + $0x50c] sm:$0xf0]  ;;  %v6798_v8 = vor.u32 %v9553_v58, %v6797_v57  ;;  %4875 = vmatpush.bf16.msrb.mxu2 %v7070_v60 }
  0x40   :  { %v7053_v0 = vld [vmem:[%s15464_s1 + $0x600] sm:$0xf]  ;;  %v9617_v2 = vld [vmem:[%s15464_s1 + $0x60c] sm:$0xf0]  ;;  %v6926_v13 = vor.u32 %v9585_v62, %v6925_v61  ;;  %4888 = vmatpush.bf16.msrb.mxu3 %v7198_v1 }
  0x41   :  { %v7181_v3 = vld [vmem:[%s15464_s1 + $0x700] sm:$0xf]  ;;  %v9649_v4 = vld [vmem:[%s15464_s1 + $0x70c] sm:$0xf0]  ;;  %v7054_v14 = vor.u32 %v9617_v2, %v7053_v0 }
  0x42   :  { %v7421_v5 = vld [vmem:[%s15464_s1 + $0x8e0] sm:$0xf]  ;;  %v9709_v6 = vld [vmem:[%s15464_s1 + $0x8ec] sm:$0xf0]  ;;  %v7182_v20 = vor.u32 %v9649_v4, %v7181_v3  ;;  %4850 = vmatpush.bf16.msrb.mxu0 %v6798_v8  ;;  %4863 = vmatpush.bf16.msrb.mxu1 %v6926_v13 }
  0x43   :  { %v7549_v7 = vld [vmem:[%s15464_s1 + $0x9e0] sm:$0xf]  ;;  %v9741_v10 = vld [vmem:[%s15464_s1 + $0x9ec] sm:$0xf0]  ;;  %v7422_v21 = vor.u32 %v9709_v6, %v7421_v5  ;;  %4876 = vmatpush.bf16.msrb.mxu2 %v7054_v14 }
  0x44   :  { %v7677_v11 = vld [vmem:[%s15464_s1 + $0xae0] sm:$0xf]  ;;  %v9773_v12 = vld [vmem:[%s15464_s1 + $0xaec] sm:$0xf0]  ;;  %v7550_v25 = vor.u32 %v9741_v10, %v7549_v7  ;;  %4889 = vmatpush.bf16.msrb.mxu3 %v7182_v20 }
  0x45   :  { %v7805_v15 = vld [vmem:[%s15464_s1 + $0xbe0] sm:$0xf]  ;;  %v9805_v18 = vld [vmem:[%s15464_s1 + $0xbec] sm:$0xf0]  ;;  %v7678_v26 = vor.u32 %v9773_v12, %v7677_v11  ;;  %4864 = vmatmul.bf16.vlgmr.msrb.gmra.mxu1 %v10726_v40 }
  0x46   :  { %v29_v19 = vld [vmem:[%s15465_s0 + $0x30] sm:$0xff]  ;;  %v7405_v22 = vld [vmem:[%s15464_s1 + $0x8c0] sm:$0xf]  ;;  %v7806_v30 = vor.u32 %v9805_v18, %v7805_v15  ;;  %4895 = vmatpush.bf16.msra.mxu0 %v7422_v21  ;;  %4908 = vmatpush.bf16.msra.mxu1 %v7550_v25 }
  0x47   :  { %v27_v23 = vld [vmem:[%s15465_s0 + $0x20] sm:$0xff]  ;;  %v9705_v27 = vld [vmem:[%s15464_s1 + $0x8cc] sm:$0xf0]  ;;  %v10714_v34 = vpack.c.bf16 %v29_v19, %v29_v19  ;;  %4921 = vmatpush.bf16.msra.mxu2 %v7678_v26  ;;  %4890 = vmatmul.bf16.vlgmr.msrb.gmra.mxu3 %v10724_v38 }
  0x48   :  { %v7533_v28 = vld [vmem:[%s15464_s1 + $0x9c0] sm:$0xf]  ;;  %v9737_v31 = vld [vmem:[%s15464_s1 + $0x9cc] sm:$0xf0]  ;;  %v10722_v37 = vpack.c.bf16 %v27_v23, %v27_v23  ;;  %v7406_v39 = vor.u32 %v9705_v27, %v7405_v22  ;;  %4934 = vmatpush.bf16.msra.mxu3 %v7806_v30 }
  0x49   :  { %v7661_v32 = vld [vmem:[%s15464_s1 + $0xac0] sm:$0xf]  ;;  %v9769_v33 = vld [vmem:[%s15464_s1 + $0xacc] sm:$0xf0]  ;;  %v7534_v41 = vor.u32 %v9737_v31, %v7533_v28  ;;  %4877 = vmatmul.bf16.vlgmr.msrb.gmra.mxu2 %v10714_v34 }
  0x4a   :  { %v7789_v35 = vld [vmem:[%s15464_s1 + $0xbc0] sm:$0xf]  ;;  %v9801_v36 = vld [vmem:[%s15464_s1 + $0xbcc] sm:$0xf0]  ;;  %v7662_v42 = vor.u32 %v9769_v33, %v7661_v32  ;;  %4851 = vmatmul.bf16.vlgmr.msrb.gmra.mxu0 %v10722_v37 }
  0x4b   :  { %v7389_v43 = vld [vmem:[%s15464_s1 + $0x8a0] sm:$0xf]  ;;  %v9701_v44 = vld [vmem:[%s15464_s1 + $0x8ac] sm:$0xf0]  ;;  %v7790_v46 = vor.u32 %v9801_v36, %v7789_v35  ;;  %4896 = vmatpush.bf16.msra.mxu0 %v7406_v39  ;;  %4909 = vmatpush.bf16.msra.mxu1 %v7534_v41 }
  0x4c   :  { %v7517_v45 = vld [vmem:[%s15464_s1 + $0x9a0] sm:$0xf]  ;;  %v9733_v47 = vld [vmem:[%s15464_s1 + $0x9ac] sm:$0xf0]  ;;  %v7390_v52 = vor.u32 %v9701_v44, %v7389_v43  ;;  %4922 = vmatpush.bf16.msra.mxu2 %v7662_v42 }
  0x4d   :  { %v7645_v48 = vld [vmem:[%s15464_s1 + $0xaa0] sm:$0xf]  ;;  %v9765_v49 = vld [vmem:[%s15464_s1 + $0xaac] sm:$0xf0]  ;;  %v7518_v53 = vor.u32 %v9733_v47, %v7517_v45  ;;  %4935 = vmatpush.bf16.msra.mxu3 %v7790_v46 }
  0x4e   :  { %v7773_v50 = vld [vmem:[%s15464_s1 + $0xba0] sm:$0xf]  ;;  %v9797_v51 = vld [vmem:[%s15464_s1 + $0xbac] sm:$0xf0]  ;;  %v7646_v54 = vor.u32 %v9765_v49, %v7645_v48 }
  0x4f   :  { %v7373_v55 = vld [vmem:[%s15464_s1 + $0x880] sm:$0xf]  ;;  %v9697_v56 = vld [vmem:[%s15464_s1 + $0x88c] sm:$0xf0]  ;;  %v7774_v58 = vor.u32 %v9797_v51, %v7773_v50  ;;  %4897 = vmatpush.bf16.msra.mxu0 %v7390_v52  ;;  %4910 = vmatpush.bf16.msra.mxu1 %v7518_v53 }
  0x50   :  { %v7501_v57 = vld [vmem:[%s15464_s1 + $0x980] sm:$0xf]  ;;  %v9729_v59 = vld [vmem:[%s15464_s1 + $0x98c] sm:$0xf0]  ;;  %v7374_v1 = vor.u32 %v9697_v56, %v7373_v55  ;;  %4923 = vmatpush.bf16.msra.mxu2 %v7646_v54 }
  0x51   :  { %v7629_v60 = vld [vmem:[%s15464_s1 + $0xa80] sm:$0xf]  ;;  %v9761_v61 = vld [vmem:[%s15464_s1 + $0xa8c] sm:$0xf0]  ;;  %v7502_v2 = vor.u32 %v9729_v59, %v7501_v57  ;;  %4936 = vmatpush.bf16.msra.mxu3 %v7774_v58 }
  0x52   :  { %v7757_v62 = vld [vmem:[%s15464_s1 + $0xb80] sm:$0xf]  ;;  %v9793_v0 = vld [vmem:[%s15464_s1 + $0xb8c] sm:$0xf0]  ;;  %v7630_v3 = vor.u32 %v9761_v61, %v7629_v60 }
  0x53   :  { %v7357_v4 = vld [vmem:[%s15464_s1 + $0x860] sm:$0xf]  ;;  %v9693_v5 = vld [vmem:[%s15464_s1 + $0x86c] sm:$0xf0]  ;;  %v7758_v7 = vor.u32 %v9793_v0, %v7757_v62  ;;  %4898 = vmatpush.bf16.msra.mxu0 %v7374_v1  ;;  %4911 = vmatpush.bf16.msra.mxu1 %v7502_v2 }
  0x54   :  { %v7485_v6 = vld [vmem:[%s15464_s1 + $0x960] sm:$0xf]  ;;  %v9725_v8 = vld [vmem:[%s15464_s1 + $0x96c] sm:$0xf0]  ;;  %v7358_v14 = vor.u32 %v9693_v5, %v7357_v4  ;;  %4924 = vmatpush.bf16.msra.mxu2 %v7630_v3 }
  0x55   :  { %v7613_v10 = vld [vmem:[%s15464_s1 + $0xa60] sm:$0xf]  ;;  %v9757_v11 = vld [vmem:[%s15464_s1 + $0xa6c] sm:$0xf0]  ;;  %v7486_v15 = vor.u32 %v9725_v8, %v7485_v6  ;;  %4937 = vmatpush.bf16.msra.mxu3 %v7758_v7  ;;  %v32_v8 = vld [vmem:[%s15465_s0 + $0x48] sm:$0xff] }
  0x56   :  { %v7741_v12 = vld [vmem:[%s15464_s1 + $0xb60] sm:$0xf]  ;;  %v9789_v13 = vld [vmem:[%s15464_s1 + $0xb6c] sm:$0xf0]  ;;  %v7614_v18 = vor.u32 %v9757_v11, %v7613_v10  ;;  %v34_v10 = vld [vmem:[%s15465_s0 + $0x58] sm:$0xff] }
  0x57   :  { %v7341_v19 = vld [vmem:[%s15464_s1 + $0x840] sm:$0xf]  ;;  %v9689_v20 = vld [vmem:[%s15464_s1 + $0x84c] sm:$0xf0]  ;;  %v7742_v22 = vor.u32 %v9789_v13, %v7741_v12  ;;  %4899 = vmatpush.bf16.msra.mxu0 %v7358_v14  ;;  %4912 = vmatpush.bf16.msra.mxu1 %v7486_v15 }
  0x58   :  { %v7469_v21 = vld [vmem:[%s15464_s1 + $0x940] sm:$0xf]  ;;  %v9721_v23 = vld [vmem:[%s15464_s1 + $0x94c] sm:$0xf0]  ;;  %v7342_v28 = vor.u32 %v9689_v20, %v7341_v19  ;;  %4925 = vmatpush.bf16.msra.mxu2 %v7614_v18 }
  0x59   :  { %v7597_v24 = vld [vmem:[%s15464_s1 + $0xa40] sm:$0xf]  ;;  %v9753_v25 = vld [vmem:[%s15464_s1 + $0xa4c] sm:$0xf0]  ;;  %v7470_v29 = vor.u32 %v9721_v23, %v7469_v21  ;;  %4938 = vmatpush.bf16.msra.mxu3 %v7742_v22 }
  0x5a   :  { %v7725_v26 = vld [vmem:[%s15464_s1 + $0xb40] sm:$0xf]  ;;  %v9785_v27 = vld [vmem:[%s15464_s1 + $0xb4c] sm:$0xf0]  ;;  %v7598_v30 = vor.u32 %v9753_v25, %v7597_v24  ;;  %v10934_v24 = vpack.c.bf16 %v32_v8, %v32_v8 }
  0x5b   :  { %v7325_v31 = vld [vmem:[%s15464_s1 + $0x820] sm:$0xf]  ;;  %v9685_v32 = vld [vmem:[%s15464_s1 + $0x82c] sm:$0xf0]  ;;  %v7726_v35 = vor.u32 %v9785_v27, %v7725_v26  ;;  %4900 = vmatpush.bf16.msra.mxu0 %v7342_v28  ;;  %4913 = vmatpush.bf16.msra.mxu1 %v7470_v29  ;;  %v10942_v27 = vpack.c.bf16 %v34_v10, %v34_v10 }
  0x5c   :  { %v7453_v33 = vld [vmem:[%s15464_s1 + $0x920] sm:$0xf]  ;;  %v9717_v36 = vld [vmem:[%s15464_s1 + $0x92c] sm:$0xf0]  ;;  %v7326_v44 = vor.u32 %v9685_v32, %v7325_v31  ;;  %4926 = vmatpush.bf16.msra.mxu2 %v7598_v30 }
  0x5d   :  { %v7581_v39 = vld [vmem:[%s15464_s1 + $0xa20] sm:$0xf]  ;;  %v9749_v41 = vld [vmem:[%s15464_s1 + $0xa2c] sm:$0xf0]  ;;  %v7454_v47 = vor.u32 %v9717_v36, %v7453_v33  ;;  %4939 = vmatpush.bf16.msra.mxu3 %v7726_v35 }
  0x5e   :  { %v7709_v42 = vld [vmem:[%s15464_s1 + $0xb20] sm:$0xf]  ;;  %v9781_v43 = vld [vmem:[%s15464_s1 + $0xb2c] sm:$0xf0]  ;;  %v7582_v48 = vor.u32 %v9749_v41, %v7581_v39 }
  0x5f   :  { %v7309_v45 = vld [vmem:[%s15464_s1 + $0x800] sm:$0xf]  ;;  %v9681_v46 = vld [vmem:[%s15464_s1 + $0x80c] sm:$0xf0]  ;;  %v7710_v52 = vor.u32 %v9781_v43, %v7709_v42  ;;  %4901 = vmatpush.bf16.msra.mxu0 %v7326_v44  ;;  %4914 = vmatpush.bf16.msra.mxu1 %v7454_v47 }
  0x60   :  { %v7437_v49 = vld [vmem:[%s15464_s1 + $0x900] sm:$0xf]  ;;  %v9713_v50 = vld [vmem:[%s15464_s1 + $0x90c] sm:$0xf0]  ;;  %v7310_v59 = vor.u32 %v9681_v46, %v7309_v45  ;;  %4927 = vmatpush.bf16.msra.mxu2 %v7582_v48 }
  0x61   :  { %v7565_v51 = vld [vmem:[%s15464_s1 + $0xa00] sm:$0xf]  ;;  %v9745_v53 = vld [vmem:[%s15464_s1 + $0xa0c] sm:$0xf0]  ;;  %v7438_v0 = vor.u32 %v9713_v50, %v7437_v49  ;;  %4940 = vmatpush.bf16.msra.mxu3 %v7710_v52 }
  0x62   :  { %v7693_v54 = vld [vmem:[%s15464_s1 + $0xb00] sm:$0xf]  ;;  %v9777_v55 = vld [vmem:[%s15464_s1 + $0xb0c] sm:$0xf0]  ;;  %v7566_v1 = vor.u32 %v9745_v53, %v7565_v51 }
  0x63   :  { %v7933_v56 = vld [vmem:[%s15464_s1 + $0xce0] sm:$0xf]  ;;  %v9837_v57 = vld [vmem:[%s15464_s1 + $0xcec] sm:$0xf0]  ;;  %v7694_v5 = vor.u32 %v9777_v55, %v7693_v54  ;;  %4902 = vmatpush.bf16.msra.mxu0 %v7310_v59  ;;  %4915 = vmatpush.bf16.msra.mxu1 %v7438_v0 }
  0x64   :  { %v8061_v58 = vld [vmem:[%s15464_s1 + $0xde0] sm:$0xf]  ;;  %v9869_v60 = vld [vmem:[%s15464_s1 + $0xdec] sm:$0xf0]  ;;  %v7934_v6 = vor.u32 %v9837_v57, %v7933_v56  ;;  %4928 = vmatpush.bf16.msra.mxu2 %v7566_v1 }
  0x65   :  { %v8189_v61 = vld [vmem:[%s15464_s1 + $0xee0] sm:$0xf]  ;;  %v9901_v62 = vld [vmem:[%s15464_s1 + $0xeec] sm:$0xf0]  ;;  %v8062_v11 = vor.u32 %v9869_v60, %v8061_v58  ;;  %4941 = vmatpush.bf16.msra.mxu3 %v7694_v5 }
  0x66   :  { %v8317_v2 = vld [vmem:[%s15464_s1 + $0xfe0] sm:$0xf]  ;;  %v9933_v3 = vld [vmem:[%s15464_s1 + $0xfec] sm:$0xf0]  ;;  %v8190_v12 = vor.u32 %v9901_v62, %v8189_v61  ;;  %4916 = vmatmul.bf16.vlgmr.msra.gmra.mxu1 %v10934_v24 }
  0x67   :  { %v31_v4 = vld [vmem:[%s15465_s0 + $0x40] sm:$0xff]  ;;  %v33_v7 = vld [vmem:[%s15465_s0 + $0x50] sm:$0xff]  ;;  %v8318_v18 = vor.u32 %v9933_v3, %v8317_v2  ;;  %4947 = vmatpush.bf16.msrb.mxu0 %v7934_v6  ;;  %4960 = vmatpush.bf16.msrb.mxu1 %v8062_v11 }
  0x68   :  { %v7917_v13 = vld [vmem:[%s15464_s1 + $0xcc0] sm:$0xf]  ;;  %v9833_v14 = vld [vmem:[%s15464_s1 + $0xccc] sm:$0xf0]  ;;  %v10921_v19 = vpack.c.bf16 %v31_v4, %v31_v4  ;;  %v10932_v23 = vpack.c.bf16 %v33_v7, %v33_v7  ;;  %4973 = vmatpush.bf16.msrb.mxu2 %v8190_v12  ;;  %4942 = vmatmul.bf16.vlgmr.msra.gmra.mxu3 %v10942_v27 }
  0x69   :  { %v8045_v15 = vld [vmem:[%s15464_s1 + $0xdc0] sm:$0xf]  ;;  %v9865_v20 = vld [vmem:[%s15464_s1 + $0xdcc] sm:$0xf0]  ;;  %v7918_v28 = vor.u32 %v9833_v14, %v7917_v13  ;;  %4986 = vmatpush.bf16.msrb.mxu3 %v8318_v18 }
  0x6a   :  { %v8173_v21 = vld [vmem:[%s15464_s1 + $0xec0] sm:$0xf]  ;;  %v9897_v22 = vld [vmem:[%s15464_s1 + $0xecc] sm:$0xf0]  ;;  %v8046_v29 = vor.u32 %v9865_v20, %v8045_v15  ;;  %4903 = vmatmul.bf16.vlgmr.msra.gmra.mxu0 %v10921_v19  ;;  %4929 = vmatmul.bf16.vlgmr.msra.gmra.mxu2 %v10932_v23 }
  0x6b   :  { %v8301_v25 = vld [vmem:[%s15464_s1 + $0xfc0] sm:$0xf]  ;;  %v9929_v26 = vld [vmem:[%s15464_s1 + $0xfcc] sm:$0xf0]  ;;  %v8174_v30 = vor.u32 %v9897_v22, %v8173_v21  ;;  %4948 = vmatpush.bf16.msrb.mxu0 %v7918_v28 }
  0x6c   :  { %v7901_v31 = vld [vmem:[%s15464_s1 + $0xca0] sm:$0xf]  ;;  %v9829_v32 = vld [vmem:[%s15464_s1 + $0xcac] sm:$0xf0]  ;;  %v8302_v35 = vor.u32 %v9929_v26, %v8301_v25  ;;  %4961 = vmatpush.bf16.msrb.mxu1 %v8046_v29 }
  0x6d   :  { %v8029_v33 = vld [vmem:[%s15464_s1 + $0xda0] sm:$0xf]  ;;  %v9861_v36 = vld [vmem:[%s15464_s1 + $0xdac] sm:$0xf0]  ;;  %v7902_v44 = vor.u32 %v9829_v32, %v7901_v31  ;;  %4974 = vmatpush.bf16.msrb.mxu2 %v8174_v30 }
  0x6e   :  { %v8157_v39 = vld [vmem:[%s15464_s1 + $0xea0] sm:$0xf]  ;;  %v9893_v41 = vld [vmem:[%s15464_s1 + $0xeac] sm:$0xf0]  ;;  %v8030_v45 = vor.u32 %v9861_v36, %v8029_v33  ;;  %4987 = vmatpush.bf16.msrb.mxu3 %v8302_v35 }
  0x6f   :  { %v8285_v42 = vld [vmem:[%s15464_s1 + $0xfa0] sm:$0xf]  ;;  %v9925_v43 = vld [vmem:[%s15464_s1 + $0xfac] sm:$0xf0]  ;;  %v8158_v46 = vor.u32 %v9893_v41, %v8157_v39  ;;  %4949 = vmatpush.bf16.msrb.mxu0 %v7902_v44 }
  0x70   :  { %v7885_v47 = vld [vmem:[%s15464_s1 + $0xc80] sm:$0xf]  ;;  %v9825_v48 = vld [vmem:[%s15464_s1 + $0xc8c] sm:$0xf0]  ;;  %v8286_v50 = vor.u32 %v9925_v43, %v8285_v42  ;;  %4962 = vmatpush.bf16.msrb.mxu1 %v8030_v45 }
  0x71   :  { %v8013_v49 = vld [vmem:[%s15464_s1 + $0xd80] sm:$0xf]  ;;  %v9857_v51 = vld [vmem:[%s15464_s1 + $0xd8c] sm:$0xf0]  ;;  %v7886_v56 = vor.u32 %v9825_v48, %v7885_v47  ;;  %4975 = vmatpush.bf16.msrb.mxu2 %v8158_v46 }
  0x72   :  { %v8141_v52 = vld [vmem:[%s15464_s1 + $0xe80] sm:$0xf]  ;;  %v9889_v53 = vld [vmem:[%s15464_s1 + $0xe8c] sm:$0xf0]  ;;  %v8014_v57 = vor.u32 %v9857_v51, %v8013_v49  ;;  %4988 = vmatpush.bf16.msrb.mxu3 %v8286_v50 }
  0x73   :  { %v8269_v54 = vld [vmem:[%s15464_s1 + $0xf80] sm:$0xf]  ;;  %v9921_v55 = vld [vmem:[%s15464_s1 + $0xf8c] sm:$0xf0]  ;;  %v8142_v58 = vor.u32 %v9889_v53, %v8141_v52  ;;  %4950 = vmatpush.bf16.msrb.mxu0 %v7886_v56 }
  0x74   :  { %v7869_v59 = vld [vmem:[%s15464_s1 + $0xc60] sm:$0xf]  ;;  %v9821_v60 = vld [vmem:[%s15464_s1 + $0xc6c] sm:$0xf0]  ;;  %v8270_v62 = vor.u32 %v9921_v55, %v8269_v54  ;;  %4963 = vmatpush.bf16.msrb.mxu1 %v8014_v57 }
  0x75   :  { %v7997_v61 = vld [vmem:[%s15464_s1 + $0xd60] sm:$0xf]  ;;  %v9853_v0 = vld [vmem:[%s15464_s1 + $0xd6c] sm:$0xf0]  ;;  %v7870_v5 = vor.u32 %v9821_v60, %v7869_v59  ;;  %4976 = vmatpush.bf16.msrb.mxu2 %v8142_v58 }
  0x76   :  { %v8125_v1 = vld [vmem:[%s15464_s1 + $0xe60] sm:$0xf]  ;;  %v9885_v2 = vld [vmem:[%s15464_s1 + $0xe6c] sm:$0xf0]  ;;  %v7998_v6 = vor.u32 %v9853_v0, %v7997_v61  ;;  %4989 = vmatpush.bf16.msrb.mxu3 %v8270_v62 }
  0x77   :  { %v8253_v3 = vld [vmem:[%s15464_s1 + $0xf60] sm:$0xf]  ;;  %v9917_v4 = vld [vmem:[%s15464_s1 + $0xf6c] sm:$0xf0]  ;;  %v8126_v7 = vor.u32 %v9885_v2, %v8125_v1  ;;  %4951 = vmatpush.bf16.msrb.mxu0 %v7870_v5  ;;  %v38_v5 = vld [vmem:[%s15465_s0 + $0x78] sm:$0xff] }
  0x78   :  { %v7853_v8 = vld [vmem:[%s15464_s1 + $0xc40] sm:$0xf]  ;;  %v9817_v10 = vld [vmem:[%s15464_s1 + $0xc4c] sm:$0xf0]  ;;  %v8254_v12 = vor.u32 %v9917_v4, %v8253_v3  ;;  %4964 = vmatpush.bf16.msrb.mxu1 %v7998_v6  ;;  %v36_v4 = vld [vmem:[%s15465_s0 + $0x68] sm:$0xff] }
  0x79   :  { %v7981_v11 = vld [vmem:[%s15464_s1 + $0xd40] sm:$0xf]  ;;  %v9849_v13 = vld [vmem:[%s15464_s1 + $0xd4c] sm:$0xf0]  ;;  %v7854_v21 = vor.u32 %v9817_v10, %v7853_v8  ;;  %4977 = vmatpush.bf16.msrb.mxu2 %v8126_v7 }
  0x7a   :  { %v8109_v14 = vld [vmem:[%s15464_s1 + $0xe40] sm:$0xf]  ;;  %v9881_v15 = vld [vmem:[%s15464_s1 + $0xe4c] sm:$0xf0]  ;;  %v7982_v22 = vor.u32 %v9849_v13, %v7981_v11  ;;  %4990 = vmatpush.bf16.msrb.mxu3 %v8254_v12 }
  0x7b   :  { %v8237_v18 = vld [vmem:[%s15464_s1 + $0xf40] sm:$0xf]  ;;  %v9913_v20 = vld [vmem:[%s15464_s1 + $0xf4c] sm:$0xf0]  ;;  %v8110_v25 = vor.u32 %v9881_v15, %v8109_v14  ;;  %4952 = vmatpush.bf16.msrb.mxu0 %v7854_v21  ;;  %v11150_v21 = vpack.c.bf16 %v36_v4, %v36_v4 }
  0x7c   :  { %v7837_v26 = vld [vmem:[%s15464_s1 + $0xc20] sm:$0xf]  ;;  %v9813_v28 = vld [vmem:[%s15464_s1 + $0xc2c] sm:$0xf0]  ;;  %v8238_v30 = vor.u32 %v9913_v20, %v8237_v18  ;;  %4965 = vmatpush.bf16.msrb.mxu1 %v7982_v22 }
  0x7d   :  { %v7965_v29 = vld [vmem:[%s15464_s1 + $0xd20] sm:$0xf]  ;;  %v9845_v31 = vld [vmem:[%s15464_s1 + $0xd2c] sm:$0xf0]  ;;  %v7838_v39 = vor.u32 %v9813_v28, %v7837_v26  ;;  %4978 = vmatpush.bf16.msrb.mxu2 %v8110_v25  ;;  %v11158_v26 = vpack.c.bf16 %v38_v5, %v38_v5 }
  0x7e   :  { %v8093_v32 = vld [vmem:[%s15464_s1 + $0xe20] sm:$0xf]  ;;  %v9877_v33 = vld [vmem:[%s15464_s1 + $0xe2c] sm:$0xf0]  ;;  %v7966_v43 = vor.u32 %v9845_v31, %v7965_v29  ;;  %4991 = vmatpush.bf16.msrb.mxu3 %v8238_v30 }
  0x7f   :  { %v8221_v35 = vld [vmem:[%s15464_s1 + $0xf20] sm:$0xf]  ;;  %v9909_v36 = vld [vmem:[%s15464_s1 + $0xf2c] sm:$0xf0]  ;;  %v8094_v44 = vor.u32 %v9877_v33, %v8093_v32  ;;  %4953 = vmatpush.bf16.msrb.mxu0 %v7838_v39 }
  0x80   :  { %v7821_v41 = vld [vmem:[%s15464_s1 + $0xc00] sm:$0xf]  ;;  %v9809_v42 = vld [vmem:[%s15464_s1 + $0xc0c] sm:$0xf0]  ;;  %v8222_v48 = vor.u32 %v9909_v36, %v8221_v35  ;;  %4966 = vmatpush.bf16.msrb.mxu1 %v7966_v43 }
  0x81   :  { %v7949_v45 = vld [vmem:[%s15464_s1 + $0xd00] sm:$0xf]  ;;  %v9841_v46 = vld [vmem:[%s15464_s1 + $0xd0c] sm:$0xf0]  ;;  %v7822_v55 = vor.u32 %v9809_v42, %v7821_v41  ;;  %4979 = vmatpush.bf16.msrb.mxu2 %v8094_v44 }
  0x82   :  { %v8077_v47 = vld [vmem:[%s15464_s1 + $0xe00] sm:$0xf]  ;;  %v9873_v49 = vld [vmem:[%s15464_s1 + $0xe0c] sm:$0xf0]  ;;  %v7950_v59 = vor.u32 %v9841_v46, %v7949_v45  ;;  %4992 = vmatpush.bf16.msrb.mxu3 %v8222_v48 }
  0x83   :  { %v8205_v50 = vld [vmem:[%s15464_s1 + $0xf00] sm:$0xf]  ;;  %v9905_v51 = vld [vmem:[%s15464_s1 + $0xf0c] sm:$0xf0]  ;;  %v8078_v60 = vor.u32 %v9873_v49, %v8077_v47  ;;  %4954 = vmatpush.bf16.msrb.mxu0 %v7822_v55 }
  0x84   :  { %v8445_v52 = vld [vmem:[%s15464_s1 + $0x10e0] sm:$0xf]  ;;  %v9965_v53 = vld [vmem:[%s15464_s1 + $0x10ec] sm:$0xf0]  ;;  %v8206_v1 = vor.u32 %v9905_v51, %v8205_v50  ;;  %4967 = vmatpush.bf16.msrb.mxu1 %v7950_v59 }
  0x85   :  { %v8573_v54 = vld [vmem:[%s15464_s1 + $0x11e0] sm:$0xf]  ;;  %v9997_v56 = vld [vmem:[%s15464_s1 + $0x11ec] sm:$0xf0]  ;;  %v8446_v2 = vor.u32 %v9965_v53, %v8445_v52  ;;  %4980 = vmatpush.bf16.msrb.mxu2 %v8078_v60 }
  0x86   :  { %v8701_v57 = vld [vmem:[%s15464_s1 + $0x12e0] sm:$0xf]  ;;  %v10029_v58 = vld [vmem:[%s15464_s1 + $0x12ec] sm:$0xf0]  ;;  %v8574_v6 = vor.u32 %v9997_v56, %v8573_v54  ;;  %4993 = vmatpush.bf16.msrb.mxu3 %v8206_v1 }
  0x87   :  { %v8829_v61 = vld [vmem:[%s15464_s1 + $0x13e0] sm:$0xf]  ;;  %v10061_v62 = vld [vmem:[%s15464_s1 + $0x13ec] sm:$0xf0]  ;;  %v8702_v7 = vor.u32 %v10029_v58, %v8701_v57  ;;  %4999 = vmatpush.bf16.msra.mxu0 %v8446_v2  ;;  %4968 = vmatmul.bf16.vlgmr.msrb.gmra.mxu1 %v11150_v21 }
  0x88   :  { %v35_v0 = vld [vmem:[%s15465_s0 + $0x60] sm:$0xff]  ;;  %v37_v3 = vld [vmem:[%s15465_s0 + $0x70] sm:$0xff]  ;;  %v8830_v12 = vor.u32 %v10061_v62, %v8829_v61  ;;  %5012 = vmatpush.bf16.msra.mxu1 %v8574_v6 }
  0x89   :  { %v8429_v8 = vld [vmem:[%s15464_s1 + $0x10c0] sm:$0xf]  ;;  %v9961_v10 = vld [vmem:[%s15464_s1 + $0x10cc] sm:$0xf0]  ;;  %v11137_v13 = vpack.c.bf16 %v35_v0, %v35_v0  ;;  %v11148_v20 = vpack.c.bf16 %v37_v3, %v37_v3  ;;  %5025 = vmatpush.bf16.msra.mxu2 %v8702_v7  ;;  %4994 = vmatmul.bf16.vlgmr.msrb.gmra.mxu3 %v11158_v26 }
  0x8a   :  { %v8557_v11 = vld [vmem:[%s15464_s1 + $0x11c0] sm:$0xf]  ;;  %v9993_v14 = vld [vmem:[%s15464_s1 + $0x11cc] sm:$0xf0]  ;;  %v8430_v28 = vor.u32 %v9961_v10, %v8429_v8  ;;  %5038 = vmatpush.bf16.msra.mxu3 %v8830_v12 }
  0x8b   :  { %v8685_v15 = vld [vmem:[%s15464_s1 + $0x12c0] sm:$0xf]  ;;  %v10025_v18 = vld [vmem:[%s15464_s1 + $0x12cc] sm:$0xf0]  ;;  %v8558_v29 = vor.u32 %v9993_v14, %v8557_v11  ;;  %4955 = vmatmul.bf16.vlgmr.msrb.gmra.mxu0 %v11137_v13  ;;  %4981 = vmatmul.bf16.vlgmr.msrb.gmra.mxu2 %v11148_v20 }
  0x8c   :  { %v8813_v22 = vld [vmem:[%s15464_s1 + $0x13c0] sm:$0xf]  ;;  %v10057_v25 = vld [vmem:[%s15464_s1 + $0x13cc] sm:$0xf0]  ;;  %v8686_v30 = vor.u32 %v10025_v18, %v8685_v15  ;;  %5000 = vmatpush.bf16.msra.mxu0 %v8430_v28 }
  0x8d   :  { %v8413_v31 = vld [vmem:[%s15464_s1 + $0x10a0] sm:$0xf]  ;;  %v9957_v32 = vld [vmem:[%s15464_s1 + $0x10ac] sm:$0xf0]  ;;  %v8814_v35 = vor.u32 %v10057_v25, %v8813_v22  ;;  %5013 = vmatpush.bf16.msra.mxu1 %v8558_v29 }
  0x8e   :  { %v8541_v33 = vld [vmem:[%s15464_s1 + $0x11a0] sm:$0xf]  ;;  %v9989_v36 = vld [vmem:[%s15464_s1 + $0x11ac] sm:$0xf0]  ;;  %v8414_v44 = vor.u32 %v9957_v32, %v8413_v31  ;;  %5026 = vmatpush.bf16.msra.mxu2 %v8686_v30 }
  0x8f   :  { %v8669_v39 = vld [vmem:[%s15464_s1 + $0x12a0] sm:$0xf]  ;;  %v10021_v41 = vld [vmem:[%s15464_s1 + $0x12ac] sm:$0xf0]  ;;  %v8542_v45 = vor.u32 %v9989_v36, %v8541_v33  ;;  %5039 = vmatpush.bf16.msra.mxu3 %v8814_v35 }
  0x90   :  { %v8797_v42 = vld [vmem:[%s15464_s1 + $0x13a0] sm:$0xf]  ;;  %v10053_v43 = vld [vmem:[%s15464_s1 + $0x13ac] sm:$0xf0]  ;;  %v8670_v46 = vor.u32 %v10021_v41, %v8669_v39  ;;  %5001 = vmatpush.bf16.msra.mxu0 %v8414_v44 }
  0x91   :  { %v8397_v47 = vld [vmem:[%s15464_s1 + $0x1080] sm:$0xf]  ;;  %v9953_v48 = vld [vmem:[%s15464_s1 + $0x108c] sm:$0xf0]  ;;  %v8798_v50 = vor.u32 %v10053_v43, %v8797_v42  ;;  %5014 = vmatpush.bf16.msra.mxu1 %v8542_v45 }
  0x92   :  { %v8525_v49 = vld [vmem:[%s15464_s1 + $0x1180] sm:$0xf]  ;;  %v9985_v51 = vld [vmem:[%s15464_s1 + $0x118c] sm:$0xf0]  ;;  %v8398_v56 = vor.u32 %v9953_v48, %v8397_v47  ;;  %5027 = vmatpush.bf16.msra.mxu2 %v8670_v46 }
  0x93   :  { %v8653_v52 = vld [vmem:[%s15464_s1 + $0x1280] sm:$0xf]  ;;  %v10017_v53 = vld [vmem:[%s15464_s1 + $0x128c] sm:$0xf0]  ;;  %v8526_v57 = vor.u32 %v9985_v51, %v8525_v49  ;;  %5040 = vmatpush.bf16.msra.mxu3 %v8798_v50 }
  0x94   :  { %v8781_v54 = vld [vmem:[%s15464_s1 + $0x1380] sm:$0xf]  ;;  %v10049_v55 = vld [vmem:[%s15464_s1 + $0x138c] sm:$0xf0]  ;;  %v8654_v58 = vor.u32 %v10017_v53, %v8653_v52  ;;  %5002 = vmatpush.bf16.msra.mxu0 %v8398_v56 }
  0x95   :  { %v8381_v59 = vld [vmem:[%s15464_s1 + $0x1060] sm:$0xf]  ;;  %v9949_v60 = vld [vmem:[%s15464_s1 + $0x106c] sm:$0xf0]  ;;  %v8782_v62 = vor.u32 %v10049_v55, %v8781_v54  ;;  %5015 = vmatpush.bf16.msra.mxu1 %v8526_v57 }
  0x96   :  { %v8509_v61 = vld [vmem:[%s15464_s1 + $0x1160] sm:$0xf]  ;;  %v9981_v0 = vld [vmem:[%s15464_s1 + $0x116c] sm:$0xf0]  ;;  %v8382_v5 = vor.u32 %v9949_v60, %v8381_v59  ;;  %5028 = vmatpush.bf16.msra.mxu2 %v8654_v58 }
  0x97   :  { %v8637_v1 = vld [vmem:[%s15464_s1 + $0x1260] sm:$0xf]  ;;  %v10013_v2 = vld [vmem:[%s15464_s1 + $0x126c] sm:$0xf0]  ;;  %v8510_v6 = vor.u32 %v9981_v0, %v8509_v61  ;;  %5041 = vmatpush.bf16.msra.mxu3 %v8782_v62 }
  0x98   :  { %v8765_v3 = vld [vmem:[%s15464_s1 + $0x1360] sm:$0xf]  ;;  %v10045_v4 = vld [vmem:[%s15464_s1 + $0x136c] sm:$0xf0]  ;;  %v8638_v7 = vor.u32 %v10013_v2, %v8637_v1  ;;  %5003 = vmatpush.bf16.msra.mxu0 %v8382_v5 }
  0x99   :  { %v8365_v8 = vld [vmem:[%s15464_s1 + $0x1040] sm:$0xf]  ;;  %v9945_v10 = vld [vmem:[%s15464_s1 + $0x104c] sm:$0xf0]  ;;  %v8766_v12 = vor.u32 %v10045_v4, %v8765_v3  ;;  %5016 = vmatpush.bf16.msra.mxu1 %v8510_v6 }
  0x9a   :  { %v8493_v11 = vld [vmem:[%s15464_s1 + $0x1140] sm:$0xf]  ;;  %v9977_v14 = vld [vmem:[%s15464_s1 + $0x114c] sm:$0xf0]  ;;  %v8366_v28 = vor.u32 %v9945_v10, %v8365_v8  ;;  %5029 = vmatpush.bf16.msra.mxu2 %v8638_v7  ;;  %v40_v8 = vld [vmem:[%s15465_s0 + $0x88] sm:$0xff] }
  0x9b   :  { %v8621_v15 = vld [vmem:[%s15464_s1 + $0x1240] sm:$0xf]  ;;  %v10009_v18 = vld [vmem:[%s15464_s1 + $0x124c] sm:$0xf0]  ;;  %v8494_v29 = vor.u32 %v9977_v14, %v8493_v11  ;;  %5042 = vmatpush.bf16.msra.mxu3 %v8766_v12  ;;  %v42_v10 = vld [vmem:[%s15465_s0 + $0x98] sm:$0xff] }
  0x9c   :  { %v8749_v22 = vld [vmem:[%s15464_s1 + $0x1340] sm:$0xf]  ;;  %v10041_v25 = vld [vmem:[%s15464_s1 + $0x134c] sm:$0xf0]  ;;  %v8622_v30 = vor.u32 %v10009_v18, %v8621_v15  ;;  %5004 = vmatpush.bf16.msra.mxu0 %v8366_v28 }
  0x9d   :  { %v8349_v31 = vld [vmem:[%s15464_s1 + $0x1020] sm:$0xf]  ;;  %v9941_v32 = vld [vmem:[%s15464_s1 + $0x102c] sm:$0xf0]  ;;  %v8750_v35 = vor.u32 %v10041_v25, %v8749_v22  ;;  %5017 = vmatpush.bf16.msra.mxu1 %v8494_v29 }
  0x9e   :  { %v8477_v33 = vld [vmem:[%s15464_s1 + $0x1120] sm:$0xf]  ;;  %v9973_v36 = vld [vmem:[%s15464_s1 + $0x112c] sm:$0xf0]  ;;  %v8350_v44 = vor.u32 %v9941_v32, %v8349_v31  ;;  %5030 = vmatpush.bf16.msra.mxu2 %v8622_v30  ;;  %v11366_v32 = vpack.c.bf16 %v40_v8, %v40_v8 }
  0x9f   :  { %v8605_v39 = vld [vmem:[%s15464_s1 + $0x1220] sm:$0xf]  ;;  %v10005_v41 = vld [vmem:[%s15464_s1 + $0x122c] sm:$0xf0]  ;;  %v8478_v47 = vor.u32 %v9973_v36, %v8477_v33  ;;  %5043 = vmatpush.bf16.msra.mxu3 %v8750_v35  ;;  %v11374_v36 = vpack.c.bf16 %v42_v10, %v42_v10 }
  0xa0   :  { %v8733_v42 = vld [vmem:[%s15464_s1 + $0x1320] sm:$0xf]  ;;  %v10037_v43 = vld [vmem:[%s15464_s1 + $0x132c] sm:$0xf0]  ;;  %v8606_v48 = vor.u32 %v10005_v41, %v8605_v39  ;;  %5005 = vmatpush.bf16.msra.mxu0 %v8350_v44 }
  0xa1   :  { %v8333_v45 = vld [vmem:[%s15464_s1 + $0x1000] sm:$0xf]  ;;  %v9937_v46 = vld [vmem:[%s15464_s1 + $0x100c] sm:$0xf0]  ;;  %v8734_v52 = vor.u32 %v10037_v43, %v8733_v42  ;;  %5018 = vmatpush.bf16.msra.mxu1 %v8478_v47 }
  0xa2   :  { %v8461_v49 = vld [vmem:[%s15464_s1 + $0x1100] sm:$0xf]  ;;  %v9969_v50 = vld [vmem:[%s15464_s1 + $0x110c] sm:$0xf0]  ;;  %v8334_v59 = vor.u32 %v9937_v46, %v8333_v45  ;;  %5031 = vmatpush.bf16.msra.mxu2 %v8606_v48 }
  0xa3   :  { %v8589_v51 = vld [vmem:[%s15464_s1 + $0x1200] sm:$0xf]  ;;  %v10001_v53 = vld [vmem:[%s15464_s1 + $0x120c] sm:$0xf0]  ;;  %v8462_v0 = vor.u32 %v9969_v50, %v8461_v49  ;;  %5044 = vmatpush.bf16.msra.mxu3 %v8734_v52 }
  0xa4   :  { %v8717_v54 = vld [vmem:[%s15464_s1 + $0x1300] sm:$0xf]  ;;  %v10033_v55 = vld [vmem:[%s15464_s1 + $0x130c] sm:$0xf0]  ;;  %v8590_v1 = vor.u32 %v10001_v53, %v8589_v51  ;;  %5006 = vmatpush.bf16.msra.mxu0 %v8334_v59 }
  0xa5   :  { %v8957_v56 = vld [vmem:[%s15464_s1 + $0x14e0] sm:$0xf]  ;;  %v10093_v57 = vld [vmem:[%s15464_s1 + $0x14ec] sm:$0xf0]  ;;  %v8718_v5 = vor.u32 %v10033_v55, %v8717_v54  ;;  %5019 = vmatpush.bf16.msra.mxu1 %v8462_v0 }
  0xa6   :  { %v9085_v58 = vld [vmem:[%s15464_s1 + $0x15e0] sm:$0xf]  ;;  %v10125_v60 = vld [vmem:[%s15464_s1 + $0x15ec] sm:$0xf0]  ;;  %v8958_v6 = vor.u32 %v10093_v57, %v8957_v56  ;;  %5032 = vmatpush.bf16.msra.mxu2 %v8590_v1 }
  0xa7   :  { %v9213_v61 = vld [vmem:[%s15464_s1 + $0x16e0] sm:$0xf]  ;;  %v10157_v62 = vld [vmem:[%s15464_s1 + $0x16ec] sm:$0xf0]  ;;  %v9086_v11 = vor.u32 %v10125_v60, %v9085_v58  ;;  %5045 = vmatpush.bf16.msra.mxu3 %v8718_v5 }
  0xa8   :  { %v9341_v2 = vld [vmem:[%s15464_s1 + $0x17e0] sm:$0xf]  ;;  %v10189_v3 = vld [vmem:[%s15464_s1 + $0x17ec] sm:$0xf0]  ;;  %v9214_v12 = vor.u32 %v10157_v62, %v9213_v61  ;;  %5051 = vmatpush.bf16.msrb.mxu0 %v8958_v6  ;;  %5020 = vmatmul.bf16.vlgmr.msra.gmra.mxu1 %v11366_v32 }
  0xa9   :  { %v39_v4 = vld [vmem:[%s15465_s0 + $0x80] sm:$0xff]  ;;  %v41_v7 = vld [vmem:[%s15465_s0 + $0x90] sm:$0xff]  ;;  %v9342_v22 = vor.u32 %v10189_v3, %v9341_v2  ;;  %5064 = vmatpush.bf16.msrb.mxu1 %v9086_v11 }
  0xaa   :  { %v8941_v14 = vld [vmem:[%s15464_s1 + $0x14c0] sm:$0xf]  ;;  %v10089_v15 = vld [vmem:[%s15464_s1 + $0x14cc] sm:$0xf0]  ;;  %v11353_v25 = vpack.c.bf16 %v39_v4, %v39_v4  ;;  %v11364_v31 = vpack.c.bf16 %v41_v7, %v41_v7  ;;  %5077 = vmatpush.bf16.msrb.mxu2 %v9214_v12  ;;  %5046 = vmatmul.bf16.vlgmr.msra.gmra.mxu3 %v11374_v36 }
  0xab   :  { %v9069_v18 = vld [vmem:[%s15464_s1 + $0x15c0] sm:$0xf]  ;;  %v10121_v28 = vld [vmem:[%s15464_s1 + $0x15cc] sm:$0xf0]  ;;  %v8942_v39 = vor.u32 %v10089_v15, %v8941_v14  ;;  %5090 = vmatpush.bf16.msrb.mxu3 %v9342_v22 }
  0xac   :  { %v9197_v29 = vld [vmem:[%s15464_s1 + $0x16c0] sm:$0xf]  ;;  %v10153_v30 = vld [vmem:[%s15464_s1 + $0x16cc] sm:$0xf0]  ;;  %v9070_v41 = vor.u32 %v10121_v28, %v9069_v18  ;;  %5007 = vmatmul.bf16.vlgmr.msra.gmra.mxu0 %v11353_v25  ;;  %5033 = vmatmul.bf16.vlgmr.msra.gmra.mxu2 %v11364_v31 }
  0xad   :  { %v9325_v33 = vld [vmem:[%s15464_s1 + $0x17c0] sm:$0xf]  ;;  %v10185_v35 = vld [vmem:[%s15464_s1 + $0x17cc] sm:$0xf0]  ;;  %v9198_v42 = vor.u32 %v10153_v30, %v9197_v29  ;;  %5052 = vmatpush.bf16.msrb.mxu0 %v8942_v39 }
  0xae   :  { %v8925_v43 = vld [vmem:[%s15464_s1 + $0x14a0] sm:$0xf]  ;;  %v10085_v44 = vld [vmem:[%s15464_s1 + $0x14ac] sm:$0xf0]  ;;  %v9326_v46 = vor.u32 %v10185_v35, %v9325_v33  ;;  %5065 = vmatpush.bf16.msrb.mxu1 %v9070_v41  ;;  %v4800_v28 = vpop.f32.mrf.mxu0 }
  0xaf   :  { %v9053_v45 = vld [vmem:[%s15464_s1 + $0x15a0] sm:$0xf]  ;;  %v10117_v47 = vld [vmem:[%s15464_s1 + $0x15ac] sm:$0xf0]  ;;  %v8926_v52 = vor.u32 %v10085_v44, %v8925_v43  ;;  %5078 = vmatpush.bf16.msrb.mxu2 %v9198_v42 }
  0xb0   :  { %v9181_v48 = vld [vmem:[%s15464_s1 + $0x16a0] sm:$0xf]  ;;  %v10149_v49 = vld [vmem:[%s15464_s1 + $0x16ac] sm:$0xf0]  ;;  %v9054_v54 = vor.u32 %v10117_v47, %v9053_v45  ;;  %5091 = vmatpush.bf16.msrb.mxu3 %v9326_v46 }
  0xb1   :  { %v9309_v50 = vld [vmem:[%s15464_s1 + $0x17a0] sm:$0xf]  ;;  %v10181_v51 = vld [vmem:[%s15464_s1 + $0x17ac] sm:$0xf0]  ;;  %v9182_v55 = vor.u32 %v10149_v49, %v9181_v48  ;;  %5053 = vmatpush.bf16.msrb.mxu0 %v8926_v52  ;;  %v4813_v48 = vpop.f32.mrf.mxu1  ;;  %v4826_v49 = vpop.f32.mrf.mxu2 }
  0xb2   :  { %v8909_v53 = vld [vmem:[%s15464_s1 + $0x1480] sm:$0xf]  ;;  %v10081_v56 = vld [vmem:[%s15464_s1 + $0x148c] sm:$0xf0]  ;;  %v9310_v59 = vor.u32 %v10181_v51, %v9309_v50  ;;  %5066 = vmatpush.bf16.msrb.mxu1 %v9054_v54 }
  0xb3   :  { %v9037_v57 = vld [vmem:[%s15464_s1 + $0x1580] sm:$0xf]  ;;  %v10113_v58 = vld [vmem:[%s15464_s1 + $0x158c] sm:$0xf0]  ;;  %v8910_v2 = vor.u32 %v10081_v56, %v8909_v53  ;;  %5079 = vmatpush.bf16.msrb.mxu2 %v9182_v55 }
  0xb4   :  { %v9165_v60 = vld [vmem:[%s15464_s1 + $0x1680] sm:$0xf]  ;;  %v10145_v61 = vld [vmem:[%s15464_s1 + $0x168c] sm:$0xf0]  ;;  %v9038_v4 = vor.u32 %v10113_v58, %v9037_v57  ;;  %5092 = vmatpush.bf16.msrb.mxu3 %v9310_v59 }
  0xb5   :  { %v857_v62 = vld [vmem:[%s15466_s2] sm:$0xf]  ;;  %v10177_v1 = vld [vmem:[%s15464_s1 + $0x178c] sm:$0xf0]  ;;  %v9166_v5 = vor.u32 %v10145_v61, %v9165_v60  ;;  %5054 = vmatpush.bf16.msrb.mxu0 %v8910_v2 }
  0xb6   :  { %v9293_v0 = vld [vmem:[%s15464_s1 + $0x1780] sm:$0xf]  ;;  %v10077_v6 = vld [vmem:[%s15464_s1 + $0x146c] sm:$0xf0]  ;;  %v859_v8 = vperm.slane %v857_v62, 0  ;;  %5067 = vmatpush.bf16.msrb.mxu1 %v9038_v4 }
  0xb7   :  { %v8893_v3 = vld [vmem:[%s15464_s1 + $0x1460] sm:$0xf]  ;;  %v9294_v10 = vor.u32 %v10177_v1, %v9293_v0  ;;  %v10109_v11 = vld [vmem:[%s15464_s1 + $0x156c] sm:$0xf0]  ;;  %5080 = vmatpush.bf16.msrb.mxu2 %v9166_v5  ;;  %v4839_v1 = vpop.f32.mrf.mxu3 }
  0xb8   :  { %v9021_v7 = vld [vmem:[%s15464_s1 + $0x1560] sm:$0xf]  ;;  %v10141_v14 = vld [vmem:[%s15464_s1 + $0x166c] sm:$0xf0]  ;;  %v8894_v22 = vor.u32 %v10077_v6, %v8893_v3  ;;  %v4801_v41 = vadd.f32 %v4800_v28, %v859_v8  ;;  %v4802_v6 = vpop.f32.mrf.mxu0 }
  0xb9   :  { %v9149_v12 = vld [vmem:[%s15464_s1 + $0x1660] sm:$0xf]  ;;  %v10173_v18 = vld [vmem:[%s15464_s1 + $0x176c] sm:$0xf0]  ;;  %v9022_v29 = vor.u32 %v10109_v11, %v9021_v7  ;;  %5093 = vmatpush.bf16.msrb.mxu3 %v9294_v10  ;;  %v6639_v6 = vld [vmem:[%s15464_s1 + $0x2d0] sm:$0xf0] }
  0xba   :  { %v9277_v15 = vld [vmem:[%s15464_s1 + $0x1760] sm:$0xf]  ;;  %v9150_v30 = vor.u32 %v10141_v14, %v9149_v12  ;;  %v10073_v35 = vld [vmem:[%s15464_s1 + $0x144c] sm:$0xf0]  ;;  %5055 = vmatpush.bf16.msrb.mxu0 %v8894_v22  ;;  %v4814_v51 = vadd.f32 %v4813_v48, %v4801_v41  ;;  %v6399_v41 = vld [vmem:[%s15464_s1 + $0xf0] sm:$0xf0] }
  0xbb   :  { %v8877_v33 = vld [vmem:[%s15464_s1 + $0x1440] sm:$0xf]  ;;  %v9278_v42 = vor.u32 %v10173_v18, %v9277_v15  ;;  %v10105_v43 = vld [vmem:[%s15464_s1 + $0x154c] sm:$0xf0]  ;;  %5068 = vmatpush.bf16.msrb.mxu1 %v9022_v29 }
  0xbc   :  { %v9005_v39 = vld [vmem:[%s15464_s1 + $0x1540] sm:$0xf]  ;;  %v10137_v45 = vld [vmem:[%s15464_s1 + $0x164c] sm:$0xf0]  ;;  %v8878_v50 = vor.u32 %v10073_v35, %v8877_v33  ;;  %5081 = vmatpush.bf16.msrb.mxu2 %v9150_v30  ;;  %v4827_v61 = vadd.f32 %v4826_v49, %v4814_v51  ;;  %v9451_v30 = vld [vmem:[%s15464_s1 + $0xe4] sm:$0xf]  ;;  %v4815_v33 = vpop.f32.mrf.mxu1  ;;  %v4828_v35 = vpop.f32.mrf.mxu2 }
  0xbd   :  { %v9133_v44 = vld [vmem:[%s15464_s1 + $0x1640] sm:$0xf]  ;;  %v10169_v47 = vld [vmem:[%s15464_s1 + $0x174c] sm:$0xf0]  ;;  %v9006_v52 = vor.u32 %v10105_v43, %v9005_v39  ;;  %5094 = vmatpush.bf16.msrb.mxu3 %v9278_v42  ;;  %v9483_v42 = vld [vmem:[%s15464_s1 + $0x1e4] sm:$0xf] }
  0xbe   :  { %v9261_v46 = vld [vmem:[%s15464_s1 + $0x1740] sm:$0xf]  ;;  %v9134_v53 = vor.u32 %v10137_v45, %v9133_v44  ;;  %v10069_v55 = vld [vmem:[%s15464_s1 + $0x142c] sm:$0xf0]  ;;  %5056 = vmatpush.bf16.msrb.mxu0 %v8878_v50  ;;  %v11509_v5 = vadd.f32 %v4839_v1, %v4827_v61  ;;  %v6527_v43 = vld [vmem:[%s15464_s1 + $0x1f0] sm:$0xf0] }
  0xbf   :  { %v8861_v54 = vld [vmem:[%s15464_s1 + $0x1420] sm:$0xf]  ;;  %v9262_v57 = vor.u32 %v10169_v47, %v9261_v46  ;;  %v10101_v58 = vld [vmem:[%s15464_s1 + $0x152c] sm:$0xf0]  ;;  %5069 = vmatpush.bf16.msrb.mxu1 %v9006_v52  ;;  %v9515_v46 = vld [vmem:[%s15464_s1 + $0x2e4] sm:$0xf] }
  0xc0   :  { %v8989_v56 = vld [vmem:[%s15464_s1 + $0x1520] sm:$0xf]  ;;  %v10133_v60 = vld [vmem:[%s15464_s1 + $0x162c] sm:$0xf0]  ;;  %v8862_v2 = vor.u32 %v10069_v55, %v8861_v54  ;;  %5082 = vmatpush.bf16.msrb.mxu2 %v9134_v53  ;;  %v6655_v47 = vld [vmem:[%s15464_s1 + $0x2f0] sm:$0xf0]  ;;  %v6402_v54 = vor.u32 %v9451_v30, %v6399_v41  ;;  %v6530_v55 = vor.u32 %v9483_v42, %v6527_v43 }
  0xc1   :  { %v9117_v59 = vld [vmem:[%s15464_s1 + $0x1620] sm:$0xf]  ;;  %v10165_v0 = vld [vmem:[%s15464_s1 + $0x172c] sm:$0xf0]  ;;  %v8990_v7 = vor.u32 %v10101_v58, %v8989_v56  ;;  %5095 = vmatpush.bf16.msrb.mxu3 %v9262_v57  ;;  %v44_v52 = vld [vmem:[%s15465_s0 + $0xa8] sm:$0xff] }
  0xc2   :  { %v9245_v62 = vld [vmem:[%s15464_s1 + $0x1720] sm:$0xf]  ;;  %v10065_v4 = vld [vmem:[%s15464_s1 + $0x140c] sm:$0xf0]  ;;  %v9118_v8 = vor.u32 %v10133_v60, %v9117_v59  ;;  %5057 = vmatpush.bf16.msrb.mxu0 %v8862_v2  ;;  %v46_v53 = vld [vmem:[%s15465_s0 + $0xb8] sm:$0xff]  ;;  %v4841_v59 = vpop.f32.mrf.mxu3  ;;  %v6658_v60 = vor.u32 %v9515_v46, %v6655_v47 }
  0xc3   :  { %v8845_v3 = vld [vmem:[%s15464_s1 + $0x1400] sm:$0xf]  ;;  %v10097_v11 = vld [vmem:[%s15464_s1 + $0x150c] sm:$0xf0]  ;;  %v9246_v14 = vor.u32 %v10165_v0, %v9245_v62  ;;  %5070 = vmatpush.bf16.msrb.mxu1 %v8990_v7  ;;  %v9447_v58 = vld [vmem:[%s15464_s1 + $0xc4] sm:$0xf]  ;;  %v11595_v7 = vpack.c.bf16 %v46_v53, %v46_v53 }
  0xc4   :  { %v8973_v10 = vld [vmem:[%s15464_s1 + $0x1500] sm:$0xf]  ;;  %v10129_v15 = vld [vmem:[%s15464_s1 + $0x160c] sm:$0xf0]  ;;  %v8846_v39 = vor.u32 %v10065_v4, %v8845_v3  ;;  %5083 = vmatpush.bf16.msrb.mxu2 %v9118_v8  ;;  %v6383_v62 = vld [vmem:[%s15464_s1 + $0xd0] sm:$0xf0]  ;;  %v11587_v3 = vpack.c.bf16 %v44_v52, %v44_v52 }
  0xc5   :  { %v9101_v12 = vld [vmem:[%s15464_s1 + $0x1600] sm:$0xf]  ;;  %v10161_v22 = vld [vmem:[%s15464_s1 + $0x170c] sm:$0xf0]  ;;  %v8974_v44 = vor.u32 %v10097_v11, %v8973_v10  ;;  %5096 = vmatpush.bf16.msrb.mxu3 %v9246_v14  ;;  %v9479_v0 = vld [vmem:[%s15464_s1 + $0x1c4] sm:$0xf]  ;;  %v6386_v10 = vor.u32 %v9447_v58, %v6383_v62 }
  0xc6   :  { %v9229_v18 = vld [vmem:[%s15464_s1 + $0x1700] sm:$0xf]  ;;  %v10205_v29 = vld [vmem:[%s15464_s1 + $0x186c] sm:$0xf0]  ;;  %v9102_v45 = vor.u32 %v10129_v15, %v9101_v12  ;;  %5058 = vmatpush.bf16.msrb.mxu0 %v8846_v39  ;;  %v6511_v1 = vld [vmem:[%s15464_s1 + $0x1d0] sm:$0xf0] }
  0xc7   :  { %v9405_v28 = vld [vmem:[%s15464_s1 + $0x1860] sm:$0xf]  ;;  %v9230_v49 = vor.u32 %v10161_v22, %v9229_v18  ;;  %v45_v51 = vld [vmem:[%s15465_s0 + $0xb0] sm:$0xff]  ;;  %5071 = vmatpush.bf16.msrb.mxu1 %v8974_v44  ;;  %v9511_v4 = vld [vmem:[%s15464_s1 + $0x2c4] sm:$0xf]  ;;  %v6514_v11 = vor.u32 %v9479_v0, %v6511_v1 }
  0xc8   :  { %v43_v48 = vld [vmem:[%s15465_s0 + $0xa0] sm:$0xff]  ;;  %v9406_v50 = vor.u32 %v10205_v29, %v9405_v28  ;;  %v10201_v57 = vld [vmem:[%s15464_s1 + $0x184c] sm:$0xf0]  ;;  %5084 = vmatpush.bf16.msrb.mxu2 %v9102_v45  ;;  %v11585_v2 = vpack.c.bf16 %v45_v51, %v45_v51  ;;  %v6642_v18 = vor.u32 %v9511_v4, %v6639_v6  ;;  %v6367_v22 = vld [vmem:[%s15464_s1 + $0xb0] sm:$0xf0] }
  0xc9   :  { %v9389_v56 = vld [vmem:[%s15464_s1 + $0x1840] sm:$0xf]  ;;  %v11574_v61 = vpack.c.bf16 %v43_v48, %v43_v48  ;;  %5097 = vmatpush.bf16.msrb.mxu3 %v9230_v49  ;;  %v10197_v14 = vld [vmem:[%s15464_s1 + $0x182c] sm:$0xf0]  ;;  %v9443_v15 = vld [vmem:[%s15464_s1 + $0xa4] sm:$0xf] }
  0xca   :  { %5107 = vmatpush.bf16.msra.mxu0 %v9406_v50  ;;  %v9390_v8 = vor.u32 %v10201_v57, %v9389_v56  ;;  %v9373_v12 = vld [vmem:[%s15464_s1 + $0x1820] sm:$0xf]  ;;  %v9475_v28 = vld [vmem:[%s15464_s1 + $0x1a4] sm:$0xf]  ;;  %v6495_v29 = vld [vmem:[%s15464_s1 + $0x1b0] sm:$0xf0]  ;;  %5072 = vmatmul.bf16.vlgmr.msrb.gmra.mxu1 %v11587_v3  ;;  %v6370_v41 = vor.u32 %v9443_v15, %v6367_v22 }
  0xcb   :  { %5116 = vmatpush.bf16.msra.mxu1 %v6402_v54  ;;  %5059 = vmatmul.bf16.vlgmr.msrb.gmra.mxu0 %v11574_v61  ;;  %v9507_v30 = vld [vmem:[%s15464_s1 + $0x2a4] sm:$0xf]  ;;  %v6623_v33 = vld [vmem:[%s15464_s1 + $0x2b0] sm:$0xf0]  ;;  %v9374_v35 = vor.u32 %v10197_v14, %v9373_v12  ;;  %v9357_v39 = vld [vmem:[%s15464_s1 + $0x1800] sm:$0xf]  ;;  %v6498_v42 = vor.u32 %v9475_v28, %v6495_v29  ;;  %v4852_v54 = vpop.f32.mrf.mxu0 }
  0xcc   :  { %5129 = vmatpush.bf16.msra.mxu2 %v6530_v55  ;;  %5098 = vmatmul.bf16.vlgmr.msrb.gmra.mxu3 %v11595_v7  ;;  %v10193_v43 = vld [vmem:[%s15464_s1 + $0x180c] sm:$0xf0]  ;;  %v9439_v44 = vld [vmem:[%s15464_s1 + $0x84] sm:$0xf]  ;;  %v6351_v45 = vld [vmem:[%s15464_s1 + $0x90] sm:$0xf0]  ;;  %v6626_v46 = vor.u32 %v9507_v30, %v6623_v33  ;;  %v4853_v59 = vadd.f32 %v4852_v54, %v11509_v5  ;;  %v4878_v28 = vpop.f32.mrf.mxu2 }
  0xcd   :  { %5142 = vmatpush.bf16.msra.mxu3 %v6658_v60  ;;  %5085 = vmatmul.bf16.vlgmr.msrb.gmra.mxu2 %v11585_v2  ;;  %v9471_v47 = vld [vmem:[%s15464_s1 + $0x184] sm:$0xf]  ;;  %v6479_v48 = vld [vmem:[%s15464_s1 + $0x190] sm:$0xf0]  ;;  %v9358_v53 = vor.u32 %v10193_v43, %v9357_v39  ;;  %v6354_v55 = vor.u32 %v9439_v44, %v6351_v45  ;;  %v4865_v60 = vpop.f32.mrf.mxu1 }
  0xce   :  { %5108 = vmatpush.bf16.msra.mxu0 %v9390_v8  ;;  %v9503_v49 = vld [vmem:[%s15464_s1 + $0x284] sm:$0xf]  ;;  %v6607_v50 = vld [vmem:[%s15464_s1 + $0x290] sm:$0xf0]  ;;  %v6482_v56 = vor.u32 %v9471_v47, %v6479_v48 }
  0xcf   :  { %5117 = vmatpush.bf16.msra.mxu1 %v6386_v10  ;;  %v9547_v51 = vld [vmem:[%s15464_s1 + $0x3e4] sm:$0xf]  ;;  %v6783_v52 = vld [vmem:[%s15464_s1 + $0x3f0] sm:$0xf0]  ;;  %v6610_v62 = vor.u32 %v9503_v49, %v6607_v50 }
  0xd0   :  { %5130 = vmatpush.bf16.msra.mxu2 %v6514_v11  ;;  %v9435_v57 = vld [vmem:[%s15464_s1 + $0x64] sm:$0xf]  ;;  %v6335_v58 = vld [vmem:[%s15464_s1 + $0x70] sm:$0xf0]  ;;  %v6786_v0 = vor.u32 %v9547_v51, %v6783_v52  ;;  %v4866_v11 = vadd.f32 %v4865_v60, %v4853_v59 }
  0xd1   :  { %5143 = vmatpush.bf16.msra.mxu3 %v6642_v18  ;;  %v9467_v1 = vld [vmem:[%s15464_s1 + $0x164] sm:$0xf]  ;;  %v6463_v4 = vld [vmem:[%s15464_s1 + $0x170] sm:$0xf0]  ;;  %v6338_v14 = vor.u32 %v9435_v57, %v6335_v58 }
  0xd2   :  { %5109 = vmatpush.bf16.msra.mxu0 %v9374_v35  ;;  %v9499_v6 = vld [vmem:[%s15464_s1 + $0x264] sm:$0xf]  ;;  %v6591_v5 = vld [vmem:[%s15464_s1 + $0x270] sm:$0xf0]  ;;  %v6466_v15 = vor.u32 %v9467_v1, %v6463_v4 }
  0xd3   :  { %5118 = vmatpush.bf16.msra.mxu1 %v6370_v41  ;;  %v9543_v8 = vld [vmem:[%s15464_s1 + $0x3c4] sm:$0xf]  ;;  %v6767_v10 = vld [vmem:[%s15464_s1 + $0x3d0] sm:$0xf0]  ;;  %v6594_v29 = vor.u32 %v9499_v6, %v6591_v5  ;;  %v4879_v41 = vadd.f32 %v4878_v28, %v4866_v11  ;;  %v4854_v48 = vpop.f32.mrf.mxu0 }
  0xd4   :  { %5131 = vmatpush.bf16.msra.mxu2 %v6498_v42  ;;  %v47_v12 = vld [vmem:[%s15465_s0 + $0xc0] sm:$0xff]  ;;  %v6319_v22 = vld [vmem:[%s15464_s1 + $0x50] sm:$0xf0]  ;;  %v6770_v30 = vor.u32 %v9543_v8, %v6767_v10  ;;  %v4891_v42 = vpop.f32.mrf.mxu3  ;;  %v4880_v8 = vpop.f32.mrf.mxu2 }
  0xd5   :  { %5144 = vmatpush.bf16.msra.mxu3 %v6626_v46  ;;  %v9431_v18 = vld [vmem:[%s15464_s1 + $0x44] sm:$0xf]  ;;  %v6447_v35 = vld [vmem:[%s15464_s1 + $0x150] sm:$0xf0]  ;;  %v11698_v43 = vpack.c.bf16 %v47_v12, %v47_v12  ;;  %v11709_v47 = vadd.f32 %v4891_v42, %v4879_v41 }
  0xd6   :  { %5110 = vmatpush.bf16.msra.mxu0 %v9358_v53  ;;  %v9463_v33 = vld [vmem:[%s15464_s1 + $0x144] sm:$0xf]  ;;  %v6575_v44 = vld [vmem:[%s15464_s1 + $0x250] sm:$0xf0]  ;;  %v6322_v49 = vor.u32 %v9431_v18, %v6319_v22  ;;  %v4867_v53 = vpop.f32.mrf.mxu1 }
  0xd7   :  { %5119 = vmatpush.bf16.msra.mxu1 %v6354_v55  ;;  %v9495_v39 = vld [vmem:[%s15464_s1 + $0x244] sm:$0xf]  ;;  %v6751_v46 = vld [vmem:[%s15464_s1 + $0x3b0] sm:$0xf0]  ;;  %v6450_v50 = vor.u32 %v9463_v33, %v6447_v35 }
  0xd8   :  { %5132 = vmatpush.bf16.msra.mxu2 %v6482_v56  ;;  %v9539_v45 = vld [vmem:[%s15464_s1 + $0x3a4] sm:$0xf]  ;;  %v6303_v52 = vld [vmem:[%s15464_s1 + $0x30] sm:$0xf0]  ;;  %v6578_v54 = vor.u32 %v9495_v39, %v6575_v44 }
  0xd9   :  { %5145 = vmatpush.bf16.msra.mxu3 %v6610_v62  ;;  %v9427_v51 = vld [vmem:[%s15464_s1 + $0x24] sm:$0xf]  ;;  %v6754_v55 = vor.u32 %v9539_v45, %v6751_v46  ;;  %v6431_v57 = vld [vmem:[%s15464_s1 + $0x130] sm:$0xf0] }
  0xda   :  { %5155 = vmatpush.bf16.msrb.mxu0 %v6786_v0  ;;  %v9459_v56 = vld [vmem:[%s15464_s1 + $0x124] sm:$0xf]  ;;  %v6559_v59 = vld [vmem:[%s15464_s1 + $0x230] sm:$0xf0]  ;;  %v6306_v0 = vor.u32 %v9427_v51, %v6303_v52 }
  0xdb   :  { %5120 = vmatpush.bf16.msra.mxu1 %v6338_v14  ;;  %v9491_v58 = vld [vmem:[%s15464_s1 + $0x224] sm:$0xf]  ;;  %9419 = vmatmul.msk.bf16.vlgmr.msra.gmra.mxu0 %vm4787_vm0, %v11698_v43  ;;  %v6735_v62 = vld [vmem:[%s15464_s1 + $0x390] sm:$0xf0]  ;;  %v6434_v1 = vor.u32 %v9459_v56, %v6431_v57 }
  0xdc   :  { %5133 = vmatpush.bf16.msra.mxu2 %v6466_v15  ;;  %v9535_v60 = vld [vmem:[%s15464_s1 + $0x384] sm:$0xf]  ;;  %v6287_v6 = vld [vmem:[%s15464_s1 + $0x10] sm:$0xf0]  ;;  %v6562_v10 = vor.u32 %v9491_v58, %v6559_v59  ;;  %v4893_v18 = vpop.f32.mrf.mxu3 }
  0xdd   :  { %5146 = vmatpush.bf16.msra.mxu3 %v6594_v29  ;;  %v9423_v4 = vld [vmem:[%s15464_s1 + $0x4] sm:$0xf]  ;;  %v6738_v11 = vor.u32 %v9535_v60, %v6735_v62  ;;  %v6415_v12 = vld [vmem:[%s15464_s1 + $0x110] sm:$0xf0] }
  0xde   :  { %5156 = vmatpush.bf16.msrb.mxu0 %v6770_v30  ;;  %v9455_v5 = vld [vmem:[%s15464_s1 + $0x104] sm:$0xf]  ;;  %v6543_v15 = vld [vmem:[%s15464_s1 + $0x210] sm:$0xf0]  ;;  %v6290_v39 = vor.u32 %v9423_v4, %v6287_v6 }
  0xdf   :  { %5121 = vmatpush.bf16.msra.mxu1 %v6322_v49  ;;  %v9487_v14 = vld [vmem:[%s15464_s1 + $0x204] sm:$0xf]  ;;  %v6719_v28 = vld [vmem:[%s15464_s1 + $0x370] sm:$0xf0]  ;;  %v6418_v41 = vor.u32 %v9455_v5, %v6415_v12 }
  0xe0   :  { %5134 = vmatpush.bf16.msra.mxu2 %v6450_v50  ;;  %v9531_v22 = vld [vmem:[%s15464_s1 + $0x364] sm:$0xf]  ;;  %v6911_v30 = vld [vmem:[%s15464_s1 + $0x4f0] sm:$0xf0]  ;;  %v6546_v45 = vor.u32 %v9487_v14, %v6543_v15 }
  0xe1   :  { %5147 = vmatpush.bf16.msra.mxu3 %v6578_v54  ;;  %v9579_v29 = vld [vmem:[%s15464_s1 + $0x4e4] sm:$0xf]  ;;  %v7039_v35 = vld [vmem:[%s15464_s1 + $0x5f0] sm:$0xf0]  ;;  %v6722_v46 = vor.u32 %v9531_v22, %v6719_v28 }
  0xe2   :  { %5157 = vmatpush.bf16.msrb.mxu0 %v6754_v55  ;;  %v9611_v33 = vld [vmem:[%s15464_s1 + $0x5e4] sm:$0xf]  ;;  %v7167_v44 = vld [vmem:[%s15464_s1 + $0x6f0] sm:$0xf0]  ;;  %v6914_v48 = vor.u32 %v9579_v29, %v6911_v30 }
  0xe3   :  { %5122 = vmatpush.bf16.msra.mxu1 %v6306_v0  ;;  %v9643_v42 = vld [vmem:[%s15464_s1 + $0x6e4] sm:$0xf]  ;;  %v7042_v49 = vor.u32 %v9611_v33, %v7039_v35  ;;  %v6703_v51 = vld [vmem:[%s15464_s1 + $0x350] sm:$0xf0] }
  0xe4   :  { %5135 = vmatpush.bf16.msra.mxu2 %v6434_v1  ;;  %v9527_v50 = vld [vmem:[%s15464_s1 + $0x344] sm:$0xf]  ;;  %v7170_v53 = vor.u32 %v9643_v42, %v7167_v44  ;;  %v6895_v54 = vld [vmem:[%s15464_s1 + $0x4d0] sm:$0xf0] }
  0xe5   :  { %5148 = vmatpush.bf16.msra.mxu3 %v6562_v10  ;;  %v9575_v52 = vld [vmem:[%s15464_s1 + $0x4c4] sm:$0xf]  ;;  %v7023_v56 = vld [vmem:[%s15464_s1 + $0x5d0] sm:$0xf0]  ;;  %v6706_v59 = vor.u32 %v9527_v50, %v6703_v51  ;;  %v4917_v50 = vpop.f32.mrf.mxu1 }
  0xe6   :  { %5158 = vmatpush.bf16.msrb.mxu0 %v6738_v11  ;;  %v9607_v55 = vld [vmem:[%s15464_s1 + $0x5c4] sm:$0xf]  ;;  %v7151_v58 = vld [vmem:[%s15464_s1 + $0x6d0] sm:$0xf0]  ;;  %v6898_v60 = vor.u32 %v9575_v52, %v6895_v54 }
  0xe7   :  { %5123 = vmatpush.bf16.msra.mxu1 %v6290_v39  ;;  %v9639_v57 = vld [vmem:[%s15464_s1 + $0x6c4] sm:$0xf]  ;;  %v7026_v62 = vor.u32 %v9607_v55, %v7023_v56  ;;  %v6687_v1 = vld [vmem:[%s15464_s1 + $0x330] sm:$0xf0]  ;;  %v4904_v42 = vpop.f32.mrf.mxu0 }
  0xe8   :  { %5136 = vmatpush.bf16.msra.mxu2 %v6418_v41  ;;  %v9523_v0 = vld [vmem:[%s15464_s1 + $0x324] sm:$0xf]  ;;  %v7154_v6 = vor.u32 %v9639_v57, %v7151_v58  ;;  %v6879_v5 = vld [vmem:[%s15464_s1 + $0x4b0] sm:$0xf0] }
  0xe9   :  { %5149 = vmatpush.bf16.msra.mxu3 %v6546_v45  ;;  %v9571_v4 = vld [vmem:[%s15464_s1 + $0x4a4] sm:$0xf]  ;;  %v7007_v10 = vld [vmem:[%s15464_s1 + $0x5b0] sm:$0xf0]  ;;  %v6690_v14 = vor.u32 %v9523_v0, %v6687_v1 }
  0xea   :  { %5159 = vmatpush.bf16.msrb.mxu0 %v6722_v46  ;;  %v9603_v8 = vld [vmem:[%s15464_s1 + $0x5a4] sm:$0xf]  ;;  %v7135_v12 = vld [vmem:[%s15464_s1 + $0x6b0] sm:$0xf0]  ;;  %5124 = vmatmul.bf16.vlgmr.msra.gmra.mxu1 %v10534_v9  ;;  %v6882_v18 = vor.u32 %v9571_v4, %v6879_v5 }
  0xeb   :  { %5168 = vmatpush.bf16.msrb.mxu1 %v6914_v48  ;;  %5137 = vmatmul.bf16.vlgmr.msra.gmra.mxu2 %v10553_v17  ;;  %v9635_v11 = vld [vmem:[%s15464_s1 + $0x6a4] sm:$0xf]  ;;  %v7010_v22 = vor.u32 %v9603_v8, %v7007_v10  ;;  %v6671_v28 = vld [vmem:[%s15464_s1 + $0x310] sm:$0xf0]  ;;  %v4905_v48 = vadd.f32 %v4904_v42, %v11709_v47 }
  0xec   :  { %5181 = vmatpush.bf16.msrb.mxu2 %v7042_v49  ;;  %5150 = vmatmul.bf16.vlgmr.msra.gmra.mxu3 %v10513_v63  ;;  %v9519_v15 = vld [vmem:[%s15464_s1 + $0x304] sm:$0xf]  ;;  %v6863_v30 = vld [vmem:[%s15464_s1 + $0x490] sm:$0xf0]  ;;  %v7138_v33 = vor.u32 %v9635_v11, %v7135_v12 }
  0xed   :  { %5194 = vmatpush.bf16.msrb.mxu3 %v7170_v53  ;;  %v9567_v29 = vld [vmem:[%s15464_s1 + $0x484] sm:$0xf]  ;;  %v6991_v39 = vld [vmem:[%s15464_s1 + $0x590] sm:$0xf0]  ;;  %v6674_v49 = vor.u32 %v9519_v15, %v6671_v28  ;;  %v4918_v56 = vadd.f32 %v4917_v50, %v4905_v48  ;;  %v4930_v10 = vpop.f32.mrf.mxu2 }
  0xee   :  { %5160 = vmatpush.bf16.msrb.mxu0 %v6706_v59  ;;  %v9599_v35 = vld [vmem:[%s15464_s1 + $0x584] sm:$0xf]  ;;  %v7119_v44 = vld [vmem:[%s15464_s1 + $0x690] sm:$0xf0]  ;;  %v6866_v51 = vor.u32 %v9567_v29, %v6863_v30 }
  0xef   :  { %5169 = vmatpush.bf16.msrb.mxu1 %v6898_v60  ;;  %v9631_v41 = vld [vmem:[%s15464_s1 + $0x684] sm:$0xf]  ;;  %v7295_v46 = vld [vmem:[%s15464_s1 + $0x7f0] sm:$0xf0]  ;;  %v6994_v52 = vor.u32 %v9599_v35, %v6991_v39  ;;  %v4919_v35 = vpop.f32.mrf.mxu1 }
  0xf0   :  { %5182 = vmatpush.bf16.msrb.mxu2 %v7026_v62  ;;  %v9675_v45 = vld [vmem:[%s15464_s1 + $0x7e4] sm:$0xf]  ;;  %v6847_v54 = vld [vmem:[%s15464_s1 + $0x470] sm:$0xf0]  ;;  %v7122_v55 = vor.u32 %v9631_v41, %v7119_v44 }
  0xf1   :  { %5195 = vmatpush.bf16.msrb.mxu3 %v7154_v6  ;;  %v9563_v53 = vld [vmem:[%s15464_s1 + $0x464] sm:$0xf]  ;;  %v7298_v57 = vor.u32 %v9675_v45, %v7295_v46  ;;  %v6975_v58 = vld [vmem:[%s15464_s1 + $0x570] sm:$0xf0] }
  0xf2   :  { %5161 = vmatpush.bf16.msrb.mxu0 %v6690_v14  ;;  %v9595_v47 = vld [vmem:[%s15464_s1 + $0x564] sm:$0xf]  ;;  %v7103_v60 = vld [vmem:[%s15464_s1 + $0x670] sm:$0xf0]  ;;  %v6850_v1 = vor.u32 %v9563_v53, %v6847_v54 }
  0xf3   :  { %5170 = vmatpush.bf16.msrb.mxu1 %v6882_v18  ;;  %v9627_v59 = vld [vmem:[%s15464_s1 + $0x664] sm:$0xf]  ;;  %v7279_v0 = vld [vmem:[%s15464_s1 + $0x7d0] sm:$0xf0]  ;;  %v6978_v4 = vor.u32 %v9595_v47, %v6975_v58  ;;  %v4931_v18 = vadd.f32 %v4930_v10, %v4918_v56 }
  0xf4   :  { %5183 = vmatpush.bf16.msrb.mxu2 %v7010_v22  ;;  %v9671_v62 = vld [vmem:[%s15464_s1 + $0x7c4] sm:$0xf]  ;;  %v6831_v5 = vld [vmem:[%s15464_s1 + $0x450] sm:$0xf0]  ;;  %v7106_v8 = vor.u32 %v9627_v59, %v7103_v60  ;;  %v4943_v22 = vpop.f32.mrf.mxu3 }
  0xf5   :  { %5196 = vmatpush.bf16.msrb.mxu3 %v7138_v33  ;;  %v9559_v6 = vld [vmem:[%s15464_s1 + $0x444] sm:$0xf]  ;;  %v7282_v11 = vor.u32 %v9671_v62, %v7279_v0  ;;  %v6959_v14 = vld [vmem:[%s15464_s1 + $0x550] sm:$0xf0]  ;;  %v4906_v33 = vpop.f32.mrf.mxu0  ;;  %v11910_v39 = vadd.f32 %v4943_v22, %v4931_v18 }
  0xf6   :  { %5162 = vmatpush.bf16.msrb.mxu0 %v6674_v49  ;;  %v9591_v12 = vld [vmem:[%s15464_s1 + $0x544] sm:$0xf]  ;;  %v7087_v28 = vld [vmem:[%s15464_s1 + $0x650] sm:$0xf0]  ;;  %v6834_v41 = vor.u32 %v9559_v6, %v6831_v5 }
  0xf7   :  { %5171 = vmatpush.bf16.msrb.mxu1 %v6866_v51  ;;  %v9623_v15 = vld [vmem:[%s15464_s1 + $0x644] sm:$0xf]  ;;  %v7263_v30 = vld [vmem:[%s15464_s1 + $0x7b0] sm:$0xf0]  ;;  %v6962_v42 = vor.u32 %v9591_v12, %v6959_v14 }
  0xf8   :  { %5184 = vmatpush.bf16.msrb.mxu2 %v6994_v52  ;;  %v9667_v29 = vld [vmem:[%s15464_s1 + $0x7a4] sm:$0xf]  ;;  %v6815_v45 = vld [vmem:[%s15464_s1 + $0x430] sm:$0xf0]  ;;  %v7090_v46 = vor.u32 %v9623_v15, %v7087_v28 }
  0xf9   :  { %5197 = vmatpush.bf16.msrb.mxu3 %v7122_v55  ;;  %5163 = vmatmul.bf16.vlgmr.msrb.gmra.mxu0 %v10551_v16  ;;  %v9555_v44 = vld [vmem:[%s15464_s1 + $0x424] sm:$0xf]  ;;  %v7266_v48 = vor.u32 %v9667_v29, %v7263_v30  ;;  %v6943_v50 = vld [vmem:[%s15464_s1 + $0x530] sm:$0xf0] }
  0xfa   :  { %5207 = vmatpush.bf16.msra.mxu0 %v7298_v57  ;;  %v9587_v49 = vld [vmem:[%s15464_s1 + $0x524] sm:$0xf]  ;;  %v7071_v52 = vld [vmem:[%s15464_s1 + $0x630] sm:$0xf0]  ;;  %v6818_v55 = vor.u32 %v9555_v44, %v6815_v45 }
  0xfb   :  { %5172 = vmatpush.bf16.msrb.mxu1 %v6850_v1  ;;  %v9619_v51 = vld [vmem:[%s15464_s1 + $0x624] sm:$0xf]  ;;  %v7247_v54 = vld [vmem:[%s15464_s1 + $0x790] sm:$0xf0]  ;;  %v6946_v56 = vor.u32 %v9587_v49, %v6943_v50 }
  0xfc   :  { %5185 = vmatpush.bf16.msrb.mxu2 %v6978_v4  ;;  %v9663_v53 = vld [vmem:[%s15464_s1 + $0x784] sm:$0xf]  ;;  %v6799_v47 = vld [vmem:[%s15464_s1 + $0x410] sm:$0xf0]  ;;  %v7074_v59 = vor.u32 %v9619_v51, %v7071_v52  ;;  %v4932_v4 = vpop.f32.mrf.mxu2  ;;  %v4945_v10 = vpop.f32.mrf.mxu3 }
  0xfd   :  { %5198 = vmatpush.bf16.msrb.mxu3 %v7106_v8  ;;  %v9551_v57 = vld [vmem:[%s15464_s1 + $0x404] sm:$0xf]  ;;  %v7250_v60 = vor.u32 %v9663_v53, %v7247_v54  ;;  %v6927_v62 = vld [vmem:[%s15464_s1 + $0x510] sm:$0xf0] }
  0xfe   :  { %5208 = vmatpush.bf16.msra.mxu0 %v7282_v11  ;;  %v9583_v58 = vld [vmem:[%s15464_s1 + $0x504] sm:$0xf]  ;;  %v7055_v1 = vld [vmem:[%s15464_s1 + $0x610] sm:$0xf0]  ;;  %v6802_v15 = vor.u32 %v9551_v57, %v6799_v47 }
  0xff   :  { %5173 = vmatpush.bf16.msrb.mxu1 %v6834_v41  ;;  %v9615_v0 = vld [vmem:[%s15464_s1 + $0x604] sm:$0xf]  ;;  %v7231_v5 = vld [vmem:[%s15464_s1 + $0x770] sm:$0xf0]  ;;  %v6930_v18 = vor.u32 %v9583_v58, %v6927_v62 }
 0x100   :  { %5186 = vmatpush.bf16.msrb.mxu2 %v6962_v42  ;;  %v9659_v6 = vld [vmem:[%s15464_s1 + $0x764] sm:$0xf]  ;;  %v7423_v11 = vld [vmem:[%s15464_s1 + $0x8f0] sm:$0xf0]  ;;  %v7058_v29 = vor.u32 %v9615_v0, %v7055_v1 }
 0x101   :  { %5199 = vmatpush.bf16.msrb.mxu3 %v7090_v46  ;;  %v9707_v8 = vld [vmem:[%s15464_s1 + $0x8e4] sm:$0xf]  ;;  %v7551_v14 = vld [vmem:[%s15464_s1 + $0x9f0] sm:$0xf0]  ;;  %v7234_v30 = vor.u32 %v9659_v6, %v7231_v5 }
 0x102   :  { %5209 = vmatpush.bf16.msra.mxu0 %v7266_v48  ;;  %v9739_v12 = vld [vmem:[%s15464_s1 + $0x9e4] sm:$0xf]  ;;  %v7679_v28 = vld [vmem:[%s15464_s1 + $0xaf0] sm:$0xf0]  ;;  %v7426_v33 = vor.u32 %v9707_v8, %v7423_v11 }
 0x103   :  { %5174 = vmatpush.bf16.msrb.mxu1 %v6818_v55  ;;  %v9771_v22 = vld [vmem:[%s15464_s1 + $0xae4] sm:$0xf]  ;;  %v7554_v35 = vor.u32 %v9739_v12, %v7551_v14  ;;  %v7215_v42 = vld [vmem:[%s15464_s1 + $0x750] sm:$0xf0] }
 0x104   :  { %5187 = vmatpush.bf16.msrb.mxu2 %v6946_v56  ;;  %v9655_v41 = vld [vmem:[%s15464_s1 + $0x744] sm:$0xf]  ;;  %v7682_v45 = vor.u32 %v9771_v22, %v7679_v28  ;;  %v7407_v46 = vld [vmem:[%s15464_s1 + $0x8d0] sm:$0xf0] }
 0x105   :  { %5200 = vmatpush.bf16.msrb.mxu3 %v7074_v59  ;;  %v9703_v44 = vld [vmem:[%s15464_s1 + $0x8c4] sm:$0xf]  ;;  %v7535_v49 = vld [vmem:[%s15464_s1 + $0x9d0] sm:$0xf0]  ;;  %v7218_v52 = vor.u32 %v9655_v41, %v7215_v42  ;;  %v4969_v41 = vpop.f32.mrf.mxu1 }
 0x106   :  { %5210 = vmatpush.bf16.msra.mxu0 %v7250_v60  ;;  %v9735_v48 = vld [vmem:[%s15464_s1 + $0x9c4] sm:$0xf]  ;;  %v7663_v51 = vld [vmem:[%s15464_s1 + $0xad0] sm:$0xf0]  ;;  %v7410_v53 = vor.u32 %v9703_v44, %v7407_v46 }
 0x107   :  { %5175 = vmatpush.bf16.msrb.mxu1 %v6802_v15  ;;  %v9767_v50 = vld [vmem:[%s15464_s1 + $0xac4] sm:$0xf]  ;;  %v7538_v54 = vor.u32 %v9735_v48, %v7535_v49  ;;  %v7199_v56 = vld [vmem:[%s15464_s1 + $0x730] sm:$0xf0] }
 0x108   :  { %5188 = vmatpush.bf16.msrb.mxu2 %v6930_v18  ;;  %v9651_v55 = vld [vmem:[%s15464_s1 + $0x724] sm:$0xf]  ;;  %v7666_v47 = vor.u32 %v9767_v50, %v7663_v51  ;;  %v7391_v58 = vld [vmem:[%s15464_s1 + $0x8b0] sm:$0xf0]  ;;  %v4956_v22 = vpop.f32.mrf.mxu0 }
 0x109   :  { %5201 = vmatpush.bf16.msrb.mxu3 %v7058_v29  ;;  %v9699_v57 = vld [vmem:[%s15464_s1 + $0x8a4] sm:$0xf]  ;;  %v7519_v60 = vld [vmem:[%s15464_s1 + $0x9b0] sm:$0xf0]  ;;  %v7202_v1 = vor.u32 %v9651_v55, %v7199_v56 }
 0x10a   :  { %5211 = vmatpush.bf16.msra.mxu0 %v7234_v30  ;;  %v9731_v59 = vld [vmem:[%s15464_s1 + $0x9a4] sm:$0xf]  ;;  %v7647_v0 = vld [vmem:[%s15464_s1 + $0xab0] sm:$0xf0]  ;;  %5176 = vmatmul.bf16.vlgmr.msrb.gmra.mxu1 %v10722_v37  ;;  %v7394_v6 = vor.u32 %v9699_v57, %v7391_v58 }
 0x10b   :  { %5220 = vmatpush.bf16.msra.mxu1 %v7426_v33  ;;  %5189 = vmatmul.bf16.vlgmr.msrb.gmra.mxu2 %v10726_v40  ;;  %v9763_v62 = vld [vmem:[%s15464_s1 + $0xaa4] sm:$0xf]  ;;  %v7522_v5 = vor.u32 %v9731_v59, %v7519_v60  ;;  %v7183_v8 = vld [vmem:[%s15464_s1 + $0x710] sm:$0xf0]  ;;  %v4957_v33 = vadd.f32 %v4956_v22, %v11910_v39 }
 0x10c   :  { %5233 = vmatpush.bf16.msra.mxu2 %v7554_v35  ;;  %5202 = vmatmul.bf16.vlgmr.msrb.gmra.mxu3 %v10714_v34  ;;  %v9647_v4 = vld [vmem:[%s15464_s1 + $0x704] sm:$0xf]  ;;  %v7375_v11 = vld [vmem:[%s15464_s1 + $0x890] sm:$0xf0]  ;;  %v7650_v12 = vor.u32 %v9763_v62, %v7647_v0 }
 0x10d   :  { %5246 = vmatpush.bf16.msra.mxu3 %v7682_v45  ;;  %v9695_v10 = vld [vmem:[%s15464_s1 + $0x884] sm:$0xf]  ;;  %v7503_v15 = vld [vmem:[%s15464_s1 + $0x990] sm:$0xf0]  ;;  %v7186_v35 = vor.u32 %v9647_v4, %v7183_v8  ;;  %v4970_v49 = vadd.f32 %v4969_v41, %v4957_v33 }
 0x10e   :  { %5212 = vmatpush.bf16.msra.mxu0 %v7218_v52  ;;  %v9727_v14 = vld [vmem:[%s15464_s1 + $0x984] sm:$0xf]  ;;  %v7631_v28 = vld [vmem:[%s15464_s1 + $0xa90] sm:$0xf0]  ;;  %v7378_v42 = vor.u32 %v9695_v10, %v7375_v11  ;;  %v4982_v60 = vpop.f32.mrf.mxu2 }
 0x10f   :  { %5221 = vmatpush.bf16.msra.mxu1 %v7410_v53  ;;  %v9759_v18 = vld [vmem:[%s15464_s1 + $0xa84] sm:$0xf]  ;;  %v7807_v30 = vld [vmem:[%s15464_s1 + $0xbf0] sm:$0xf0]  ;;  %v7506_v44 = vor.u32 %v9727_v14, %v7503_v15  ;;  %v4971_v14 = vpop.f32.mrf.mxu1 }
 0x110   :  { %5234 = vmatpush.bf16.msra.mxu2 %v7538_v54  ;;  %v9803_v29 = vld [vmem:[%s15464_s1 + $0xbe4] sm:$0xf]  ;;  %v7359_v46 = vld [vmem:[%s15464_s1 + $0x870] sm:$0xf0]  ;;  %v7634_v48 = vor.u32 %v9759_v18, %v7631_v28 }
 0x111   :  { %5247 = vmatpush.bf16.msra.mxu3 %v7666_v47  ;;  %v9691_v45 = vld [vmem:[%s15464_s1 + $0x864] sm:$0xf]  ;;  %v7810_v50 = vor.u32 %v9803_v29, %v7807_v30  ;;  %v7487_v51 = vld [vmem:[%s15464_s1 + $0x970] sm:$0xf0] }
 0x112   :  { %5213 = vmatpush.bf16.msra.mxu0 %v7202_v1  ;;  %v9723_v39 = vld [vmem:[%s15464_s1 + $0x964] sm:$0xf]  ;;  %v7615_v53 = vld [vmem:[%s15464_s1 + $0xa70] sm:$0xf0]  ;;  %v7362_v56 = vor.u32 %v9691_v45, %v7359_v46 }
 0x113   :  { %5222 = vmatpush.bf16.msra.mxu1 %v7394_v6  ;;  %v9755_v52 = vld [vmem:[%s15464_s1 + $0xa64] sm:$0xf]  ;;  %v7791_v55 = vld [vmem:[%s15464_s1 + $0xbd0] sm:$0xf0]  ;;  %v7490_v57 = vor.u32 %v9723_v39, %v7487_v51  ;;  %v4983_v6 = vadd.f32 %v4982_v60, %v4970_v49 }
 0x114   :  { %5235 = vmatpush.bf16.msra.mxu2 %v7522_v5  ;;  %v9799_v54 = vld [vmem:[%s15464_s1 + $0xbc4] sm:$0xf]  ;;  %v7343_v58 = vld [vmem:[%s15464_s1 + $0x850] sm:$0xf0]  ;;  %v7618_v59 = vor.u32 %v9755_v52, %v7615_v53  ;;  %v4995_v5 = vpop.f32.mrf.mxu3 }
 0x115   :  { %5248 = vmatpush.bf16.msra.mxu3 %v7650_v12  ;;  %v9687_v47 = vld [vmem:[%s15464_s1 + $0x844] sm:$0xf]  ;;  %v7794_v62 = vor.u32 %v9799_v54, %v7791_v55  ;;  %v7471_v1 = vld [vmem:[%s15464_s1 + $0x950] sm:$0xf0]  ;;  %v4958_v12 = vpop.f32.mrf.mxu0  ;;  %v12109_v15 = vadd.f32 %v4995_v5, %v4983_v6 }
 0x116   :  { %5214 = vmatpush.bf16.msra.mxu0 %v7186_v35  ;;  %v9719_v0 = vld [vmem:[%s15464_s1 + $0x944] sm:$0xf]  ;;  %v7599_v8 = vld [vmem:[%s15464_s1 + $0xa50] sm:$0xf0]  ;;  %v7346_v18 = vor.u32 %v9687_v47, %v7343_v58 }
 0x117   :  { %5223 = vmatpush.bf16.msra.mxu1 %v7378_v42  ;;  %v9751_v4 = vld [vmem:[%s15464_s1 + $0xa44] sm:$0xf]  ;;  %v7775_v11 = vld [vmem:[%s15464_s1 + $0xbb0] sm:$0xf0]  ;;  %v7474_v22 = vor.u32 %v9719_v0, %v7471_v1 }
 0x118   :  { %5236 = vmatpush.bf16.msra.mxu2 %v7506_v44  ;;  %v9795_v10 = vld [vmem:[%s15464_s1 + $0xba4] sm:$0xf]  ;;  %v7327_v29 = vld [vmem:[%s15464_s1 + $0x830] sm:$0xf0]  ;;  %v7602_v30 = vor.u32 %v9751_v4, %v7599_v8 }
 0x119   :  { %5249 = vmatpush.bf16.msra.mxu3 %v7634_v48  ;;  %5215 = vmatmul.bf16.vlgmr.msra.gmra.mxu0 %v10724_v38  ;;  %v9683_v28 = vld [vmem:[%s15464_s1 + $0x824] sm:$0xf]  ;;  %v7778_v33 = vor.u32 %v9795_v10, %v7775_v11  ;;  %v7455_v41 = vld [vmem:[%s15464_s1 + $0x930] sm:$0xf0] }
 0x11a   :  { %5259 = vmatpush.bf16.msrb.mxu0 %v7810_v50  ;;  %v9715_v35 = vld [vmem:[%s15464_s1 + $0x924] sm:$0xf]  ;;  %v7583_v44 = vld [vmem:[%s15464_s1 + $0xa30] sm:$0xf0]  ;;  %v7330_v48 = vor.u32 %v9683_v28, %v7327_v29 }
 0x11b   :  { %5224 = vmatpush.bf16.msra.mxu1 %v7362_v56  ;;  %v9747_v42 = vld [vmem:[%s15464_s1 + $0xa24] sm:$0xf]  ;;  %v7759_v46 = vld [vmem:[%s15464_s1 + $0xb90] sm:$0xf0]  ;;  %v7458_v49 = vor.u32 %v9715_v35, %v7455_v41 }
 0x11c   :  { %5237 = vmatpush.bf16.msra.mxu2 %v7490_v57  ;;  %v9791_v45 = vld [vmem:[%s15464_s1 + $0xb84] sm:$0xf]  ;;  %v7311_v39 = vld [vmem:[%s15464_s1 + $0x810] sm:$0xf0]  ;;  %v7586_v52 = vor.u32 %v9747_v42, %v7583_v44  ;;  %v4984_v57 = vpop.f32.mrf.mxu2  ;;  %v4997_v60 = vpop.f32.mrf.mxu3 }
 0x11d   :  { %5250 = vmatpush.bf16.msra.mxu3 %v7618_v59  ;;  %v9679_v50 = vld [vmem:[%s15464_s1 + $0x804] sm:$0xf]  ;;  %v7762_v53 = vor.u32 %v9791_v45, %v7759_v46  ;;  %v7439_v54 = vld [vmem:[%s15464_s1 + $0x910] sm:$0xf0] }
 0x11e   :  { %5260 = vmatpush.bf16.msrb.mxu0 %v7794_v62  ;;  %v9711_v51 = vld [vmem:[%s15464_s1 + $0x904] sm:$0xf]  ;;  %v7567_v56 = vld [vmem:[%s15464_s1 + $0xa10] sm:$0xf0]  ;;  %v7314_v4 = vor.u32 %v9679_v50, %v7311_v39 }
 0x11f   :  { %5225 = vmatpush.bf16.msra.mxu1 %v7346_v18  ;;  %v9743_v55 = vld [vmem:[%s15464_s1 + $0xa04] sm:$0xf]  ;;  %v7743_v58 = vld [vmem:[%s15464_s1 + $0xb70] sm:$0xf0]  ;;  %v7442_v6 = vor.u32 %v9711_v51, %v7439_v54 }
 0x120   :  { %5238 = vmatpush.bf16.msra.mxu2 %v7474_v22  ;;  %v9787_v47 = vld [vmem:[%s15464_s1 + $0xb64] sm:$0xf]  ;;  %v7935_v62 = vld [vmem:[%s15464_s1 + $0xcf0] sm:$0xf0]  ;;  %v7570_v10 = vor.u32 %v9743_v55, %v7567_v56 }
 0x121   :  { %5251 = vmatpush.bf16.msra.mxu3 %v7602_v30  ;;  %v9835_v59 = vld [vmem:[%s15464_s1 + $0xce4] sm:$0xf]  ;;  %v8063_v1 = vld [vmem:[%s15464_s1 + $0xdf0] sm:$0xf0]  ;;  %v7746_v11 = vor.u32 %v9787_v47, %v7743_v58 }
 0x122   :  { %5261 = vmatpush.bf16.msrb.mxu0 %v7778_v33  ;;  %v9867_v0 = vld [vmem:[%s15464_s1 + $0xde4] sm:$0xf]  ;;  %v8191_v8 = vld [vmem:[%s15464_s1 + $0xef0] sm:$0xf0]  ;;  %v7938_v12 = vor.u32 %v9835_v59, %v7935_v62 }
 0x123   :  { %5226 = vmatpush.bf16.msra.mxu1 %v7330_v48  ;;  %v9899_v5 = vld [vmem:[%s15464_s1 + $0xee4] sm:$0xf]  ;;  %v8066_v14 = vor.u32 %v9867_v0, %v8063_v1  ;;  %v7727_v22 = vld [vmem:[%s15464_s1 + $0xb50] sm:$0xf0] }
 0x124   :  { %5239 = vmatpush.bf16.msra.mxu2 %v7458_v49  ;;  %v9783_v18 = vld [vmem:[%s15464_s1 + $0xb44] sm:$0xf]  ;;  %v8194_v29 = vor.u32 %v9899_v5, %v8191_v8  ;;  %v7919_v30 = vld [vmem:[%s15464_s1 + $0xcd0] sm:$0xf0] }
 0x125   :  { %5252 = vmatpush.bf16.msra.mxu3 %v7586_v52  ;;  %v9831_v28 = vld [vmem:[%s15464_s1 + $0xcc4] sm:$0xf]  ;;  %v8047_v35 = vld [vmem:[%s15464_s1 + $0xdd0] sm:$0xf0]  ;;  %v7730_v44 = vor.u32 %v9783_v18, %v7727_v22  ;;  %v5021_v18 = vpop.f32.mrf.mxu1 }
 0x126   :  { %5262 = vmatpush.bf16.msrb.mxu0 %v7762_v53  ;;  %v9863_v33 = vld [vmem:[%s15464_s1 + $0xdc4] sm:$0xf]  ;;  %v8175_v42 = vld [vmem:[%s15464_s1 + $0xed0] sm:$0xf0]  ;;  %v7922_v45 = vor.u32 %v9831_v28, %v7919_v30 }
 0x127   :  { %5227 = vmatpush.bf16.msra.mxu1 %v7314_v4  ;;  %v9895_v41 = vld [vmem:[%s15464_s1 + $0xec4] sm:$0xf]  ;;  %v8050_v46 = vor.u32 %v9863_v33, %v8047_v35  ;;  %v7711_v49 = vld [vmem:[%s15464_s1 + $0xb30] sm:$0xf0] }
 0x128   :  { %5240 = vmatpush.bf16.msra.mxu2 %v7442_v6  ;;  %v9779_v48 = vld [vmem:[%s15464_s1 + $0xb24] sm:$0xf]  ;;  %v8178_v39 = vor.u32 %v9895_v41, %v8175_v42  ;;  %v7903_v51 = vld [vmem:[%s15464_s1 + $0xcb0] sm:$0xf0] }
 0x129   :  { %5253 = vmatpush.bf16.msra.mxu3 %v7570_v10  ;;  %v9827_v50 = vld [vmem:[%s15464_s1 + $0xca4] sm:$0xf]  ;;  %v8031_v53 = vld [vmem:[%s15464_s1 + $0xdb0] sm:$0xf0]  ;;  %v7714_v56 = vor.u32 %v9779_v48, %v7711_v49  ;;  %v5008_v5 = vpop.f32.mrf.mxu0 }
 0x12a   :  { %5263 = vmatpush.bf16.msrb.mxu0 %v7746_v11  ;;  %5228 = vmatmul.bf16.vlgmr.msra.gmra.mxu1 %v10921_v19  ;;  %v9859_v52 = vld [vmem:[%s15464_s1 + $0xda4] sm:$0xf]  ;;  %v8159_v55 = vld [vmem:[%s15464_s1 + $0xeb0] sm:$0xf0]  ;;  %v7906_v47 = vor.u32 %v9827_v50, %v7903_v51 }
 0x12b   :  { %5272 = vmatpush.bf16.msrb.mxu1 %v7938_v12  ;;  %5241 = vmatmul.bf16.vlgmr.msra.gmra.mxu2 %v10934_v24  ;;  %v9891_v54 = vld [vmem:[%s15464_s1 + $0xea4] sm:$0xf]  ;;  %v8034_v58 = vor.u32 %v9859_v52, %v8031_v53  ;;  %v7695_v59 = vld [vmem:[%s15464_s1 + $0xb10] sm:$0xf0]  ;;  %v5009_v12 = vadd.f32 %v5008_v5, %v12109_v15 }
 0x12c   :  { %5285 = vmatpush.bf16.msrb.mxu2 %v8066_v14  ;;  %5254 = vmatmul.bf16.vlgmr.msra.gmra.mxu3 %v10932_v23  ;;  %v9775_v57 = vld [vmem:[%s15464_s1 + $0xb04] sm:$0xf]  ;;  %v7887_v62 = vld [vmem:[%s15464_s1 + $0xc90] sm:$0xf0]  ;;  %v8162_v0 = vor.u32 %v9891_v54, %v8159_v55 }
 0x12d   :  { %5298 = vmatpush.bf16.msrb.mxu3 %v8194_v29  ;;  %v9823_v60 = vld [vmem:[%s15464_s1 + $0xc84] sm:$0xf]  ;;  %v8015_v4 = vld [vmem:[%s15464_s1 + $0xd90] sm:$0xf0]  ;;  %v7698_v14 = vor.u32 %v9775_v57, %v7695_v59  ;;  %v5022_v35 = vadd.f32 %v5021_v18, %v5009_v12 }
 0x12e   :  { %5264 = vmatpush.bf16.msrb.mxu0 %v7730_v44  ;;  %v9855_v1 = vld [vmem:[%s15464_s1 + $0xd84] sm:$0xf]  ;;  %v8143_v8 = vld [vmem:[%s15464_s1 + $0xe90] sm:$0xf0]  ;;  %v7890_v22 = vor.u32 %v9823_v60, %v7887_v62 }
 0x12f   :  { %5273 = vmatpush.bf16.msrb.mxu1 %v7922_v45  ;;  %v9887_v6 = vld [vmem:[%s15464_s1 + $0xe84] sm:$0xf]  ;;  %v8319_v11 = vld [vmem:[%s15464_s1 + $0xff0] sm:$0xf0]  ;;  %v8018_v28 = vor.u32 %v9855_v1, %v8015_v4  ;;  %v5034_v53 = vpop.f32.mrf.mxu2  ;;  %v5023_v1 = vpop.f32.mrf.mxu1 }
 0x130   :  { %5286 = vmatpush.bf16.msrb.mxu2 %v8050_v46  ;;  %v9931_v10 = vld [vmem:[%s15464_s1 + $0xfe4] sm:$0xf]  ;;  %v7871_v30 = vld [vmem:[%s15464_s1 + $0xc70] sm:$0xf0]  ;;  %v8146_v33 = vor.u32 %v9887_v6, %v8143_v8 }
 0x131   :  { %5299 = vmatpush.bf16.msrb.mxu3 %v8178_v39  ;;  %v9819_v29 = vld [vmem:[%s15464_s1 + $0xc64] sm:$0xf]  ;;  %v8322_v41 = vor.u32 %v9931_v10, %v8319_v11  ;;  %v7999_v42 = vld [vmem:[%s15464_s1 + $0xd70] sm:$0xf0] }
 0x132   :  { %5265 = vmatpush.bf16.msrb.mxu0 %v7714_v56  ;;  %v9851_v15 = vld [vmem:[%s15464_s1 + $0xd64] sm:$0xf]  ;;  %v8127_v45 = vld [vmem:[%s15464_s1 + $0xe70] sm:$0xf0]  ;;  %v7874_v49 = vor.u32 %v9819_v29, %v7871_v30 }
 0x133   :  { %5274 = vmatpush.bf16.msrb.mxu1 %v7906_v47  ;;  %v9883_v44 = vld [vmem:[%s15464_s1 + $0xe64] sm:$0xf]  ;;  %v8303_v48 = vld [vmem:[%s15464_s1 + $0xfd0] sm:$0xf0]  ;;  %v8002_v50 = vor.u32 %v9851_v15, %v7999_v42  ;;  %v5035_v47 = vadd.f32 %v5034_v53, %v5022_v35 }
 0x134   :  { %5287 = vmatpush.bf16.msrb.mxu2 %v8034_v58  ;;  %v9927_v46 = vld [vmem:[%s15464_s1 + $0xfc4] sm:$0xf]  ;;  %v7855_v51 = vld [vmem:[%s15464_s1 + $0xc50] sm:$0xf0]  ;;  %v8130_v52 = vor.u32 %v9883_v44, %v8127_v45  ;;  %v5047_v58 = vpop.f32.mrf.mxu3 }
 0x135   :  { %5300 = vmatpush.bf16.msrb.mxu3 %v8162_v0  ;;  %v9815_v39 = vld [vmem:[%s15464_s1 + $0xc44] sm:$0xf]  ;;  %v8306_v54 = vor.u32 %v9927_v46, %v8303_v48  ;;  %v7983_v56 = vld [vmem:[%s15464_s1 + $0xd50] sm:$0xf0]  ;;  %v5010_v0 = vpop.f32.mrf.mxu0  ;;  %v12308_v4 = vadd.f32 %v5047_v58, %v5035_v47 }
 0x136   :  { %5266 = vmatpush.bf16.msrb.mxu0 %v7698_v14  ;;  %v9847_v55 = vld [vmem:[%s15464_s1 + $0xd44] sm:$0xf]  ;;  %v8111_v59 = vld [vmem:[%s15464_s1 + $0xe50] sm:$0xf0]  ;;  %v7858_v6 = vor.u32 %v9815_v39, %v7855_v51 }
 0x137   :  { %5275 = vmatpush.bf16.msrb.mxu1 %v7890_v22  ;;  %v9879_v57 = vld [vmem:[%s15464_s1 + $0xe44] sm:$0xf]  ;;  %v8287_v62 = vld [vmem:[%s15464_s1 + $0xfb0] sm:$0xf0]  ;;  %v7986_v5 = vor.u32 %v9847_v55, %v7983_v56 }
 0x138   :  { %5288 = vmatpush.bf16.msrb.mxu2 %v8018_v28  ;;  %v9923_v60 = vld [vmem:[%s15464_s1 + $0xfa4] sm:$0xf]  ;;  %v7839_v10 = vld [vmem:[%s15464_s1 + $0xc30] sm:$0xf0]  ;;  %v8114_v11 = vor.u32 %v9879_v57, %v8111_v59 }
 0x139   :  { %5301 = vmatpush.bf16.msrb.mxu3 %v8146_v33  ;;  %5267 = vmatmul.bf16.vlgmr.msrb.gmra.mxu0 %v10942_v27  ;;  %v9811_v8 = vld [vmem:[%s15464_s1 + $0xc24] sm:$0xf]  ;;  %v8290_v12 = vor.u32 %v9923_v60, %v8287_v62  ;;  %v7967_v18 = vld [vmem:[%s15464_s1 + $0xd30] sm:$0xf0] }
 0x13a   :  { %5311 = vmatpush.bf16.msra.mxu0 %v8322_v41  ;;  %v9843_v14 = vld [vmem:[%s15464_s1 + $0xd24] sm:$0xf]  ;;  %v8095_v28 = vld [vmem:[%s15464_s1 + $0xe30] sm:$0xf0]  ;;  %v7842_v33 = vor.u32 %v9811_v8, %v7839_v10 }
 0x13b   :  { %5276 = vmatpush.bf16.msrb.mxu1 %v7874_v49  ;;  %v9875_v22 = vld [vmem:[%s15464_s1 + $0xe24] sm:$0xf]  ;;  %v8271_v30 = vld [vmem:[%s15464_s1 + $0xf90] sm:$0xf0]  ;;  %v7970_v35 = vor.u32 %v9843_v14, %v7967_v18 }
 0x13c   :  { %5289 = vmatpush.bf16.msrb.mxu2 %v8002_v50  ;;  %v9919_v29 = vld [vmem:[%s15464_s1 + $0xf84] sm:$0xf]  ;;  %v7823_v15 = vld [vmem:[%s15464_s1 + $0xc10] sm:$0xf0]  ;;  %v8098_v44 = vor.u32 %v9875_v22, %v8095_v28  ;;  %v5036_v50 = vpop.f32.mrf.mxu2  ;;  %v5049_v53 = vpop.f32.mrf.mxu3 }
 0x13d   :  { %5302 = vmatpush.bf16.msrb.mxu3 %v8130_v52  ;;  %v9807_v41 = vld [vmem:[%s15464_s1 + $0xc04] sm:$0xf]  ;;  %v8274_v45 = vor.u32 %v9919_v29, %v8271_v30  ;;  %v7951_v46 = vld [vmem:[%s15464_s1 + $0xd10] sm:$0xf0] }
 0x13e   :  { %5312 = vmatpush.bf16.msra.mxu0 %v8306_v54  ;;  %v9839_v42 = vld [vmem:[%s15464_s1 + $0xd04] sm:$0xf]  ;;  %v8079_v49 = vld [vmem:[%s15464_s1 + $0xe10] sm:$0xf0]  ;;  %v7826_v57 = vor.u32 %v9807_v41, %v7823_v15 }
 0x13f   :  { %5277 = vmatpush.bf16.msrb.mxu1 %v7858_v6  ;;  %v9871_v48 = vld [vmem:[%s15464_s1 + $0xe04] sm:$0xf]  ;;  %v8255_v51 = vld [vmem:[%s15464_s1 + $0xf70] sm:$0xf0]  ;;  %v7954_v47 = vor.u32 %v9839_v42, %v7951_v46 }
 0x140   :  { %5290 = vmatpush.bf16.msrb.mxu2 %v7986_v5  ;;  %v9915_v39 = vld [vmem:[%s15464_s1 + $0xf64] sm:$0xf]  ;;  %v8447_v54 = vld [vmem:[%s15464_s1 + $0x10f0] sm:$0xf0]  ;;  %v8082_v60 = vor.u32 %v9871_v48, %v8079_v49 }
 0x141   :  { %5303 = vmatpush.bf16.msrb.mxu3 %v8114_v11  ;;  %v9963_v52 = vld [vmem:[%s15464_s1 + $0x10e4] sm:$0xf]  ;;  %v8575_v56 = vld [vmem:[%s15464_s1 + $0x11f0] sm:$0xf0]  ;;  %v8258_v62 = vor.u32 %v9915_v39, %v8255_v51 }
 0x142   :  { %5313 = vmatpush.bf16.msra.mxu0 %v8290_v12  ;;  %v9995_v55 = vld [vmem:[%s15464_s1 + $0x11e4] sm:$0xf]  ;;  %v8703_v59 = vld [vmem:[%s15464_s1 + $0x12f0] sm:$0xf0]  ;;  %v8450_v0 = vor.u32 %v9963_v52, %v8447_v54 }
 0x143   :  { %5278 = vmatpush.bf16.msrb.mxu1 %v7842_v33  ;;  %v10027_v58 = vld [vmem:[%s15464_s1 + $0x12e4] sm:$0xf]  ;;  %v8578_v1 = vor.u32 %v9995_v55, %v8575_v56  ;;  %v8239_v5 = vld [vmem:[%s15464_s1 + $0xf50] sm:$0xf0] }
 0x144   :  { %5291 = vmatpush.bf16.msrb.mxu2 %v7970_v35  ;;  %v9911_v6 = vld [vmem:[%s15464_s1 + $0xf44] sm:$0xf]  ;;  %v8706_v10 = vor.u32 %v10027_v58, %v8703_v59  ;;  %v8431_v11 = vld [vmem:[%s15464_s1 + $0x10d0] sm:$0xf0] }
 0x145   :  { %5304 = vmatpush.bf16.msrb.mxu3 %v8098_v44  ;;  %v9959_v8 = vld [vmem:[%s15464_s1 + $0x10c4] sm:$0xf]  ;;  %v8559_v14 = vld [vmem:[%s15464_s1 + $0x11d0] sm:$0xf0]  ;;  %v8242_v28 = vor.u32 %v9911_v6, %v8239_v5 }
 0x146   :  { %5314 = vmatpush.bf16.msra.mxu0 %v8274_v45  ;;  %v9991_v12 = vld [vmem:[%s15464_s1 + $0x11c4] sm:$0xf]  ;;  %v8687_v22 = vld [vmem:[%s15464_s1 + $0x12d0] sm:$0xf0]  ;;  %v8434_v29 = vor.u32 %v9959_v8, %v8431_v11 }
 0x147   :  { %5279 = vmatpush.bf16.msrb.mxu1 %v7826_v57  ;;  %v10023_v18 = vld [vmem:[%s15464_s1 + $0x12c4] sm:$0xf]  ;;  %v8562_v30 = vor.u32 %v9991_v12, %v8559_v14  ;;  %v8223_v35 = vld [vmem:[%s15464_s1 + $0xf30] sm:$0xf0]  ;;  %v5073_v6 = vpop.f32.mrf.mxu1 }
 0x148   :  { %5292 = vmatpush.bf16.msrb.mxu2 %v7954_v47  ;;  %v9907_v33 = vld [vmem:[%s15464_s1 + $0xf24] sm:$0xf]  ;;  %v8690_v15 = vor.u32 %v10023_v18, %v8687_v22  ;;  %v8415_v42 = vld [vmem:[%s15464_s1 + $0x10b0] sm:$0xf0]  ;;  %v5060_v58 = vpop.f32.mrf.mxu0 }
 0x149   :  { %5305 = vmatpush.bf16.msrb.mxu3 %v8082_v60  ;;  %v9955_v41 = vld [vmem:[%s15464_s1 + $0x10a4] sm:$0xf]  ;;  %v8543_v45 = vld [vmem:[%s15464_s1 + $0x11b0] sm:$0xf0]  ;;  %v8226_v49 = vor.u32 %v9907_v33, %v8223_v35 }
 0x14a   :  { %5315 = vmatpush.bf16.msra.mxu0 %v8258_v62  ;;  %5280 = vmatmul.bf16.vlgmr.msrb.gmra.mxu1 %v11137_v13  ;;  %v9987_v44 = vld [vmem:[%s15464_s1 + $0x11a4] sm:$0xf]  ;;  %v8671_v48 = vld [vmem:[%s15464_s1 + $0x12b0] sm:$0xf0]  ;;  %v8418_v39 = vor.u32 %v9955_v41, %v8415_v42 }
 0x14b   :  { %5324 = vmatpush.bf16.msra.mxu1 %v8450_v0  ;;  %5293 = vmatmul.bf16.vlgmr.msrb.gmra.mxu2 %v11150_v21  ;;  %v10019_v46 = vld [vmem:[%s15464_s1 + $0x12a4] sm:$0xf]  ;;  %v8546_v51 = vor.u32 %v9987_v44, %v8543_v45  ;;  %v8207_v52 = vld [vmem:[%s15464_s1 + $0xf10] sm:$0xf0]  ;;  %v5061_v0 = vadd.f32 %v5060_v58, %v12308_v4 }
 0x14c   :  { %5337 = vmatpush.bf16.msra.mxu2 %v8578_v1  ;;  %5306 = vmatmul.bf16.vlgmr.msrb.gmra.mxu3 %v11148_v20  ;;  %v9903_v50 = vld [vmem:[%s15464_s1 + $0xf04] sm:$0xf]  ;;  %v8399_v54 = vld [vmem:[%s15464_s1 + $0x1090] sm:$0xf0]  ;;  %v8674_v55 = vor.u32 %v10019_v46, %v8671_v48 }
 0x14d   :  { %5350 = vmatpush.bf16.msra.mxu3 %v8706_v10  ;;  %v9951_v53 = vld [vmem:[%s15464_s1 + $0x1084] sm:$0xf]  ;;  %v8527_v57 = vld [vmem:[%s15464_s1 + $0x1190] sm:$0xf0]  ;;  %v8210_v1 = vor.u32 %v9903_v50, %v8207_v52  ;;  %v5074_v14 = vadd.f32 %v5073_v6, %v5061_v0 }
 0x14e   :  { %5316 = vmatpush.bf16.msra.mxu0 %v8242_v28  ;;  %v9983_v56 = vld [vmem:[%s15464_s1 + $0x1184] sm:$0xf]  ;;  %v8655_v59 = vld [vmem:[%s15464_s1 + $0x1290] sm:$0xf0]  ;;  %v8402_v5 = vor.u32 %v9951_v53, %v8399_v54 }
 0x14f   :  { %5325 = vmatpush.bf16.msra.mxu1 %v8434_v29  ;;  %v10015_v47 = vld [vmem:[%s15464_s1 + $0x1284] sm:$0xf]  ;;  %v8831_v62 = vld [vmem:[%s15464_s1 + $0x13f0] sm:$0xf0]  ;;  %v8530_v8 = vor.u32 %v9983_v56, %v8527_v57  ;;  %v5099_v52 = vpop.f32.mrf.mxu3  ;;  %v5075_v56 = vpop.f32.mrf.mxu1 }
 0x150   :  { %5338 = vmatpush.bf16.msra.mxu2 %v8562_v30  ;;  %v10059_v60 = vld [vmem:[%s15464_s1 + $0x13e4] sm:$0xf]  ;;  %v8383_v11 = vld [vmem:[%s15464_s1 + $0x1070] sm:$0xf0]  ;;  %v8658_v12 = vor.u32 %v10015_v47, %v8655_v59  ;;  %v5086_v45 = vpop.f32.mrf.mxu2 }
 0x151   :  { %5351 = vmatpush.bf16.msra.mxu3 %v8690_v15  ;;  %v9947_v10 = vld [vmem:[%s15464_s1 + $0x1064] sm:$0xf]  ;;  %v8834_v18 = vor.u32 %v10059_v60, %v8831_v62  ;;  %v8511_v22 = vld [vmem:[%s15464_s1 + $0x1170] sm:$0xf0] }
 0x152   :  { %5317 = vmatpush.bf16.msra.mxu0 %v8226_v49  ;;  %v9979_v4 = vld [vmem:[%s15464_s1 + $0x1164] sm:$0xf]  ;;  %v8639_v29 = vld [vmem:[%s15464_s1 + $0x1270] sm:$0xf0]  ;;  %v8386_v35 = vor.u32 %v9947_v10, %v8383_v11 }
 0x153   :  { %5326 = vmatpush.bf16.msra.mxu1 %v8418_v39  ;;  %v10011_v28 = vld [vmem:[%s15464_s1 + $0x1264] sm:$0xf]  ;;  %v8815_v33 = vld [vmem:[%s15464_s1 + $0x13d0] sm:$0xf0]  ;;  %v8514_v41 = vor.u32 %v9979_v4, %v8511_v22  ;;  %v5087_v39 = vadd.f32 %v5086_v45, %v5074_v14 }
 0x154   :  { %5339 = vmatpush.bf16.msra.mxu2 %v8546_v51  ;;  %v10055_v30 = vld [vmem:[%s15464_s1 + $0x13c4] sm:$0xf]  ;;  %v8367_v42 = vld [vmem:[%s15464_s1 + $0x1050] sm:$0xf0]  ;;  %v8642_v44 = vor.u32 %v10011_v28, %v8639_v29  ;;  %v5062_v51 = vpop.f32.mrf.mxu0 }
 0x155   :  { %5352 = vmatpush.bf16.msra.mxu3 %v8674_v55  ;;  %v9943_v15 = vld [vmem:[%s15464_s1 + $0x1044] sm:$0xf]  ;;  %v8818_v46 = vor.u32 %v10055_v30, %v8815_v33  ;;  %v8495_v49 = vld [vmem:[%s15464_s1 + $0x1150] sm:$0xf0]  ;;  %v5100_v57 = vadd.f32 %v5099_v52, %v5087_v39 }
 0x156   :  { %5318 = vmatpush.bf16.msra.mxu0 %v8210_v1  ;;  %v9975_v48 = vld [vmem:[%s15464_s1 + $0x1144] sm:$0xf]  ;;  %v8623_v53 = vld [vmem:[%s15464_s1 + $0x1250] sm:$0xf0]  ;;  %v8370_v47 = vor.u32 %v9943_v15, %v8367_v42 }
 0x157   :  { %5327 = vmatpush.bf16.msra.mxu1 %v8402_v5  ;;  %v10007_v50 = vld [vmem:[%s15464_s1 + $0x1244] sm:$0xf]  ;;  %v8799_v55 = vld [vmem:[%s15464_s1 + $0x13b0] sm:$0xf0]  ;;  %v8498_v58 = vor.u32 %v9975_v48, %v8495_v49  ;;  %v5101_v45 = vpop.f32.mrf.mxu3 }
 0x158   :  { %5340 = vmatpush.bf16.msra.mxu2 %v8530_v8  ;;  %v10051_v54 = vld [vmem:[%s15464_s1 + $0x13a4] sm:$0xf]  ;;  %v8351_v60 = vld [vmem:[%s15464_s1 + $0x1030] sm:$0xf0]  ;;  %v8626_v62 = vor.u32 %v10007_v50, %v8623_v53 }
 0x159   :  { %5353 = vmatpush.bf16.msra.mxu3 %v8658_v12  ;;  %5319 = vmatmul.bf16.vlgmr.msra.gmra.mxu0 %v11158_v26  ;;  %v9939_v59 = vld [vmem:[%s15464_s1 + $0x1024] sm:$0xf]  ;;  %v8802_v0 = vor.u32 %v10051_v54, %v8799_v55  ;;  %v8479_v6 = vld [vmem:[%s15464_s1 + $0x1130] sm:$0xf0] }
 0x15a   :  { %5363 = vmatpush.bf16.msrb.mxu0 %v8834_v18  ;;  %v9971_v1 = vld [vmem:[%s15464_s1 + $0x1124] sm:$0xf]  ;;  %v8607_v8 = vld [vmem:[%s15464_s1 + $0x1230] sm:$0xf0]  ;;  %v8354_v12 = vor.u32 %v9939_v59, %v8351_v60 }
 0x15b   :  { %5328 = vmatpush.bf16.msra.mxu1 %v8386_v35  ;;  %v10003_v5 = vld [vmem:[%s15464_s1 + $0x1224] sm:$0xf]  ;;  %v8783_v11 = vld [vmem:[%s15464_s1 + $0x1390] sm:$0xf0]  ;;  %v8482_v14 = vor.u32 %v9971_v1, %v8479_v6 }
 0x15c   :  { %5341 = vmatpush.bf16.msra.mxu2 %v8514_v41  ;;  %v10047_v10 = vld [vmem:[%s15464_s1 + $0x1384] sm:$0xf]  ;;  %v8335_v4 = vld [vmem:[%s15464_s1 + $0x1010] sm:$0xf0]  ;;  %v8610_v28 = vor.u32 %v10003_v5, %v8607_v8  ;;  %v5088_v41 = vpop.f32.mrf.mxu2 }
 0x15d   :  { %5354 = vmatpush.bf16.msra.mxu3 %v8642_v44  ;;  %v9935_v18 = vld [vmem:[%s15464_s1 + $0x1004] sm:$0xf]  ;;  %v8786_v29 = vor.u32 %v10047_v10, %v8783_v11  ;;  %v8463_v30 = vld [vmem:[%s15464_s1 + $0x1110] sm:$0xf0] }
 0x15e   :  { %5364 = vmatpush.bf16.msrb.mxu0 %v8818_v46  ;;  %v9967_v22 = vld [vmem:[%s15464_s1 + $0x1104] sm:$0xf]  ;;  %v8591_v35 = vld [vmem:[%s15464_s1 + $0x1210] sm:$0xf0]  ;;  %v5112_v46 = vpop.f32.mrf.mxu0  ;;  %v8338_v51 = vor.u32 %v9935_v18, %v8335_v4 }
 0x15f   :  { %5329 = vmatpush.bf16.msra.mxu1 %v8370_v47  ;;  %v9999_v33 = vld [vmem:[%s15464_s1 + $0x1204] sm:$0xf]  ;;  %v8767_v42 = vld [vmem:[%s15464_s1 + $0x1370] sm:$0xf0]  ;;  %v12567_v39 = vadd.f32 %v5112_v46, %v5100_v57  ;;  %v8466_v52 = vor.u32 %v9967_v22, %v8463_v30 }
 0x160   :  { %5342 = vmatpush.bf16.msra.mxu2 %v8498_v58  ;;  %v10043_v15 = vld [vmem:[%s15464_s1 + $0x1364] sm:$0xf]  ;;  %v8959_v48 = vld [vmem:[%s15464_s1 + $0x14f0] sm:$0xf0]  ;;  %v8594_v55 = vor.u32 %v9999_v33, %v8591_v35 }
 0x161   :  { %5355 = vmatpush.bf16.msra.mxu3 %v8626_v62  ;;  %v10091_v44 = vld [vmem:[%s15464_s1 + $0x14e4] sm:$0xf]  ;;  %v9087_v50 = vld [vmem:[%s15464_s1 + $0x15f0] sm:$0xf0]  ;;  %v8770_v56 = vor.u32 %v10043_v15, %v8767_v42 }
 0x162   :  { %5365 = vmatpush.bf16.msrb.mxu0 %v8802_v0  ;;  %v10123_v49 = vld [vmem:[%s15464_s1 + $0x15e4] sm:$0xf]  ;;  %v9215_v54 = vld [vmem:[%s15464_s1 + $0x16f0] sm:$0xf0]  ;;  %v8962_v47 = vor.u32 %v10091_v44, %v8959_v48 }
 0x163   :  { %5330 = vmatpush.bf16.msra.mxu1 %v8354_v12  ;;  %v10155_v53 = vld [vmem:[%s15464_s1 + $0x16e4] sm:$0xf]  ;;  %v9090_v58 = vor.u32 %v10123_v49, %v9087_v50  ;;  %v8751_v59 = vld [vmem:[%s15464_s1 + $0x1350] sm:$0xf0] }
 0x164   :  { %5343 = vmatpush.bf16.msra.mxu2 %v8482_v14  ;;  %v10039_v57 = vld [vmem:[%s15464_s1 + $0x1344] sm:$0xf]  ;;  %v9218_v62 = vor.u32 %v10155_v53, %v9215_v54  ;;  %v8943_v0 = vld [vmem:[%s15464_s1 + $0x14d0] sm:$0xf0]  ;;  %v10213_v54 = vld [vmem:[%s15466_s2] sm:$0xf] }
 0x165   :  { %5356 = vmatpush.bf16.msra.mxu3 %v8610_v28  ;;  %v10087_v60 = vld [vmem:[%s15464_s1 + $0x14c4] sm:$0xf]  ;;  %v9071_v6 = vld [vmem:[%s15464_s1 + $0x15d0] sm:$0xf0]  ;;  %v8754_v10 = vor.u32 %v10039_v57, %v8751_v59 }
 0x166   :  { %5366 = vmatpush.bf16.msrb.mxu0 %v8786_v29  ;;  %v10119_v1 = vld [vmem:[%s15464_s1 + $0x15c4] sm:$0xf]  ;;  %v9199_v8 = vld [vmem:[%s15464_s1 + $0x16d0] sm:$0xf0]  ;;  %v8946_v11 = vor.u32 %v10087_v60, %v8943_v0  ;;  %v5114_v33 = vpop.f32.mrf.mxu0 }
 0x167   :  { %5331 = vmatpush.bf16.msra.mxu1 %v8338_v51  ;;  %v10151_v5 = vld [vmem:[%s15464_s1 + $0x16c4] sm:$0xf]  ;;  %v9074_v12 = vor.u32 %v10119_v1, %v9071_v6  ;;  %v8735_v18 = vld [vmem:[%s15464_s1 + $0x1330] sm:$0xf0]  ;;  %v5125_v59 = vpop.f32.mrf.mxu1 }
 0x168   :  { %5344 = vmatpush.bf16.msra.mxu2 %v8466_v52  ;;  %v10035_v14 = vld [vmem:[%s15464_s1 + $0x1324] sm:$0xf]  ;;  %v9202_v22 = vor.u32 %v10151_v5, %v9199_v8  ;;  %v8927_v28 = vld [vmem:[%s15464_s1 + $0x14b0] sm:$0xf0] }
 0x169   :  { %5357 = vmatpush.bf16.msra.mxu3 %v8594_v55  ;;  %v10083_v4 = vld [vmem:[%s15464_s1 + $0x14a4] sm:$0xf]  ;;  %v9055_v30 = vld [vmem:[%s15464_s1 + $0x15b0] sm:$0xf0]  ;;  %v8738_v15 = vor.u32 %v10035_v14, %v8735_v18  ;;  %v860_v55 = vperm.slane %v10213_v54, 1 }
 0x16a   :  { %5367 = vmatpush.bf16.msrb.mxu0 %v8770_v56  ;;  %5332 = vmatmul.bf16.vlgmr.msra.gmra.mxu1 %v11353_v25  ;;  %v10115_v29 = vld [vmem:[%s15464_s1 + $0x15a4] sm:$0xf]  ;;  %v9183_v41 = vld [vmem:[%s15464_s1 + $0x16b0] sm:$0xf0]  ;;  %v8930_v45 = vor.u32 %v10083_v4, %v8927_v28 }
 0x16b   :  { %5376 = vmatpush.bf16.msrb.mxu1 %v8962_v47  ;;  %5345 = vmatmul.bf16.vlgmr.msra.gmra.mxu2 %v11366_v32  ;;  %v10147_v35 = vld [vmem:[%s15464_s1 + $0x16a4] sm:$0xf]  ;;  %v8719_v44 = vld [vmem:[%s15464_s1 + $0x1310] sm:$0xf0]  ;;  %v9058_v46 = vor.u32 %v10115_v29, %v9055_v30 }
 0x16c   :  { %5389 = vmatpush.bf16.msrb.mxu2 %v9090_v58  ;;  %5358 = vmatmul.bf16.vlgmr.msra.gmra.mxu3 %v11364_v31  ;;  %v10031_v42 = vld [vmem:[%s15464_s1 + $0x1304] sm:$0xf]  ;;  %v8911_v49 = vld [vmem:[%s15464_s1 + $0x1490] sm:$0xf0]  ;;  %v9186_v51 = vor.u32 %v10147_v35, %v9183_v41 }
 0x16d   :  { %5402 = vmatpush.bf16.msrb.mxu3 %v9218_v62  ;;  %v10079_v48 = vld [vmem:[%s15464_s1 + $0x1484] sm:$0xf]  ;;  %v9039_v52 = vld [vmem:[%s15464_s1 + $0x1590] sm:$0xf0]  ;;  %v8722_v57 = vor.u32 %v10031_v42, %v8719_v44 }
 0x16e   :  { %5368 = vmatpush.bf16.msrb.mxu0 %v8754_v10  ;;  %v10111_v50 = vld [vmem:[%s15464_s1 + $0x1584] sm:$0xf]  ;;  %v9167_v56 = vld [vmem:[%s15464_s1 + $0x1690] sm:$0xf0]  ;;  %v8914_v60 = vor.u32 %v10079_v48, %v8911_v49  ;;  %v5138_v33 = vpop.f32.mrf.mxu2 }
 0x16f   :  { %5377 = vmatpush.bf16.msrb.mxu1 %v8946_v11  ;;  %v10143_v53 = vld [vmem:[%s15464_s1 + $0x1684] sm:$0xf]  ;;  %v9343_v58 = vld [vmem:[%s15464_s1 + $0x17f0] sm:$0xf0]  ;;  %v9042_v62 = vor.u32 %v10111_v50, %v9039_v52  ;;  %v5127_v52 = vpop.f32.mrf.mxu1 }
 0x170   :  { %5390 = vmatpush.bf16.msrb.mxu2 %v9074_v12  ;;  %v10187_v47 = vld [vmem:[%s15464_s1 + $0x17e4] sm:$0xf]  ;;  %v8895_v1 = vld [vmem:[%s15464_s1 + $0x1470] sm:$0xf0]  ;;  %v9170_v6 = vor.u32 %v10143_v53, %v9167_v56  ;;  %v5126_v12 = vadd.f32 %v5125_v59, %v860_v55 }
 0x171   :  { %5403 = vmatpush.bf16.msrb.mxu3 %v9202_v22  ;;  %v10075_v0 = vld [vmem:[%s15464_s1 + $0x1464] sm:$0xf]  ;;  %v9346_v5 = vor.u32 %v10187_v47, %v9343_v58  ;;  %v9023_v10 = vld [vmem:[%s15464_s1 + $0x1570] sm:$0xf0] }
 0x172   :  { %5369 = vmatpush.bf16.msrb.mxu0 %v8738_v15  ;;  %v10107_v8 = vld [vmem:[%s15464_s1 + $0x1564] sm:$0xf]  ;;  %v9151_v14 = vld [vmem:[%s15464_s1 + $0x1670] sm:$0xf0]  ;;  %v8898_v22 = vor.u32 %v10075_v0, %v8895_v1 }
 0x173   :  { %5378 = vmatpush.bf16.msrb.mxu1 %v8930_v45  ;;  %v10139_v11 = vld [vmem:[%s15464_s1 + $0x1664] sm:$0xf]  ;;  %v9327_v4 = vld [vmem:[%s15464_s1 + $0x17d0] sm:$0xf0]  ;;  %v9026_v28 = vor.u32 %v10107_v8, %v9023_v10  ;;  %v5139_v45 = vadd.f32 %v5138_v33, %v5126_v12 }
 0x174   :  { %5391 = vmatpush.bf16.msrb.mxu2 %v9058_v46  ;;  %v10183_v18 = vld [vmem:[%s15464_s1 + $0x17c4] sm:$0xf]  ;;  %v8879_v30 = vld [vmem:[%s15464_s1 + $0x1450] sm:$0xf0]  ;;  %v9154_v35 = vor.u32 %v10139_v11, %v9151_v14  ;;  %v5151_v46 = vpop.f32.mrf.mxu3 }
 0x175   :  { %5404 = vmatpush.bf16.msrb.mxu3 %v9186_v51  ;;  %v10071_v29 = vld [vmem:[%s15464_s1 + $0x1444] sm:$0xf]  ;;  %v9330_v41 = vor.u32 %v10183_v18, %v9327_v4  ;;  %v9007_v42 = vld [vmem:[%s15464_s1 + $0x1550] sm:$0xf0]  ;;  %v5152_v51 = vadd.f32 %v5151_v46, %v5139_v45  ;;  %v9454_v45 = vld [vmem:[%s15464_s1 + $0xf4] sm:$0xf0] }
 0x176   :  { %5370 = vmatpush.bf16.msrb.mxu0 %v8722_v57  ;;  %v10103_v15 = vld [vmem:[%s15464_s1 + $0x1544] sm:$0xf]  ;;  %v9135_v48 = vld [vmem:[%s15464_s1 + $0x1650] sm:$0xf0]  ;;  %v8882_v53 = vor.u32 %v10071_v29, %v8879_v30  ;;  %v5140_v18 = vpop.f32.mrf.mxu2 }
 0x177   :  { %5379 = vmatpush.bf16.msrb.mxu1 %v8914_v60  ;;  %v10135_v44 = vld [vmem:[%s15464_s1 + $0x1644] sm:$0xf]  ;;  %v9311_v50 = vld [vmem:[%s15464_s1 + $0x17b0] sm:$0xf0]  ;;  %v9010_v54 = vor.u32 %v10103_v15, %v9007_v42 }
 0x178   :  { %5392 = vmatpush.bf16.msrb.mxu2 %v9042_v62  ;;  %v10179_v49 = vld [vmem:[%s15464_s1 + $0x17a4] sm:$0xf]  ;;  %v8863_v56 = vld [vmem:[%s15464_s1 + $0x1430] sm:$0xf0]  ;;  %v9138_v47 = vor.u32 %v10135_v44, %v9135_v48  ;;  %v6405_v44 = vld [vmem:[%s15464_s1 + $0xe8] sm:$0xf] }
 0x179   :  { %5405 = vmatpush.bf16.msrb.mxu3 %v9170_v6  ;;  %5371 = vmatmul.bf16.vlgmr.msrb.gmra.mxu0 %v11374_v36  ;;  %v10067_v55 = vld [vmem:[%s15464_s1 + $0x1424] sm:$0xf]  ;;  %v9314_v58 = vor.u32 %v10179_v49, %v9311_v50  ;;  %v8991_v59 = vld [vmem:[%s15464_s1 + $0x1530] sm:$0xf0]  ;;  %v5164_v6 = vpop.f32.mrf.mxu0  ;;  %v6533_v49 = vld [vmem:[%s15464_s1 + $0x1e8] sm:$0xf] }
 0x17a   :  { %5415 = vmatpush.bf16.msra.mxu0 %v9346_v5  ;;  %v10099_v57 = vld [vmem:[%s15464_s1 + $0x1524] sm:$0xf]  ;;  %v9119_v62 = vld [vmem:[%s15464_s1 + $0x1630] sm:$0xf0]  ;;  %v8866_v5 = vor.u32 %v10067_v55, %v8863_v56  ;;  %v12741_v14 = vadd.f32 %v5164_v6, %v5152_v51  ;;  %v9486_v50 = vld [vmem:[%s15464_s1 + $0x1f4] sm:$0xf0] }
 0x17b   :  { %5380 = vmatpush.bf16.msrb.mxu1 %v8898_v22  ;;  %v10131_v60 = vld [vmem:[%s15464_s1 + $0x1624] sm:$0xf]  ;;  %v9295_v1 = vld [vmem:[%s15464_s1 + $0x1790] sm:$0xf0]  ;;  %v8994_v8 = vor.u32 %v10099_v57, %v8991_v59  ;;  %v6389_v59 = vld [vmem:[%s15464_s1 + $0xc8] sm:$0xf] }
 0x17c   :  { %5393 = vmatpush.bf16.msrb.mxu2 %v9026_v28  ;;  %v10175_v0 = vld [vmem:[%s15464_s1 + $0x1784] sm:$0xf]  ;;  %v8847_v11 = vld [vmem:[%s15464_s1 + $0x1410] sm:$0xf0]  ;;  %v9122_v4 = vor.u32 %v10131_v60, %v9119_v62  ;;  %v5153_v33 = vpop.f32.mrf.mxu3  ;;  %v9450_v60 = vld [vmem:[%s15464_s1 + $0xd4] sm:$0xf0] }
 0x17d   :  { %5406 = vmatpush.bf16.msrb.mxu3 %v9154_v35  ;;  %v10063_v10 = vld [vmem:[%s15464_s1 + $0x1404] sm:$0xf]  ;;  %v9298_v22 = vor.u32 %v10175_v0, %v9295_v1  ;;  %v8975_v28 = vld [vmem:[%s15464_s1 + $0x1510] sm:$0xf0]  ;;  %v6517_v0 = vld [vmem:[%s15464_s1 + $0x1c8] sm:$0xf] }
 0x17e   :  { %5416 = vmatpush.bf16.msra.mxu0 %v9330_v41  ;;  %v10095_v12 = vld [vmem:[%s15464_s1 + $0x1504] sm:$0xf]  ;;  %v9103_v30 = vld [vmem:[%s15464_s1 + $0x1610] sm:$0xf0]  ;;  %v8850_v46 = vor.u32 %v10063_v10, %v8847_v11  ;;  %v9482_v1 = vld [vmem:[%s15464_s1 + $0x1d4] sm:$0xf0] }
 0x17f   :  { %5381 = vmatpush.bf16.msrb.mxu1 %v8882_v53  ;;  %v10127_v29 = vld [vmem:[%s15464_s1 + $0x1604] sm:$0xf]  ;;  %v9279_v41 = vld [vmem:[%s15464_s1 + $0x1770] sm:$0xf0]  ;;  %v8978_v48 = vor.u32 %v10095_v12, %v8975_v28  ;;  %v6518_v18 = vor.u32 %v9482_v1, %v6517_v0  ;;  %v9446_v28 = vld [vmem:[%s15464_s1 + $0xb4] sm:$0xf0] }
 0x180   :  { %5394 = vmatpush.bf16.msrb.mxu2 %v9010_v54  ;;  %v10171_v35 = vld [vmem:[%s15464_s1 + $0x1764] sm:$0xf]  ;;  %v9407_v42 = vld [vmem:[%s15464_s1 + $0x1870] sm:$0xf0]  ;;  %v9106_v51 = vor.u32 %v10127_v29, %v9103_v30  ;;  %v6406_v54 = vor.u32 %v9454_v45, %v6405_v44  ;;  %v6501_v29 = vld [vmem:[%s15464_s1 + $0x1a8] sm:$0xf] }
 0x181   :  { %5407 = vmatpush.bf16.msrb.mxu3 %v9138_v47  ;;  %v10203_v15 = vld [vmem:[%s15464_s1 + $0x1864] sm:$0xf]  ;;  %v9282_v52 = vor.u32 %v10171_v35, %v9279_v41  ;;  %v9263_v56 = vld [vmem:[%s15464_s1 + $0x1750] sm:$0xf0]  ;;  %v5166_v62 = vpop.f32.mrf.mxu0  ;;  %v9478_v30 = vld [vmem:[%s15464_s1 + $0x1b4] sm:$0xf0] }
 0x182   :  { %5417 = vmatpush.bf16.msra.mxu0 %v9314_v58  ;;  %v9410_v53 = vor.u32 %v10203_v15, %v9407_v42  ;;  %v10167_v55 = vld [vmem:[%s15464_s1 + $0x1744] sm:$0xf]  ;;  %v6534_v58 = vor.u32 %v9486_v50, %v6533_v49  ;;  %v9391_v57 = vld [vmem:[%s15464_s1 + $0x1850] sm:$0xf0]  ;;  %v9442_v49 = vld [vmem:[%s15464_s1 + $0x94] sm:$0xf0] }
 0x183   :  { %5382 = vmatpush.bf16.msrb.mxu1 %v8866_v5  ;;  %v10199_v47 = vld [vmem:[%s15464_s1 + $0x1844] sm:$0xf]  ;;  %v9266_v6 = vor.u32 %v10167_v55, %v9263_v56  ;;  %v9247_v11 = vld [vmem:[%s15464_s1 + $0x1730] sm:$0xf0]  ;;  %v6485_v50 = vld [vmem:[%s15464_s1 + $0x188] sm:$0xf] }
 0x184   :  { %5395 = vmatpush.bf16.msrb.mxu2 %v8994_v8  ;;  %v9394_v5 = vor.u32 %v10199_v47, %v9391_v57  ;;  %v6390_v8 = vor.u32 %v9450_v60, %v6389_v59  ;;  %v10163_v10 = vld [vmem:[%s15464_s1 + $0x1724] sm:$0xf]  ;;  %v9231_v42 = vld [vmem:[%s15464_s1 + $0x1710] sm:$0xf0]  ;;  %v6789_v55 = vld [vmem:[%s15464_s1 + $0x3e8] sm:$0xf] }
 0x185   :  { %5408 = vmatpush.bf16.msrb.mxu3 %v9122_v4  ;;  %v10195_v12 = vld [vmem:[%s15464_s1 + $0x1824] sm:$0xf]  ;;  %v9375_v4 = vld [vmem:[%s15464_s1 + $0x1830] sm:$0xf0]  ;;  %v9250_v33 = vor.u32 %v10163_v10, %v9247_v11  ;;  %v9550_v56 = vld [vmem:[%s15464_s1 + $0x3f4] sm:$0xf0] }
 0x186   :  { %5418 = vmatpush.bf16.msra.mxu0 %v9298_v22  ;;  %v6373_v22 = vld [vmem:[%s15464_s1 + $0xa8] sm:$0xf]  ;;  %v10159_v35 = vld [vmem:[%s15464_s1 + $0x1704] sm:$0xf]  ;;  %v9378_v41 = vor.u32 %v10195_v12, %v9375_v4  ;;  %v9359_v45 = vld [vmem:[%s15464_s1 + $0x1810] sm:$0xf0] }
 0x187   :  { %5383 = vmatpush.bf16.msrb.mxu1 %v8850_v46  ;;  %v6374_v15 = vor.u32 %v9446_v28, %v6373_v22  ;;  %v10191_v44 = vld [vmem:[%s15464_s1 + $0x1804] sm:$0xf]  ;;  %v6502_v46 = vor.u32 %v9478_v30, %v6501_v29  ;;  %v5177_v47 = vpop.f32.mrf.mxu1  ;;  %v6341_v0 = vld [vmem:[%s15464_s1 + $0x68] sm:$0xf]  ;;  %v9438_v1 = vld [vmem:[%s15464_s1 + $0x74] sm:$0xf0] }
 0x188   :  { %5396 = vmatpush.bf16.msrb.mxu2 %v8978_v48  ;;  %v6357_v48 = vld [vmem:[%s15464_s1 + $0x88] sm:$0xf]  ;;  %v5178_v59 = vadd.f32 %v5177_v47, %v12741_v14  ;;  %v9470_v14 = vld [vmem:[%s15464_s1 + $0x174] sm:$0xf0] }
 0x189   :  { %5409 = vmatpush.bf16.msrb.mxu3 %v9106_v51  ;;  %v9474_v51 = vld [vmem:[%s15464_s1 + $0x194] sm:$0xf0]  ;;  %v6358_v57 = vor.u32 %v9442_v49, %v6357_v48  ;;  %v6773_v11 = vld [vmem:[%s15464_s1 + $0x3c8] sm:$0xf] }
 0x18a   :  { %5419 = vmatpush.bf16.msra.mxu0 %v9282_v52  ;;  %5384 = vmatmul.bf16.vlgmr.msrb.gmra.mxu1 %v11574_v61  ;;  %v6661_v52 = vld [vmem:[%s15464_s1 + $0x2e8] sm:$0xf]  ;;  %v6486_v60 = vor.u32 %v9474_v51, %v6485_v50  ;;  %v9514_v10 = vld [vmem:[%s15464_s1 + $0x2d4] sm:$0xf0] }
 0x18b   :  { %5432 = vmatpush.bf16.msra.mxu1 %v9410_v53  ;;  %5397 = vmatmul.bf16.vlgmr.msrb.gmra.mxu2 %v11587_v3  ;;  %v9518_v53 = vld [vmem:[%s15464_s1 + $0x2f4] sm:$0xf0]  ;;  %v6325_v29 = vld [vmem:[%s15464_s1 + $0x48] sm:$0xf] }
 0x18c   :  { %5441 = vmatpush.bf16.msra.mxu2 %v6406_v54  ;;  %5410 = vmatmul.bf16.vlgmr.msrb.gmra.mxu3 %v11585_v2  ;;  %v9234_v54 = vor.u32 %v10159_v35, %v9231_v42  ;;  %v6662_v62 = vor.u32 %v9518_v53, %v6661_v52  ;;  %v9546_v12 = vld [vmem:[%s15464_s1 + $0x3d4] sm:$0xf0] }
 0x18d   :  { %5454 = vmatpush.bf16.msra.mxu3 %v6534_v58  ;;  %v9362_v58 = vor.u32 %v10191_v44, %v9359_v45  ;;  %v9434_v30 = vld [vmem:[%s15464_s1 + $0x54] sm:$0xf0]  ;;  %v6629_v44 = vld [vmem:[%s15464_s1 + $0x2a8] sm:$0xf] }
 0x18e   :  { %5420 = vmatpush.bf16.msra.mxu0 %v9266_v6  ;;  %v6469_v6 = vld [vmem:[%s15464_s1 + $0x168] sm:$0xf]  ;;  %v5190_v4 = vpop.f32.mrf.mxu2  ;;  %v9466_v42 = vld [vmem:[%s15464_s1 + $0x154] sm:$0xf0]  ;;  %v6326_v51 = vor.u32 %v9434_v30, %v6325_v29 }
 0x18f   :  { %5433 = vmatpush.bf16.msra.mxu1 %v9394_v5  ;;  %v6790_v5 = vor.u32 %v9550_v56, %v6789_v55  ;;  %v6470_v22 = vor.u32 %v9470_v14, %v6469_v6  ;;  %v5191_v35 = vadd.f32 %v5190_v4, %v5178_v59  ;;  %v9510_v45 = vld [vmem:[%s15464_s1 + $0x2b4] sm:$0xf0]  ;;  %v5179_v50 = vpop.f32.mrf.mxu1  ;;  %v6437_v56 = vld [vmem:[%s15464_s1 + $0x128] sm:$0xf] }
 0x190   :  { %5442 = vmatpush.bf16.msra.mxu2 %v6390_v8  ;;  %v6645_v8 = vld [vmem:[%s15464_s1 + $0x2c8] sm:$0xf]  ;;  %v9542_v48 = vld [vmem:[%s15464_s1 + $0x3b4] sm:$0xf0]  ;;  %v6630_v53 = vor.u32 %v9510_v45, %v6629_v44 }
 0x191   :  { %5455 = vmatpush.bf16.msra.mxu3 %v6518_v18  ;;  %v6342_v18 = vor.u32 %v9438_v1, %v6341_v0  ;;  %v6646_v28 = vor.u32 %v9514_v10, %v6645_v8  ;;  %v9430_v55 = vld [vmem:[%s15464_s1 + $0x34] sm:$0xf0]  ;;  %v6725_v30 = vld [vmem:[%s15464_s1 + $0x368] sm:$0xf] }
 0x192   :  { %5421 = vmatpush.bf16.msra.mxu0 %v9250_v33  ;;  %v6453_v33 = vld [vmem:[%s15464_s1 + $0x148] sm:$0xf]  ;;  %v9506_v59 = vld [vmem:[%s15464_s1 + $0x294] sm:$0xf0] }
 0x193   :  { %5434 = vmatpush.bf16.msra.mxu1 %v9378_v41  ;;  %v5203_v41 = vpop.f32.mrf.mxu3  ;;  %v6454_v52 = vor.u32 %v9466_v42, %v6453_v33  ;;  %v9538_v0 = vld [vmem:[%s15464_s1 + $0x394] sm:$0xf0]  ;;  %v7045_v42 = vld [vmem:[%s15464_s1 + $0x5e8] sm:$0xf] }
 0x194   :  { %5443 = vmatpush.bf16.msra.mxu2 %v6374_v15  ;;  %v6774_v15 = vor.u32 %v9546_v12, %v6773_v11  ;;  %v5204_v49 = vadd.f32 %v5203_v41, %v5191_v35  ;;  %v9426_v11 = vld [vmem:[%s15464_s1 + $0x14] sm:$0xf0]  ;;  %v6421_v12 = vld [vmem:[%s15464_s1 + $0x108] sm:$0xf] }
 0x195   :  { %5456 = vmatpush.bf16.msra.mxu3 %v6502_v46  ;;  %v6757_v46 = vld [vmem:[%s15464_s1 + $0x3a8] sm:$0xf]  ;;  %v9502_v29 = vld [vmem:[%s15464_s1 + $0x274] sm:$0xf0] }
 0x196   :  { %5422 = vmatpush.bf16.msra.mxu0 %v9234_v54  ;;  %v6309_v54 = vld [vmem:[%s15464_s1 + $0x28] sm:$0xf]  ;;  %v6758_v47 = vor.u32 %v9542_v48, %v6757_v46  ;;  %v5192_v14 = vpop.f32.mrf.mxu2  ;;  %v9534_v33 = vld [vmem:[%s15464_s1 + $0x374] sm:$0xf0] }
 0x197   :  { %5435 = vmatpush.bf16.msra.mxu1 %v9362_v58  ;;  %v9462_v58 = vld [vmem:[%s15464_s1 + $0x134] sm:$0xf0]  ;;  %v6310_v1 = vor.u32 %v9430_v55, %v6309_v54  ;;  %v6917_v35 = vld [vmem:[%s15464_s1 + $0x4e8] sm:$0xf]  ;;  %v6726_v48 = vor.u32 %v9534_v33, %v6725_v30 }
 0x198   :  { %5444 = vmatpush.bf16.msra.mxu2 %v6358_v57  ;;  %v6613_v57 = vld [vmem:[%s15464_s1 + $0x288] sm:$0xf]  ;;  %v6438_v8 = vor.u32 %v9462_v58, %v6437_v56  ;;  %v9582_v41 = vld [vmem:[%s15464_s1 + $0x4f4] sm:$0xf0] }
 0x199   :  { %5457 = vmatpush.bf16.msra.mxu3 %v6486_v60  ;;  %5423 = vmatmul.bf16.vlgmr.msra.gmra.mxu0 %v11595_v7  ;;  %v5216_v60 = vpop.f32.mrf.mxu0  ;;  %v6614_v10 = vor.u32 %v9506_v59, %v6613_v57  ;;  %v9614_v44 = vld [vmem:[%s15464_s1 + $0x5f4] sm:$0xf0]  ;;  %v6581_v50 = vld [vmem:[%s15464_s1 + $0x248] sm:$0xf] }
 0x19a   :  { %5467 = vmatpush.bf16.msrb.mxu0 %v6662_v62  ;;  %9420 = vmatmul.msk.bf16.vlgmr.msra.gmra.mxu1 %vm4787_vm0, %v11698_v43  ;;  %v6741_v62 = vld [vmem:[%s15464_s1 + $0x388] sm:$0xf]  ;;  %v12939_v6 = vadd.f32 %v5216_v60, %v5204_v49  ;;  %v6918_v49 = vor.u32 %v9582_v41, %v6917_v35  ;;  %v9530_v54 = vld [vmem:[%s15464_s1 + $0x354] sm:$0xf0] }
 0x19b   :  { %5480 = vmatpush.bf16.msrb.mxu1 %v6790_v5  ;;  %v6293_v5 = vld [vmem:[%s15464_s1 + $0x8] sm:$0xf]  ;;  %v5205_v4 = vpop.f32.mrf.mxu3  ;;  %v9578_v56 = vld [vmem:[%s15464_s1 + $0x4d4] sm:$0xf0] }
 0x19c   :  { %5445 = vmatpush.bf16.msra.mxu2 %v6342_v18  ;;  %v9458_v18 = vld [vmem:[%s15464_s1 + $0x114] sm:$0xf0]  ;;  %v6901_v55 = vld [vmem:[%s15464_s1 + $0x4c8] sm:$0xf] }
 0x19d   :  { %5458 = vmatpush.bf16.msra.mxu3 %v6470_v22  ;;  %v6742_v22 = vor.u32 %v9538_v0, %v6741_v62  ;;  %v6422_v45 = vor.u32 %v9458_v18, %v6421_v12  ;;  %v7029_v58 = vld [vmem:[%s15464_s1 + $0x5c8] sm:$0xf]  ;;  %v9610_v57 = vld [vmem:[%s15464_s1 + $0x5d4] sm:$0xf0]  ;;  %v6902_v62 = vor.u32 %v9578_v56, %v6901_v55 }
 0x19e   :  { %5468 = vmatpush.bf16.msrb.mxu0 %v6646_v28  ;;  %v6597_v28 = vld [vmem:[%s15464_s1 + $0x268] sm:$0xf]  ;;  %v7030_v14 = vor.u32 %v9610_v57, %v7029_v58  ;;  %v9606_v18 = vld [vmem:[%s15464_s1 + $0x5b4] sm:$0xf0] }
 0x19f   :  { %5481 = vmatpush.bf16.msrb.mxu1 %v6774_v15  ;;  %v6294_v15 = vor.u32 %v9426_v11, %v6293_v5  ;;  %v6598_v46 = vor.u32 %v9502_v29, %v6597_v28  ;;  %v6565_v0 = vld [vmem:[%s15464_s1 + $0x228] sm:$0xf]  ;;  %v9574_v11 = vld [vmem:[%s15464_s1 + $0x4b4] sm:$0xf0] }
 0x1a0   :  { %5446 = vmatpush.bf16.msra.mxu2 %v6326_v51  ;;  %v9498_v51 = vld [vmem:[%s15464_s1 + $0x254] sm:$0xf0]  ;;  %v6693_v5 = vld [vmem:[%s15464_s1 + $0x328] sm:$0xf] }
 0x1a1   :  { %5459 = vmatpush.bf16.msra.mxu3 %v6454_v52  ;;  %v6709_v52 = vld [vmem:[%s15464_s1 + $0x348] sm:$0xf]  ;;  %v6582_v59 = vor.u32 %v9498_v51, %v6581_v50  ;;  %v9490_v30 = vld [vmem:[%s15464_s1 + $0x214] sm:$0xf0] }
 0x1a2   :  { %5469 = vmatpush.bf16.msrb.mxu0 %v6630_v53  ;;  %v7046_v53 = vor.u32 %v9614_v44, %v7045_v42  ;;  %v6710_v60 = vor.u32 %v9530_v54, %v6709_v52  ;;  %v7013_v12 = vld [vmem:[%s15464_s1 + $0x5a8] sm:$0xf]  ;;  %v9522_v35 = vld [vmem:[%s15464_s1 + $0x314] sm:$0xf0] }
 0x1a3   :  { %5482 = vmatpush.bf16.msrb.mxu1 %v6758_v47  ;;  %v5218_v47 = vpop.f32.mrf.mxu0  ;;  %v6677_v33 = vld [vmem:[%s15464_s1 + $0x308] sm:$0xf]  ;;  %v7014_v41 = vor.u32 %v9606_v18, %v7013_v12  ;;  %v9570_v42 = vld [vmem:[%s15464_s1 + $0x494] sm:$0xf0] }
 0x1a4   :  { %5447 = vmatpush.bf16.msra.mxu2 %v6310_v1  ;;  %v9494_v1 = vld [vmem:[%s15464_s1 + $0x234] sm:$0xf0]  ;;  %v6997_v44 = vld [vmem:[%s15464_s1 + $0x588] sm:$0xf]  ;;  %v6678_v54 = vor.u32 %v9522_v35, %v6677_v33 }
 0x1a5   :  { %5460 = vmatpush.bf16.msra.mxu3 %v6438_v8  ;;  %v9526_v8 = vld [vmem:[%s15464_s1 + $0x334] sm:$0xf0]  ;;  %v6566_v4 = vor.u32 %v9494_v1, %v6565_v0  ;;  %v7301_v52 = vld [vmem:[%s15464_s1 + $0x7e8] sm:$0xf] }
 0x1a6   :  { %5470 = vmatpush.bf16.msrb.mxu0 %v6614_v10  ;;  %v6885_v10 = vld [vmem:[%s15464_s1 + $0x4a8] sm:$0xf]  ;;  %v6694_v28 = vor.u32 %v9526_v8, %v6693_v5  ;;  %v9566_v58 = vld [vmem:[%s15464_s1 + $0x474] sm:$0xf0] }
 0x1a7   :  { %5483 = vmatpush.bf16.msrb.mxu1 %v6742_v22  ;;  %v6549_v22 = vld [vmem:[%s15464_s1 + $0x208] sm:$0xf]  ;;  %v6886_v29 = vor.u32 %v9574_v11, %v6885_v10  ;;  %v9642_v0 = vld [vmem:[%s15464_s1 + $0x6d4] sm:$0xf0] }
 0x1a8   :  { %5448 = vmatpush.bf16.msra.mxu2 %v6294_v15  ;;  %v6869_v15 = vld [vmem:[%s15464_s1 + $0x488] sm:$0xf]  ;;  %v6550_v51 = vor.u32 %v9490_v30, %v6549_v22  ;;  %v9674_v5 = vld [vmem:[%s15464_s1 + $0x7d4] sm:$0xf0] }
 0x1a9   :  { %5461 = vmatpush.bf16.msra.mxu3 %v6422_v45  ;;  %v5229_v45 = vpop.f32.mrf.mxu1  ;;  %v6870_v55 = vor.u32 %v9570_v42, %v6869_v15  ;;  %v6981_v57 = vld [vmem:[%s15464_s1 + $0x568] sm:$0xf]  ;;  %v9594_v30 = vld [vmem:[%s15464_s1 + $0x554] sm:$0xf0] }
 0x1aa   :  { %5471 = vmatpush.bf16.msrb.mxu0 %v6598_v46  ;;  %v9602_v46 = vld [vmem:[%s15464_s1 + $0x594] sm:$0xf0]  ;;  %v5230_v50 = vadd.f32 %v5229_v45, %v12939_v6  ;;  %v6853_v6 = vld [vmem:[%s15464_s1 + $0x468] sm:$0xf] }
 0x1ab   :  { %5484 = vmatpush.bf16.msrb.mxu1 %v6726_v48  ;;  %5449 = vmatmul.bf16.vlgmr.msra.gmra.mxu2 %v10534_v9  ;;  %v7173_v48 = vld [vmem:[%s15464_s1 + $0x6e8] sm:$0xf]  ;;  %v6998_v56 = vor.u32 %v9602_v46, %v6997_v44  ;;  %v9638_v35 = vld [vmem:[%s15464_s1 + $0x6b4] sm:$0xf0] }
 0x1ac   :  { %5493 = vmatpush.bf16.msrb.mxu2 %v6918_v49  ;;  %5462 = vmatmul.bf16.vlgmr.msra.gmra.mxu3 %v10553_v17  ;;  %v9646_v49 = vld [vmem:[%s15464_s1 + $0x6f4] sm:$0xf0]  ;;  %v7285_v1 = vld [vmem:[%s15464_s1 + $0x7c8] sm:$0xf] }
 0x1ad   :  { %5506 = vmatpush.bf16.msrb.mxu3 %v7046_v53  ;;  %v9678_v53 = vld [vmem:[%s15464_s1 + $0x7f4] sm:$0xf0]  ;;  %v7174_v47 = vor.u32 %v9646_v49, %v7173_v48  ;;  %v6837_v18 = vld [vmem:[%s15464_s1 + $0x448] sm:$0xf] }
 0x1ae   :  { %5472 = vmatpush.bf16.msrb.mxu0 %v6582_v59  ;;  %v7302_v59 = vor.u32 %v9678_v53, %v7301_v52  ;;  %v5242_v10 = vpop.f32.mrf.mxu2  ;;  %v6965_v22 = vld [vmem:[%s15464_s1 + $0x548] sm:$0xf]  ;;  %v9670_v42 = vld [vmem:[%s15464_s1 + $0x7b4] sm:$0xf0] }
 0x1af   :  { %5485 = vmatpush.bf16.msrb.mxu1 %v6710_v60  ;;  %v9598_v60 = vld [vmem:[%s15464_s1 + $0x574] sm:$0xf0]  ;;  %v5255_v12 = vpop.f32.mrf.mxu3  ;;  %v7141_v33 = vld [vmem:[%s15464_s1 + $0x6a8] sm:$0xf]  ;;  %v6966_v46 = vor.u32 %v9594_v30, %v6965_v22 }
 0x1b0   :  { %5494 = vmatpush.bf16.msrb.mxu2 %v6902_v62  ;;  %v7157_v62 = vld [vmem:[%s15464_s1 + $0x6c8] sm:$0xf]  ;;  %v6982_v8 = vor.u32 %v9598_v60, %v6981_v57  ;;  %v7142_v48 = vor.u32 %v9638_v35, %v7141_v33  ;;  %v9590_v53 = vld [vmem:[%s15464_s1 + $0x534] sm:$0xf0] }
 0x1b1   :  { %5507 = vmatpush.bf16.msrb.mxu3 %v7030_v14  ;;  %v6854_v14 = vor.u32 %v9566_v58, %v6853_v6  ;;  %v7158_v11 = vor.u32 %v9642_v0, %v7157_v62  ;;  %v7269_v15 = vld [vmem:[%s15464_s1 + $0x7a8] sm:$0xf]  ;;  %v9666_v6 = vld [vmem:[%s15464_s1 + $0x794] sm:$0xf0] }
 0x1b2   :  { %5473 = vmatpush.bf16.msrb.mxu0 %v6566_v4  ;;  %v9562_v4 = vld [vmem:[%s15464_s1 + $0x454] sm:$0xf0]  ;;  %v6821_v49 = vld [vmem:[%s15464_s1 + $0x428] sm:$0xf]  ;;  %v7270_v52 = vor.u32 %v9670_v42, %v7269_v15 }
 0x1b3   :  { %5486 = vmatpush.bf16.msrb.mxu1 %v6694_v28  ;;  %v5243_v28 = vadd.f32 %v5242_v10, %v5230_v50  ;;  %v6838_v45 = vor.u32 %v9562_v4, %v6837_v18  ;;  %v9558_v50 = vld [vmem:[%s15464_s1 + $0x434] sm:$0xf0]  ;;  %v7237_v18 = vld [vmem:[%s15464_s1 + $0x768] sm:$0xf] }
 0x1b4   :  { %5495 = vmatpush.bf16.msrb.mxu2 %v6886_v29  ;;  %v7286_v29 = vor.u32 %v9674_v5, %v7285_v1  ;;  %v6822_v57 = vor.u32 %v9558_v50, %v6821_v49  ;;  %v9554_v0 = vld [vmem:[%s15464_s1 + $0x414] sm:$0xf0]  ;;  %v6933_v1 = vld [vmem:[%s15464_s1 + $0x508] sm:$0xf] }
 0x1b5   :  { %5508 = vmatpush.bf16.msrb.mxu3 %v7014_v41  ;;  %v5231_v41 = vpop.f32.mrf.mxu1  ;;  %v5256_v44 = vadd.f32 %v5255_v12, %v5243_v28  ;;  %v9586_v5 = vld [vmem:[%s15464_s1 + $0x514] sm:$0xf0]  ;;  %v7429_v22 = vld [vmem:[%s15464_s1 + $0x8e8] sm:$0xf] }
 0x1b6   :  { %5474 = vmatpush.bf16.msrb.mxu0 %v6550_v51  ;;  %v6949_v51 = vld [vmem:[%s15464_s1 + $0x528] sm:$0xf]  ;;  %v9630_v12 = vld [vmem:[%s15464_s1 + $0x674] sm:$0xf0]  ;;  %v6934_v35 = vor.u32 %v9586_v5, %v6933_v1 }
 0x1b7   :  { %5487 = vmatpush.bf16.msrb.mxu1 %v6678_v54  ;;  %v7125_v54 = vld [vmem:[%s15464_s1 + $0x688] sm:$0xf]  ;;  %v6950_v60 = vor.u32 %v9590_v53, %v6949_v51  ;;  %v9662_v4 = vld [vmem:[%s15464_s1 + $0x774] sm:$0xf0] }
 0x1b8   :  { %5496 = vmatpush.bf16.msrb.mxu2 %v6870_v55  ;;  %v9634_v55 = vld [vmem:[%s15464_s1 + $0x694] sm:$0xf0]  ;;  %v7557_v30 = vld [vmem:[%s15464_s1 + $0x9e8] sm:$0xf]  ;;  %v7238_v15 = vor.u32 %v9662_v4, %v7237_v18 }
 0x1b9   :  { %5509 = vmatpush.bf16.msrb.mxu3 %v6998_v56  ;;  %5475 = vmatmul.bf16.vlgmr.msrb.gmra.mxu0 %v10513_v63  ;;  %v5268_v56 = vpop.f32.mrf.mxu0  ;;  %v7126_v62 = vor.u32 %v9634_v55, %v7125_v54  ;;  %v9710_v28 = vld [vmem:[%s15464_s1 + $0x8f4] sm:$0xf0]  ;;  %v7413_v50 = vld [vmem:[%s15464_s1 + $0x8c8] sm:$0xf] }
 0x1ba   :  { %5519 = vmatpush.bf16.msra.mxu0 %v7174_v47  ;;  %5488 = vmatmul.bf16.vlgmr.msrb.gmra.mxu1 %v10551_v16  ;;  %v7253_v47 = vld [vmem:[%s15464_s1 + $0x788] sm:$0xf]  ;;  %v13138_v58 = vadd.f32 %v5268_v56, %v5256_v44  ;;  %v9742_v33 = vld [vmem:[%s15464_s1 + $0x9f4] sm:$0xf0]  ;;  %v7430_v42 = vor.u32 %v9710_v28, %v7429_v22 }
 0x1bb   :  { %5532 = vmatpush.bf16.msra.mxu1 %v7302_v59  ;;  %v6805_v59 = vld [vmem:[%s15464_s1 + $0x408] sm:$0xf]  ;;  %v7254_v10 = vor.u32 %v9666_v6, %v7253_v47  ;;  %v9658_v49 = vld [vmem:[%s15464_s1 + $0x754] sm:$0xf0] }
 0x1bc   :  { %5497 = vmatpush.bf16.msrb.mxu2 %v6854_v14  ;;  %v5244_v14 = vpop.f32.mrf.mxu2  ;;  %v7093_v44 = vld [vmem:[%s15464_s1 + $0x648] sm:$0xf]  ;;  %v9706_v51 = vld [vmem:[%s15464_s1 + $0x8d4] sm:$0xf0] }
 0x1bd   :  { %5510 = vmatpush.bf16.msrb.mxu3 %v6982_v8  ;;  %v5257_v8 = vpop.f32.mrf.mxu3  ;;  %v7541_v53 = vld [vmem:[%s15464_s1 + $0x9c8] sm:$0xf]  ;;  %v9738_v54 = vld [vmem:[%s15464_s1 + $0x9d4] sm:$0xf0]  ;;  %v7414_v47 = vor.u32 %v9706_v51, %v7413_v50 }
 0x1be   :  { %5520 = vmatpush.bf16.msra.mxu0 %v7158_v11  ;;  %v7109_v11 = vld [vmem:[%s15464_s1 + $0x668] sm:$0xf]  ;;  %v9702_v1 = vld [vmem:[%s15464_s1 + $0x8b4] sm:$0xf0] }
 0x1bf   :  { %5533 = vmatpush.bf16.msra.mxu1 %v7286_v29  ;;  %v6806_v29 = vor.u32 %v9554_v0, %v6805_v59  ;;  %v7110_v41 = vor.u32 %v9630_v12, %v7109_v11  ;;  %v7077_v6 = vld [vmem:[%s15464_s1 + $0x628] sm:$0xf]  ;;  %v9734_v14 = vld [vmem:[%s15464_s1 + $0x9b4] sm:$0xf0] }
 0x1c0   :  { %5498 = vmatpush.bf16.msrb.mxu2 %v6838_v45  ;;  %v9626_v45 = vld [vmem:[%s15464_s1 + $0x654] sm:$0xf0]  ;;  %v7205_v59 = vld [vmem:[%s15464_s1 + $0x728] sm:$0xf] }
 0x1c1   :  { %5511 = vmatpush.bf16.msrb.mxu3 %v6966_v46  ;;  %v7221_v46 = vld [vmem:[%s15464_s1 + $0x748] sm:$0xf]  ;;  %v7094_v55 = vor.u32 %v9626_v45, %v7093_v44  ;;  %v9618_v18 = vld [vmem:[%s15464_s1 + $0x614] sm:$0xf0] }
 0x1c2   :  { %5521 = vmatpush.bf16.msra.mxu0 %v7142_v48  ;;  %v7558_v48 = vor.u32 %v9742_v33, %v7557_v30  ;;  %v7222_v56 = vor.u32 %v9658_v49, %v7221_v46  ;;  %v7397_v0 = vld [vmem:[%s15464_s1 + $0x8a8] sm:$0xf]  ;;  %v9650_v22 = vld [vmem:[%s15464_s1 + $0x714] sm:$0xf0] }
 0x1c3   :  { %5534 = vmatpush.bf16.msra.mxu1 %v7270_v52  ;;  %v5270_v52 = vpop.f32.mrf.mxu0  ;;  %v7525_v5 = vld [vmem:[%s15464_s1 + $0x9a8] sm:$0xf]  ;;  %v7398_v12 = vor.u32 %v9702_v1, %v7397_v0  ;;  %v9698_v30 = vld [vmem:[%s15464_s1 + $0x894] sm:$0xf0] }
 0x1c4   :  { %5499 = vmatpush.bf16.msrb.mxu2 %v6822_v57  ;;  %v9622_v57 = vld [vmem:[%s15464_s1 + $0x634] sm:$0xf0]  ;;  %v7189_v4 = vld [vmem:[%s15464_s1 + $0x708] sm:$0xf]  ;;  %v7526_v28 = vor.u32 %v9734_v14, %v7525_v5 }
 0x1c5   :  { %5512 = vmatpush.bf16.msrb.mxu3 %v6950_v60  ;;  %v7542_v60 = vor.u32 %v9738_v54, %v7541_v53  ;;  %v7078_v8 = vor.u32 %v9622_v57, %v7077_v6  ;;  %v7509_v33 = vld [vmem:[%s15464_s1 + $0x988] sm:$0xf]  ;;  %v7190_v49 = vor.u32 %v9650_v22, %v7189_v4  ;;  %v9694_v53 = vld [vmem:[%s15464_s1 + $0x874] sm:$0xf0] }
 0x1c6   :  { %5522 = vmatpush.bf16.msra.mxu0 %v7126_v62  ;;  %v9654_v62 = vld [vmem:[%s15464_s1 + $0x734] sm:$0xf0]  ;;  %v7813_v46 = vld [vmem:[%s15464_s1 + $0xbe8] sm:$0xf] }
 0x1c7   :  { %5535 = vmatpush.bf16.msra.mxu1 %v7254_v10  ;;  %v7061_v10 = vld [vmem:[%s15464_s1 + $0x608] sm:$0xf]  ;;  %v7206_v11 = vor.u32 %v9654_v62, %v7205_v59  ;;  %v9770_v6 = vld [vmem:[%s15464_s1 + $0xad4] sm:$0xf0] }
 0x1c8   :  { %5500 = vmatpush.bf16.msrb.mxu2 %v6806_v29  ;;  %v7381_v29 = vld [vmem:[%s15464_s1 + $0x888] sm:$0xf]  ;;  %v7062_v45 = vor.u32 %v9618_v18, %v7061_v10  ;;  %v9802_v59 = vld [vmem:[%s15464_s1 + $0xbd4] sm:$0xf0] }
 0x1c9   :  { %5513 = vmatpush.bf16.msrb.mxu3 %v6934_v35  ;;  %v5281_v35 = vpop.f32.mrf.mxu1  ;;  %v7382_v50 = vor.u32 %v9698_v30, %v7381_v29  ;;  %v7493_v54 = vld [vmem:[%s15464_s1 + $0x968] sm:$0xf]  ;;  %v9722_v18 = vld [vmem:[%s15464_s1 + $0x954] sm:$0xf0] }
 0x1ca   :  { %5523 = vmatpush.bf16.msra.mxu0 %v7110_v41  ;;  %v9730_v41 = vld [vmem:[%s15464_s1 + $0x994] sm:$0xf0]  ;;  %v5282_v44 = vadd.f32 %v5281_v35, %v13138_v58  ;;  %v7365_v58 = vld [vmem:[%s15464_s1 + $0x868] sm:$0xf] }
 0x1cb   :  { %5536 = vmatpush.bf16.msra.mxu1 %v7238_v15  ;;  %5501 = vmatmul.bf16.vlgmr.msrb.gmra.mxu2 %v10722_v37  ;;  %v7685_v15 = vld [vmem:[%s15464_s1 + $0xae8] sm:$0xf]  ;;  %v7510_v51 = vor.u32 %v9730_v41, %v7509_v33  ;;  %v9766_v22 = vld [vmem:[%s15464_s1 + $0xab4] sm:$0xf0] }
 0x1cc   :  { %5545 = vmatpush.bf16.msra.mxu2 %v7430_v42  ;;  %5514 = vmatmul.bf16.vlgmr.msrb.gmra.mxu3 %v10726_v40  ;;  %v9774_v42 = vld [vmem:[%s15464_s1 + $0xaf4] sm:$0xf0]  ;;  %v7797_v57 = vld [vmem:[%s15464_s1 + $0xbc8] sm:$0xf] }
 0x1cd   :  { %5558 = vmatpush.bf16.msra.mxu3 %v7558_v48  ;;  %v9806_v48 = vld [vmem:[%s15464_s1 + $0xbf4] sm:$0xf0]  ;;  %v7686_v52 = vor.u32 %v9774_v42, %v7685_v15  ;;  %v7349_v14 = vld [vmem:[%s15464_s1 + $0x848] sm:$0xf] }
 0x1ce   :  { %5524 = vmatpush.bf16.msra.mxu0 %v7094_v55  ;;  %v7814_v55 = vor.u32 %v9806_v48, %v7813_v46  ;;  %v5294_v0 = vpop.f32.mrf.mxu2  ;;  %v7477_v10 = vld [vmem:[%s15464_s1 + $0x948] sm:$0xf]  ;;  %v9798_v30 = vld [vmem:[%s15464_s1 + $0xbb4] sm:$0xf0] }
 0x1cf   :  { %5537 = vmatpush.bf16.msra.mxu1 %v7222_v56  ;;  %v9726_v56 = vld [vmem:[%s15464_s1 + $0x974] sm:$0xf0]  ;;  %v5307_v5 = vpop.f32.mrf.mxu3  ;;  %v7653_v4 = vld [vmem:[%s15464_s1 + $0xaa8] sm:$0xf]  ;;  %v7478_v41 = vor.u32 %v9722_v18, %v7477_v10 }
 0x1d0   :  { %5546 = vmatpush.bf16.msra.mxu2 %v7414_v47  ;;  %v7669_v47 = vld [vmem:[%s15464_s1 + $0xac8] sm:$0xf]  ;;  %v7494_v62 = vor.u32 %v9726_v56, %v7493_v54  ;;  %v7654_v15 = vor.u32 %v9766_v22, %v7653_v4  ;;  %v9718_v48 = vld [vmem:[%s15464_s1 + $0x934] sm:$0xf0] }
 0x1d1   :  { %5559 = vmatpush.bf16.msra.mxu3 %v7542_v60  ;;  %v7366_v60 = vor.u32 %v9694_v53, %v7365_v58  ;;  %v7670_v1 = vor.u32 %v9770_v6, %v7669_v47  ;;  %v7781_v29 = vld [vmem:[%s15464_s1 + $0xba8] sm:$0xf]  ;;  %v9794_v58 = vld [vmem:[%s15464_s1 + $0xb94] sm:$0xf0] }
 0x1d2   :  { %5525 = vmatpush.bf16.msra.mxu0 %v7078_v8  ;;  %v9690_v8 = vld [vmem:[%s15464_s1 + $0x854] sm:$0xf0]  ;;  %v7333_v42 = vld [vmem:[%s15464_s1 + $0x828] sm:$0xf]  ;;  %v7782_v46 = vor.u32 %v9798_v30, %v7781_v29 }
 0x1d3   :  { %5538 = vmatpush.bf16.msra.mxu1 %v7206_v11  ;;  %v5295_v11 = vadd.f32 %v5294_v0, %v5282_v44  ;;  %v7350_v35 = vor.u32 %v9690_v8, %v7349_v14  ;;  %v9686_v44 = vld [vmem:[%s15464_s1 + $0x834] sm:$0xf0]  ;;  %v7749_v14 = vld [vmem:[%s15464_s1 + $0xb68] sm:$0xf] }
 0x1d4   :  { %5547 = vmatpush.bf16.msra.mxu2 %v7398_v12  ;;  %v7798_v12 = vor.u32 %v9802_v59, %v7797_v57  ;;  %v7334_v54 = vor.u32 %v9686_v44, %v7333_v42  ;;  %v9682_v6 = vld [vmem:[%s15464_s1 + $0x814] sm:$0xf0]  ;;  %v7445_v57 = vld [vmem:[%s15464_s1 + $0x908] sm:$0xf] }
 0x1d5   :  { %5560 = vmatpush.bf16.msra.mxu3 %v7526_v28  ;;  %v5283_v28 = vpop.f32.mrf.mxu1  ;;  %v5308_v33 = vadd.f32 %v5307_v5, %v5295_v11  ;;  %v9714_v59 = vld [vmem:[%s15464_s1 + $0x914] sm:$0xf0]  ;;  %v7941_v10 = vld [vmem:[%s15464_s1 + $0xce8] sm:$0xf] }
 0x1d6   :  { %5526 = vmatpush.bf16.msra.mxu0 %v7062_v45  ;;  %v7461_v45 = vld [vmem:[%s15464_s1 + $0x928] sm:$0xf]  ;;  %v9758_v5 = vld [vmem:[%s15464_s1 + $0xa74] sm:$0xf0]  ;;  %v7446_v22 = vor.u32 %v9714_v59, %v7445_v57 }
 0x1d7   :  { %5539 = vmatpush.bf16.msra.mxu1 %v7190_v49  ;;  %v7637_v49 = vld [vmem:[%s15464_s1 + $0xa88] sm:$0xf]  ;;  %v7462_v56 = vor.u32 %v9718_v48, %v7461_v45  ;;  %v9790_v8 = vld [vmem:[%s15464_s1 + $0xb74] sm:$0xf0] }
 0x1d8   :  { %5548 = vmatpush.bf16.msra.mxu2 %v7382_v50  ;;  %v9762_v50 = vld [vmem:[%s15464_s1 + $0xa94] sm:$0xf0]  ;;  %v8069_v18 = vld [vmem:[%s15464_s1 + $0xde8] sm:$0xf]  ;;  %v7750_v29 = vor.u32 %v9790_v8, %v7749_v14 }
 0x1d9   :  { %5561 = vmatpush.bf16.msra.mxu3 %v7510_v51  ;;  %5527 = vmatmul.bf16.vlgmr.msra.gmra.mxu0 %v10714_v34  ;;  %v5320_v51 = vpop.f32.mrf.mxu0  ;;  %v7638_v47 = vor.u32 %v9762_v50, %v7637_v49  ;;  %v9838_v11 = vld [vmem:[%s15464_s1 + $0xcf4] sm:$0xf0]  ;;  %v7925_v44 = vld [vmem:[%s15464_s1 + $0xcc8] sm:$0xf] }
 0x1da   :  { %5571 = vmatpush.bf16.msrb.mxu0 %v7686_v52  ;;  %5540 = vmatmul.bf16.vlgmr.msra.gmra.mxu1 %v10724_v38  ;;  %v7765_v52 = vld [vmem:[%s15464_s1 + $0xb88] sm:$0xf]  ;;  %v13337_v53 = vadd.f32 %v5320_v51, %v5308_v33  ;;  %v9870_v4 = vld [vmem:[%s15464_s1 + $0xdf4] sm:$0xf0]  ;;  %v7942_v30 = vor.u32 %v9838_v11, %v7941_v10 }
 0x1db   :  { %5584 = vmatpush.bf16.msrb.mxu1 %v7814_v55  ;;  %v7317_v55 = vld [vmem:[%s15464_s1 + $0x808] sm:$0xf]  ;;  %v7766_v0 = vor.u32 %v9794_v58, %v7765_v52  ;;  %v9786_v42 = vld [vmem:[%s15464_s1 + $0xb54] sm:$0xf0] }
 0x1dc   :  { %5549 = vmatpush.bf16.msra.mxu2 %v7366_v60  ;;  %v5296_v60 = vpop.f32.mrf.mxu2  ;;  %v7605_v33 = vld [vmem:[%s15464_s1 + $0xa48] sm:$0xf]  ;;  %v9834_v45 = vld [vmem:[%s15464_s1 + $0xcd4] sm:$0xf0] }
 0x1dd   :  { %5562 = vmatpush.bf16.msra.mxu3 %v7494_v62  ;;  %v5309_v62 = vpop.f32.mrf.mxu3  ;;  %v8053_v48 = vld [vmem:[%s15464_s1 + $0xdc8] sm:$0xf]  ;;  %v9866_v49 = vld [vmem:[%s15464_s1 + $0xdd4] sm:$0xf0]  ;;  %v7926_v52 = vor.u32 %v9834_v45, %v7925_v44 }
 0x1de   :  { %5572 = vmatpush.bf16.msrb.mxu0 %v7670_v1  ;;  %v7621_v1 = vld [vmem:[%s15464_s1 + $0xa68] sm:$0xf]  ;;  %v9830_v57 = vld [vmem:[%s15464_s1 + $0xcb4] sm:$0xf0] }
 0x1df   :  { %5585 = vmatpush.bf16.msrb.mxu1 %v7798_v12  ;;  %v7318_v12 = vor.u32 %v9682_v6, %v7317_v55  ;;  %v7622_v28 = vor.u32 %v9758_v5, %v7621_v1  ;;  %v7589_v58 = vld [vmem:[%s15464_s1 + $0xa28] sm:$0xf]  ;;  %v9862_v60 = vld [vmem:[%s15464_s1 + $0xdb4] sm:$0xf0] }
 0x1e0   :  { %5550 = vmatpush.bf16.msra.mxu2 %v7350_v35  ;;  %v9754_v35 = vld [vmem:[%s15464_s1 + $0xa54] sm:$0xf0]  ;;  %v7717_v55 = vld [vmem:[%s15464_s1 + $0xb28] sm:$0xf] }
 0x1e1   :  { %5563 = vmatpush.bf16.msra.mxu3 %v7478_v41  ;;  %v7733_v41 = vld [vmem:[%s15464_s1 + $0xb48] sm:$0xf]  ;;  %v7606_v50 = vor.u32 %v9754_v35, %v7605_v33  ;;  %v9746_v14 = vld [vmem:[%s15464_s1 + $0xa14] sm:$0xf0] }
 0x1e2   :  { %5573 = vmatpush.bf16.msrb.mxu0 %v7654_v15  ;;  %v8070_v15 = vor.u32 %v9870_v4, %v8069_v18  ;;  %v7734_v51 = vor.u32 %v9786_v42, %v7733_v41  ;;  %v7909_v6 = vld [vmem:[%s15464_s1 + $0xca8] sm:$0xf]  ;;  %v9778_v10 = vld [vmem:[%s15464_s1 + $0xb14] sm:$0xf0] }
 0x1e3   :  { %5586 = vmatpush.bf16.msrb.mxu1 %v7782_v46  ;;  %v5322_v46 = vpop.f32.mrf.mxu0  ;;  %v8037_v59 = vld [vmem:[%s15464_s1 + $0xda8] sm:$0xf]  ;;  %v7910_v5 = vor.u32 %v9830_v57, %v7909_v6  ;;  %v9826_v18 = vld [vmem:[%s15464_s1 + $0xc94] sm:$0xf0] }
 0x1e4   :  { %5551 = vmatpush.bf16.msra.mxu2 %v7334_v54  ;;  %v9750_v54 = vld [vmem:[%s15464_s1 + $0xa34] sm:$0xf0]  ;;  %v7701_v8 = vld [vmem:[%s15464_s1 + $0xb08] sm:$0xf]  ;;  %v8038_v11 = vor.u32 %v9862_v60, %v8037_v59 }
 0x1e5   :  { %5564 = vmatpush.bf16.msra.mxu3 %v7462_v56  ;;  %v8054_v56 = vor.u32 %v9866_v49, %v8053_v48  ;;  %v7590_v62 = vor.u32 %v9750_v54, %v7589_v58  ;;  %v8021_v4 = vld [vmem:[%s15464_s1 + $0xd88] sm:$0xf]  ;;  %v7702_v42 = vor.u32 %v9778_v10, %v7701_v8  ;;  %v9822_v48 = vld [vmem:[%s15464_s1 + $0xc74] sm:$0xf0] }
 0x1e6   :  { %5574 = vmatpush.bf16.msrb.mxu0 %v7638_v47  ;;  %v9782_v47 = vld [vmem:[%s15464_s1 + $0xb34] sm:$0xf0]  ;;  %v8325_v41 = vld [vmem:[%s15464_s1 + $0xfe8] sm:$0xf] }
 0x1e7   :  { %5587 = vmatpush.bf16.msrb.mxu1 %v7766_v0  ;;  %v7573_v0 = vld [vmem:[%s15464_s1 + $0xa08] sm:$0xf]  ;;  %v7718_v1 = vor.u32 %v9782_v47, %v7717_v55  ;;  %v9898_v58 = vld [vmem:[%s15464_s1 + $0xed4] sm:$0xf0] }
 0x1e8   :  { %5552 = vmatpush.bf16.msra.mxu2 %v7318_v12  ;;  %v7893_v12 = vld [vmem:[%s15464_s1 + $0xc88] sm:$0xf]  ;;  %v7574_v35 = vor.u32 %v9746_v14, %v7573_v0  ;;  %v9930_v55 = vld [vmem:[%s15464_s1 + $0xfd4] sm:$0xf0] }
 0x1e9   :  { %5565 = vmatpush.bf16.msra.mxu3 %v7446_v22  ;;  %v5333_v22 = vpop.f32.mrf.mxu1  ;;  %v7894_v44 = vor.u32 %v9826_v18, %v7893_v12  ;;  %v8005_v49 = vld [vmem:[%s15464_s1 + $0xd68] sm:$0xf]  ;;  %v9850_v14 = vld [vmem:[%s15464_s1 + $0xd54] sm:$0xf0] }
 0x1ea   :  { %5575 = vmatpush.bf16.msrb.mxu0 %v7622_v28  ;;  %v9858_v28 = vld [vmem:[%s15464_s1 + $0xd94] sm:$0xf0]  ;;  %v5334_v33 = vadd.f32 %v5333_v22, %v13337_v53  ;;  %v7877_v53 = vld [vmem:[%s15464_s1 + $0xc68] sm:$0xf] }
 0x1eb   :  { %5588 = vmatpush.bf16.msrb.mxu1 %v7750_v29  ;;  %5553 = vmatmul.bf16.vlgmr.msra.gmra.mxu2 %v10921_v19  ;;  %v8197_v29 = vld [vmem:[%s15464_s1 + $0xee8] sm:$0xf]  ;;  %v8022_v45 = vor.u32 %v9858_v28, %v8021_v4  ;;  %v9894_v10 = vld [vmem:[%s15464_s1 + $0xeb4] sm:$0xf0] }
 0x1ec   :  { %5597 = vmatpush.bf16.msrb.mxu2 %v7942_v30  ;;  %5566 = vmatmul.bf16.vlgmr.msra.gmra.mxu3 %v10934_v24  ;;  %v9902_v30 = vld [vmem:[%s15464_s1 + $0xef4] sm:$0xf0]  ;;  %v8309_v54 = vld [vmem:[%s15464_s1 + $0xfc8] sm:$0xf] }
 0x1ed   :  { %5610 = vmatpush.bf16.msrb.mxu3 %v8070_v15  ;;  %v9934_v15 = vld [vmem:[%s15464_s1 + $0xff4] sm:$0xf0]  ;;  %v8198_v46 = vor.u32 %v9902_v30, %v8197_v29  ;;  %v7861_v60 = vld [vmem:[%s15464_s1 + $0xc48] sm:$0xf] }
 0x1ee   :  { %5576 = vmatpush.bf16.msrb.mxu0 %v7606_v50  ;;  %v8326_v50 = vor.u32 %v9934_v15, %v8325_v41  ;;  %v5346_v6 = vpop.f32.mrf.mxu2  ;;  %v7989_v0 = vld [vmem:[%s15464_s1 + $0xd48] sm:$0xf]  ;;  %v9926_v18 = vld [vmem:[%s15464_s1 + $0xfb4] sm:$0xf0] }
 0x1ef   :  { %5589 = vmatpush.bf16.msrb.mxu1 %v7734_v51  ;;  %v9854_v51 = vld [vmem:[%s15464_s1 + $0xd74] sm:$0xf0]  ;;  %v5359_v59 = vpop.f32.mrf.mxu3  ;;  %v8165_v8 = vld [vmem:[%s15464_s1 + $0xea8] sm:$0xf]  ;;  %v7990_v28 = vor.u32 %v9850_v14, %v7989_v0 }
 0x1f0   :  { %5598 = vmatpush.bf16.msrb.mxu2 %v7926_v52  ;;  %v8181_v52 = vld [vmem:[%s15464_s1 + $0xec8] sm:$0xf]  ;;  %v8006_v47 = vor.u32 %v9854_v51, %v8005_v49  ;;  %v8166_v29 = vor.u32 %v9894_v10, %v8165_v8  ;;  %v9846_v15 = vld [vmem:[%s15464_s1 + $0xd34] sm:$0xf0] }
 0x1f1   :  { %5611 = vmatpush.bf16.msrb.mxu3 %v8054_v56  ;;  %v7878_v56 = vor.u32 %v9822_v48, %v7877_v53  ;;  %v8182_v57 = vor.u32 %v9898_v58, %v8181_v52  ;;  %v8293_v12 = vld [vmem:[%s15464_s1 + $0xfa8] sm:$0xf]  ;;  %v9922_v53 = vld [vmem:[%s15464_s1 + $0xf94] sm:$0xf0] }
 0x1f2   :  { %5577 = vmatpush.bf16.msrb.mxu0 %v7590_v62  ;;  %v9818_v62 = vld [vmem:[%s15464_s1 + $0xc54] sm:$0xf0]  ;;  %v7845_v30 = vld [vmem:[%s15464_s1 + $0xc28] sm:$0xf]  ;;  %v8294_v41 = vor.u32 %v9926_v18, %v8293_v12 }
 0x1f3   :  { %5590 = vmatpush.bf16.msrb.mxu1 %v7718_v1  ;;  %v5347_v1 = vadd.f32 %v5346_v6, %v5334_v33  ;;  %v7862_v22 = vor.u32 %v9818_v62, %v7861_v60  ;;  %v9814_v33 = vld [vmem:[%s15464_s1 + $0xc34] sm:$0xf0]  ;;  %v8261_v60 = vld [vmem:[%s15464_s1 + $0xf68] sm:$0xf] }
 0x1f4   :  { %5599 = vmatpush.bf16.msrb.mxu2 %v7910_v5  ;;  %v8310_v5 = vor.u32 %v9930_v55, %v8309_v54  ;;  %v7846_v49 = vor.u32 %v9814_v33, %v7845_v30  ;;  %v9810_v58 = vld [vmem:[%s15464_s1 + $0xc14] sm:$0xf0]  ;;  %v7957_v54 = vld [vmem:[%s15464_s1 + $0xd08] sm:$0xf] }
 0x1f5   :  { %5612 = vmatpush.bf16.msrb.mxu3 %v8038_v11  ;;  %v5335_v11 = vpop.f32.mrf.mxu1  ;;  %v5360_v4 = vadd.f32 %v5359_v59, %v5347_v1  ;;  %v9842_v55 = vld [vmem:[%s15464_s1 + $0xd14] sm:$0xf0]  ;;  %v8453_v0 = vld [vmem:[%s15464_s1 + $0x10e8] sm:$0xf] }
 0x1f6   :  { %5578 = vmatpush.bf16.msrb.mxu0 %v7574_v35  ;;  %v7973_v35 = vld [vmem:[%s15464_s1 + $0xd28] sm:$0xf]  ;;  %v9886_v59 = vld [vmem:[%s15464_s1 + $0xe74] sm:$0xf0]  ;;  %v7958_v10 = vor.u32 %v9842_v55, %v7957_v54 }
 0x1f7   :  { %5591 = vmatpush.bf16.msrb.mxu1 %v7702_v42  ;;  %v8149_v42 = vld [vmem:[%s15464_s1 + $0xe88] sm:$0xf]  ;;  %v7974_v51 = vor.u32 %v9846_v15, %v7973_v35  ;;  %v9918_v62 = vld [vmem:[%s15464_s1 + $0xf74] sm:$0xf0] }
 0x1f8   :  { %5600 = vmatpush.bf16.msrb.mxu2 %v7894_v44  ;;  %v9890_v44 = vld [vmem:[%s15464_s1 + $0xe94] sm:$0xf0]  ;;  %v8581_v14 = vld [vmem:[%s15464_s1 + $0x11e8] sm:$0xf]  ;;  %v8262_v12 = vor.u32 %v9918_v62, %v8261_v60 }
 0x1f9   :  { %5613 = vmatpush.bf16.msrb.mxu3 %v8022_v45  ;;  %5579 = vmatmul.bf16.vlgmr.msrb.gmra.mxu0 %v10932_v23  ;;  %v5372_v45 = vpop.f32.mrf.mxu0  ;;  %v8150_v52 = vor.u32 %v9890_v44, %v8149_v42  ;;  %v9966_v1 = vld [vmem:[%s15464_s1 + $0x10f4] sm:$0xf0]  ;;  %v8437_v33 = vld [vmem:[%s15464_s1 + $0x10c8] sm:$0xf] }
 0x1fa   :  { %5623 = vmatpush.bf16.msra.mxu0 %v8198_v46  ;;  %5592 = vmatmul.bf16.vlgmr.msrb.gmra.mxu1 %v10942_v27  ;;  %v8277_v46 = vld [vmem:[%s15464_s1 + $0xf88] sm:$0xf]  ;;  %v13536_v48 = vadd.f32 %v5372_v45, %v5360_v4  ;;  %v9998_v8 = vld [vmem:[%s15464_s1 + $0x11f4] sm:$0xf0]  ;;  %v8454_v18 = vor.u32 %v9966_v1, %v8453_v0 }
 0x1fb   :  { %5636 = vmatpush.bf16.msra.mxu1 %v8326_v50  ;;  %v7829_v50 = vld [vmem:[%s15464_s1 + $0xc08] sm:$0xf]  ;;  %v8278_v6 = vor.u32 %v9922_v53, %v8277_v46  ;;  %v9914_v30 = vld [vmem:[%s15464_s1 + $0xf54] sm:$0xf0] }
 0x1fc   :  { %5601 = vmatpush.bf16.msrb.mxu2 %v7878_v56  ;;  %v5348_v56 = vpop.f32.mrf.mxu2  ;;  %v8117_v4 = vld [vmem:[%s15464_s1 + $0xe48] sm:$0xf]  ;;  %v9962_v35 = vld [vmem:[%s15464_s1 + $0x10d4] sm:$0xf0] }
 0x1fd   :  { %5614 = vmatpush.bf16.msrb.mxu3 %v8006_v47  ;;  %v5361_v47 = vpop.f32.mrf.mxu3  ;;  %v8565_v15 = vld [vmem:[%s15464_s1 + $0x11c8] sm:$0xf]  ;;  %v9994_v42 = vld [vmem:[%s15464_s1 + $0x11d4] sm:$0xf0]  ;;  %v8438_v46 = vor.u32 %v9962_v35, %v8437_v33 }
 0x1fe   :  { %5624 = vmatpush.bf16.msra.mxu0 %v8182_v57  ;;  %v8133_v57 = vld [vmem:[%s15464_s1 + $0xe68] sm:$0xf]  ;;  %v9958_v54 = vld [vmem:[%s15464_s1 + $0x10b4] sm:$0xf0] }
 0x1ff   :  { %5637 = vmatpush.bf16.msra.mxu1 %v8310_v5  ;;  %v7830_v5 = vor.u32 %v9810_v58, %v7829_v50  ;;  %v8134_v11 = vor.u32 %v9886_v59, %v8133_v57  ;;  %v8101_v53 = vld [vmem:[%s15464_s1 + $0xe28] sm:$0xf]  ;;  %v9990_v56 = vld [vmem:[%s15464_s1 + $0x11b4] sm:$0xf0] }
 0x200   :  { %5602 = vmatpush.bf16.msrb.mxu2 %v7862_v22  ;;  %v9882_v22 = vld [vmem:[%s15464_s1 + $0xe54] sm:$0xf0]  ;;  %v8229_v50 = vld [vmem:[%s15464_s1 + $0xf28] sm:$0xf] }
 0x201   :  { %5615 = vmatpush.bf16.msrb.mxu3 %v7990_v28  ;;  %v8245_v28 = vld [vmem:[%s15464_s1 + $0xf48] sm:$0xf]  ;;  %v8118_v44 = vor.u32 %v9882_v22, %v8117_v4  ;;  %v9874_v60 = vld [vmem:[%s15464_s1 + $0xe14] sm:$0xf0] }
 0x202   :  { %5625 = vmatpush.bf16.msra.mxu0 %v8166_v29  ;;  %v8582_v29 = vor.u32 %v9998_v8, %v8581_v14  ;;  %v8246_v45 = vor.u32 %v9914_v30, %v8245_v28  ;;  %v8421_v58 = vld [vmem:[%s15464_s1 + $0x10a8] sm:$0xf]  ;;  %v9906_v0 = vld [vmem:[%s15464_s1 + $0xf14] sm:$0xf0] }
 0x203   :  { %5638 = vmatpush.bf16.msra.mxu1 %v8294_v41  ;;  %v5374_v41 = vpop.f32.mrf.mxu0  ;;  %v8549_v55 = vld [vmem:[%s15464_s1 + $0x11a8] sm:$0xf]  ;;  %v8422_v59 = vor.u32 %v9958_v54, %v8421_v58  ;;  %v9954_v14 = vld [vmem:[%s15464_s1 + $0x1094] sm:$0xf0] }
 0x204   :  { %5603 = vmatpush.bf16.msrb.mxu2 %v7846_v49  ;;  %v9878_v49 = vld [vmem:[%s15464_s1 + $0xe34] sm:$0xf0]  ;;  %v8213_v62 = vld [vmem:[%s15464_s1 + $0xf08] sm:$0xf]  ;;  %v8550_v1 = vor.u32 %v9990_v56, %v8549_v55 }
 0x205   :  { %5616 = vmatpush.bf16.msrb.mxu3 %v7974_v51  ;;  %v8566_v51 = vor.u32 %v9994_v42, %v8565_v15  ;;  %v8102_v47 = vor.u32 %v9878_v49, %v8101_v53  ;;  %v8533_v8 = vld [vmem:[%s15464_s1 + $0x1188] sm:$0xf]  ;;  %v8214_v30 = vor.u32 %v9906_v0, %v8213_v62  ;;  %v9950_v15 = vld [vmem:[%s15464_s1 + $0x1074] sm:$0xf0] }
 0x206   :  { %5626 = vmatpush.bf16.msra.mxu0 %v8150_v52  ;;  %v9910_v52 = vld [vmem:[%s15464_s1 + $0xf34] sm:$0xf0]  ;;  %v8837_v28 = vld [vmem:[%s15464_s1 + $0x13e8] sm:$0xf] }
 0x207   :  { %5639 = vmatpush.bf16.msra.mxu1 %v8278_v6  ;;  %v8085_v6 = vld [vmem:[%s15464_s1 + $0xe08] sm:$0xf]  ;;  %v8230_v57 = vor.u32 %v9910_v52, %v8229_v50  ;;  %v10026_v53 = vld [vmem:[%s15464_s1 + $0x12d4] sm:$0xf0] }
 0x208   :  { %5604 = vmatpush.bf16.msrb.mxu2 %v7830_v5  ;;  %v8405_v5 = vld [vmem:[%s15464_s1 + $0x1088] sm:$0xf]  ;;  %v8086_v22 = vor.u32 %v9874_v60, %v8085_v6  ;;  %v10058_v50 = vld [vmem:[%s15464_s1 + $0x13d4] sm:$0xf0] }
 0x209   :  { %5617 = vmatpush.bf16.msrb.mxu3 %v7958_v10  ;;  %v5385_v10 = vpop.f32.mrf.mxu1  ;;  %v8406_v33 = vor.u32 %v9954_v14, %v8405_v5  ;;  %v8517_v42 = vld [vmem:[%s15464_s1 + $0x1168] sm:$0xf]  ;;  %v9978_v62 = vld [vmem:[%s15464_s1 + $0x1154] sm:$0xf0] }
 0x20a   :  { %5627 = vmatpush.bf16.msra.mxu0 %v8134_v11  ;;  %v9986_v11 = vld [vmem:[%s15464_s1 + $0x1194] sm:$0xf0]  ;;  %v5386_v4 = vadd.f32 %v5385_v10, %v13536_v48  ;;  %v8389_v48 = vld [vmem:[%s15464_s1 + $0x1068] sm:$0xf] }
 0x20b   :  { %5640 = vmatpush.bf16.msra.mxu1 %v8262_v12  ;;  %5605 = vmatmul.bf16.vlgmr.msrb.gmra.mxu2 %v11137_v13  ;;  %v8709_v12 = vld [vmem:[%s15464_s1 + $0x12e8] sm:$0xf]  ;;  %v8534_v35 = vor.u32 %v9986_v11, %v8533_v8  ;;  %v10054_v14 = vld [vmem:[%s15464_s1 + $0x13b4] sm:$0xf0] }
 0x20c   :  { %5649 = vmatpush.bf16.msra.mxu2 %v8454_v18  ;;  %5618 = vmatmul.bf16.vlgmr.msrb.gmra.mxu3 %v11150_v21  ;;  %v10030_v18 = vld [vmem:[%s15464_s1 + $0x12f4] sm:$0xf0]  ;;  %v8821_v49 = vld [vmem:[%s15464_s1 + $0x13c8] sm:$0xf] }
 0x20d   :  { %5662 = vmatpush.bf16.msra.mxu3 %v8582_v29  ;;  %v10062_v29 = vld [vmem:[%s15464_s1 + $0x13f4] sm:$0xf0]  ;;  %v8710_v41 = vor.u32 %v10030_v18, %v8709_v12  ;;  %v8373_v56 = vld [vmem:[%s15464_s1 + $0x1048] sm:$0xf] }
 0x20e   :  { %5628 = vmatpush.bf16.msra.mxu0 %v8118_v44  ;;  %v8838_v44 = vor.u32 %v10062_v29, %v8837_v28  ;;  %v5398_v58 = vpop.f32.mrf.mxu2  ;;  %v8501_v6 = vld [vmem:[%s15464_s1 + $0x1148] sm:$0xf]  ;;  %v9974_v29 = vld [vmem:[%s15464_s1 + $0x1134] sm:$0xf0] }
 0x20f   :  { %5641 = vmatpush.bf16.msra.mxu1 %v8246_v45  ;;  %v9982_v45 = vld [vmem:[%s15464_s1 + $0x1174] sm:$0xf0]  ;;  %v5411_v55 = vpop.f32.mrf.mxu3  ;;  %v8677_v0 = vld [vmem:[%s15464_s1 + $0x12a8] sm:$0xf]  ;;  %v8502_v11 = vor.u32 %v9978_v62, %v8501_v6 }
 0x210   :  { %5650 = vmatpush.bf16.msra.mxu2 %v8438_v46  ;;  %v8693_v46 = vld [vmem:[%s15464_s1 + $0x12c8] sm:$0xf]  ;;  %v8518_v52 = vor.u32 %v9982_v45, %v8517_v42 }
 0x211   :  { %5663 = vmatpush.bf16.msra.mxu3 %v8566_v51  ;;  %v8390_v51 = vor.u32 %v9950_v15, %v8389_v48  ;;  %v8694_v54 = vor.u32 %v10026_v53, %v8693_v46  ;;  %v5387_v60 = vpop.f32.mrf.mxu1  ;;  %v8805_v5 = vld [vmem:[%s15464_s1 + $0x13a8] sm:$0xf]  ;;  %v10050_v48 = vld [vmem:[%s15464_s1 + $0x1394] sm:$0xf0] }
 0x212   :  { %5629 = vmatpush.bf16.msra.mxu0 %v8102_v47  ;;  %v9946_v47 = vld [vmem:[%s15464_s1 + $0x1054] sm:$0xf0]  ;;  %v8357_v18 = vld [vmem:[%s15464_s1 + $0x1028] sm:$0xf]  ;;  %v8806_v28 = vor.u32 %v10054_v14, %v8805_v5 }
 0x213   :  { %5642 = vmatpush.bf16.msra.mxu1 %v8230_v57  ;;  %v5399_v57 = vadd.f32 %v5398_v58, %v5386_v4  ;;  %v8374_v10 = vor.u32 %v9946_v47, %v8373_v56  ;;  %v9942_v4 = vld [vmem:[%s15464_s1 + $0x1034] sm:$0xf0]  ;;  %v8773_v56 = vld [vmem:[%s15464_s1 + $0x1368] sm:$0xf] }
 0x214   :  { %5651 = vmatpush.bf16.msra.mxu2 %v8422_v59  ;;  %v8822_v59 = vor.u32 %v10058_v50, %v8821_v49  ;;  %v8358_v42 = vor.u32 %v9942_v4, %v8357_v18  ;;  %v9938_v53 = vld [vmem:[%s15464_s1 + $0x1014] sm:$0xf0]  ;;  %v8469_v49 = vld [vmem:[%s15464_s1 + $0x1108] sm:$0xf] }
 0x215   :  { %5664 = vmatpush.bf16.msra.mxu3 %v8550_v1  ;;  %v10022_v1 = vld [vmem:[%s15464_s1 + $0x12b4] sm:$0xf0]  ;;  %v5412_v8 = vadd.f32 %v5411_v55, %v5399_v57  ;;  %v8965_v6 = vld [vmem:[%s15464_s1 + $0x14e8] sm:$0xf] }
 0x216   :  { %5630 = vmatpush.bf16.msra.mxu0 %v8086_v22  ;;  %v8678_v12 = vor.u32 %v10022_v1, %v8677_v0  ;;  %v8485_v22 = vld [vmem:[%s15464_s1 + $0x1128] sm:$0xf]  ;;  %v9970_v50 = vld [vmem:[%s15464_s1 + $0x1114] sm:$0xf0] }
 0x217   :  { %5643 = vmatpush.bf16.msra.mxu1 %v8214_v30  ;;  %v8661_v30 = vld [vmem:[%s15464_s1 + $0x1288] sm:$0xf]  ;;  %v8486_v45 = vor.u32 %v9974_v29, %v8485_v22  ;;  %v10014_v55 = vld [vmem:[%s15464_s1 + $0x1274] sm:$0xf0]  ;;  %v8470_v5 = vor.u32 %v9970_v50, %v8469_v49 }
 0x218   :  { %5652 = vmatpush.bf16.msra.mxu2 %v8406_v33  ;;  %v10018_v33 = vld [vmem:[%s15464_s1 + $0x1294] sm:$0xf0]  ;;  %v9093_v62 = vld [vmem:[%s15464_s1 + $0x15e8] sm:$0xf] }
 0x219   :  { %5665 = vmatpush.bf16.msra.mxu3 %v8534_v35  ;;  %5631 = vmatmul.bf16.vlgmr.msra.gmra.mxu0 %v11148_v20  ;;  %v5424_v35 = vpop.f32.mrf.mxu0  ;;  %v8662_v46 = vor.u32 %v10018_v33, %v8661_v30  ;;  %v10046_v47 = vld [vmem:[%s15464_s1 + $0x1374] sm:$0xf0]  ;;  %v8757_v18 = vld [vmem:[%s15464_s1 + $0x1348] sm:$0xf] }
 0x21a   :  { %5675 = vmatpush.bf16.msrb.mxu0 %v8710_v41  ;;  %5644 = vmatmul.bf16.vlgmr.msra.gmra.mxu1 %v11158_v26  ;;  %v8789_v41 = vld [vmem:[%s15464_s1 + $0x1388] sm:$0xf]  ;;  %v5425_v15 = vadd.f32 %v5424_v35, %v5412_v8  ;;  %v10094_v57 = vld [vmem:[%s15464_s1 + $0x14f4] sm:$0xf0]  ;;  %v8774_v8 = vor.u32 %v10046_v47, %v8773_v56 }
 0x21b   :  { %5688 = vmatpush.bf16.msrb.mxu1 %v8838_v44  ;;  %v8341_v44 = vld [vmem:[%s15464_s1 + $0x1008] sm:$0xf]  ;;  %v8790_v58 = vor.u32 %v10050_v48, %v8789_v41  ;;  %v10126_v0 = vld [vmem:[%s15464_s1 + $0x15f4] sm:$0xf0] }
 0x21c   :  { %5653 = vmatpush.bf16.msra.mxu2 %v8390_v51  ;;  %v5413_v51 = vpop.f32.mrf.mxu3  ;;  %v8342_v60 = vor.u32 %v9938_v53, %v8341_v44  ;;  %v9094_v4 = vor.u32 %v10126_v0, %v9093_v62  ;;  %v10042_v22 = vld [vmem:[%s15464_s1 + $0x1354] sm:$0xf0]  ;;  %v9077_v33 = vld [vmem:[%s15464_s1 + $0x15c8] sm:$0xf] }
 0x21d   :  { %5666 = vmatpush.bf16.msra.mxu3 %v8518_v52  ;;  %v5400_v52 = vpop.f32.mrf.mxu2  ;;  %v10090_v29 = vld [vmem:[%s15464_s1 + $0x14d4] sm:$0xf0]  ;;  %v8758_v48 = vor.u32 %v10042_v22, %v8757_v18  ;;  %v8933_v49 = vld [vmem:[%s15464_s1 + $0x14a8] sm:$0xf] }
 0x21e   :  { %5676 = vmatpush.bf16.msrb.mxu0 %v8694_v54  ;;  %v8645_v54 = vld [vmem:[%s15464_s1 + $0x1268] sm:$0xf]  ;;  %v10122_v35 = vld [vmem:[%s15464_s1 + $0x15d4] sm:$0xf0] }
 0x21f   :  { %5689 = vmatpush.bf16.msrb.mxu1 %v8822_v59  ;;  %v5437_v59 = vpop.f32.mrf.mxu1  ;;  %v8646_v14 = vor.u32 %v10014_v55, %v8645_v54  ;;  %v10006_v44 = vld [vmem:[%s15464_s1 + $0x1234] sm:$0xf0]  ;;  %v9061_v51 = vld [vmem:[%s15464_s1 + $0x15a8] sm:$0xf] }
 0x220   :  { %5654 = vmatpush.bf16.msra.mxu2 %v8374_v10  ;;  %v13771_v1 = vadd.f32 %v5437_v59, %v5425_v15  ;;  %v8966_v10 = vor.u32 %v10094_v57, %v8965_v6  ;;  %v10038_v53 = vld [vmem:[%s15464_s1 + $0x1334] sm:$0xf0]  ;;  %v8597_v55 = vld [vmem:[%s15464_s1 + $0x1208] sm:$0xf] }
 0x221   :  { %5667 = vmatpush.bf16.msra.mxu3 %v8502_v11  ;;  %v8629_v11 = vld [vmem:[%s15464_s1 + $0x1248] sm:$0xf]  ;;  %v5426_v30 = vpop.f32.mrf.mxu0  ;;  %v10086_v50 = vld [vmem:[%s15464_s1 + $0x14b4] sm:$0xf0] }
 0x222   :  { %5677 = vmatpush.bf16.msrb.mxu0 %v8678_v12  ;;  %v10010_v12 = vld [vmem:[%s15464_s1 + $0x1254] sm:$0xf0]  ;;  %v8934_v47 = vor.u32 %v10086_v50, %v8933_v49  ;;  %v8725_v57 = vld [vmem:[%s15464_s1 + $0x1308] sm:$0xf] }
 0x223   :  { %5690 = vmatpush.bf16.msrb.mxu1 %v8806_v28  ;;  %v8949_v28 = vld [vmem:[%s15464_s1 + $0x14c8] sm:$0xf]  ;;  %v8630_v41 = vor.u32 %v10010_v12, %v8629_v11  ;;  %v10118_v52 = vld [vmem:[%s15464_s1 + $0x15b4] sm:$0xf0] }
 0x224   :  { %5655 = vmatpush.bf16.msra.mxu2 %v8358_v42  ;;  %v8950_v15 = vor.u32 %v10090_v29, %v8949_v28  ;;  %v8613_v42 = vld [vmem:[%s15464_s1 + $0x1228] sm:$0xf]  ;;  %v10002_v6 = vld [vmem:[%s15464_s1 + $0x1214] sm:$0xf0] }
 0x225   :  { %5668 = vmatpush.bf16.msra.mxu3 %v8486_v45  ;;  %v8741_v45 = vld [vmem:[%s15464_s1 + $0x1328] sm:$0xf]  ;;  %v8614_v54 = vor.u32 %v10006_v44, %v8613_v42  ;;  %v10034_v59 = vld [vmem:[%s15464_s1 + $0x1314] sm:$0xf0]  ;;  %v8598_v11 = vor.u32 %v10002_v6, %v8597_v55 }
 0x226   :  { %5678 = vmatpush.bf16.msrb.mxu0 %v8662_v46  ;;  %v9078_v46 = vor.u32 %v10122_v35, %v9077_v33  ;;  %v8742_v56 = vor.u32 %v10038_v53, %v8741_v45  ;;  %v8917_v62 = vld [vmem:[%s15464_s1 + $0x1488] sm:$0xf]  ;;  %v10082_v0 = vld [vmem:[%s15464_s1 + $0x1494] sm:$0xf0] }
 0x227   :  { %5691 = vmatpush.bf16.msrb.mxu1 %v8790_v58  ;;  %v5439_v58 = vpop.f32.mrf.mxu1  ;;  %v9349_v12 = vld [vmem:[%s15464_s1 + $0x17e8] sm:$0xf]  ;;  %v10190_v18 = vld [vmem:[%s15464_s1 + $0x17f4] sm:$0xf0]  ;;  %v8918_v22 = vor.u32 %v10082_v0, %v8917_v62 }
 0x228   :  { %5656 = vmatpush.bf16.msra.mxu2 %v8342_v60  ;;  %v9062_v60 = vor.u32 %v10118_v52, %v9061_v51  ;;  %v8901_v28 = vld [vmem:[%s15464_s1 + $0x1468] sm:$0xf]  ;;  %v10078_v33 = vld [vmem:[%s15464_s1 + $0x1474] sm:$0xf0] }
 0x229   :  { %5669 = vmatpush.bf16.msra.mxu3 %v8470_v5  ;;  %v9045_v5 = vld [vmem:[%s15464_s1 + $0x1588] sm:$0xf]  ;;  %v10110_v42 = vld [vmem:[%s15464_s1 + $0x1574] sm:$0xf0]  ;;  %v8902_v49 = vor.u32 %v10078_v33, %v8901_v28 }
 0x22a   :  { %5679 = vmatpush.bf16.msrb.mxu0 %v8646_v14  ;;  %v10114_v14 = vld [vmem:[%s15464_s1 + $0x1594] sm:$0xf0]  ;;  %v9029_v35 = vld [vmem:[%s15464_s1 + $0x1568] sm:$0xf] }
 0x22b   :  { %5692 = vmatpush.bf16.msrb.mxu1 %v8774_v8  ;;  %5657 = vmatmul.bf16.vlgmr.msra.gmra.mxu2 %v11353_v25  ;;  %v9221_v8 = vld [vmem:[%s15464_s1 + $0x16e8] sm:$0xf]  ;;  %v9046_v29 = vor.u32 %v10114_v14, %v9045_v5  ;;  %v10154_v45 = vld [vmem:[%s15464_s1 + $0x16d4] sm:$0xf0]  ;;  %v9030_v51 = vor.u32 %v10110_v42, %v9029_v35 }
 0x22c   :  { %5701 = vmatpush.bf16.msrb.mxu2 %v8966_v10  ;;  %5670 = vmatmul.bf16.vlgmr.msra.gmra.mxu3 %v11366_v32  ;;  %v10158_v10 = vld [vmem:[%s15464_s1 + $0x16f4] sm:$0xf0]  ;;  %v9205_v44 = vld [vmem:[%s15464_s1 + $0x16c8] sm:$0xf] }
 0x22d   :  { %5714 = vmatpush.bf16.msrb.mxu3 %v9094_v4  ;;  %v8726_v4 = vor.u32 %v10034_v59, %v8725_v57  ;;  %v9222_v30 = vor.u32 %v10158_v10, %v9221_v8  ;;  %v10186_v53 = vld [vmem:[%s15464_s1 + $0x17d4] sm:$0xf0]  ;;  %v9206_v52 = vor.u32 %v10154_v45, %v9205_v44  ;;  %v8885_v58 = vld [vmem:[%s15464_s1 + $0x1448] sm:$0xf] }
 0x22e   :  { %5680 = vmatpush.bf16.msrb.mxu0 %v8630_v41  ;;  %v10214_v41 = vld [vmem:[%s15466_s2] sm:$0xf]  ;;  %v5450_v50 = vpop.f32.mrf.mxu2  ;;  %v9013_v55 = vld [vmem:[%s15464_s1 + $0x1548] sm:$0xf]  ;;  %v10106_v57 = vld [vmem:[%s15464_s1 + $0x1554] sm:$0xf0] }
 0x22f   :  { %5693 = vmatpush.bf16.msrb.mxu1 %v8758_v48  ;;  %v861_v48 = vperm.slane %v10214_v41, 2  ;;  %v9189_v59 = vld [vmem:[%s15464_s1 + $0x16a8] sm:$0xf]  ;;  %v10182_v0 = vld [vmem:[%s15464_s1 + $0x17b4] sm:$0xf0]  ;;  %v9014_v8 = vor.u32 %v10106_v57, %v9013_v55 }
 0x230   :  { %5702 = vmatpush.bf16.msrb.mxu2 %v8950_v15  ;;  %v9350_v15 = vor.u32 %v10190_v18, %v9349_v12  ;;  %v9317_v62 = vld [vmem:[%s15464_s1 + $0x17a8] sm:$0xf]  ;;  %v10070_v12 = vld [vmem:[%s15464_s1 + $0x1434] sm:$0xf0]  ;;  %v9452_v57 = vld [vmem:[%s15464_s1 + $0xec] sm:$0xf] }
 0x231   :  { %5715 = vmatpush.bf16.msrb.mxu3 %v9078_v46  ;;  %v9333_v46 = vld [vmem:[%s15464_s1 + $0x17c8] sm:$0xf]  ;;  %v10178_v33 = vld [vmem:[%s15464_s1 + $0x1794] sm:$0xf0] }
 0x232   :  { %5681 = vmatpush.bf16.msrb.mxu0 %v8614_v54  ;;  %v10074_v54 = vld [vmem:[%s15464_s1 + $0x1454] sm:$0xf0]  ;;  %v9334_v6 = vor.u32 %v10186_v53, %v9333_v46  ;;  %v8997_v18 = vld [vmem:[%s15464_s1 + $0x1528] sm:$0xf] }
 0x233   :  { %5694 = vmatpush.bf16.msrb.mxu1 %v8742_v56  ;;  %v5451_v56 = vadd.f32 %v5450_v50, %v861_v48  ;;  %v8886_v14 = vor.u32 %v10074_v54, %v8885_v58  ;;  %v9173_v28 = vld [vmem:[%s15464_s1 + $0x1688] sm:$0xf]  ;;  %v10066_v46 = vld [vmem:[%s15464_s1 + $0x1414] sm:$0xf0] }
 0x234   :  { %5703 = vmatpush.bf16.msrb.mxu2 %v8934_v47  ;;  %v5463_v47 = vpop.f32.mrf.mxu3  ;;  %v8853_v48 = vld [vmem:[%s15464_s1 + $0x1408] sm:$0xf]  ;;  %v10142_v58 = vld [vmem:[%s15464_s1 + $0x1674] sm:$0xf0] }
 0x235   :  { %5716 = vmatpush.bf16.msrb.mxu3 %v9062_v60  ;;  %v10150_v60 = vld [vmem:[%s15464_s1 + $0x16b4] sm:$0xf0]  ;;  %v13912_v5 = vadd.f32 %v5463_v47, %v5451_v56  ;;  %v8981_v53 = vld [vmem:[%s15464_s1 + $0x1508] sm:$0xf] }
 0x236   :  { %5682 = vmatpush.bf16.msrb.mxu0 %v8598_v11  ;;  %v9190_v10 = vor.u32 %v10150_v60, %v9189_v59  ;;  %v8869_v11 = vld [vmem:[%s15464_s1 + $0x1428] sm:$0xf]  ;;  %v13938_v35 = vpop.f32.mrf.mxu0  ;;  %v5452_v42 = vpop.f32.mrf.mxu2  ;;  %v10174_v55 = vld [vmem:[%s15464_s1 + $0x1774] sm:$0xf0]  ;;  %v6407_v59 = vld [vmem:[%s15464_s1 + $0xf8] sm:$0xf0] }
 0x237   :  { %5695 = vmatpush.bf16.msrb.mxu1 %v8726_v4  ;;  %v9318_v4 = vor.u32 %v10182_v0, %v9317_v62  ;;  %v8870_v41 = vor.u32 %v10070_v12, %v8869_v11  ;;  %v9285_v54 = vld [vmem:[%s15464_s1 + $0x1768] sm:$0xf]  ;;  %v10206_v47 = vld [vmem:[%s15464_s1 + $0x1874] sm:$0xf0]  ;;  %v6410_v12 = vor.u32 %v9452_v57, %v6407_v59 }
 0x238   :  { %5704 = vmatpush.bf16.msrb.mxu2 %v8918_v22  ;;  %v10102_v22 = vld [vmem:[%s15464_s1 + $0x1534] sm:$0xf0]  ;;  %v9413_v56 = vld [vmem:[%s15464_s1 + $0x1868] sm:$0xf]  ;;  %v9286_v0 = vor.u32 %v10174_v55, %v9285_v54 }
 0x239   :  { %5717 = vmatpush.bf16.msrb.mxu3 %v9046_v29  ;;  %5683 = vmatmul.bf16.vlgmr.msrb.gmra.mxu0 %v11364_v31  ;;  %v10146_v29 = vld [vmem:[%s15464_s1 + $0x1694] sm:$0xf0]  ;;  %v8998_v44 = vor.u32 %v10102_v22, %v8997_v18  ;;  %v9269_v11 = vld [vmem:[%s15464_s1 + $0x1748] sm:$0xf] }
 0x23a   :  { %5727 = vmatpush.bf16.msra.mxu0 %v9222_v30  ;;  %5696 = vmatmul.bf16.vlgmr.msrb.gmra.mxu1 %v11374_v36  ;;  %v9301_v30 = vld [vmem:[%s15464_s1 + $0x1788] sm:$0xf]  ;;  %v9174_v45 = vor.u32 %v10146_v29, %v9173_v28  ;;  %v10170_v18 = vld [vmem:[%s15464_s1 + $0x1754] sm:$0xf0]  ;;  %v9448_v29 = vld [vmem:[%s15464_s1 + $0xcc] sm:$0xf] }
 0x23b   :  { %5740 = vmatpush.bf16.msra.mxu1 %v9350_v15  ;;  %v13943_v15 = vpop.f32.mrf.mxu1  ;;  %v10202_v22 = vld [vmem:[%s15464_s1 + $0x1854] sm:$0xf0]  ;;  %v9109_v55 = vld [vmem:[%s15464_s1 + $0x1608] sm:$0xf] }
 0x23c   :  { %5705 = vmatpush.bf16.msrb.mxu2 %v8902_v49  ;;  %v10098_v49 = vld [vmem:[%s15464_s1 + $0x1514] sm:$0xf0]  ;;  %v5465_v50 = vpop.f32.mrf.mxu3  ;;  %v9237_v57 = vld [vmem:[%s15464_s1 + $0x1708] sm:$0xf] }
 0x23d   :  { %5718 = vmatpush.bf16.msrb.mxu3 %v9030_v51  ;;  %v9302_v51 = vor.u32 %v10178_v33, %v9301_v30  ;;  %v8982_v60 = vor.u32 %v10098_v49, %v8981_v53  ;;  %v6391_v30 = vld [vmem:[%s15464_s1 + $0xd8] sm:$0xf0]  ;;  %v10166_v49 = vld [vmem:[%s15464_s1 + $0x1734] sm:$0xf0]  ;;  %v9381_v50 = vld [vmem:[%s15464_s1 + $0x1828] sm:$0xf] }
 0x23e   :  { %5728 = vmatpush.bf16.msra.mxu0 %v9206_v52  ;;  %v9157_v52 = vld [vmem:[%s15464_s1 + $0x1668] sm:$0xf]  ;;  %v5478_v28 = vpop.f32.mrf.mxu0  ;;  %v6394_v53 = vor.u32 %v9448_v29, %v6391_v30  ;;  %v10162_v59 = vld [vmem:[%s15464_s1 + $0x1714] sm:$0xf0] }
 0x23f   :  { %5741 = vmatpush.bf16.msra.mxu1 %v9334_v6  ;;  %v8854_v6 = vor.u32 %v10066_v46, %v8853_v48  ;;  %v9158_v62 = vor.u32 %v10142_v58, %v9157_v52  ;;  %v9270_v48 = vor.u32 %v10170_v18, %v9269_v11  ;;  %v9253_v46 = vld [vmem:[%s15464_s1 + $0x1728] sm:$0xf]  ;;  %v9444_v52 = vld [vmem:[%s15464_s1 + $0xac] sm:$0xf]  ;;  %v6375_v58 = vld [vmem:[%s15464_s1 + $0xb8] sm:$0xf0]  ;;  %v9238_v28 = vor.u32 %v10162_v59, %v9237_v57 }
 0x240   :  { %5706 = vmatpush.bf16.msrb.mxu2 %v8886_v14  ;;  %v9414_v14 = vor.u32 %v10206_v47, %v9413_v56  ;;  %v10130_v56 = vld [vmem:[%s15464_s1 + $0x1614] sm:$0xf0]  ;;  %v9254_v47 = vor.u32 %v10166_v49, %v9253_v46  ;;  %v9484_v11 = vld [vmem:[%s15464_s1 + $0x1ec] sm:$0xf]  ;;  %v6663_v18 = vld [vmem:[%s15464_s1 + $0x2f8] sm:$0xf0] }
 0x241   :  { %5719 = vmatpush.bf16.msrb.mxu3 %v9014_v8  ;;  %v9141_v8 = vld [vmem:[%s15464_s1 + $0x1648] sm:$0xf]  ;;  %v9480_v46 = vld [vmem:[%s15464_s1 + $0x1cc] sm:$0xf]  ;;  %v6647_v49 = vld [vmem:[%s15464_s1 + $0x2d8] sm:$0xf0] }
 0x242   :  { %5729 = vmatpush.bf16.msra.mxu0 %v9190_v10  ;;  %v10138_v10 = vld [vmem:[%s15464_s1 + $0x1654] sm:$0xf0] }
 0x243   :  { %5742 = vmatpush.bf16.msra.mxu1 %v9318_v4  ;;  %v9397_v4 = vld [vmem:[%s15464_s1 + $0x1848] sm:$0xf]  ;;  %v5491_v33 = vpop.f32.mrf.mxu1 }
 0x244   :  { %5707 = vmatpush.bf16.msrb.mxu2 %v8870_v41  ;;  %v9142_v41 = vor.u32 %v10138_v10, %v9141_v8  ;;  %v9398_v42 = vor.u32 %v10202_v22, %v9397_v4  ;;  %v9440_v8 = vld [vmem:[%s15464_s1 + $0x8c] sm:$0xf]  ;;  %v6359_v10 = vld [vmem:[%s15464_s1 + $0x98] sm:$0xf0] }
 0x245   :  { %5720 = vmatpush.bf16.msrb.mxu3 %v8998_v44  ;;  %v9125_v44 = vld [vmem:[%s15464_s1 + $0x1628] sm:$0xf]  ;;  %v9548_v4 = vld [vmem:[%s15464_s1 + $0x3ec] sm:$0xf]  ;;  %v6791_v22 = vld [vmem:[%s15464_s1 + $0x3f8] sm:$0xf0]  ;;  %v6362_v33 = vor.u32 %v9440_v8, %v6359_v10 }
 0x246   :  { %5730 = vmatpush.bf16.msra.mxu0 %v9174_v45  ;;  %v10134_v45 = vld [vmem:[%s15464_s1 + $0x1634] sm:$0xf0]  ;;  %v9540_v8 = vld [vmem:[%s15464_s1 + $0x3ac] sm:$0xf]  ;;  %v6759_v10 = vld [vmem:[%s15464_s1 + $0x3b8] sm:$0xf0] }
 0x247   :  { %5743 = vmatpush.bf16.msra.mxu1 %v9302_v51  ;;  %v10198_v51 = vld [vmem:[%s15464_s1 + $0x1834] sm:$0xf0]  ;;  %v9126_v54 = vor.u32 %v10134_v45, %v9125_v44  ;;  %v6794_v45 = vor.u32 %v9548_v4, %v6791_v22  ;;  %v6762_v22 = vor.u32 %v9540_v8, %v6759_v10 }
 0x248   :  { %5708 = vmatpush.bf16.msrb.mxu2 %v8854_v6  ;;  %v9382_v6 = vor.u32 %v10198_v51, %v9381_v50  ;;  %v9544_v50 = vld [vmem:[%s15464_s1 + $0x3cc] sm:$0xf]  ;;  %v6775_v51 = vld [vmem:[%s15464_s1 + $0x3d8] sm:$0xf0] }
 0x249   :  { %5721 = vmatpush.bf16.msrb.mxu3 %v8982_v60  ;;  %v9365_v60 = vld [vmem:[%s15464_s1 + $0x1808] sm:$0xf]  ;;  %v6778_v59 = vor.u32 %v9544_v50, %v6775_v51  ;;  %v6295_v50 = vld [vmem:[%s15464_s1 + $0x18] sm:$0xf0] }
 0x24a   :  { %5731 = vmatpush.bf16.msra.mxu0 %v9158_v62  ;;  %v6378_v62 = vor.u32 %v9444_v52, %v6375_v58 }
 0x24b   :  { %5744 = vmatpush.bf16.msra.mxu1 %v9286_v0  ;;  %5709 = vmatmul.bf16.vlgmr.msrb.gmra.mxu2 %v11574_v61  ;;  %v5477_v0 = vadd.f32 %v13938_v35, %v13912_v5  ;;  %v6535_v5 = vld [vmem:[%s15464_s1 + $0x1f8] sm:$0xf0]  ;;  %v9516_v35 = vld [vmem:[%s15464_s1 + $0x2ec] sm:$0xf] }
 0x24c   :  { %5757 = vmatpush.bf16.msra.mxu2 %v9414_v14  ;;  %5722 = vmatmul.bf16.vlgmr.msrb.gmra.mxu3 %v11587_v3  ;;  %v10194_v14 = vld [vmem:[%s15464_s1 + $0x1814] sm:$0xf0]  ;;  %v6666_v44 = vor.u32 %v9516_v35, %v6663_v18  ;;  %v6311_v18 = vld [vmem:[%s15464_s1 + $0x38] sm:$0xf0] }
 0x24d   :  { %5766 = vmatpush.bf16.msra.mxu3 %v6410_v12  ;;  %v9110_v12 = vor.u32 %v10130_v56, %v9109_v55  ;;  %v9366_v29 = vor.u32 %v10194_v14, %v9365_v60  ;;  %v5490_v30 = vadd.f32 %v13943_v15, %v5477_v0  ;;  %v6519_v15 = vld [vmem:[%s15464_s1 + $0x1d8] sm:$0xf0]  ;;  %v9432_v55 = vld [vmem:[%s15464_s1 + $0x4c] sm:$0xf] }
 0x24e   :  { %5732 = vmatpush.bf16.msra.mxu0 %v9142_v41  ;;  %v6538_v41 = vor.u32 %v9484_v11, %v6535_v5  ;;  %v5502_v52 = vpop.f32.mrf.mxu2  ;;  %v6327_v56 = vld [vmem:[%s15464_s1 + $0x58] sm:$0xf0]  ;;  %v9476_v60 = vld [vmem:[%s15464_s1 + $0x1ac] sm:$0xf] }
 0x24f   :  { %5745 = vmatpush.bf16.msra.mxu1 %v9270_v48  ;;  %v9436_v48 = vld [vmem:[%s15464_s1 + $0x6c] sm:$0xf]  ;;  %v6631_v14 = vld [vmem:[%s15464_s1 + $0x2b8] sm:$0xf0]  ;;  %v6330_v5 = vor.u32 %v9432_v55, %v6327_v56 }
 0x250   :  { %5758 = vmatpush.bf16.msra.mxu2 %v9398_v42  ;;  %v6343_v42 = vld [vmem:[%s15464_s1 + $0x78] sm:$0xf0]  ;;  %v9508_v0 = vld [vmem:[%s15464_s1 + $0x2ac] sm:$0xf] }
 0x251   :  { %5767 = vmatpush.bf16.msra.mxu3 %v6394_v53  ;;  %v9512_v53 = vld [vmem:[%s15464_s1 + $0x2cc] sm:$0xf]  ;;  %v6346_v58 = vor.u32 %v9436_v48, %v6343_v42  ;;  %v6634_v4 = vor.u32 %v9508_v0, %v6631_v14  ;;  %v6743_v42 = vld [vmem:[%s15464_s1 + $0x398] sm:$0xf0] }
 0x252   :  { %5733 = vmatpush.bf16.msra.mxu0 %v9126_v54  ;;  %v6522_v54 = vor.u32 %v9480_v46, %v6519_v15  ;;  %v6650_v57 = vor.u32 %v9512_v53, %v6647_v49  ;;  %v9536_v48 = vld [vmem:[%s15464_s1 + $0x38c] sm:$0xf]  ;;  %v6471_v56 = vld [vmem:[%s15464_s1 + $0x178] sm:$0xf0] }
 0x253   :  { %5746 = vmatpush.bf16.msra.mxu1 %v9254_v47  ;;  %v5503_v47 = vadd.f32 %v5502_v52, %v5490_v30  ;;  %v9504_v30 = vld [vmem:[%s15464_s1 + $0x28c] sm:$0xf] }
 0x254   :  { %5759 = vmatpush.bf16.msra.mxu2 %v9382_v6  ;;  %v5515_v6 = vpop.f32.mrf.mxu3  ;;  %v9424_v49 = vld [vmem:[%s15464_s1 + $0xc] sm:$0xf] }
 0x255   :  { %5768 = vmatpush.bf16.msra.mxu3 %v6378_v62  ;;  %v6503_v62 = vld [vmem:[%s15464_s1 + $0x1b8] sm:$0xf0]  ;;  %v5516_v11 = vadd.f32 %v5515_v6, %v5503_v47  ;;  %v9468_v55 = vld [vmem:[%s15464_s1 + $0x16c] sm:$0xf]  ;;  %v6298_v0 = vor.u32 %v9424_v49, %v6295_v50 }
 0x256   :  { %5734 = vmatpush.bf16.msra.mxu0 %v9110_v12  ;;  %v6506_v35 = vor.u32 %v9476_v60, %v6503_v62  ;;  %v9428_v12 = vld [vmem:[%s15464_s1 + $0x2c] sm:$0xf]  ;;  %v5504_v46 = vpop.f32.mrf.mxu2  ;;  %v6599_v6 = vld [vmem:[%s15464_s1 + $0x278] sm:$0xf0]  ;;  %v6474_v14 = vor.u32 %v9468_v55, %v6471_v56 }
 0x257   :  { %5747 = vmatpush.bf16.msra.mxu1 %v9238_v28  ;;  %v9472_v28 = vld [vmem:[%s15464_s1 + $0x18c] sm:$0xf]  ;;  %v6314_v15 = vor.u32 %v9428_v12, %v6311_v18  ;;  %v6919_v62 = vld [vmem:[%s15464_s1 + $0x4f8] sm:$0xf0] }
 0x258   :  { %5760 = vmatpush.bf16.msra.mxu2 %v9366_v29  ;;  %v6487_v29 = vld [vmem:[%s15464_s1 + $0x198] sm:$0xf0]  ;;  %v9500_v47 = vld [vmem:[%s15464_s1 + $0x26c] sm:$0xf] }
 0x259   :  { %5769 = vmatpush.bf16.msra.mxu3 %v6362_v33  ;;  %5735 = vmatmul.bf16.vlgmr.msra.gmra.mxu0 %v11585_v2  ;;  %v5528_v33 = vpop.f32.mrf.mxu0  ;;  %v6490_v53 = vor.u32 %v9472_v28, %v6487_v29  ;;  %v9580_v60 = vld [vmem:[%s15464_s1 + $0x4ec] sm:$0xf]  ;;  %v6602_v8 = vor.u32 %v9500_v47, %v6599_v6  ;;  %v6583_v18 = vld [vmem:[%s15464_s1 + $0x258] sm:$0xf0] }
 0x25a   :  { %5779 = vmatpush.bf16.msrb.mxu0 %v6538_v41  ;;  %5748 = vmatmul.bf16.vlgmr.msra.gmra.mxu1 %v11595_v7  ;;  %v6615_v41 = vld [vmem:[%s15464_s1 + $0x298] sm:$0xf0]  ;;  %v6922_v12 = vor.u32 %v9580_v60, %v6919_v62  ;;  %v9576_v29 = vld [vmem:[%s15464_s1 + $0x4cc] sm:$0xf] }
 0x25b   :  { %5792 = vmatpush.bf16.msrb.mxu1 %v6666_v44  ;;  %9421 = vmatmul.msk.bf16.vlgmr.msra.gmra.mxu2 %vm4787_vm0, %v11698_v43  ;;  %v5529_v44 = vadd.f32 %v5528_v33, %v5516_v11  ;;  %v6618_v52 = vor.u32 %v9504_v30, %v6615_v41  ;;  %v9464_v11 = vld [vmem:[%s15464_s1 + $0x14c] sm:$0xf]  ;;  %v6903_v30 = vld [vmem:[%s15464_s1 + $0x4d8] sm:$0xf0] }
 0x25c   :  { %5805 = vmatpush.bf16.msrb.mxu2 %v6794_v45  ;;  %v5541_v45 = vpop.f32.mrf.mxu1  ;;  %v5517_v51 = vpop.f32.mrf.mxu3  ;;  %v9492_v46 = vld [vmem:[%s15464_s1 + $0x22c] sm:$0xf]  ;;  %v6695_v50 = vld [vmem:[%s15464_s1 + $0x338] sm:$0xf0] }
 0x25d   :  { %5770 = vmatpush.bf16.msra.mxu3 %v6346_v58  ;;  %v6746_v58 = vor.u32 %v9536_v48, %v6743_v42  ;;  %v9524_v49 = vld [vmem:[%s15464_s1 + $0x32c] sm:$0xf]  ;;  %v6423_v56 = vld [vmem:[%s15464_s1 + $0x118] sm:$0xf0] }
 0x25e   :  { %5780 = vmatpush.bf16.msrb.mxu0 %v6522_v54  ;;  %v14155_v54 = vadd.f32 %v5541_v45, %v5529_v44  ;;  %v9460_v44 = vld [vmem:[%s15464_s1 + $0x12c] sm:$0xf]  ;;  %v6439_v45 = vld [vmem:[%s15464_s1 + $0x138] sm:$0xf0]  ;;  %v6698_v6 = vor.u32 %v9524_v49, %v6695_v50 }
 0x25f   :  { %5793 = vmatpush.bf16.msrb.mxu1 %v6650_v57  ;;  %v9532_v57 = vld [vmem:[%s15464_s1 + $0x36c] sm:$0xf]  ;;  %v6679_v62 = vld [vmem:[%s15464_s1 + $0x318] sm:$0xf0] }
 0x260   :  { %5806 = vmatpush.bf16.msrb.mxu2 %v6778_v59  ;;  %v6727_v59 = vld [vmem:[%s15464_s1 + $0x378] sm:$0xf0]  ;;  %v9572_v51 = vld [vmem:[%s15464_s1 + $0x4ac] sm:$0xf] }
 0x261   :  { %5771 = vmatpush.bf16.msra.mxu3 %v6330_v5  ;;  %v6730_v10 = vor.u32 %v9532_v57, %v6727_v59  ;;  %v6455_v5 = vld [vmem:[%s15464_s1 + $0x158] sm:$0xf0]  ;;  %v5530_v28 = vpop.f32.mrf.mxu0  ;;  %v9456_v55 = vld [vmem:[%s15464_s1 + $0x10c] sm:$0xf] }
 0x262   :  { %5781 = vmatpush.bf16.msrb.mxu0 %v6506_v35  ;;  %v9496_v35 = vld [vmem:[%s15464_s1 + $0x24c] sm:$0xf]  ;;  %v6458_v41 = vor.u32 %v9464_v11, %v6455_v5  ;;  %v6426_v5 = vor.u32 %v9456_v55, %v6423_v56  ;;  %v6839_v56 = vld [vmem:[%s15464_s1 + $0x458] sm:$0xf0] }
 0x263   :  { %5794 = vmatpush.bf16.msrb.mxu1 %v6634_v4  ;;  %v9528_v4 = vld [vmem:[%s15464_s1 + $0x34c] sm:$0xf]  ;;  %v6586_v48 = vor.u32 %v9496_v35, %v6583_v18  ;;  %v7175_v35 = vld [vmem:[%s15464_s1 + $0x6f8] sm:$0xf0] }
 0x264   :  { %5807 = vmatpush.bf16.msrb.mxu2 %v6762_v22  ;;  %v6711_v22 = vld [vmem:[%s15464_s1 + $0x358] sm:$0xf0]  ;;  %v5543_v33 = vpop.f32.mrf.mxu1  ;;  %v9488_v57 = vld [vmem:[%s15464_s1 + $0x20c] sm:$0xf] }
 0x265   :  { %5772 = vmatpush.bf16.msra.mxu3 %v6314_v15  ;;  %v6714_v42 = vor.u32 %v9528_v4, %v6711_v22  ;;  %v6906_v15 = vor.u32 %v9576_v29, %v6903_v30  ;;  %v9520_v59 = vld [vmem:[%s15464_s1 + $0x30c] sm:$0xf]  ;;  %v7303_v18 = vld [vmem:[%s15464_s1 + $0x7f8] sm:$0xf0] }
 0x266   :  { %5782 = vmatpush.bf16.msrb.mxu0 %v6490_v53  ;;  %v6567_v53 = vld [vmem:[%s15464_s1 + $0x238] sm:$0xf0]  ;;  %v9644_v11 = vld [vmem:[%s15464_s1 + $0x6ec] sm:$0xf]  ;;  %v6682_v22 = vor.u32 %v9520_v59, %v6679_v62 }
 0x267   :  { %5795 = vmatpush.bf16.msrb.mxu1 %v6618_v52  ;;  %v6887_v52 = vld [vmem:[%s15464_s1 + $0x4b8] sm:$0xf0]  ;;  %v6570_v47 = vor.u32 %v9492_v46, %v6567_v53  ;;  %v9564_v30 = vld [vmem:[%s15464_s1 + $0x46c] sm:$0xf] }
 0x268   :  { %5808 = vmatpush.bf16.msrb.mxu2 %v6746_v58  ;;  %v6442_v58 = vor.u32 %v9460_v44, %v6439_v45  ;;  %v6890_v60 = vor.u32 %v9572_v51, %v6887_v52  ;;  %v6855_v33 = vld [vmem:[%s15464_s1 + $0x478] sm:$0xf0]  ;;  %v9640_v45 = vld [vmem:[%s15464_s1 + $0x6cc] sm:$0xf] }
 0x269   :  { %5773 = vmatpush.bf16.msra.mxu3 %v6298_v0  ;;  %v9568_v0 = vld [vmem:[%s15464_s1 + $0x48c] sm:$0xf]  ;;  %v7031_v44 = vld [vmem:[%s15464_s1 + $0x5d8] sm:$0xf0]  ;;  %v6858_v50 = vor.u32 %v9564_v30, %v6855_v33 }
 0x26a   :  { %5783 = vmatpush.bf16.msrb.mxu0 %v6474_v14  ;;  %v6871_v14 = vld [vmem:[%s15464_s1 + $0x498] sm:$0xf0]  ;;  %v9560_v55 = vld [vmem:[%s15464_s1 + $0x44c] sm:$0xf] }
 0x26b   :  { %5796 = vmatpush.bf16.msrb.mxu1 %v6602_v8  ;;  %v9612_v8 = vld [vmem:[%s15464_s1 + $0x5ec] sm:$0xf]  ;;  %v6874_v28 = vor.u32 %v9568_v0, %v6871_v14  ;;  %v7159_v46 = vld [vmem:[%s15464_s1 + $0x6d8] sm:$0xf0]  ;;  %v6842_v14 = vor.u32 %v9560_v55, %v6839_v56 }
 0x26c   :  { %5809 = vmatpush.bf16.msrb.mxu2 %v6730_v10  ;;  %5774 = vmatmul.bf16.vlgmr.msra.gmra.mxu3 %v10534_v9  ;;  %v6551_v9 = vld [vmem:[%s15464_s1 + $0x218] sm:$0xf0]  ;;  %v9668_v62 = vld [vmem:[%s15464_s1 + $0x7ac] sm:$0xf] }
 0x26d   :  { %5818 = vmatpush.bf16.msrb.mxu3 %v6922_v12  ;;  %v7047_v10 = vld [vmem:[%s15464_s1 + $0x5f8] sm:$0xf0]  ;;  %v9676_v12 = vld [vmem:[%s15464_s1 + $0x7ec] sm:$0xf]  ;;  %v6554_v4 = vor.u32 %v9488_v57, %v6551_v9 }
 0x26e   :  { %5784 = vmatpush.bf16.msrb.mxu0 %v6458_v41  ;;  %v7050_v29 = vor.u32 %v9612_v8, %v7047_v10  ;;  %v7178_v41 = vor.u32 %v9644_v11, %v7175_v35  ;;  %v7287_v53 = vld [vmem:[%s15464_s1 + $0x7d8] sm:$0xf0]  ;;  %v5554_v49 = vpop.f32.mrf.mxu2  ;;  %v9604_v57 = vld [vmem:[%s15464_s1 + $0x5ac] sm:$0xf] }
 0x26f   :  { %5797 = vmatpush.bf16.msrb.mxu1 %v6586_v48  ;;  %v7306_v48 = vor.u32 %v9676_v12, %v7303_v18  ;;  %v5555_v51 = vadd.f32 %v5554_v49, %v14155_v54  ;;  %v7015_v54 = vld [vmem:[%s15464_s1 + $0x5b8] sm:$0xf0]  ;;  %v9636_v9 = vld [vmem:[%s15464_s1 + $0x6ac] sm:$0xf] }
 0x270   :  { %5810 = vmatpush.bf16.msrb.mxu2 %v6714_v42  ;;  %v9608_v42 = vld [vmem:[%s15464_s1 + $0x5cc] sm:$0xf]  ;;  %v7271_v0 = vld [vmem:[%s15464_s1 + $0x7b8] sm:$0xf0]  ;;  %v7018_v8 = vor.u32 %v9604_v57, %v7015_v54 }
 0x271   :  { %5819 = vmatpush.bf16.msrb.mxu3 %v6906_v15  ;;  %v9672_v15 = vld [vmem:[%s15464_s1 + $0x7cc] sm:$0xf]  ;;  %v7034_v52 = vor.u32 %v9608_v42, %v7031_v44  ;;  %v6823_v11 = vld [vmem:[%s15464_s1 + $0x438] sm:$0xf0] }
 0x272   :  { %5785 = vmatpush.bf16.msrb.mxu0 %v6442_v58  ;;  %v5567_v58 = vpop.f32.mrf.mxu3  ;;  %v9556_v10 = vld [vmem:[%s15464_s1 + $0x42c] sm:$0xf]  ;;  %v7127_v18 = vld [vmem:[%s15464_s1 + $0x698] sm:$0xf0] }
 0x273   :  { %5798 = vmatpush.bf16.msrb.mxu1 %v6570_v47  ;;  %v7162_v47 = vor.u32 %v9640_v45, %v7159_v46  ;;  %v5568_v59 = vadd.f32 %v5567_v58, %v5555_v51  ;;  %v9632_v35 = vld [vmem:[%s15464_s1 + $0x68c] sm:$0xf]  ;;  %v6826_v33 = vor.u32 %v9556_v10, %v6823_v11  ;;  %v6807_v42 = vld [vmem:[%s15464_s1 + $0x418] sm:$0xf0] }
 0x274   :  { %5811 = vmatpush.bf16.msrb.mxu2 %v6698_v6  ;;  %v7290_v6 = vor.u32 %v9672_v15, %v7287_v53  ;;  %v7130_v45 = vor.u32 %v9632_v35, %v7127_v18  ;;  %v9596_v53 = vld [vmem:[%s15464_s1 + $0x56c] sm:$0xf]  ;;  %v6983_v49 = vld [vmem:[%s15464_s1 + $0x578] sm:$0xf0] }
 0x275   :  { %5820 = vmatpush.bf16.msrb.mxu3 %v6890_v60  ;;  %v7143_v60 = vld [vmem:[%s15464_s1 + $0x6b8] sm:$0xf0]  ;;  %v9708_v55 = vld [vmem:[%s15464_s1 + $0x8ec] sm:$0xf] }
 0x276   :  { %5786 = vmatpush.bf16.msrb.mxu0 %v6426_v5  ;;  %v7146_v5 = vor.u32 %v9636_v9, %v7143_v60  ;;  %v5580_v12 = vpop.f32.mrf.mxu0  ;;  %v5556_v30 = vpop.f32.mrf.mxu2  ;;  %v7111_v51 = vld [vmem:[%s15464_s1 + $0x678] sm:$0xf0]  ;;  %v9592_v9 = vld [vmem:[%s15464_s1 + $0x54c] sm:$0xf] }
 0x277   :  { %5799 = vmatpush.bf16.msrb.mxu1 %v6554_v4  ;;  %v9664_v4 = vld [vmem:[%s15464_s1 + $0x78c] sm:$0xf]  ;;  %v7239_v58 = vld [vmem:[%s15464_s1 + $0x778] sm:$0xf0] }
 0x278   :  { %5812 = vmatpush.bf16.msrb.mxu2 %v6682_v22  ;;  %v7255_v22 = vld [vmem:[%s15464_s1 + $0x798] sm:$0xf0]  ;;  %v9624_v60 = vld [vmem:[%s15464_s1 + $0x64c] sm:$0xf] }
 0x279   :  { %5821 = vmatpush.bf16.msrb.mxu3 %v6874_v28  ;;  %5787 = vmatmul.bf16.vlgmr.msrb.gmra.mxu0 %v10553_v17  ;;  %v6999_v17 = vld [vmem:[%s15464_s1 + $0x598] sm:$0xf0]  ;;  %v5581_v28 = vadd.f32 %v5580_v12, %v5568_v59  ;;  %v7258_v46 = vor.u32 %v9664_v4, %v7255_v22  ;;  %v9704_v11 = vld [vmem:[%s15464_s1 + $0x8cc] sm:$0xf] }
 0x27a   :  { %5831 = vmatpush.bf16.msra.mxu0 %v7050_v29  ;;  %5800 = vmatmul.bf16.vlgmr.msrb.gmra.mxu1 %v10513_v63  ;;  %v9600_v63 = vld [vmem:[%s15464_s1 + $0x58c] sm:$0xf]  ;;  %v5593_v29 = vpop.f32.mrf.mxu1  ;;  %v5569_v44 = vpop.f32.mrf.mxu3  ;;  %v7431_v56 = vld [vmem:[%s15464_s1 + $0x8f8] sm:$0xf0] }
 0x27b   :  { %5844 = vmatpush.bf16.msra.mxu1 %v7178_v41  ;;  %5813 = vmatmul.bf16.vlgmr.msrb.gmra.mxu2 %v10551_v16  ;;  %v7274_v16 = vor.u32 %v9668_v62, %v7271_v0  ;;  %v7002_v41 = vor.u32 %v9600_v63, %v6999_v17  ;;  %v14354_v15 = vadd.f32 %v5593_v29, %v5581_v28  ;;  %v6967_v59 = vld [vmem:[%s15464_s1 + $0x558] sm:$0xf0]  ;;  %v9588_v12 = vld [vmem:[%s15464_s1 + $0x52c] sm:$0xf] }
 0x27c   :  { %5857 = vmatpush.bf16.msra.mxu2 %v7306_v48  ;;  %v9552_v48 = vld [vmem:[%s15464_s1 + $0x40c] sm:$0xf]  ;;  %v7434_v62 = vor.u32 %v9708_v55, %v7431_v56  ;;  %v7095_v0 = vld [vmem:[%s15464_s1 + $0x658] sm:$0xf0]  ;;  %v6970_v63 = vor.u32 %v9592_v9, %v6967_v59 }
 0x27d   :  { %5822 = vmatpush.bf16.msrb.mxu3 %v6858_v50  ;;  %v9628_v50 = vld [vmem:[%s15464_s1 + $0x66c] sm:$0xf]  ;;  %v7098_v17 = vor.u32 %v9624_v60, %v7095_v0  ;;  %v6951_v18 = vld [vmem:[%s15464_s1 + $0x538] sm:$0xf0] }
 0x27e   :  { %5832 = vmatpush.bf16.msra.mxu0 %v7034_v52  ;;  %v9660_v52 = vld [vmem:[%s15464_s1 + $0x76c] sm:$0xf]  ;;  %v7114_v57 = vor.u32 %v9628_v50, %v7111_v51  ;;  %v5582_v10 = vpop.f32.mrf.mxu0  ;;  %v7079_v28 = vld [vmem:[%s15464_s1 + $0x638] sm:$0xf0] }
 0x27f   :  { %5845 = vmatpush.bf16.msra.mxu1 %v7162_v47  ;;  %v6810_v47 = vor.u32 %v9552_v48, %v6807_v42  ;;  %v7242_v54 = vor.u32 %v9660_v52, %v7239_v58  ;;  %v9620_v4 = vld [vmem:[%s15464_s1 + $0x62c] sm:$0xf]  ;;  %v7207_v30 = vld [vmem:[%s15464_s1 + $0x738] sm:$0xf0]  ;;  %v6954_v48 = vor.u32 %v9588_v12, %v6951_v18 }
 0x280   :  { %5858 = vmatpush.bf16.msra.mxu2 %v7290_v6  ;;  %v6986_v6 = vor.u32 %v9596_v53, %v6983_v49  ;;  %v9652_v29 = vld [vmem:[%s15464_s1 + $0x72c] sm:$0xf]  ;;  %v6935_v44 = vld [vmem:[%s15464_s1 + $0x518] sm:$0xf0] }
 0x281   :  { %5823 = vmatpush.bf16.msrb.mxu3 %v6842_v14  ;;  %v9656_v14 = vld [vmem:[%s15464_s1 + $0x74c] sm:$0xf]  ;;  %v7063_v53 = vld [vmem:[%s15464_s1 + $0x618] sm:$0xf0] }
 0x282   :  { %5833 = vmatpush.bf16.msra.mxu0 %v7018_v8  ;;  %v7223_v8 = vld [vmem:[%s15464_s1 + $0x758] sm:$0xf0]  ;;  %v9584_v42 = vld [vmem:[%s15464_s1 + $0x50c] sm:$0xf] }
 0x283   :  { %5846 = vmatpush.bf16.msra.mxu1 %v7146_v5  ;;  %v7415_v5 = vld [vmem:[%s15464_s1 + $0x8d8] sm:$0xf0]  ;;  %v7226_v35 = vor.u32 %v9656_v14, %v7223_v8  ;;  %v9648_v49 = vld [vmem:[%s15464_s1 + $0x70c] sm:$0xf] }
 0x284   :  { %5859 = vmatpush.bf16.msra.mxu2 %v7274_v16  ;;  %v5595_v16 = vpop.f32.mrf.mxu1  ;;  %v7418_v22 = vor.u32 %v9704_v11, %v7415_v5  ;;  %v7191_v51 = vld [vmem:[%s15464_s1 + $0x718] sm:$0xf0]  ;;  %v9696_v52 = vld [vmem:[%s15464_s1 + $0x88c] sm:$0xf] }
 0x285   :  { %5824 = vmatpush.bf16.msrb.mxu3 %v6826_v33  ;;  %v9700_v33 = vld [vmem:[%s15464_s1 + $0x8ac] sm:$0xf]  ;;  %v7383_v58 = vld [vmem:[%s15464_s1 + $0x898] sm:$0xf0]  ;;  %v7194_v60 = vor.u32 %v9648_v49, %v7191_v51 }
 0x286   :  { %5834 = vmatpush.bf16.msra.mxu0 %v7002_v41  ;;  %v7399_v41 = vld [vmem:[%s15464_s1 + $0x8b8] sm:$0xf0]  ;;  %v9740_v55 = vld [vmem:[%s15464_s1 + $0x9ec] sm:$0xf] }
 0x287   :  { %5847 = vmatpush.bf16.msra.mxu1 %v7130_v45  ;;  %v7210_v45 = vor.u32 %v9652_v29, %v7207_v30  ;;  %v7402_v50 = vor.u32 %v9700_v33, %v7399_v41  ;;  %v7559_v56 = vld [vmem:[%s15464_s1 + $0x9f8] sm:$0xf0]  ;;  %v9692_v14 = vld [vmem:[%s15464_s1 + $0x86c] sm:$0xf] }
 0x288   :  { %5860 = vmatpush.bf16.msra.mxu2 %v7258_v46  ;;  %v9616_v46 = vld [vmem:[%s15464_s1 + $0x60c] sm:$0xf]  ;;  %v7815_v9 = vld [vmem:[%s15464_s1 + $0xbf8] sm:$0xf0]  ;;  %v7562_v0 = vor.u32 %v9740_v55, %v7559_v56 }
 0x289   :  { %5825 = vmatpush.bf16.msrb.mxu3 %v6810_v47  ;;  %v9772_v47 = vld [vmem:[%s15464_s1 + $0xaec] sm:$0xf]  ;;  %v7066_v59 = vor.u32 %v9616_v46, %v7063_v53  ;;  %v7367_v8 = vld [vmem:[%s15464_s1 + $0x878] sm:$0xf0] }
 0x28a   :  { %5835 = vmatpush.bf16.msra.mxu0 %v6986_v6  ;;  %v6938_v6 = vor.u32 %v9584_v42, %v6935_v44  ;;  %v9736_v5 = vld [vmem:[%s15464_s1 + $0x9cc] sm:$0xf]  ;;  %v7543_v16 = vld [vmem:[%s15464_s1 + $0x9d8] sm:$0xf0] }
 0x28b   :  { %5848 = vmatpush.bf16.msra.mxu1 %v7114_v57  ;;  %v7687_v57 = vld [vmem:[%s15464_s1 + $0xaf8] sm:$0xf0]  ;;  %v9688_v30 = vld [vmem:[%s15464_s1 + $0x84c] sm:$0xf] }
 0x28c   :  { %5861 = vmatpush.bf16.msra.mxu2 %v7242_v54  ;;  %5826 = vmatmul.bf16.vlgmr.msrb.gmra.mxu3 %v10722_v37  ;;  %v7082_v37 = vor.u32 %v9620_v4, %v7079_v28  ;;  %v9804_v54 = vld [vmem:[%s15464_s1 + $0xbec] sm:$0xf]  ;;  %v7690_v10 = vor.u32 %v9772_v47, %v7687_v57  ;;  %v7799_v12 = vld [vmem:[%s15464_s1 + $0xbd8] sm:$0xf0]  ;;  %v7370_v4 = vor.u32 %v9692_v14, %v7367_v8 }
 0x28d   :  { %5870 = vmatpush.bf16.msra.mxu3 %v7434_v62  ;;  %v7386_v62 = vor.u32 %v9696_v52, %v7383_v58  ;;  %v7818_v11 = vor.u32 %v9804_v54, %v7815_v9  ;;  %v7546_v28 = vor.u32 %v9736_v5, %v7543_v16  ;;  %v7351_v33 = vld [vmem:[%s15464_s1 + $0x858] sm:$0xf0]  ;;  %v9732_v42 = vld [vmem:[%s15464_s1 + $0x9ac] sm:$0xf] }
 0x28e   :  { %5836 = vmatpush.bf16.msra.mxu0 %v6970_v63  ;;  %v9768_v63 = vld [vmem:[%s15464_s1 + $0xacc] sm:$0xf]  ;;  %v5606_v18 = vpop.f32.mrf.mxu2  ;;  %v7783_v53 = vld [vmem:[%s15464_s1 + $0xbb8] sm:$0xf0] }
 0x28f   :  { %5849 = vmatpush.bf16.msra.mxu1 %v7098_v17  ;;  %v7671_v17 = vld [vmem:[%s15464_s1 + $0xad8] sm:$0xf0]  ;;  %v5619_v29 = vpop.f32.mrf.mxu3  ;;  %v9764_v44 = vld [vmem:[%s15464_s1 + $0xaac] sm:$0xf] }
 0x290   :  { %5862 = vmatpush.bf16.msra.mxu2 %v7226_v35  ;;  %v9800_v35 = vld [vmem:[%s15464_s1 + $0xbcc] sm:$0xf]  ;;  %v7674_v41 = vor.u32 %v9768_v63, %v7671_v17  ;;  %v7511_v58 = vld [vmem:[%s15464_s1 + $0x998] sm:$0xf0] }
 0x291   :  { %5871 = vmatpush.bf16.msra.mxu3 %v7418_v22  ;;  %v5607_v22 = vadd.f32 %v5606_v18, %v14354_v15  ;;  %v7527_v15 = vld [vmem:[%s15464_s1 + $0x9b8] sm:$0xf0]  ;;  %v9796_v46 = vld [vmem:[%s15464_s1 + $0xbac] sm:$0xf] }
 0x292   :  { %5837 = vmatpush.bf16.msra.mxu0 %v6954_v48  ;;  %v7802_v48 = vor.u32 %v9800_v35, %v7799_v12  ;;  %v7530_v49 = vor.u32 %v9732_v42, %v7527_v15  ;;  %v7786_v52 = vor.u32 %v9796_v46, %v7783_v53  ;;  %v9760_v55 = vld [vmem:[%s15464_s1 + $0xa8c] sm:$0xf]  ;;  %v7639_v47 = vld [vmem:[%s15464_s1 + $0xa98] sm:$0xf0] }
 0x293   :  { %5850 = vmatpush.bf16.msra.mxu1 %v7082_v37  ;;  %v5620_v37 = vadd.f32 %v5619_v29, %v5607_v22  ;;  %v7767_v57 = vld [vmem:[%s15464_s1 + $0xb98] sm:$0xf0]  ;;  %v9724_v16 = vld [vmem:[%s15464_s1 + $0x96c] sm:$0xf] }
 0x294   :  { %5863 = vmatpush.bf16.msra.mxu2 %v7210_v45  ;;  %v7655_v45 = vld [vmem:[%s15464_s1 + $0xab8] sm:$0xf0]  ;;  %v9756_v17 = vld [vmem:[%s15464_s1 + $0xa6c] sm:$0xf] }
 0x295   :  { %5872 = vmatpush.bf16.msra.mxu3 %v7402_v50  ;;  %v7335_v50 = vld [vmem:[%s15464_s1 + $0x838] sm:$0xf0]  ;;  %v7658_v51 = vor.u32 %v9764_v44, %v7655_v45  ;;  %v9788_v12 = vld [vmem:[%s15464_s1 + $0xb6c] sm:$0xf] }
 0x296   :  { %5838 = vmatpush.bf16.msra.mxu0 %v6938_v6  ;;  %v5632_v56 = vpop.f32.mrf.mxu0  ;;  %v9792_v6 = vld [vmem:[%s15464_s1 + $0xb8c] sm:$0xf]  ;;  %v7319_v14 = vld [vmem:[%s15464_s1 + $0x818] sm:$0xf0] }
 0x297   :  { %5851 = vmatpush.bf16.msra.mxu1 %v7066_v59  ;;  %v5633_v54 = vadd.f32 %v5632_v56, %v5620_v37  ;;  %v5645_v9 = vpop.f32.mrf.mxu1  ;;  %v5608_v59 = vpop.f32.mrf.mxu2  ;;  %v7495_v63 = vld [vmem:[%s15464_s1 + $0x978] sm:$0xf0]  ;;  %v9752_v42 = vld [vmem:[%s15464_s1 + $0xa4c] sm:$0xf] }
 0x298   :  { %5864 = vmatpush.bf16.msra.mxu2 %v7194_v60  ;;  %v5621_v8 = vpop.f32.mrf.mxu3  ;;  %v7623_v35 = vld [vmem:[%s15464_s1 + $0xa78] sm:$0xf0]  ;;  %v7498_v29 = vor.u32 %v9724_v16, %v7495_v63  ;;  %v9784_v37 = vld [vmem:[%s15464_s1 + $0xb4c] sm:$0xf] }
 0x299   :  { %5873 = vmatpush.bf16.msra.mxu3 %v7386_v62  ;;  %5839 = vmatmul.bf16.vlgmr.msra.gmra.mxu0 %v10726_v40  ;;  %v9684_v40 = vld [vmem:[%s15464_s1 + $0x82c] sm:$0xf]  ;;  %v14553_v5 = vadd.f32 %v5645_v9, %v5633_v54  ;;  %v7751_v18 = vld [vmem:[%s15464_s1 + $0xb78] sm:$0xf0] }
 0x29a   :  { %5883 = vmatpush.bf16.msrb.mxu0 %v7562_v0  ;;  %5852 = vmatmul.bf16.vlgmr.msra.gmra.mxu1 %v10714_v34  ;;  %v9728_v34 = vld [vmem:[%s15464_s1 + $0x98c] sm:$0xf]  ;;  %v7338_v60 = vor.u32 %v9684_v40, %v7335_v50  ;;  %v7943_v22 = vld [vmem:[%s15464_s1 + $0xcf8] sm:$0xf0] }
 0x29b   :  { %5896 = vmatpush.bf16.msrb.mxu1 %v7690_v10  ;;  %5865 = vmatmul.bf16.vlgmr.msra.gmra.mxu2 %v10724_v38  ;;  %v7354_v38 = vor.u32 %v9688_v30, %v7351_v33  ;;  %v7514_v62 = vor.u32 %v9728_v34, %v7511_v58  ;;  %v9680_v0 = vld [vmem:[%s15464_s1 + $0x80c] sm:$0xf]  ;;  %v7642_v10 = vor.u32 %v9760_v55, %v7639_v47  ;;  %v7607_v44 = vld [vmem:[%s15464_s1 + $0xa58] sm:$0xf0] }
 0x29c   :  { %5909 = vmatpush.bf16.msrb.mxu2 %v7818_v11  ;;  %v7770_v11 = vor.u32 %v9792_v6, %v7767_v57  ;;  %v7626_v30 = vor.u32 %v9756_v17, %v7623_v35  ;;  %v7754_v33 = vor.u32 %v9788_v12, %v7751_v18  ;;  %v7735_v45 = vld [vmem:[%s15464_s1 + $0xb58] sm:$0xf0]  ;;  %v9832_v53 = vld [vmem:[%s15464_s1 + $0xccc] sm:$0xf]  ;;  %v7610_v50 = vor.u32 %v9752_v42, %v7607_v44 }
 0x29d   :  { %5874 = vmatpush.bf16.msra.mxu3 %v7370_v4  ;;  %v9836_v4 = vld [vmem:[%s15464_s1 + $0xcec] sm:$0xf]  ;;  %v7463_v34 = vld [vmem:[%s15464_s1 + $0x938] sm:$0xf0] }
 0x29e   :  { %5884 = vmatpush.bf16.msrb.mxu0 %v7546_v28  ;;  %v7322_v28 = vor.u32 %v9680_v0, %v7319_v14  ;;  %v7946_v15 = vor.u32 %v9836_v4, %v7943_v22  ;;  %v5634_v46 = vpop.f32.mrf.mxu0  ;;  %v9748_v58 = vld [vmem:[%s15464_s1 + $0xa2c] sm:$0xf]  ;;  %v7591_v56 = vld [vmem:[%s15464_s1 + $0xa38] sm:$0xf0] }
 0x29f   :  { %5897 = vmatpush.bf16.msrb.mxu1 %v7674_v41  ;;  %v9720_v41 = vld [vmem:[%s15464_s1 + $0x94c] sm:$0xf]  ;;  %v7719_v6 = vld [vmem:[%s15464_s1 + $0xb38] sm:$0xf0] }
 0x2a0   :  { %5910 = vmatpush.bf16.msrb.mxu2 %v7802_v48  ;;  %v7479_v48 = vld [vmem:[%s15464_s1 + $0x958] sm:$0xf0]  ;;  %v9780_v47 = vld [vmem:[%s15464_s1 + $0xb2c] sm:$0xf] }
 0x2a1   :  { %5875 = vmatpush.bf16.msra.mxu3 %v7354_v38  ;;  %v7927_v38 = vld [vmem:[%s15464_s1 + $0xcd8] sm:$0xf0]  ;;  %v7482_v40 = vor.u32 %v9720_v41, %v7479_v48  ;;  %v9828_v57 = vld [vmem:[%s15464_s1 + $0xcac] sm:$0xf] }
 0x2a2   :  { %5885 = vmatpush.bf16.msrb.mxu0 %v7530_v49  ;;  %v5647_v49 = vpop.f32.mrf.mxu1  ;;  %v7930_v55 = vor.u32 %v9832_v53, %v7927_v38  ;;  %v7911_v54 = vld [vmem:[%s15464_s1 + $0xcb8] sm:$0xf0]  ;;  %v9712_v59 = vld [vmem:[%s15464_s1 + $0x90c] sm:$0xf] }
 0x2a3   :  { %5898 = vmatpush.bf16.msrb.mxu1 %v7658_v51  ;;  %v7738_v51 = vor.u32 %v9784_v37, %v7735_v45  ;;  %v9744_v0 = vld [vmem:[%s15464_s1 + $0xa0c] sm:$0xf]  ;;  %v7575_v14 = vld [vmem:[%s15464_s1 + $0xa18] sm:$0xf0] }
 0x2a4   :  { %5911 = vmatpush.bf16.msrb.mxu2 %v7786_v52  ;;  %v9716_v52 = vld [vmem:[%s15464_s1 + $0x92c] sm:$0xf]  ;;  %v7895_v63 = vld [vmem:[%s15464_s1 + $0xc98] sm:$0xf0] }
 0x2a5   :  { %5876 = vmatpush.bf16.msra.mxu3 %v7338_v60  ;;  %v7466_v9 = vor.u32 %v9716_v52, %v7463_v34  ;;  %v7447_v60 = vld [vmem:[%s15464_s1 + $0x918] sm:$0xf0]  ;;  %v9776_v8 = vld [vmem:[%s15464_s1 + $0xb0c] sm:$0xf] }
 0x2a6   :  { %5886 = vmatpush.bf16.msrb.mxu0 %v7514_v62  ;;  %v7722_v62 = vor.u32 %v9780_v47, %v7719_v6  ;;  %v9824_v16 = vld [vmem:[%s15464_s1 + $0xc8c] sm:$0xf]  ;;  %v8071_v35 = vld [vmem:[%s15464_s1 + $0xdf8] sm:$0xf0]  ;;  %v7450_v18 = vor.u32 %v9712_v59, %v7447_v60 }
 0x2a7   :  { %5899 = vmatpush.bf16.msrb.mxu1 %v7642_v10  ;;  %v7914_v10 = vor.u32 %v9828_v57, %v7911_v54  ;;  %v9868_v17 = vld [vmem:[%s15464_s1 + $0xdec] sm:$0xf]  ;;  %v8199_v4 = vld [vmem:[%s15464_s1 + $0xef8] sm:$0xf0] }
 0x2a8   :  { %5912 = vmatpush.bf16.msrb.mxu2 %v7770_v11  ;;  %v7703_v11 = vld [vmem:[%s15464_s1 + $0xb18] sm:$0xf0]  ;;  %v9900_v12 = vld [vmem:[%s15464_s1 + $0xeec] sm:$0xf]  ;;  %v8074_v41 = vor.u32 %v9868_v17, %v8071_v35 }
 0x2a9   :  { %5877 = vmatpush.bf16.msra.mxu3 %v7322_v28  ;;  %v9932_v22 = vld [vmem:[%s15464_s1 + $0xfec] sm:$0xf]  ;;  %v8327_v28 = vld [vmem:[%s15464_s1 + $0xff8] sm:$0xf0] }
 0x2aa   :  { %5887 = vmatpush.bf16.msrb.mxu0 %v7498_v29  ;;  %v7578_v29 = vor.u32 %v9744_v0, %v7575_v14  ;;  %v9820_v48 = vld [vmem:[%s15464_s1 + $0xc6c] sm:$0xf]  ;;  %v7879_v42 = vld [vmem:[%s15464_s1 + $0xc78] sm:$0xf0]  ;;  %v8330_v44 = vor.u32 %v9932_v22, %v8327_v28 }
 0x2ab   :  { %5900 = vmatpush.bf16.msrb.mxu1 %v7626_v30  ;;  %v7706_v30 = vor.u32 %v9776_v8, %v7703_v11  ;;  %v9864_v37 = vld [vmem:[%s15464_s1 + $0xdcc] sm:$0xf]  ;;  %v8055_v45 = vld [vmem:[%s15464_s1 + $0xdd8] sm:$0xf0] }
 0x2ac   :  { %5913 = vmatpush.bf16.msrb.mxu2 %v7754_v33  ;;  %5878 = vmatmul.bf16.vlgmr.msra.gmra.mxu3 %v10921_v19  ;;  %v7594_v19 = vor.u32 %v9748_v58, %v7591_v56  ;;  %v7898_v33 = vor.u32 %v9824_v16, %v7895_v63  ;;  %v9896_v46 = vld [vmem:[%s15464_s1 + $0xecc] sm:$0xf]  ;;  %v8183_v53 = vld [vmem:[%s15464_s1 + $0xed8] sm:$0xf0]  ;;  %v8058_v52 = vor.u32 %v9864_v37, %v8055_v45 }
 0x2ad   :  { %5922 = vmatpush.bf16.msrb.mxu3 %v7946_v15  ;;  %v8202_v15 = vor.u32 %v9900_v12, %v8199_v4  ;;  %v9928_v38 = vld [vmem:[%s15464_s1 + $0xfcc] sm:$0xf]  ;;  %v8311_v49 = vld [vmem:[%s15464_s1 + $0xfd8] sm:$0xf0]  ;;  %v8186_v56 = vor.u32 %v9896_v46, %v8183_v53 }
 0x2ae   :  { %5888 = vmatpush.bf16.msrb.mxu0 %v7482_v40  ;;  %v5658_v40 = vpop.f32.mrf.mxu2  ;;  %v9816_v58 = vld [vmem:[%s15464_s1 + $0xc4c] sm:$0xf]  ;;  %v8314_v47 = vor.u32 %v9928_v38, %v8311_v49  ;;  %v8295_v60 = vld [vmem:[%s15464_s1 + $0xfb8] sm:$0xf0] }
 0x2af   :  { %5901 = vmatpush.bf16.msrb.mxu1 %v7610_v50  ;;  %v7882_v50 = vor.u32 %v9820_v48, %v7879_v42  ;;  %v5671_v34 = vpop.f32.mrf.mxu3  ;;  %v9860_v6 = vld [vmem:[%s15464_s1 + $0xdac] sm:$0xf]  ;;  %v8023_v8 = vld [vmem:[%s15464_s1 + $0xd98] sm:$0xf0] }
 0x2b0   :  { %5914 = vmatpush.bf16.msrb.mxu2 %v7738_v51  ;;  %v5659_v51 = vadd.f32 %v5658_v40, %v14553_v5  ;;  %v8039_v5 = vld [vmem:[%s15464_s1 + $0xdb8] sm:$0xf0]  ;;  %v9892_v57 = vld [vmem:[%s15464_s1 + $0xeac] sm:$0xf] }
 0x2b1   :  { %5923 = vmatpush.bf16.msrb.mxu3 %v7930_v55  ;;  %v7863_v55 = vld [vmem:[%s15464_s1 + $0xc58] sm:$0xf0]  ;;  %v9924_v59 = vld [vmem:[%s15464_s1 + $0xfac] sm:$0xf] }
 0x2b2   :  { %5889 = vmatpush.bf16.msrb.mxu0 %v7466_v9  ;;  %v5672_v54 = vadd.f32 %v5671_v34, %v5659_v51  ;;  %v8167_v9 = vld [vmem:[%s15464_s1 + $0xeb8] sm:$0xf0]  ;;  %v8298_v14 = vor.u32 %v9924_v59, %v8295_v60  ;;  %v9920_v63 = vld [vmem:[%s15464_s1 + $0xf8c] sm:$0xf] }
 0x2b3   :  { %5902 = vmatpush.bf16.msrb.mxu1 %v7594_v19  ;;  %v8042_v19 = vor.u32 %v9860_v6, %v8039_v5  ;;  %v8170_v0 = vor.u32 %v9892_v57, %v8167_v9  ;;  %v8151_v16 = vld [vmem:[%s15464_s1 + $0xe98] sm:$0xf0]  ;;  %v9808_v28 = vld [vmem:[%s15464_s1 + $0xc0c] sm:$0xf] }
 0x2b4   :  { %5915 = vmatpush.bf16.msrb.mxu2 %v7722_v62  ;;  %v7847_v62 = vld [vmem:[%s15464_s1 + $0xc38] sm:$0xf0]  ;;  %v9852_v42 = vld [vmem:[%s15464_s1 + $0xd6c] sm:$0xf] }
 0x2b5   :  { %5924 = vmatpush.bf16.msrb.mxu3 %v7914_v10  ;;  %v9888_v10 = vld [vmem:[%s15464_s1 + $0xe8c] sm:$0xf]  ;;  %v8279_v17 = vld [vmem:[%s15464_s1 + $0xf98] sm:$0xf0] }
 0x2b6   :  { %5890 = vmatpush.bf16.msrb.mxu0 %v7450_v18  ;;  %v5684_v11 = vpop.f32.mrf.mxu0  ;;  %v5660_v18 = vpop.f32.mrf.mxu2  ;;  %v8135_v37 = vld [vmem:[%s15464_s1 + $0xe78] sm:$0xf0]  ;;  %v9916_v45 = vld [vmem:[%s15464_s1 + $0xf6c] sm:$0xf] }
 0x2b7   :  { %5903 = vmatpush.bf16.msrb.mxu1 %v7578_v29  ;;  %v5685_v35 = vadd.f32 %v5684_v11, %v5672_v54  ;;  %v5697_v12 = vpop.f32.mrf.mxu1  ;;  %v7831_v29 = vld [vmem:[%s15464_s1 + $0xc18] sm:$0xf0]  ;;  %v9964_v53 = vld [vmem:[%s15464_s1 + $0x10ec] sm:$0xf] }
 0x2b8   :  { %5916 = vmatpush.bf16.msrb.mxu2 %v7706_v30  ;;  %v5673_v30 = vpop.f32.mrf.mxu3  ;;  %v8263_v46 = vld [vmem:[%s15464_s1 + $0xf78] sm:$0xf0]  ;;  %v7834_v49 = vor.u32 %v9808_v28, %v7831_v29  ;;  %v9960_v57 = vld [vmem:[%s15464_s1 + $0x10cc] sm:$0xf] }
 0x2b9   :  { %5925 = vmatpush.bf16.msrb.mxu3 %v7898_v33  ;;  %5891 = vmatmul.bf16.vlgmr.msrb.gmra.mxu0 %v10934_v24  ;;  %v7866_v24 = vor.u32 %v9816_v58, %v7863_v55  ;;  %v8154_v33 = vor.u32 %v9888_v10, %v8151_v16  ;;  %v14752_v48 = vadd.f32 %v5697_v12, %v5685_v35  ;;  %v8455_v38 = vld [vmem:[%s15464_s1 + $0x10f8] sm:$0xf0]  ;;  %v9880_v58 = vld [vmem:[%s15464_s1 + $0xe4c] sm:$0xf] }
 0x2ba   :  { %5935 = vmatpush.bf16.msra.mxu0 %v8074_v41  ;;  %5904 = vmatmul.bf16.vlgmr.msrb.gmra.mxu1 %v10932_v23  ;;  %v9856_v23 = vld [vmem:[%s15464_s1 + $0xd8c] sm:$0xf]  ;;  %v8282_v41 = vor.u32 %v9920_v63, %v8279_v17  ;;  %v8266_v51 = vor.u32 %v9916_v45, %v8263_v46  ;;  %v7991_v34 = vld [vmem:[%s15464_s1 + $0xd58] sm:$0xf0]  ;;  %v8458_v55 = vor.u32 %v9964_v53, %v8455_v38 }
 0x2bb   :  { %5948 = vmatpush.bf16.msra.mxu1 %v8202_v15  ;;  %5917 = vmatmul.bf16.vlgmr.msrb.gmra.mxu2 %v10942_v27  ;;  %v9812_v27 = vld [vmem:[%s15464_s1 + $0xc2c] sm:$0xf]  ;;  %v8026_v22 = vor.u32 %v9856_v23, %v8023_v8  ;;  %v8007_v15 = vld [vmem:[%s15464_s1 + $0xd78] sm:$0xf0] }
 0x2bc   :  { %5961 = vmatpush.bf16.msra.mxu2 %v8330_v44  ;;  %v7850_v4 = vor.u32 %v9812_v27, %v7847_v62  ;;  %v9884_v44 = vld [vmem:[%s15464_s1 + $0xe6c] sm:$0xf]  ;;  %v8010_v40 = vor.u32 %v9852_v42, %v8007_v15  ;;  %v8247_v6 = vld [vmem:[%s15464_s1 + $0xf58] sm:$0xf0] }
 0x2bd   :  { %5926 = vmatpush.bf16.msrb.mxu3 %v7882_v50  ;;  %v8138_v50 = vor.u32 %v9884_v44, %v8135_v37  ;;  %v8439_v54 = vld [vmem:[%s15464_s1 + $0x10d8] sm:$0xf0]  ;;  %v9876_v62 = vld [vmem:[%s15464_s1 + $0xe2c] sm:$0xf] }
 0x2be   :  { %5936 = vmatpush.bf16.msra.mxu0 %v8058_v52  ;;  %v9848_v52 = vld [vmem:[%s15464_s1 + $0xd4c] sm:$0xf]  ;;  %v5686_v5 = vpop.f32.mrf.mxu0  ;;  %v7975_v27 = vld [vmem:[%s15464_s1 + $0xd38] sm:$0xf0] }
 0x2bf   :  { %5949 = vmatpush.bf16.msra.mxu1 %v8186_v56  ;;  %v8119_v56 = vld [vmem:[%s15464_s1 + $0xe58] sm:$0xf0]  ;;  %v5699_v9 = vpop.f32.mrf.mxu1  ;;  %v7994_v59 = vor.u32 %v9848_v52, %v7991_v34  ;;  %v9908_v23 = vld [vmem:[%s15464_s1 + $0xf2c] sm:$0xf] }
 0x2c0   :  { %5962 = vmatpush.bf16.msra.mxu2 %v8314_v47  ;;  %v9912_v47 = vld [vmem:[%s15464_s1 + $0xf4c] sm:$0xf]  ;;  %v8122_v60 = vor.u32 %v9880_v58, %v8119_v56  ;;  %v8231_v8 = vld [vmem:[%s15464_s1 + $0xf38] sm:$0xf0] }
 0x2c1   :  { %5927 = vmatpush.bf16.msrb.mxu3 %v7866_v24  ;;  %v8250_v24 = vor.u32 %v9912_v47, %v8247_v6  ;;  %v9956_v10 = vld [vmem:[%s15464_s1 + $0x10ac] sm:$0xf]  ;;  %v8423_v11 = vld [vmem:[%s15464_s1 + $0x10b8] sm:$0xf0]  ;;  %v8234_v35 = vor.u32 %v9908_v23, %v8231_v8 }
 0x2c2   :  { %5937 = vmatpush.bf16.msra.mxu0 %v8042_v19  ;;  %v9844_v19 = vld [vmem:[%s15464_s1 + $0xd2c] sm:$0xf]  ;;  %v7959_v17 = vld [vmem:[%s15464_s1 + $0xd18] sm:$0xf0] }
 0x2c3   :  { %5950 = vmatpush.bf16.msra.mxu1 %v8170_v0  ;;  %v8442_v0 = vor.u32 %v9960_v57, %v8439_v54  ;;  %v7978_v16 = vor.u32 %v9844_v19, %v7975_v27  ;;  %v9840_v63 = vld [vmem:[%s15464_s1 + $0xd0c] sm:$0xf]  ;;  %v8087_v18 = vld [vmem:[%s15464_s1 + $0xe18] sm:$0xf0] }
 0x2c4   :  { %5963 = vmatpush.bf16.msra.mxu2 %v8298_v14  ;;  %v8103_v14 = vld [vmem:[%s15464_s1 + $0xe38] sm:$0xf0]  ;;  %v9872_v12 = vld [vmem:[%s15464_s1 + $0xe0c] sm:$0xf]  ;;  %v7962_v15 = vor.u32 %v9840_v63, %v7959_v17 }
 0x2c5   :  { %5928 = vmatpush.bf16.msrb.mxu3 %v7850_v4  ;;  %v9904_v4 = vld [vmem:[%s15464_s1 + $0xf0c] sm:$0xf]  ;;  %v8215_v28 = vld [vmem:[%s15464_s1 + $0xf18] sm:$0xf0]  ;;  %v8090_v46 = vor.u32 %v9872_v12, %v8087_v18 }
 0x2c6   :  { %5938 = vmatpush.bf16.msra.mxu0 %v8026_v22  ;;  %v8426_v22 = vor.u32 %v9956_v10, %v8423_v11  ;;  %v9952_v29 = vld [vmem:[%s15464_s1 + $0x108c] sm:$0xf]  ;;  %v8407_v30 = vld [vmem:[%s15464_s1 + $0x1098] sm:$0xf0]  ;;  %v8218_v53 = vor.u32 %v9904_v4, %v8215_v28 }
 0x2c7   :  { %5951 = vmatpush.bf16.msra.mxu1 %v8154_v33  ;;  %v9996_v33 = vld [vmem:[%s15464_s1 + $0x11ec] sm:$0xf]  ;;  %v8711_v44 = vld [vmem:[%s15464_s1 + $0x12f8] sm:$0xf0]  ;;  %v8410_v38 = vor.u32 %v9952_v29, %v8407_v30 }
 0x2c8   :  { %5964 = vmatpush.bf16.msra.mxu2 %v8282_v41  ;;  %v8583_v41 = vld [vmem:[%s15464_s1 + $0x11f8] sm:$0xf0]  ;;  %v10028_v42 = vld [vmem:[%s15464_s1 + $0x12ec] sm:$0xf] }
 0x2c9   :  { %5929 = vmatpush.bf16.msrb.mxu3 %v7834_v49  ;;  %v10060_v37 = vld [vmem:[%s15464_s1 + $0x13ec] sm:$0xf]  ;;  %v8839_v45 = vld [vmem:[%s15464_s1 + $0x13f8] sm:$0xf0]  ;;  %v8586_v49 = vor.u32 %v9996_v33, %v8583_v41 }
 0x2ca   :  { %5939 = vmatpush.bf16.msra.mxu0 %v8010_v40  ;;  %v9948_v40 = vld [vmem:[%s15464_s1 + $0x106c] sm:$0xf]  ;;  %v8842_v52 = vor.u32 %v10060_v37, %v8839_v45  ;;  %v8567_v58 = vld [vmem:[%s15464_s1 + $0x11d8] sm:$0xf0] }
 0x2cb   :  { %5952 = vmatpush.bf16.msra.mxu1 %v8138_v50  ;;  %v8391_v50 = vld [vmem:[%s15464_s1 + $0x1078] sm:$0xf0]  ;;  %v9992_v34 = vld [vmem:[%s15464_s1 + $0x11cc] sm:$0xf] }
 0x2cc   :  { %5965 = vmatpush.bf16.msra.mxu2 %v8266_v51  ;;  %5930 = vmatmul.bf16.vlgmr.msrb.gmra.mxu3 %v11137_v13  ;;  %v8106_v13 = vor.u32 %v9876_v62, %v8103_v14  ;;  %v8714_v51 = vor.u32 %v10028_v42, %v8711_v44  ;;  %v8695_v56 = vld [vmem:[%s15464_s1 + $0x12d8] sm:$0xf0]  ;;  %v10056_v47 = vld [vmem:[%s15464_s1 + $0x13cc] sm:$0xf]  ;;  %v8394_v57 = vor.u32 %v9948_v40, %v8391_v50 }
 0x2cd   :  { %5974 = vmatpush.bf16.msra.mxu3 %v8458_v55  ;;  %v10024_v55 = vld [vmem:[%s15464_s1 + $0x12cc] sm:$0xf]  ;;  %v8823_v6 = vld [vmem:[%s15464_s1 + $0x13d8] sm:$0xf0]  ;;  %v8570_v9 = vor.u32 %v9992_v34, %v8567_v58 }
 0x2ce   :  { %5940 = vmatpush.bf16.msra.mxu0 %v7994_v59  ;;  %v5710_v5 = vpop.f32.mrf.mxu2  ;;  %v8698_v19 = vor.u32 %v10024_v55, %v8695_v56  ;;  %v8826_v27 = vor.u32 %v10056_v47, %v8823_v6  ;;  %v9988_v62 = vld [vmem:[%s15464_s1 + $0x11ac] sm:$0xf]  ;;  %v8679_v23 = vld [vmem:[%s15464_s1 + $0x12b8] sm:$0xf0] }
 0x2cf   :  { %5953 = vmatpush.bf16.msra.mxu1 %v8122_v60  ;;  %v5711_v54 = vadd.f32 %v5710_v5, %v14752_v48  ;;  %v5723_v59 = vpop.f32.mrf.mxu3  ;;  %v9944_v60 = vld [vmem:[%s15464_s1 + $0x104c] sm:$0xf]  ;;  %v8551_v48 = vld [vmem:[%s15464_s1 + $0x11b8] sm:$0xf0] }
 0x2d0   :  { %5966 = vmatpush.bf16.msra.mxu2 %v8250_v24  ;;  %v8375_v24 = vld [vmem:[%s15464_s1 + $0x1058] sm:$0xf0]  ;;  %v10052_v8 = vld [vmem:[%s15464_s1 + $0x13ac] sm:$0xf]  ;;  %v8554_v11 = vor.u32 %v9988_v62, %v8551_v48 }
 0x2d1   :  { %5975 = vmatpush.bf16.msra.mxu3 %v8442_v0  ;;  %v10020_v0 = vld [vmem:[%s15464_s1 + $0x12ac] sm:$0xf]  ;;  %v5724_v14 = vadd.f32 %v5723_v59, %v5711_v54  ;;  %v8807_v10 = vld [vmem:[%s15464_s1 + $0x13b8] sm:$0xf0] }
 0x2d2   :  { %5941 = vmatpush.bf16.msra.mxu0 %v7978_v16  ;;  %v8359_v16 = vld [vmem:[%s15464_s1 + $0x1038] sm:$0xf0]  ;;  %v8682_v63 = vor.u32 %v10020_v0, %v8679_v23  ;;  %v8810_v17 = vor.u32 %v10052_v8, %v8807_v10  ;;  %v10048_v18 = vld [vmem:[%s15464_s1 + $0x138c] sm:$0xf] }
 0x2d3   :  { %5954 = vmatpush.bf16.msra.mxu1 %v8106_v13  ;;  %v8535_v13 = vld [vmem:[%s15464_s1 + $0x1198] sm:$0xf0]  ;;  %v9936_v42 = vld [vmem:[%s15464_s1 + $0x100c] sm:$0xf] }
 0x2d4   :  { %5967 = vmatpush.bf16.msra.mxu2 %v8234_v35  ;;  %v10016_v35 = vld [vmem:[%s15464_s1 + $0x128c] sm:$0xf]  ;;  %v8663_v12 = vld [vmem:[%s15464_s1 + $0x1298] sm:$0xf0] }
 0x2d5   :  { %5976 = vmatpush.bf16.msra.mxu3 %v8426_v22  ;;  %v8791_v4 = vld [vmem:[%s15464_s1 + $0x1398] sm:$0xf0]  ;;  %v8666_v37 = vor.u32 %v10016_v35, %v8663_v12  ;;  %v10044_v50 = vld [vmem:[%s15464_s1 + $0x136c] sm:$0xf] }
 0x2d6   :  { %5942 = vmatpush.bf16.msra.mxu0 %v7962_v15  ;;  %v5736_v22 = vpop.f32.mrf.mxu0  ;;  %v5712_v28 = vpop.f32.mrf.mxu2  ;;  %v8343_v15 = vld [vmem:[%s15464_s1 + $0x1018] sm:$0xf0]  ;;  %v8794_v45 = vor.u32 %v10048_v18, %v8791_v4  ;;  %v9976_v6 = vld [vmem:[%s15464_s1 + $0x114c] sm:$0xf] }
 0x2d7   :  { %5955 = vmatpush.bf16.msra.mxu1 %v8090_v46  ;;  %v5737_v29 = vadd.f32 %v5736_v22, %v5724_v14  ;;  %v5749_v41 = vpop.f32.mrf.mxu1  ;;  %v5725_v44 = vpop.f32.mrf.mxu3  ;;  %v9980_v46 = vld [vmem:[%s15464_s1 + $0x116c] sm:$0xf]  ;;  %v8647_v40 = vld [vmem:[%s15464_s1 + $0x1278] sm:$0xf0]  ;;  %v8346_v58 = vor.u32 %v9936_v42, %v8343_v15 }
 0x2d8   :  { %5968 = vmatpush.bf16.msra.mxu2 %v8218_v53  ;;  %v8519_v53 = vld [vmem:[%s15464_s1 + $0x1178] sm:$0xf0]  ;;  %v10040_v59 = vld [vmem:[%s15464_s1 + $0x134c] sm:$0xf] }
 0x2d9   :  { %5977 = vmatpush.bf16.msra.mxu3 %v8410_v38  ;;  %5943 = vmatmul.bf16.vlgmr.msra.gmra.mxu0 %v11150_v21  ;;  %v8378_v21 = vor.u32 %v9944_v60, %v8375_v24  ;;  %v10012_v38 = vld [vmem:[%s15464_s1 + $0x126c] sm:$0xf]  ;;  %v8967_v34 = vld [vmem:[%s15464_s1 + $0x14f8] sm:$0xf0]  ;;  %v8522_v55 = vor.u32 %v9980_v46, %v8519_v53 }
 0x2da   :  { %5987 = vmatpush.bf16.msrb.mxu0 %v8586_v49  ;;  %5956 = vmatmul.bf16.vlgmr.msra.gmra.mxu1 %v11148_v20  ;;  %v9984_v20 = vld [vmem:[%s15464_s1 + $0x118c] sm:$0xf]  ;;  %v5750_v49 = vadd.f32 %v5749_v41, %v5737_v29  ;;  %v8650_v56 = vor.u32 %v10012_v38, %v8647_v40  ;;  %v8503_v5 = vld [vmem:[%s15464_s1 + $0x1158] sm:$0xf0] }
 0x2db   :  { %6000 = vmatpush.bf16.msrb.mxu1 %v8714_v51  ;;  %5969 = vmatmul.bf16.vlgmr.msra.gmra.mxu2 %v11158_v26  ;;  %v9940_v26 = vld [vmem:[%s15464_s1 + $0x102c] sm:$0xf]  ;;  %v8538_v33 = vor.u32 %v9984_v20, %v8535_v13  ;;  %v8775_v51 = vld [vmem:[%s15464_s1 + $0x1378] sm:$0xf0]  ;;  %v8506_v62 = vor.u32 %v9976_v6, %v8503_v5 }
 0x2dc   :  { %6013 = vmatpush.bf16.msrb.mxu2 %v8842_v52  ;;  %v8362_v30 = vor.u32 %v9940_v26, %v8359_v16  ;;  %v10092_v52 = vld [vmem:[%s15464_s1 + $0x14ec] sm:$0xf]  ;;  %v8778_v47 = vor.u32 %v10044_v50, %v8775_v51  ;;  %v8759_v60 = vld [vmem:[%s15464_s1 + $0x1358] sm:$0xf0] }
 0x2dd   :  { %5978 = vmatpush.bf16.msra.mxu3 %v8394_v57  ;;  %v10008_v57 = vld [vmem:[%s15464_s1 + $0x124c] sm:$0xf]  ;;  %v8970_v54 = vor.u32 %v10092_v52, %v8967_v34  ;;  %v8762_v23 = vor.u32 %v10040_v59, %v8759_v60  ;;  %v8487_v10 = vld [vmem:[%s15464_s1 + $0x1138] sm:$0xf0] }
 0x2de   :  { %5988 = vmatpush.bf16.msrb.mxu0 %v8570_v9  ;;  %v8631_v9 = vld [vmem:[%s15464_s1 + $0x1258] sm:$0xf0]  ;;  %v10088_v24 = vld [vmem:[%s15464_s1 + $0x14cc] sm:$0xf]  ;;  %v5762_v0 = vpop.f32.mrf.mxu2 }
 0x2df   :  { %6001 = vmatpush.bf16.msrb.mxu1 %v8698_v19  ;;  %v8951_v19 = vld [vmem:[%s15464_s1 + $0x14d8] sm:$0xf0]  ;;  %v5751_v48 = vpop.f32.mrf.mxu1  ;;  %v8634_v14 = vor.u32 %v10008_v57, %v8631_v9  ;;  %v9972_v8 = vld [vmem:[%s15464_s1 + $0x112c] sm:$0xf] }
 0x2e0   :  { %6014 = vmatpush.bf16.msrb.mxu2 %v8826_v27  ;;  %v5738_v27 = vpop.f32.mrf.mxu0  ;;  %v8954_v26 = vor.u32 %v10088_v24, %v8951_v19  ;;  %v8615_v16 = vld [vmem:[%s15464_s1 + $0x1238] sm:$0xf0]  ;;  %v10084_v20 = vld [vmem:[%s15464_s1 + $0x14ac] sm:$0xf]  ;;  %v8490_v35 = vor.u32 %v9972_v8, %v8487_v10 }
 0x2e1   :  { %5979 = vmatpush.bf16.msra.mxu3 %v8378_v21  ;;  %v10004_v21 = vld [vmem:[%s15464_s1 + $0x122c] sm:$0xf]  ;;  %v8935_v13 = vld [vmem:[%s15464_s1 + $0x14b8] sm:$0xf0]  ;;  %v10215_v27 = vld [vmem:[%s15466_s2] sm:$0xf] }
 0x2e2   :  { %5989 = vmatpush.bf16.msrb.mxu0 %v8554_v11  ;;  %v15008_v11 = vadd.f32 %v5762_v0, %v5750_v49  ;;  %v9968_v12 = vld [vmem:[%s15464_s1 + $0x110c] sm:$0xf]  ;;  %v8471_v18 = vld [vmem:[%s15464_s1 + $0x1118] sm:$0xf0] }
 0x2e3   :  { %6002 = vmatpush.bf16.msrb.mxu1 %v8682_v63  ;;  %v10036_v63 = vld [vmem:[%s15464_s1 + $0x132c] sm:$0xf]  ;;  %v8599_v28 = vld [vmem:[%s15464_s1 + $0x1218] sm:$0xf0] }
 0x2e4   :  { %6015 = vmatpush.bf16.msrb.mxu2 %v8810_v17  ;;  %v8743_v17 = vld [vmem:[%s15464_s1 + $0x1338] sm:$0xf0]  ;;  %v10000_v22 = vld [vmem:[%s15464_s1 + $0x120c] sm:$0xf] }
 0x2e5   :  { %5980 = vmatpush.bf16.msra.mxu3 %v8362_v30  ;;  %v8746_v4 = vor.u32 %v10036_v63, %v8743_v17  ;;  %v10032_v29 = vld [vmem:[%s15464_s1 + $0x130c] sm:$0xf]  ;;  %v8938_v30 = vor.u32 %v10084_v20, %v8935_v13  ;;  %v8919_v42 = vld [vmem:[%s15464_s1 + $0x1498] sm:$0xf0]  ;;  %v8602_v49 = vor.u32 %v10000_v22, %v8599_v28 }
 0x2e6   :  { %5990 = vmatpush.bf16.msrb.mxu0 %v8538_v33  ;;  %v8727_v33 = vld [vmem:[%s15464_s1 + $0x1318] sm:$0xf0]  ;;  %v10080_v41 = vld [vmem:[%s15464_s1 + $0x148c] sm:$0xf]  ;;  %v5764_v50 = vpop.f32.mrf.mxu2 }
 0x2e7   :  { %6003 = vmatpush.bf16.msrb.mxu1 %v8666_v37  ;;  %v10124_v15 = vld [vmem:[%s15464_s1 + $0x15ec] sm:$0xf]  ;;  %v9095_v44 = vld [vmem:[%s15464_s1 + $0x15f8] sm:$0xf0]  ;;  %v8730_v40 = vor.u32 %v10032_v29, %v8727_v33  ;;  %v8922_v51 = vor.u32 %v10080_v41, %v8919_v42 }
 0x2e8   :  { %6016 = vmatpush.bf16.msrb.mxu2 %v8794_v45  ;;  %v10156_v37 = vld [vmem:[%s15464_s1 + $0x16ec] sm:$0xf]  ;;  %v8474_v45 = vor.u32 %v9968_v12, %v8471_v18  ;;  %v9223_v46 = vld [vmem:[%s15464_s1 + $0x16f8] sm:$0xf0]  ;;  %v9098_v52 = vor.u32 %v10124_v15, %v9095_v44 }
 0x2e9   :  { %5981 = vmatpush.bf16.msra.mxu3 %v8346_v58  ;;  %v10188_v53 = vld [vmem:[%s15464_s1 + $0x17ec] sm:$0xf]  ;;  %v9351_v38 = vld [vmem:[%s15464_s1 + $0x17f8] sm:$0xf0] }
 0x2ea   :  { %5991 = vmatpush.bf16.msrb.mxu0 %v8522_v55  ;;  %v10076_v34 = vld [vmem:[%s15464_s1 + $0x146c] sm:$0xf]  ;;  %v8903_v58 = vld [vmem:[%s15464_s1 + $0x1478] sm:$0xf0]  ;;  %v9226_v55 = vor.u32 %v10156_v37, %v9223_v46 }
 0x2eb   :  { %6004 = vmatpush.bf16.msrb.mxu1 %v8650_v56  ;;  %v9354_v56 = vor.u32 %v10188_v53, %v9351_v38  ;;  %v9079_v6 = vld [vmem:[%s15464_s1 + $0x15d8] sm:$0xf0]  ;;  %v10152_v5 = vld [vmem:[%s15464_s1 + $0x16cc] sm:$0xf]  ;;  %v8906_v59 = vor.u32 %v10076_v34, %v8903_v58 }
 0x2ec   :  { %6017 = vmatpush.bf16.msrb.mxu2 %v8778_v47  ;;  %5982 = vmatmul.bf16.vlgmr.msra.gmra.mxu3 %v11353_v25  ;;  %v8618_v25 = vor.u32 %v10004_v21, %v8615_v16  ;;  %v10120_v47 = vld [vmem:[%s15464_s1 + $0x15cc] sm:$0xf]  ;;  %v9207_v57 = vld [vmem:[%s15464_s1 + $0x16d8] sm:$0xf0] }
 0x2ed   :  { %6026 = vmatpush.bf16.msrb.mxu3 %v8970_v54  ;;  %v10184_v54 = vld [vmem:[%s15464_s1 + $0x17cc] sm:$0xf]  ;;  %v9335_v9 = vld [vmem:[%s15464_s1 + $0x17d8] sm:$0xf0]  ;;  %v9082_v60 = vor.u32 %v10120_v47, %v9079_v6  ;;  %v9210_v0 = vor.u32 %v10152_v5, %v9207_v57 }
 0x2ee   :  { %5992 = vmatpush.bf16.msrb.mxu0 %v8506_v62  ;;  %v10072_v24 = vld [vmem:[%s15464_s1 + $0x144c] sm:$0xf]  ;;  %v8887_v19 = vld [vmem:[%s15464_s1 + $0x1458] sm:$0xf0]  ;;  %v862_v62 = vperm.slane %v10215_v27, 3 }
 0x2ef   :  { %6005 = vmatpush.bf16.msrb.mxu1 %v8634_v14  ;;  %v5775_v48 = vpop.f32.mrf.mxu3  ;;  %v9338_v14 = vor.u32 %v10184_v54, %v9335_v9  ;;  %v9063_v8 = vld [vmem:[%s15464_s1 + $0x15b8] sm:$0xf0]  ;;  %v10148_v10 = vld [vmem:[%s15464_s1 + $0x16ac] sm:$0xf]  ;;  %v8890_v63 = vor.u32 %v10072_v24, %v8887_v19 }
 0x2f0   :  { %6018 = vmatpush.bf16.msrb.mxu2 %v8762_v23  ;;  %v10116_v23 = vld [vmem:[%s15464_s1 + $0x15ac] sm:$0xf]  ;;  %v9191_v21 = vld [vmem:[%s15464_s1 + $0x16b8] sm:$0xf0]  ;;  %v5776_v20 = vadd.f32 %v5775_v48, %v862_v62 }
 0x2f1   :  { %6027 = vmatpush.bf16.msrb.mxu3 %v8954_v26  ;;  %v10180_v26 = vld [vmem:[%s15464_s1 + $0x17ac] sm:$0xf]  ;;  %v9319_v16 = vld [vmem:[%s15464_s1 + $0x17b8] sm:$0xf0]  ;;  %v9194_v13 = vor.u32 %v10148_v10, %v9191_v21 }
 0x2f2   :  { %5993 = vmatpush.bf16.msrb.mxu0 %v8490_v35  ;;  %v8871_v17 = vld [vmem:[%s15464_s1 + $0x1438] sm:$0xf0]  ;;  %v9322_v35 = vor.u32 %v10180_v26, %v9319_v16  ;;  %v10144_v18 = vld [vmem:[%s15464_s1 + $0x168c] sm:$0xf] }
 0x2f3   :  { %6006 = vmatpush.bf16.msrb.mxu1 %v8618_v25  ;;  %v9047_v12 = vld [vmem:[%s15464_s1 + $0x1598] sm:$0xf0]  ;;  %v10064_v33 = vld [vmem:[%s15464_s1 + $0x140c] sm:$0xf] }
 0x2f4   :  { %6019 = vmatpush.bf16.msrb.mxu2 %v8746_v4  ;;  %v9175_v25 = vld [vmem:[%s15464_s1 + $0x1698] sm:$0xf0]  ;;  %v10176_v4 = vld [vmem:[%s15464_s1 + $0x178c] sm:$0xf] }
 0x2f5   :  { %6028 = vmatpush.bf16.msrb.mxu3 %v8938_v30  ;;  %v9303_v22 = vld [vmem:[%s15464_s1 + $0x1798] sm:$0xf0]  ;;  %v9178_v37 = vor.u32 %v10144_v18, %v9175_v25  ;;  %v10108_v46 = vld [vmem:[%s15464_s1 + $0x156c] sm:$0xf] }
 0x2f6   :  { %5994 = vmatpush.bf16.msrb.mxu0 %v8474_v45  ;;  %v5788_v28 = vpop.f32.mrf.mxu0  ;;  %v8855_v41 = vld [vmem:[%s15464_s1 + $0x1418] sm:$0xf0]  ;;  %v9306_v45 = vor.u32 %v10176_v4, %v9303_v22  ;;  %v10140_v38 = vld [vmem:[%s15464_s1 + $0x166c] sm:$0xf] }
 0x2f7   :  { %6007 = vmatpush.bf16.msrb.mxu1 %v8602_v49  ;;  %v5789_v42 = vadd.f32 %v5788_v28, %v5776_v20  ;;  %v5801_v15 = vpop.f32.mrf.mxu1  ;;  %v5777_v44 = vpop.f32.mrf.mxu3  ;;  %v9031_v53 = vld [vmem:[%s15464_s1 + $0x1578] sm:$0xf0]  ;;  %v8858_v58 = vor.u32 %v10064_v33, %v8855_v41  ;;  %v10104_v6 = vld [vmem:[%s15464_s1 + $0x154c] sm:$0xf] }
 0x2f8   :  { %6020 = vmatpush.bf16.msrb.mxu2 %v8730_v40  ;;  %v9159_v49 = vld [vmem:[%s15464_s1 + $0x1678] sm:$0xf0]  ;;  %v10172_v40 = vld [vmem:[%s15464_s1 + $0x176c] sm:$0xf] }
 0x2f9   :  { %6029 = vmatpush.bf16.msrb.mxu3 %v8922_v51  ;;  %5995 = vmatmul.bf16.vlgmr.msrb.gmra.mxu0 %v11366_v32  ;;  %v9066_v32 = vor.u32 %v10116_v23, %v9063_v8  ;;  %v9287_v50 = vld [vmem:[%s15464_s1 + $0x1778] sm:$0xf0]  ;;  %v5802_v51 = vadd.f32 %v5801_v15, %v5789_v42  ;;  %v10136_v57 = vld [vmem:[%s15464_s1 + $0x164c] sm:$0xf] }
 0x2fa   :  { %6039 = vmatpush.bf16.msra.mxu0 %v9098_v52  ;;  %6008 = vmatmul.bf16.vlgmr.msrb.gmra.mxu1 %v11364_v31  ;;  %v10112_v31 = vld [vmem:[%s15464_s1 + $0x158c] sm:$0xf]  ;;  %v9415_v34 = vld [vmem:[%s15464_s1 + $0x1878] sm:$0xf0]  ;;  %v9290_v47 = vor.u32 %v10172_v40, %v9287_v50  ;;  %v6141_v40 = vld [vmem:[%s15467_s3 + $0x170] sm:$0xff] }
 0x2fb   :  { %6052 = vmatpush.bf16.msra.mxu1 %v9226_v55  ;;  %6021 = vmatmul.bf16.vlgmr.msrb.gmra.mxu2 %v11374_v36  ;;  %v10068_v36 = vld [vmem:[%s15464_s1 + $0x142c] sm:$0xf]  ;;  %v9050_v30 = vor.u32 %v10112_v31, %v9047_v12  ;;  %v9034_v55 = vor.u32 %v10108_v46, %v9031_v53  ;;  %v9015_v5 = vld [vmem:[%s15464_s1 + $0x1558] sm:$0xf0]  ;;  %v6109_v53 = vld [vmem:[%s15467_s3 + $0x70] sm:$0xff] }
 0x2fc   :  { %6065 = vmatpush.bf16.msra.mxu2 %v9354_v56  ;;  %v8874_v29 = vor.u32 %v10068_v36, %v8871_v17  ;;  %v10204_v52 = vld [vmem:[%s15464_s1 + $0x186c] sm:$0xf]  ;;  %v9162_v56 = vor.u32 %v10140_v38, %v9159_v49  ;;  %v9271_v24 = vld [vmem:[%s15464_s1 + $0x1758] sm:$0xf0]  ;;  %v6125_v49 = vld [vmem:[%s15467_s3 + $0xf0] sm:$0xff] }
 0x2fd   :  { %6030 = vmatpush.bf16.msrb.mxu3 %v8906_v59  ;;  %v9418_v9 = vor.u32 %v10204_v52, %v9415_v34  ;;  %v9143_v59 = vld [vmem:[%s15464_s1 + $0x1658] sm:$0xf0]  ;;  %v10200_v27 = vld [vmem:[%s15464_s1 + $0x184c] sm:$0xf] }
 0x2fe   :  { %6040 = vmatpush.bf16.msra.mxu0 %v9082_v60  ;;  %v5814_v54 = vpop.f32.mrf.mxu2  ;;  %v10168_v60 = vld [vmem:[%s15464_s1 + $0x174c] sm:$0xf]  ;;  %v9399_v62 = vld [vmem:[%s15464_s1 + $0x1858] sm:$0xf0]  ;;  %v5790_v48 = vpop.f32.mrf.mxu0  ;;  %v9146_v23 = vor.u32 %v10136_v57, %v9143_v59 }
 0x2ff   :  { %6053 = vmatpush.bf16.msra.mxu1 %v9210_v0  ;;  %v15194_v19 = vadd.f32 %v5814_v54, %v5802_v51  ;;  %v9018_v0 = vor.u32 %v10104_v6, %v9015_v5  ;;  %v9274_v8 = vor.u32 %v10168_v60, %v9271_v24  ;;  %v10100_v10 = vld [vmem:[%s15464_s1 + $0x152c] sm:$0xf]  ;;  %v8999_v21 = vld [vmem:[%s15464_s1 + $0x1538] sm:$0xf0]  ;;  %v9402_v16 = vor.u32 %v10200_v27, %v9399_v62  ;;  %v6121_v54 = vld [vmem:[%s15467_s3 + $0xd0] sm:$0xff] }
 0x300   :  { %6066 = vmatpush.bf16.msra.mxu2 %v9338_v14  ;;  %v5803_v14 = vpop.f32.mrf.mxu1  ;;  %v10132_v26 = vld [vmem:[%s15464_s1 + $0x162c] sm:$0xf]  ;;  %v9255_v36 = vld [vmem:[%s15464_s1 + $0x1738] sm:$0xf0]  ;;  %v6103_v27 = vld [vmem:[%s15467_s3 + $0x40] sm:$0xff] }
 0x301   :  { %6031 = vmatpush.bf16.msrb.mxu3 %v8890_v63  ;;  %v9127_v63 = vld [vmem:[%s15464_s1 + $0x1638] sm:$0xf0]  ;;  %v10196_v17 = vld [vmem:[%s15464_s1 + $0x182c] sm:$0xf]  ;;  %v6119_v62 = vld [vmem:[%s15467_s3 + $0xc0] sm:$0xff] }
 0x302   :  { %6041 = vmatpush.bf16.msra.mxu0 %v9066_v32  ;;  %v10164_v32 = vld [vmem:[%s15464_s1 + $0x172c] sm:$0xf]  ;;  %v9383_v20 = vld [vmem:[%s15464_s1 + $0x1838] sm:$0xf0]  ;;  %v6135_v48 = vld [vmem:[%s15467_s3 + $0x140] sm:$0xff] }
 0x303   :  { %6054 = vmatpush.bf16.msra.mxu1 %v9194_v13  ;;  %v9002_v13 = vor.u32 %v10100_v10, %v8999_v21  ;;  %v9258_v31 = vor.u32 %v10164_v32, %v9255_v36  ;;  %v10096_v12 = vld [vmem:[%s15464_s1 + $0x150c] sm:$0xf]  ;;  %v9386_v4 = vor.u32 %v10196_v17, %v9383_v20  ;;  %v9111_v22 = vld [vmem:[%s15464_s1 + $0x1618] sm:$0xf0]  ;;  %v6133_v32 = vld [vmem:[%s15467_s3 + $0x130] sm:$0xff] }
 0x304   :  { %6067 = vmatpush.bf16.msra.mxu2 %v9322_v35  ;;  %v9130_v35 = vor.u32 %v10132_v26, %v9127_v63  ;;  %v10128_v18 = vld [vmem:[%s15464_s1 + $0x160c] sm:$0xf]  ;;  %v9367_v41 = vld [vmem:[%s15464_s1 + $0x1818] sm:$0xf0]  ;;  %v6101_v26 = vld [vmem:[%s15467_s3 + $0x30] sm:$0xff] }
 0x305   :  { %6032 = vmatpush.bf16.msrb.mxu3 %v8874_v29  ;;  %v10160_v28 = vld [vmem:[%s15464_s1 + $0x170c] sm:$0xf]  ;;  %v9239_v29 = vld [vmem:[%s15464_s1 + $0x1718] sm:$0xf0]  ;;  %v9114_v42 = vor.u32 %v10128_v18, %v9111_v22  ;;  %v6117_v63 = vld [vmem:[%s15467_s3 + $0xb0] sm:$0xff] }
 0x306   :  { %6042 = vmatpush.bf16.msra.mxu0 %v9050_v30  ;;  %v5816_v25 = vpop.f32.mrf.mxu2  ;;  %v10192_v33 = vld [vmem:[%s15464_s1 + $0x180c] sm:$0xf]  ;;  %v9242_v15 = vor.u32 %v10160_v28, %v9239_v29  ;;  %v6110_v44 = vld [vmem:[%s15467_s3 + $0x78] sm:$0xff]  ;;  %v6113_v22 = vld [vmem:[%s15467_s3 + $0x90] sm:$0xff] }
 0x307   :  { %6055 = vmatpush.bf16.msra.mxu1 %v9178_v37  ;;  %v6126_v37 = vld [vmem:[%s15467_s3 + $0xf8] sm:$0xff]  ;;  %v6108_v51 = vld [vmem:[%s15467_s3 + $0x68] sm:$0xff]  ;;  %v6129_v28 = vld [vmem:[%s15467_s3 + $0x110] sm:$0xff] }
 0x308   :  { %6068 = vmatpush.bf16.msra.mxu2 %v9306_v45  ;;  %v9370_v45 = vor.u32 %v10192_v33, %v9367_v41  ;;  %v6142_v46 = vld [vmem:[%s15467_s3 + $0x178] sm:$0xff]  ;;  %v6124_v52 = vld [vmem:[%s15467_s3 + $0xe8] sm:$0xff]  ;;  %v6095_v41 = vld [vmem:[%s15467_s3] sm:$0xff] }
 0x309   :  { %6033 = vmatpush.bf16.msrb.mxu3 %v8858_v58  ;;  %v6140_v34 = vld [vmem:[%s15467_s3 + $0x168] sm:$0xff]  ;;  %v6106_v58 = vld [vmem:[%s15467_s3 + $0x58] sm:$0xff] }
 0x30a   :  { %6043 = vmatpush.bf16.msra.mxu0 %v9034_v55  ;;  %v6122_v55 = vld [vmem:[%s15467_s3 + $0xd8] sm:$0xff]  ;;  %v6104_v59 = vld [vmem:[%s15467_s3 + $0x48] sm:$0xff] }
 0x30b   :  { %6056 = vmatpush.bf16.msra.mxu1 %v9162_v56  ;;  %v6120_v24 = vld [vmem:[%s15467_s3 + $0xc8] sm:$0xff]  ;;  %v6102_v14 = vld [vmem:[%s15467_s3 + $0x38] sm:$0xff] }
 0x30c   :  { %6069 = vmatpush.bf16.msra.mxu2 %v9290_v47  ;;  %6034 = vmatmul.bf16.vlgmr.msrb.gmra.mxu3 %v11574_v61  ;;  %v8983_v61 = vld [vmem:[%s15464_s1 + $0x1518] sm:$0xf0]  ;;  %v6105_v47 = vld [vmem:[%s15467_s3 + $0x50] sm:$0xff]  ;;  %v6100_v36 = vld [vmem:[%s15467_s3 + $0x28] sm:$0xff] }
 0x30d   :  { %6082 = vmatpush.bf16.msra.mxu3 %v9418_v9  ;;  %v8986_v30 = vor.u32 %v10096_v12, %v8983_v61  ;;  %v6137_v9 = vld [vmem:[%s15467_s3 + $0x150] sm:$0xff]  ;;  %v6134_v10 = vld [vmem:[%s15467_s3 + $0x138] sm:$0xff]  ;;  %v6116_v17 = vld [vmem:[%s15467_s3 + $0xa8] sm:$0xff] }
 0x30e   :  { %6044 = vmatpush.bf16.msra.mxu0 %v9018_v0  ;;  %v6132_v20 = vld [vmem:[%s15467_s3 + $0x128] sm:$0xff]  ;;  %v6098_v61 = vld [vmem:[%s15467_s3 + $0x18] sm:$0xff] }
 0x30f   :  { %6057 = vmatpush.bf16.msra.mxu1 %v9146_v23  ;;  %v5827_v38 = vpop.f32.mrf.mxu3  ;;  %v6114_v18 = vld [vmem:[%s15467_s3 + $0x98] sm:$0xff]  ;;  %v6096_v29 = vld [vmem:[%s15467_s3 + $0x8] sm:$0xff] }
 0x310   :  { %6070 = vmatpush.bf16.msra.mxu2 %v9274_v8  ;;  %v5828_v50 = vadd.f32 %v5827_v38, %v15194_v19  ;;  %v6136_v19 = vld [vmem:[%s15467_s3 + $0x148] sm:$0xff]  ;;  %v6118_v8 = vld [vmem:[%s15467_s3 + $0xb8] sm:$0xff] }
 0x311   :  { %6083 = vmatpush.bf16.msra.mxu3 %v9402_v16  ;;  %v6130_v25 = vld [vmem:[%s15467_s3 + $0x118] sm:$0xff]  ;;  %v6128_v33 = vld [vmem:[%s15467_s3 + $0x108] sm:$0xff] }
 0x312   :  { %6045 = vmatpush.bf16.msra.mxu0 %v9002_v13  ;;  %v6099_v13 = vld [vmem:[%s15467_s3 + $0x20] sm:$0xff] }
 0x313   :  { %6058 = vmatpush.bf16.msra.mxu1 %v9130_v35  ;;  %v6115_v35 = vld [vmem:[%s15467_s3 + $0xa0] sm:$0xff] }
 0x314   :  { %6071 = vmatpush.bf16.msra.mxu2 %v9258_v31  ;;  %v6131_v31 = vld [vmem:[%s15467_s3 + $0x120] sm:$0xff] }
 0x315   :  { %6084 = vmatpush.bf16.msra.mxu3 %v9386_v4  ;;  %v6097_v4 = vld [vmem:[%s15467_s3 + $0x10] sm:$0xff] }
 0x316   :  { %6046 = vmatpush.bf16.msra.mxu0 %v8986_v30  ;;  %v5840_v56 = vpop.f32.mrf.mxu0  ;;  %v6112_v30 = vld [vmem:[%s15467_s3 + $0x88] sm:$0xff] }
 0x317   :  { %6059 = vmatpush.bf16.msra.mxu1 %v9114_v42  ;;  %v5841_v6 = vadd.f32 %v5840_v56, %v5828_v50  ;;  %v5853_v5 = vpop.f32.mrf.mxu1  ;;  %v5829_v57 = vpop.f32.mrf.mxu3  ;;  %v6111_v42 = vld [vmem:[%s15467_s3 + $0x80] sm:$0xff] }
 0x318   :  { %6072 = vmatpush.bf16.msra.mxu2 %v9242_v15  ;;  %v6127_v15 = vld [vmem:[%s15467_s3 + $0x100] sm:$0xff] }
 0x319   :  { %6085 = vmatpush.bf16.msra.mxu3 %v9370_v45  ;;  %6047 = vmatmul.bf16.vlgmr.msra.gmra.mxu0 %v11587_v3  ;;  %v6123_v3 = vld [vmem:[%s15467_s3 + $0xe0] sm:$0xff]  ;;  %v5854_v60 = vadd.f32 %v5853_v5, %v5841_v6  ;;  %v6092_v45 = vmax.f32 %v13771_v1, 0.0 }
 0x31a   :  { %6163 = vmatpush.msrb.mxu0 %v6110_v44  ;;  %6060 = vmatmul.bf16.vlgmr.msra.gmra.mxu1 %v11585_v2  ;;  %v6107_v2 = vld [vmem:[%s15467_s3 + $0x60] sm:$0xff] }
 0x31b   :  { %6183 = vmatpush.msrb.mxu1 %v6126_v37  ;;  %6073 = vmatmul.bf16.vlgmr.msra.gmra.mxu2 %v11595_v7  ;;  %v6139_v7 = vld [vmem:[%s15467_s3 + $0x160] sm:$0xff]  ;;  %v6091_v37 = vmax.f32 %v12567_v39, 0.0 }
 0x31c   :  { %6203 = vmatpush.msrb.mxu2 %v6142_v46  ;;  %6164 = vmatpush.msrb.mxu0 %v6109_v53  ;;  %v6093_v53 = vmax.f32 %v15008_v11, 0.0  ;;  %v6158_v11 = vld [vmem:[%s15467_s3 + $0x1f8] sm:$0xff]  ;;  %v6155_v57 = vld [vmem:[%s15467_s3 + $0x1e0] sm:$0xff] }
 0x31d   :  { %6184 = vmatpush.msrb.mxu1 %v6125_v49  ;;  %9422 = vmatmul.msk.bf16.vlgmr.msra.gmra.mxu3 %vm4787_vm0, %v11698_v43  ;;  %v6138_v43 = vld [vmem:[%s15467_s3 + $0x158] sm:$0xff] }
 0x31e   :  { %6204 = vmatpush.msrb.mxu2 %v6141_v40  ;;  %6165 = vmatpush.msrb.mxu0 %v6108_v51  ;;  %v5866_v0 = vpop.f32.mrf.mxu2  ;;  %v5842_v21 = vpop.f32.mrf.mxu0 }
 0x31f   :  { %6185 = vmatpush.msrb.mxu1 %v6124_v52  ;;  %v5867_v23 = vadd.f32 %v5866_v0, %v5854_v60  ;;  %v5855_v16 = vpop.f32.mrf.mxu1  ;;  %6223 = vmatpush.msrb.mxu3 %v6158_v11  ;;  %v6152_v60 = vld [vmem:[%s15467_s3 + $0x1c8] sm:$0xff]  ;;  %v6146_v21 = vld [vmem:[%s15467_s3 + $0x198] sm:$0xff] }
 0x320   :  { %6205 = vmatpush.msrb.mxu2 %v6140_v34  ;;  %6166 = vmatpush.msrb.mxu0 %v6107_v2 }
 0x321   :  { %6186 = vmatpush.msrb.mxu1 %v6123_v3 }
 0x322   :  { %6206 = vmatpush.msrb.mxu2 %v6139_v7  ;;  %6167 = vmatpush.msrb.mxu0 %v6106_v58 }
 0x323   :  { %6187 = vmatpush.msrb.mxu1 %v6122_v55 }
 0x324   :  { %6207 = vmatpush.msrb.mxu2 %v6138_v43  ;;  %6168 = vmatpush.msrb.mxu0 %v6105_v47  ;;  %v6157_v43 = vld [vmem:[%s15467_s3 + $0x1f0] sm:$0xff]  ;;  %v6156_v47 = vld [vmem:[%s15467_s3 + $0x1e8] sm:$0xff] }
 0x325   :  { %6188 = vmatpush.msrb.mxu1 %v6121_v54  ;;  %6224 = vmatpush.msrb.mxu3 %v6157_v43  ;;  %v6154_v54 = vld [vmem:[%s15467_s3 + $0x1d8] sm:$0xff] }
 0x326   :  { %6208 = vmatpush.msrb.mxu2 %v6137_v9  ;;  %6169 = vmatpush.msrb.mxu0 %v6104_v59  ;;  %v5868_v12 = vpop.f32.mrf.mxu2  ;;  %v6153_v59 = vld [vmem:[%s15467_s3 + $0x1d0] sm:$0xff] }
 0x327   :  { %6189 = vmatpush.msrb.mxu1 %v6120_v24  ;;  %6225 = vmatpush.msrb.mxu3 %v6156_v47 }
 0x328   :  { %6209 = vmatpush.msrb.mxu2 %v6136_v19  ;;  %6170 = vmatpush.msrb.mxu0 %v6103_v27  ;;  %v6151_v19 = vld [vmem:[%s15467_s3 + $0x1c0] sm:$0xff]  ;;  %v6150_v27 = vld [vmem:[%s15467_s3 + $0x1b8] sm:$0xff] }
 0x329   :  { %6190 = vmatpush.msrb.mxu1 %v6119_v62  ;;  %6226 = vmatpush.msrb.mxu3 %v6155_v57 }
 0x32a   :  { %6210 = vmatpush.msrb.mxu2 %v6135_v48  ;;  %6171 = vmatpush.msrb.mxu0 %v6102_v14  ;;  %v6149_v14 = vld [vmem:[%s15467_s3 + $0x1b0] sm:$0xff] }
 0x32b   :  { %6191 = vmatpush.msrb.mxu1 %v6118_v8  ;;  %6227 = vmatpush.msrb.mxu3 %v6154_v54  ;;  %v6147_v8 = vld [vmem:[%s15467_s3 + $0x1a0] sm:$0xff] }
 0x32c   :  { %6211 = vmatpush.msrb.mxu2 %v6134_v10  ;;  %6172 = vmatpush.msrb.mxu0 %v6101_v26 }
 0x32d   :  { %6192 = vmatpush.msrb.mxu1 %v6117_v63  ;;  %6228 = vmatpush.msrb.mxu3 %v6153_v59  ;;  %v6145_v63 = vld [vmem:[%s15467_s3 + $0x190] sm:$0xff] }
 0x32e   :  { %6212 = vmatpush.msrb.mxu2 %v6133_v32  ;;  %6173 = vmatpush.msrb.mxu0 %v6100_v36  ;;  %v6144_v36 = vld [vmem:[%s15467_s3 + $0x188] sm:$0xff] }
 0x32f   :  { %6193 = vmatpush.msrb.mxu1 %v6116_v17  ;;  %v5879_v44 = vpop.f32.mrf.mxu3  ;;  %6229 = vmatpush.msrb.mxu3 %v6152_v60  ;;  %v6143_v17 = vld [vmem:[%s15467_s3 + $0x180] sm:$0xff] }
 0x330   :  { %6213 = vmatpush.msrb.mxu2 %v6132_v20  ;;  %6174 = vmatpush.msrb.mxu0 %v6099_v13  ;;  %v5880_v46 = vadd.f32 %v5879_v44, %v5867_v23  ;;  %v6148_v23 = vld [vmem:[%s15467_s3 + $0x1a8] sm:$0xff] }
 0x331   :  { %6194 = vmatpush.msrb.mxu1 %v6115_v35  ;;  %6230 = vmatpush.msrb.mxu3 %v6151_v19 }
 0x332   :  { %6214 = vmatpush.msrb.mxu2 %v6131_v31  ;;  %6175 = vmatpush.msrb.mxu0 %v6098_v61 }
 0x333   :  { %6195 = vmatpush.msrb.mxu1 %v6114_v18  ;;  %6231 = vmatpush.msrb.mxu3 %v6150_v27 }
 0x334   :  { %6215 = vmatpush.msrb.mxu2 %v6130_v25  ;;  %6176 = vmatpush.msrb.mxu0 %v6097_v4 }
 0x335   :  { %6196 = vmatpush.msrb.mxu1 %v6113_v22  ;;  %6232 = vmatpush.msrb.mxu3 %v6149_v14 }
 0x336   :  { %6216 = vmatpush.msrb.mxu2 %v6129_v28  ;;  %6177 = vmatpush.msrb.mxu0 %v6096_v29  ;;  %v5892_v38 = vpop.f32.mrf.mxu0 }
 0x337   :  { %6197 = vmatpush.msrb.mxu1 %v6112_v30  ;;  %v5893_v49 = vadd.f32 %v5892_v38, %v5880_v46  ;;  %v5905_v40 = vpop.f32.mrf.mxu1  ;;  %v5881_v50 = vpop.f32.mrf.mxu3  ;;  %6233 = vmatpush.msrb.mxu3 %v6148_v23 }
 0x338   :  { %6217 = vmatpush.msrb.mxu2 %v6128_v33  ;;  %6178 = vmatpush.msrb.mxu0 %v6095_v41 }
 0x339   :  { %6198 = vmatpush.msrb.mxu1 %v6111_v42  ;;  %6179 = vmatmul.f32.vlgmr.msrb.gmra.mxu0 %v6091_v37  ;;  %v5906_v51 = vadd.f32 %v5905_v40, %v5893_v49  ;;  %v10208_v40 = vld [vmem:[%s15468_s4] ss:$0 sm:$0xff] }
 0x33a   :  { %6218 = vmatpush.msrb.mxu2 %v6127_v15  ;;  %6199 = vmatmul.f32.vlgmr.msrb.gmra.mxu1 %v6092_v45 }
 0x33b   :  { %6219 = vmatmul.f32.vlgmr.msrb.gmra.mxu2 %v6093_v53  ;;  %6234 = vmatpush.msrb.mxu3 %v6147_v8 }
 0x33d   :  { %6235 = vmatpush.msrb.mxu3 %v6146_v21 }
 0x33e   :  { %v5918_v52 = vpop.f32.mrf.mxu2  ;;  %v5894_v2 = vpop.f32.mrf.mxu0 }
 0x33f   :  { %v5919_v34 = vadd.f32 %v5918_v52, %v5906_v51  ;;  %v5907_v39 = vpop.f32.mrf.mxu1  ;;  %6236 = vmatpush.msrb.mxu3 %v6145_v63 }
 0x341   :  { %6237 = vmatpush.msrb.mxu3 %v6144_v36 }
 0x343   :  { %6238 = vmatpush.msrb.mxu3 %v6143_v17 }
 0x346   :  { %v5920_v3 = vpop.f32.mrf.mxu2 }
 0x34f   :  { %v5931_v1 = vpop.f32.mrf.mxu3 }
 0x350   :  { %v5932_v32 = vadd.f32 %v5931_v1, %v5919_v34 }
 0x356   :  { %v5944_v7 = vpop.f32.mrf.mxu0 }
 0x357   :  { %v5957_v58 = vpop.f32.mrf.mxu1  ;;  %v5933_v55 = vpop.f32.mrf.mxu3  ;;  %v5945_v20 = vadd.f32 %v5944_v7, %v5932_v32 }
 0x359   :  { %v5958_v35 = vadd.f32 %v5957_v58, %v5945_v20 }
 0x35e   :  { %v5970_v56 = vpop.f32.mrf.mxu2  ;;  %v5946_v6 = vpop.f32.mrf.mxu0 }
 0x35f   :  { %v5959_v5 = vpop.f32.mrf.mxu1  ;;  %v5971_v31 = vadd.f32 %v5970_v56, %v5958_v35 }
 0x366   :  { %v5972_v9 = vpop.f32.mrf.mxu2 }
 0x36f   :  { %v5983_v24 = vpop.f32.mrf.mxu3 }
 0x370   :  { %v5984_v12 = vadd.f32 %v5983_v24, %v5971_v31 }
 0x376   :  { %v5996_v62 = vpop.f32.mrf.mxu0 }
 0x377   :  { %v6009_v48 = vpop.f32.mrf.mxu1  ;;  %v5985_v0 = vpop.f32.mrf.mxu3  ;;  %v5997_v61 = vadd.f32 %v5996_v62, %v5984_v12 }
 0x379   :  { %v6010_v25 = vadd.f32 %v6009_v48, %v5997_v61 }
 0x37e   :  { %v6022_v10 = vpop.f32.mrf.mxu2  ;;  %v5998_v26 = vpop.f32.mrf.mxu0 }
 0x37f   :  { %v6011_v16 = vpop.f32.mrf.mxu1  ;;  %v6023_v4 = vadd.f32 %v6022_v10, %v6010_v25 }
 0x386   :  { %v6024_v13 = vpop.f32.mrf.mxu2 }
 0x38f   :  { %v6035_v18 = vpop.f32.mrf.mxu3 }
 0x390   :  { %v6036_v22 = vadd.f32 %v6035_v18, %v6023_v4 }
 0x396   :  { %v6048_v28 = vpop.f32.mrf.mxu0 }
 0x397   :  { %v6061_v29 = vpop.f32.mrf.mxu1  ;;  %v6037_v30 = vpop.f32.mrf.mxu3  ;;  %v6049_v33 = vadd.f32 %v6048_v28, %v6036_v22 }
 0x399   :  { %v6062_v41 = vadd.f32 %v6061_v29, %v6049_v33 }
 0x39e   :  { %v6074_v42 = vpop.f32.mrf.mxu2  ;;  %v6050_v44 = vpop.f32.mrf.mxu0 }
 0x39f   :  { %v6075_v15 = vadd.f32 %v6074_v42, %v6062_v41  ;;  %v6063_v37 = vpop.f32.mrf.mxu1 }
 0x3a0   :  { %v6087_v45 = vpop.f32.mrf.mxu3 }
 0x3a1   :  { %v6088_v46 = vadd.f32 %v6087_v45, %v6075_v15 }
 0x3a3   :  { %v6094_v53 = vmax.f32 %v6088_v46, 0.0 }
 0x3a5   :  { %6239 = vmatmul.f32.vlgmr.msrb.gmra.mxu3 %v6094_v53 }
 0x3a6   :  { %v6076_v38 = vpop.f32.mrf.mxu2 }
 0x3a8   :  { %v6089_v49 = vpop.f32.mrf.mxu3 }
 0x3b6   :  { %v6180_v50 = vpop.f32.mrf.mxu0 }
 0x3b7   :  { %v6181_v51 = vadd.f32 %v10208_v40, %v6180_v50  ;;  %v6200_v52 = vpop.f32.mrf.mxu1 }
 0x3b9   :  { %v6201_v2 = vadd.f32 %v6200_v52, %v6181_v51 }
 0x3be   :  { %v6220_v34 = vpop.f32.mrf.mxu2 }
 0x3bf   :  { %v6221_v39 = vadd.f32 %v6220_v34, %v6201_v2 }
 0x428   :  { %v6240_v3 = vpop.f32.mrf.mxu3 }
 0x429   :  { %v6241_v1 = vadd.f32 %v6240_v3, %v6221_v39 }
 0x42b   :  { %6270 = vrot.lane.b32.xlu1 %v6241_v1, %s10216_s18  ;;  %v6244_v7 = vsel %vm6243_vm1, %v6241_v1, -inf }
 0x42c   :  { %6245 = vmax.xlane.f32.xlu0 %v6244_v7 }
 0x49d   :  { %v6271_v58 = vpop.permute.xlu1 %6270 }
 0x49e   :  { %6274 = vst.msk [vmem:[%s15469_s5] sm:$0xff] %vm6273_vm2, %v6271_v58 }
 0x49f   :  { %v6246_v55 = vpop.xlane.xlu0 %6245 }
 0x4a0   :  { %v6247_v11 = vsub.f32 %v6241_v1, %v6246_v55 }
 0x4a2   :  { %v6248_v43 = vmul.f32 1.442695, %v6247_v11 }
 0x4a4   :  { %10209 = vpow2.f32 %v6248_v43 }
 0x4aa   :  { %v10210_v56 = vpop.eup %10209 }
 0x4ab   :  { %v6250_v47 = vsel %vm6243_vm1, %v10210_v56, 0.0 }
 0x4ac   :  { %6251 = vadd.xlane.f32.xlu0 %v6250_v47 }
 0x51f   :  { %v6252_v6 = vpop.xlane.xlu0 %6251 }
 0x520   :  { %10211 = vrcp.f32 %v6252_v6  ;;  %v6264_v9 = vand.u32 2147483648, %v6252_v6  ;;  %v6262_v60 = vand.u32 2147483647, %v6252_v6  ;;  %vm6258_vm4 = vweird.f32 %v6252_v6 }
 0x522   :  { %v6265_v19 = vor.u32 1.1754944e-38, %v6264_v9  ;;  %vm6263_vm6 = vcmp.eq.f32.partialorder %v6262_v60, 8.507059e+37 }
 0x526   :  { %v10212_v5 = vpop.eup %10211 }
 0x527   :  { %v6254_v57 = vmul.f32 %v10212_v5, %v6252_v6  ;;  %vm6259_vm3 = vweird.f32 %v10212_v5 }
 0x528   :  { %vm6260_vm5 = vmor %vm6258_vm4, %vm6259_vm3 }
 0x529   :  { %v6255_v54 = vsub.f32 1.0, %v6254_v57 }
 0x52b   :  { %v6256_v59 = vmul.f32 %v10212_v5, %v6255_v54 }
 0x52d   :  { %v6257_v24 = vadd.f32 %v10212_v5, %v6256_v59 }
 0x52f   :  { %v6261_v27 = vsel %vm6260_vm5, %v10212_v5, %v6257_v24 }
 0x530   :  { %v6266_v62 = vsel %vm6263_vm6, %v6265_v19, %v6261_v27 }
 0x531   :  { %v6267_v48 = vmul.f32 %v10210_v56, %v6266_v62 }
 0x533   :  { %6268 = vst.msk [vmem:[%s15470_s6] sm:$0xff] %vm6243_vm1, %v6267_v48 }

</bundles_post_ra>
